<compile_context>
chip_gen: v7x
topology: tpu7x:2x2x1
jax: 0.10.0
libtpu: 0.0.40
codegen_flags: <defaults>
</compile_context>

<pallas_src>
import jax
import jax.numpy as jnp
from jax.experimental import pallas as pl
from jax.experimental.pallas import tpu as pltpu

L0 = 256          # input length (DCT coefficients)
C1 = 16           # conv1 out channels
C2 = 32           # conv2 out channels
L1 = L0 // 2      # 128 (after pool1)
L2 = L1 // 2      # 64  (after pool2)
HID = 128
NCLS = 10
NPAD = 128        # lane-padded logits width
BT = 32           # batch tile per grid step (review: raise from 8 to 32-64)
F32 = jnp.float32
BF16 = jnp.bfloat16


# --------------------------------------------------------------------------
# Fused kernel: conv1+ReLU+pool -> conv2+ReLU+pool -> fc1+ReLU -> fc2
#               -> log_softmax, for a tile of BT examples per grid step.
# All weight-like operands use constant index_maps -> VMEM-resident.
# --------------------------------------------------------------------------
def fused_kernel(x_ref, w1_ref, b1_ref, shm0_ref, shp0_ref, se1_ref, so1_ref,
                 w2b_ref, b2_ref, shm1_ref, shp1_ref, se2_ref, so2_ref,
                 wf1_ref, bf1_ref, wf2_ref, bf2_ref,
                 out_ref, flat_ref):
    # ---- conv1: in_ch=1 -> 16, k=3, padding=1, ReLU (VPU elementwise) ------
    x = x_ref[...]                                           # (BT, 256) f32
    # neighbour taps via exact 0/1 shift-matrix matmuls (zero at boundaries);
    # replaces the old pad-scratch + misaligned lane reads.
    xm = jnp.dot(x, shm0_ref[...], preferred_element_type=F32)   # x[:, l-1]
    xp = jnp.dot(x, shp0_ref[...], preferred_element_type=F32)   # x[:, l+1]
    w1 = w1_ref[...]                                         # (16, 3) f32
    h1 = (xm[:, None, :] * w1[None, :, 0:1]
          + x[:, None, :] * w1[None, :, 1:2]
          + xp[:, None, :] * w1[None, :, 2:3]
          + b1_ref[...][None, :, :])                         # (BT, 16, 256)
    h1 = jnp.maximum(h1, 0.0)
    h1b = h1.reshape(BT * C1, L0).astype(BF16)               # rows = b*16 + c

    # ---- maxpool1d(2): VMEM-resident 0/1 selector matmuls (MXU) ------------
    p1 = jnp.maximum(
        jnp.dot(h1b, se1_ref[...], preferred_element_type=F32),
        jnp.dot(h1b, so1_ref[...], preferred_element_type=F32))  # (BT*16,128)

    # ---- conv2: 16 -> 32, k=3, padding=1, as one batched K=48 matmul -------
    pm = jnp.dot(p1, shm1_ref[...], preferred_element_type=F32)  # p1[:, l-1]
    pp = jnp.dot(p1, shp1_ref[...], preferred_element_type=F32)  # p1[:, l+1]
    q = jnp.concatenate(
        [pm.reshape(BT, C1, L1).astype(BF16),
         p1.reshape(BT, C1, L1).astype(BF16),
         pp.reshape(BT, C1, L1).astype(BF16)], axis=1)       # (BT, 48, 128)
    # w2b is pre-broadcast in the wrapper (no per-step broadcast_in_dim).
    h2 = jax.lax.dot_general(w2b_ref[...], q, (((2,), (1,)), ((0,), (0,))),
                             preferred_element_type=F32)     # (BT, 32, 128)
    h2 = jnp.maximum(h2 + b2_ref[...][None, :, :], 0.0)

    # ---- maxpool1d(2) -------------------------------------------------------
    h2b = h2.reshape(BT * C2, L1).astype(BF16)               # rows = b*32 + c
    p2 = jnp.maximum(
        jnp.dot(h2b, se2_ref[...], preferred_element_type=F32),
        jnp.dot(h2b, so2_ref[...], preferred_element_type=F32))  # (BT*32, 64)

    # ---- torch channel-major flatten (.view(B, 32*64)) done explicitly
    #      through a VMEM scratch, then ONE K=2048 fc1 matmul + ReLU ---------
    p2r = p2.reshape(BT, C2, L2)                             # (BT, 32, 64)
    for c in range(C2):
        flat_ref[:, c * L2:(c + 1) * L2] = p2r[:, c, :]
    z1 = jnp.dot(flat_ref[...].astype(BF16), wf1_ref[...],
                 preferred_element_type=F32) + bf1_ref[...]  # (BT, 128)
    z1 = jnp.maximum(z1, 0.0)

    # ---- fc2 + log_softmax on a lane-padded 128-wide logit row -------------
    logits = jnp.dot(z1.astype(BF16), wf2_ref[...],
                     preferred_element_type=F32) + bf2_ref[...]   # (BT, 128)
    m = jnp.max(logits, axis=1, keepdims=True)
    s = logits - m
    lse = jnp.log(jnp.sum(jnp.exp(s), axis=1, keepdims=True))
    out_ref[...] = s - lse


# --------------------------------------------------------------------------
# Wrapper (jit'ed): constant / weight re-packing + one fused pallas_call
# --------------------------------------------------------------------------
def _pool_selectors(n, dtype):
    r = jnp.arange(n)[:, None]
    j = jnp.arange(n // 2)[None, :]
    return (r == 2 * j).astype(dtype), (r == 2 * j + 1).astype(dtype)


def _shift_mats(n, dtype):
    r = jnp.arange(n)[:, None]
    c = jnp.arange(n)[None, :]
    prev_m = (r == c - 1).astype(dtype)   # (x @ prev_m)[l] = x[l-1], 0 at l=0
    next_m = (r == c + 1).astype(dtype)   # (x @ next_m)[l] = x[l+1], 0 at l=n-1
    return prev_m, next_m


@jax.jit
def compressed_net_forward(x, params):
    (w_c1, b_c1, w_c2, b_c2, w_f1, b_f1, w_f2, b_f2) = params
    B = x.shape[0]
    # pad so the grid is even and >= 2 (v7x: 2 TensorCores share the
    # "parallel" axis)
    B_pad = ((B + 2 * BT - 1) // (2 * BT)) * (2 * BT)
    x_p = jnp.zeros((B_pad, L0), F32).at[:B, :].set(x.astype(F32))

    # grid-invariant constants (constant-folded by XLA, VMEM-resident in the
    # kernel via constant index_maps)
    shm0, shp0 = _shift_mats(L0, F32)          # conv1 neighbour taps
    shm1, shp1 = _shift_mats(L1, F32)          # conv2 neighbour taps
    se1, so1 = _pool_selectors(L0, BF16)       # pool1 even/odd selectors
    se2, so2 = _pool_selectors(L1, BF16)       # pool2 even/odd selectors

    w1 = w_c1.reshape(C1, 3).astype(F32)
    b1 = b_c1.reshape(C1, 1).astype(F32)
    # conv2 weights packed tap-major along K: w2p[o, t*C1 + c] = w_c2[o, c, t];
    # pre-broadcast over the batch tile so the kernel has no broadcast_in_dim.
    w2p = jnp.transpose(w_c2, (0, 2, 1)).reshape(C2, 3 * C1).astype(BF16)
    w2b = jnp.broadcast_to(w2p[None], (BT, C2, 3 * C1))
    b2 = b_c2.reshape(C2, 1).astype(F32)
    # fc1: plain transpose; flat index in the kernel is c*64 + j (torch order)
    wf1 = jnp.transpose(w_f1).astype(BF16)                     # (2048, 128)
    bf1 = b_f1.reshape(1, HID).astype(F32)
    # fc2 padded to a full 128-lane output; masked classes get -1e9 bias
    wf2p = jnp.zeros((HID, NPAD), F32).at[:, :NCLS].set(
        jnp.transpose(w_f2)).astype(BF16)
    bf2p = jnp.full((1, NPAD), -1e9, F32).at[0, :NCLS].set(b_f2.astype(F32))

    out = pl.pallas_call(
        fused_kernel,
        grid=(B_pad // BT,),
        in_specs=[
            pl.BlockSpec((BT, L0), lambda i: (i, 0)),             # x
            pl.BlockSpec((C1, 3), lambda i: (0, 0)),              # w1
            pl.BlockSpec((C1, 1), lambda i: (0, 0)),              # b1
            pl.BlockSpec((L0, L0), lambda i: (0, 0)),             # shift prev 256
            pl.BlockSpec((L0, L0), lambda i: (0, 0)),             # shift next 256
            pl.BlockSpec((L0, L1), lambda i: (0, 0)),             # pool1 even
            pl.BlockSpec((L0, L1), lambda i: (0, 0)),             # pool1 odd
            pl.BlockSpec((BT, C2, 3 * C1), lambda i: (0, 0, 0)),  # w2 broadcast
            pl.BlockSpec((C2, 1), lambda i: (0, 0)),              # b2
            pl.BlockSpec((L1, L1), lambda i: (0, 0)),             # shift prev 128
            pl.BlockSpec((L1, L1), lambda i: (0, 0)),             # shift next 128
            pl.BlockSpec((L1, L2), lambda i: (0, 0)),             # pool2 even
            pl.BlockSpec((L1, L2), lambda i: (0, 0)),             # pool2 odd
            pl.BlockSpec((C2 * L2, HID), lambda i: (0, 0)),       # fc1 w
            pl.BlockSpec((1, HID), lambda i: (0, 0)),             # fc1 b
            pl.BlockSpec((HID, NPAD), lambda i: (0, 0)),          # fc2 w (padded)
            pl.BlockSpec((1, NPAD), lambda i: (0, 0)),            # fc2 b (padded)
        ],
        out_specs=pl.BlockSpec((BT, NPAD), lambda i: (i, 0)),
        out_shape=jax.ShapeDtypeStruct((B_pad, NPAD), F32),
        scratch_shapes=[
            pltpu.VMEM((BT, C2 * L2), F32),   # channel-major flatten buffer
        ],
        compiler_params=pltpu.CompilerParams(
            dimension_semantics=("parallel",),
            vmem_limit_bytes=32 * 1024 * 1024),
    )(x_p, w1, b1, shm0, shp0, se1, so1, w2b, b2, shm1, shp1, se2, so2,
      wf1, bf1, wf2p, bf2p)

    return out[:B, :NCLS]


# --------------------------------------------------------------------------
# Deterministic parameter init (PyTorch-default-style uniform bounds)
# --------------------------------------------------------------------------
def init_params(key):
    ks = jax.random.split(key, 8)

    def u(k, shape, fan_in):
        bound = 1.0 / float(fan_in) ** 0.5
        return jax.random.uniform(k, shape, F32, -bound, bound)

    w_c1 = u(ks[0], (C1, 1, 3), 1 * 3)
    b_c1 = u(ks[1], (C1,), 1 * 3)
    w_c2 = u(ks[2], (C2, C1, 3), C1 * 3)
    b_c2 = u(ks[3], (C2,), C1 * 3)
    w_f1 = u(ks[4], (HID, C2 * L2), C2 * L2)
    b_f1 = u(ks[5], (HID,), C2 * L2)
    w_f2 = u(ks[6], (NCLS, HID), HID)
    b_f2 = u(ks[7], (NCLS,), HID)
    return (w_c1, b_c1, w_c2, b_c2, w_f1, b_f1, w_f2, b_f2)


# --------------------------------------------------------------------------
# Pure-JAX f32 reference for validation
# --------------------------------------------------------------------------
def reference_forward(x, params):
    (w_c1, b_c1, w_c2, b_c2, w_f1, b_f1, w_f2, b_f2) = params
    h = x.astype(F32)[:, None, :]                                  # (B,1,256)
    h = jax.lax.conv_general_dilated(h, w_c1, (1,), [(1, 1)],
                                     dimension_numbers=("NCH", "OIH", "NCH"))
    h = jax.nn.relu(h + b_c1[None, :, None])
    h = h.reshape(h.shape[0], h.shape[1], -1, 2).max(axis=-1)       # pool 2
    h = jax.lax.conv_general_dilated(h, w_c2, (1,), [(1, 1)],
                                     dimension_numbers=("NCH", "OIH", "NCH"))
    h = jax.nn.relu(h + b_c2[None, :, None])
    h = h.reshape(h.shape[0], h.shape[1], -1, 2).max(axis=-1)       # pool 2
    h = h.reshape(h.shape[0], -1)                                   # (B, 2048)
    h = jax.nn.relu(h @ w_f1.T + b_f1)
    h = h @ w_f2.T + b_f2
    return jax.nn.log_softmax(h, axis=1)


if __name__ == "__main__":
    key = jax.random.PRNGKey(0)
    pkey, xkey = jax.random.split(key)

    params = init_params(pkey)
    B = 2
    x = jax.random.normal(xkey, (B, L0), F32)

    out = compressed_net_forward(x, params)
    out = jax.block_until_ready(out)

    assert out.shape == (B, NCLS) and out.dtype == F32

    # self-consistency: log-probs exponentiate to a distribution
    probs_sum = jnp.sum(jnp.exp(out), axis=1)
    assert bool(jnp.allclose(probs_sum, 1.0, atol=1e-3)), probs_sum

    # compare against pure-JAX f32 reference (tolerance covers bf16 MXU ops)
    ref = reference_forward(x, params)
    assert bool(jnp.allclose(out, ref, atol=3e-2, rtol=3e-2)), \
        float(jnp.max(jnp.abs(out - ref)))

    # second check: ragged batch exercising batch padding + multi-step grid
    B2 = 19
    x2 = jax.random.normal(jax.random.PRNGKey(7), (B2, L0), F32)
    out2 = jax.block_until_ready(compressed_net_forward(x2, params))
    ref2 = reference_forward(x2, params)
    assert out2.shape == (B2, NCLS)
    assert bool(jnp.allclose(out2, ref2, atol=3e-2, rtol=3e-2)), \
        float(jnp.max(jnp.abs(out2 - ref2)))

    print("KERNEL_OK")
</pallas_src>

<mosaic_0001>
module attributes {stable_mosaic.version = 11 : i64} {
  func.func @fused_kernel(%arg0: i32, %arg1: memref<32x256xf32, #tpu.memory_space<vmem>>, %arg2: memref<16x3xf32, #tpu.memory_space<vmem>>, %arg3: memref<16x1xf32, #tpu.memory_space<vmem>>, %arg4: memref<256x256xf32, #tpu.memory_space<vmem>>, %arg5: memref<256x256xf32, #tpu.memory_space<vmem>>, %arg6: memref<256x128xbf16, #tpu.memory_space<vmem>>, %arg7: memref<256x128xbf16, #tpu.memory_space<vmem>>, %arg8: memref<32x32x48xbf16, #tpu.memory_space<vmem>>, %arg9: memref<32x1xf32, #tpu.memory_space<vmem>>, %arg10: memref<128x128xf32, #tpu.memory_space<vmem>>, %arg11: memref<128x128xf32, #tpu.memory_space<vmem>>, %arg12: memref<128x64xbf16, #tpu.memory_space<vmem>>, %arg13: memref<128x64xbf16, #tpu.memory_space<vmem>>, %arg14: memref<2048x128xbf16, #tpu.memory_space<vmem>>, %arg15: memref<1x128xf32, #tpu.memory_space<vmem>>, %arg16: memref<128x128xbf16, #tpu.memory_space<vmem>>, %arg17: memref<1x128xf32, #tpu.memory_space<vmem>>, %arg18: memref<32x128xf32, #tpu.memory_space<vmem>>, %arg19: memref<32x2048xf32, #tpu.memory_space<vmem>>) attributes {dimension_semantics = [#tpu.dimension_semantics<parallel>], iteration_bounds = array<i64: 2>, scalar_prefetch = 0 : i64, scratch_operands = 1 : i64, tpu.core_type = #tpu.core_type<tc>, window_params = [{transform_indices = @transform_0, window_bounds = array<i64: 32, 256>}, {pipeline_mode = #tpu.pipeline_mode<synchronous>, transform_indices = @transform_1, window_bounds = array<i64: 16, 3>}, {pipeline_mode = #tpu.pipeline_mode<synchronous>, transform_indices = @transform_2, window_bounds = array<i64: 16, 1>}, {pipeline_mode = #tpu.pipeline_mode<synchronous>, transform_indices = @transform_3, window_bounds = array<i64: 256, 256>}, {pipeline_mode = #tpu.pipeline_mode<synchronous>, transform_indices = @transform_4, window_bounds = array<i64: 256, 256>}, {pipeline_mode = #tpu.pipeline_mode<synchronous>, transform_indices = @transform_5, window_bounds = array<i64: 256, 128>}, {pipeline_mode = #tpu.pipeline_mode<synchronous>, transform_indices = @transform_6, window_bounds = array<i64: 256, 128>}, {pipeline_mode = #tpu.pipeline_mode<synchronous>, transform_indices = @transform_7, window_bounds = array<i64: 32, 32, 48>}, {pipeline_mode = #tpu.pipeline_mode<synchronous>, transform_indices = @transform_8, window_bounds = array<i64: 32, 1>}, {pipeline_mode = #tpu.pipeline_mode<synchronous>, transform_indices = @transform_9, window_bounds = array<i64: 128, 128>}, {pipeline_mode = #tpu.pipeline_mode<synchronous>, transform_indices = @transform_10, window_bounds = array<i64: 128, 128>}, {pipeline_mode = #tpu.pipeline_mode<synchronous>, transform_indices = @transform_11, window_bounds = array<i64: 128, 64>}, {pipeline_mode = #tpu.pipeline_mode<synchronous>, transform_indices = @transform_12, window_bounds = array<i64: 128, 64>}, {pipeline_mode = #tpu.pipeline_mode<synchronous>, transform_indices = @transform_13, window_bounds = array<i64: 2048, 128>}, {pipeline_mode = #tpu.pipeline_mode<synchronous>, transform_indices = @transform_14, window_bounds = array<i64: 1, 128>}, {pipeline_mode = #tpu.pipeline_mode<synchronous>, transform_indices = @transform_15, window_bounds = array<i64: 128, 128>}, {pipeline_mode = #tpu.pipeline_mode<synchronous>, transform_indices = @transform_16, window_bounds = array<i64: 1, 128>}, {transform_indices = @transform_17, window_bounds = array<i64: 32, 128>}]} {
    %c0 = arith.constant 0 : index
    %c0_0 = arith.constant 0 : index
    %0 = vector.load %arg1[%c0, %c0_0] : memref<32x256xf32, #tpu.memory_space<vmem>>, vector<32x256xf32>
    %c0_1 = arith.constant 0 : index
    %c0_2 = arith.constant 0 : index
    %1 = vector.load %arg4[%c0_1, %c0_2] : memref<256x256xf32, #tpu.memory_space<vmem>>, vector<256x256xf32>
    %cst = arith.constant dense<0.000000e+00> : vector<32x256xf32>
    %2 = tpu.matmul %0, %1, %cst {dimension_numbers = #tpu.dot_dimension_numbers<[1], [0], [0], [1], [0, 0, 1, 1], [], []>} : vector<32x256xf32>, vector<256x256xf32>, vector<32x256xf32> -> vector<32x256xf32>
    %c0_3 = arith.constant 0 : index
    %c0_4 = arith.constant 0 : index
    %3 = vector.load %arg5[%c0_3, %c0_4] : memref<256x256xf32, #tpu.memory_space<vmem>>, vector<256x256xf32>
    %cst_5 = arith.constant dense<0.000000e+00> : vector<32x256xf32>
    %4 = tpu.matmul %0, %3, %cst_5 {dimension_numbers = #tpu.dot_dimension_numbers<[1], [0], [0], [1], [0, 0, 1, 1], [], []>} : vector<32x256xf32>, vector<256x256xf32>, vector<32x256xf32> -> vector<32x256xf32>
    %c0_6 = arith.constant 0 : index
    %c0_7 = arith.constant 0 : index
    %5 = vector.load %arg2[%c0_6, %c0_7] : memref<16x3xf32, #tpu.memory_space<vmem>>, vector<16x3xf32>
    %6 = vector.shape_cast %2 : vector<32x256xf32> to vector<32x1x256xf32>
    %7 = vector.extract_strided_slice %5 {offsets = [0, 0], sizes = [16, 1], strides = [1, 1]} : vector<16x3xf32> to vector<16x1xf32>
    %8 = vector.shape_cast %7 : vector<16x1xf32> to vector<1x16x1xf32>
    %9 = vector.broadcast %6 : vector<32x1x256xf32> to vector<32x16x256xf32>
    %10 = vector.broadcast %8 : vector<1x16x1xf32> to vector<32x16x256xf32>
    %11 = arith.mulf %9, %10 : vector<32x16x256xf32>
    %12 = vector.shape_cast %0 : vector<32x256xf32> to vector<32x1x256xf32>
    %13 = vector.extract_strided_slice %5 {offsets = [0, 1], sizes = [16, 1], strides = [1, 1]} : vector<16x3xf32> to vector<16x1xf32>
    %14 = vector.shape_cast %13 : vector<16x1xf32> to vector<1x16x1xf32>
    %15 = vector.broadcast %12 : vector<32x1x256xf32> to vector<32x16x256xf32>
    %16 = vector.broadcast %14 : vector<1x16x1xf32> to vector<32x16x256xf32>
    %17 = arith.mulf %15, %16 : vector<32x16x256xf32>
    %18 = arith.addf %11, %17 : vector<32x16x256xf32>
    %19 = vector.shape_cast %4 : vector<32x256xf32> to vector<32x1x256xf32>
    %20 = vector.extract_strided_slice %5 {offsets = [0, 2], sizes = [16, 1], strides = [1, 1]} : vector<16x3xf32> to vector<16x1xf32>
    %21 = vector.shape_cast %20 : vector<16x1xf32> to vector<1x16x1xf32>
    %22 = vector.broadcast %19 : vector<32x1x256xf32> to vector<32x16x256xf32>
    %23 = vector.broadcast %21 : vector<1x16x1xf32> to vector<32x16x256xf32>
    %24 = arith.mulf %22, %23 : vector<32x16x256xf32>
    %25 = arith.addf %18, %24 : vector<32x16x256xf32>
    %c0_8 = arith.constant 0 : index
    %c0_9 = arith.constant 0 : index
    %26 = vector.load %arg3[%c0_8, %c0_9] : memref<16x1xf32, #tpu.memory_space<vmem>>, vector<16x1xf32>
    %27 = vector.shape_cast %26 : vector<16x1xf32> to vector<1x16x1xf32>
    %28 = vector.broadcast %27 : vector<1x16x1xf32> to vector<32x16x256xf32>
    %29 = arith.addf %25, %28 : vector<32x16x256xf32>
    %cst_10 = arith.constant 0.000000e+00 : f32
    %30 = vector.broadcast %cst_10 : f32 to vector<32x16x256xf32>
    %31 = arith.maximumf %29, %30 : vector<32x16x256xf32>
    %32 = vector.shape_cast %31 : vector<32x16x256xf32> to vector<512x256xf32>
    %33 = arith.truncf %32 : vector<512x256xf32> to vector<512x256xbf16>
    %c0_11 = arith.constant 0 : index
    %c0_12 = arith.constant 0 : index
    %34 = vector.load %arg6[%c0_11, %c0_12] : memref<256x128xbf16, #tpu.memory_space<vmem>>, vector<256x128xbf16>
    %cst_13 = arith.constant dense<0.000000e+00> : vector<512x128xf32>
    %35 = tpu.matmul %33, %34, %cst_13 {dimension_numbers = #tpu.dot_dimension_numbers<[1], [0], [0], [1], [0, 0, 1, 1], [], []>} : vector<512x256xbf16>, vector<256x128xbf16>, vector<512x128xf32> -> vector<512x128xf32>
    %c0_14 = arith.constant 0 : index
    %c0_15 = arith.constant 0 : index
    %36 = vector.load %arg7[%c0_14, %c0_15] : memref<256x128xbf16, #tpu.memory_space<vmem>>, vector<256x128xbf16>
    %cst_16 = arith.constant dense<0.000000e+00> : vector<512x128xf32>
    %37 = tpu.matmul %33, %36, %cst_16 {dimension_numbers = #tpu.dot_dimension_numbers<[1], [0], [0], [1], [0, 0, 1, 1], [], []>} : vector<512x256xbf16>, vector<256x128xbf16>, vector<512x128xf32> -> vector<512x128xf32>
    %38 = arith.maximumf %35, %37 : vector<512x128xf32>
    %c0_17 = arith.constant 0 : index
    %c0_18 = arith.constant 0 : index
    %39 = vector.load %arg10[%c0_17, %c0_18] : memref<128x128xf32, #tpu.memory_space<vmem>>, vector<128x128xf32>
    %cst_19 = arith.constant dense<0.000000e+00> : vector<512x128xf32>
    %40 = tpu.matmul %38, %39, %cst_19 {dimension_numbers = #tpu.dot_dimension_numbers<[1], [0], [0], [1], [0, 0, 1, 1], [], []>} : vector<512x128xf32>, vector<128x128xf32>, vector<512x128xf32> -> vector<512x128xf32>
    %c0_20 = arith.constant 0 : index
    %c0_21 = arith.constant 0 : index
    %41 = vector.load %arg11[%c0_20, %c0_21] : memref<128x128xf32, #tpu.memory_space<vmem>>, vector<128x128xf32>
    %cst_22 = arith.constant dense<0.000000e+00> : vector<512x128xf32>
    %42 = tpu.matmul %38, %41, %cst_22 {dimension_numbers = #tpu.dot_dimension_numbers<[1], [0], [0], [1], [0, 0, 1, 1], [], []>} : vector<512x128xf32>, vector<128x128xf32>, vector<512x128xf32> -> vector<512x128xf32>
    %43 = vector.shape_cast %40 : vector<512x128xf32> to vector<32x16x128xf32>
    %44 = arith.truncf %43 : vector<32x16x128xf32> to vector<32x16x128xbf16>
    %45 = vector.shape_cast %38 : vector<512x128xf32> to vector<32x16x128xf32>
    %46 = arith.truncf %45 : vector<32x16x128xf32> to vector<32x16x128xbf16>
    %47 = vector.shape_cast %42 : vector<512x128xf32> to vector<32x16x128xf32>
    %48 = arith.truncf %47 : vector<32x16x128xf32> to vector<32x16x128xbf16>
    %49 = tpu.concatenate %44, %46, %48 in 1 : vector<32x16x128xbf16>, vector<32x16x128xbf16>, vector<32x16x128xbf16> -> vector<32x48x128xbf16>
    %c0_23 = arith.constant 0 : index
    %c0_24 = arith.constant 0 : index
    %c0_25 = arith.constant 0 : index
    %50 = vector.load %arg8[%c0_23, %c0_24, %c0_25] : memref<32x32x48xbf16, #tpu.memory_space<vmem>>, vector<32x32x48xbf16>
    %cst_26 = arith.constant dense<0.000000e+00> : vector<32x32x128xf32>
    %51 = tpu.matmul %50, %49, %cst_26 {dimension_numbers = #tpu.dot_dimension_numbers<[2], [1], [1], [2], [0, 0, 0, 1, 1, 2], [0], [0]>} : vector<32x32x48xbf16>, vector<32x48x128xbf16>, vector<32x32x128xf32> -> vector<32x32x128xf32>
    %c0_27 = arith.constant 0 : index
    %c0_28 = arith.constant 0 : index
    %52 = vector.load %arg9[%c0_27, %c0_28] : memref<32x1xf32, #tpu.memory_space<vmem>>, vector<32x1xf32>
    %53 = vector.shape_cast %52 : vector<32x1xf32> to vector<1x32x1xf32>
    %54 = vector.broadcast %53 : vector<1x32x1xf32> to vector<32x32x128xf32>
    %55 = arith.addf %51, %54 : vector<32x32x128xf32>
    %cst_29 = arith.constant 0.000000e+00 : f32
    %56 = vector.broadcast %cst_29 : f32 to vector<32x32x128xf32>
    %57 = arith.maximumf %55, %56 : vector<32x32x128xf32>
    %58 = vector.shape_cast %57 : vector<32x32x128xf32> to vector<1024x128xf32>
    %59 = arith.truncf %58 : vector<1024x128xf32> to vector<1024x128xbf16>
    %c0_30 = arith.constant 0 : index
    %c0_31 = arith.constant 0 : index
    %60 = vector.load %arg12[%c0_30, %c0_31] : memref<128x64xbf16, #tpu.memory_space<vmem>>, vector<128x64xbf16>
    %cst_32 = arith.constant dense<0.000000e+00> : vector<1024x64xf32>
    %61 = tpu.matmul %59, %60, %cst_32 {dimension_numbers = #tpu.dot_dimension_numbers<[1], [0], [0], [1], [0, 0, 1, 1], [], []>} : vector<1024x128xbf16>, vector<128x64xbf16>, vector<1024x64xf32> -> vector<1024x64xf32>
    %c0_33 = arith.constant 0 : index
    %c0_34 = arith.constant 0 : index
    %62 = vector.load %arg13[%c0_33, %c0_34] : memref<128x64xbf16, #tpu.memory_space<vmem>>, vector<128x64xbf16>
    %cst_35 = arith.constant dense<0.000000e+00> : vector<1024x64xf32>
    %63 = tpu.matmul %59, %62, %cst_35 {dimension_numbers = #tpu.dot_dimension_numbers<[1], [0], [0], [1], [0, 0, 1, 1], [], []>} : vector<1024x128xbf16>, vector<128x64xbf16>, vector<1024x64xf32> -> vector<1024x64xf32>
    %64 = arith.maximumf %61, %63 : vector<1024x64xf32>
    %65 = vector.shape_cast %64 : vector<1024x64xf32> to vector<32x32x64xf32>
    %66 = vector.extract_strided_slice %65 {offsets = [0, 0, 0], sizes = [32, 1, 64], strides = [1, 1, 1]} : vector<32x32x64xf32> to vector<32x1x64xf32>
    %67 = vector.shape_cast %66 : vector<32x1x64xf32> to vector<32x64xf32>
    %c0_36 = arith.constant 0 : index
    %c0_37 = arith.constant 0 : index
    %68 = vector.load %arg19[%c0_36, %c0_37] : memref<32x2048xf32, #tpu.memory_space<vmem>>, vector<32x64xf32>
    tpu.vector_store %arg19[%c0_36, %c0_37], %67 {strides = array<i32>} : memref<32x2048xf32, #tpu.memory_space<vmem>>, vector<32x64xf32>,
    %69 = vector.extract_strided_slice %65 {offsets = [0, 1, 0], sizes = [32, 1, 64], strides = [1, 1, 1]} : vector<32x32x64xf32> to vector<32x1x64xf32>
    %70 = vector.shape_cast %69 : vector<32x1x64xf32> to vector<32x64xf32>
    %c0_38 = arith.constant 0 : index
    %c64 = arith.constant 64 : index
    %71 = vector.load %arg19[%c0_38, %c64] : memref<32x2048xf32, #tpu.memory_space<vmem>>, vector<32x64xf32>
    tpu.vector_store %arg19[%c0_38, %c64], %70 {strides = array<i32>} : memref<32x2048xf32, #tpu.memory_space<vmem>>, vector<32x64xf32>,
    %72 = vector.extract_strided_slice %65 {offsets = [0, 2, 0], sizes = [32, 1, 64], strides = [1, 1, 1]} : vector<32x32x64xf32> to vector<32x1x64xf32>
    %73 = vector.shape_cast %72 : vector<32x1x64xf32> to vector<32x64xf32>
    %c0_39 = arith.constant 0 : index
    %c128 = arith.constant 128 : index
    %74 = vector.load %arg19[%c0_39, %c128] : memref<32x2048xf32, #tpu.memory_space<vmem>>, vector<32x64xf32>
    tpu.vector_store %arg19[%c0_39, %c128], %73 {strides = array<i32>} : memref<32x2048xf32, #tpu.memory_space<vmem>>, vector<32x64xf32>,
    %75 = vector.extract_strided_slice %65 {offsets = [0, 3, 0], sizes = [32, 1, 64], strides = [1, 1, 1]} : vector<32x32x64xf32> to vector<32x1x64xf32>
    %76 = vector.shape_cast %75 : vector<32x1x64xf32> to vector<32x64xf32>
    %c0_40 = arith.constant 0 : index
    %c192 = arith.constant 192 : index
    %77 = vector.load %arg19[%c0_40, %c192] : memref<32x2048xf32, #tpu.memory_space<vmem>>, vector<32x64xf32>
    tpu.vector_store %arg19[%c0_40, %c192], %76 {strides = array<i32>} : memref<32x2048xf32, #tpu.memory_space<vmem>>, vector<32x64xf32>,
    %78 = vector.extract_strided_slice %65 {offsets = [0, 4, 0], sizes = [32, 1, 64], strides = [1, 1, 1]} : vector<32x32x64xf32> to vector<32x1x64xf32>
    %79 = vector.shape_cast %78 : vector<32x1x64xf32> to vector<32x64xf32>
    %c0_41 = arith.constant 0 : index
    %c256 = arith.constant 256 : index
    %80 = vector.load %arg19[%c0_41, %c256] : memref<32x2048xf32, #tpu.memory_space<vmem>>, vector<32x64xf32>
    tpu.vector_store %arg19[%c0_41, %c256], %79 {strides = array<i32>} : memref<32x2048xf32, #tpu.memory_space<vmem>>, vector<32x64xf32>,
    %81 = vector.extract_strided_slice %65 {offsets = [0, 5, 0], sizes = [32, 1, 64], strides = [1, 1, 1]} : vector<32x32x64xf32> to vector<32x1x64xf32>
    %82 = vector.shape_cast %81 : vector<32x1x64xf32> to vector<32x64xf32>
    %c0_42 = arith.constant 0 : index
    %c320 = arith.constant 320 : index
    %83 = vector.load %arg19[%c0_42, %c320] : memref<32x2048xf32, #tpu.memory_space<vmem>>, vector<32x64xf32>
    tpu.vector_store %arg19[%c0_42, %c320], %82 {strides = array<i32>} : memref<32x2048xf32, #tpu.memory_space<vmem>>, vector<32x64xf32>,
    %84 = vector.extract_strided_slice %65 {offsets = [0, 6, 0], sizes = [32, 1, 64], strides = [1, 1, 1]} : vector<32x32x64xf32> to vector<32x1x64xf32>
    %85 = vector.shape_cast %84 : vector<32x1x64xf32> to vector<32x64xf32>
    %c0_43 = arith.constant 0 : index
    %c384 = arith.constant 384 : index
    %86 = vector.load %arg19[%c0_43, %c384] : memref<32x2048xf32, #tpu.memory_space<vmem>>, vector<32x64xf32>
    tpu.vector_store %arg19[%c0_43, %c384], %85 {strides = array<i32>} : memref<32x2048xf32, #tpu.memory_space<vmem>>, vector<32x64xf32>,
    %87 = vector.extract_strided_slice %65 {offsets = [0, 7, 0], sizes = [32, 1, 64], strides = [1, 1, 1]} : vector<32x32x64xf32> to vector<32x1x64xf32>
    %88 = vector.shape_cast %87 : vector<32x1x64xf32> to vector<32x64xf32>
    %c0_44 = arith.constant 0 : index
    %c448 = arith.constant 448 : index
    %89 = vector.load %arg19[%c0_44, %c448] : memref<32x2048xf32, #tpu.memory_space<vmem>>, vector<32x64xf32>
    tpu.vector_store %arg19[%c0_44, %c448], %88 {strides = array<i32>} : memref<32x2048xf32, #tpu.memory_space<vmem>>, vector<32x64xf32>,
    %90 = vector.extract_strided_slice %65 {offsets = [0, 8, 0], sizes = [32, 1, 64], strides = [1, 1, 1]} : vector<32x32x64xf32> to vector<32x1x64xf32>
    %91 = vector.shape_cast %90 : vector<32x1x64xf32> to vector<32x64xf32>
    %c0_45 = arith.constant 0 : index
    %c512 = arith.constant 512 : index
    %92 = vector.load %arg19[%c0_45, %c512] : memref<32x2048xf32, #tpu.memory_space<vmem>>, vector<32x64xf32>
    tpu.vector_store %arg19[%c0_45, %c512], %91 {strides = array<i32>} : memref<32x2048xf32, #tpu.memory_space<vmem>>, vector<32x64xf32>,
    %93 = vector.extract_strided_slice %65 {offsets = [0, 9, 0], sizes = [32, 1, 64], strides = [1, 1, 1]} : vector<32x32x64xf32> to vector<32x1x64xf32>
    %94 = vector.shape_cast %93 : vector<32x1x64xf32> to vector<32x64xf32>
    %c0_46 = arith.constant 0 : index
    %c576 = arith.constant 576 : index
    %95 = vector.load %arg19[%c0_46, %c576] : memref<32x2048xf32, #tpu.memory_space<vmem>>, vector<32x64xf32>
    tpu.vector_store %arg19[%c0_46, %c576], %94 {strides = array<i32>} : memref<32x2048xf32, #tpu.memory_space<vmem>>, vector<32x64xf32>,
    %96 = vector.extract_strided_slice %65 {offsets = [0, 10, 0], sizes = [32, 1, 64], strides = [1, 1, 1]} : vector<32x32x64xf32> to vector<32x1x64xf32>
    %97 = vector.shape_cast %96 : vector<32x1x64xf32> to vector<32x64xf32>
    %c0_47 = arith.constant 0 : index
    %c640 = arith.constant 640 : index
    %98 = vector.load %arg19[%c0_47, %c640] : memref<32x2048xf32, #tpu.memory_space<vmem>>, vector<32x64xf32>
    tpu.vector_store %arg19[%c0_47, %c640], %97 {strides = array<i32>} : memref<32x2048xf32, #tpu.memory_space<vmem>>, vector<32x64xf32>,
    %99 = vector.extract_strided_slice %65 {offsets = [0, 11, 0], sizes = [32, 1, 64], strides = [1, 1, 1]} : vector<32x32x64xf32> to vector<32x1x64xf32>
    %100 = vector.shape_cast %99 : vector<32x1x64xf32> to vector<32x64xf32>
    %c0_48 = arith.constant 0 : index
    %c704 = arith.constant 704 : index
    %101 = vector.load %arg19[%c0_48, %c704] : memref<32x2048xf32, #tpu.memory_space<vmem>>, vector<32x64xf32>
    tpu.vector_store %arg19[%c0_48, %c704], %100 {strides = array<i32>} : memref<32x2048xf32, #tpu.memory_space<vmem>>, vector<32x64xf32>,
    %102 = vector.extract_strided_slice %65 {offsets = [0, 12, 0], sizes = [32, 1, 64], strides = [1, 1, 1]} : vector<32x32x64xf32> to vector<32x1x64xf32>
    %103 = vector.shape_cast %102 : vector<32x1x64xf32> to vector<32x64xf32>
    %c0_49 = arith.constant 0 : index
    %c768 = arith.constant 768 : index
    %104 = vector.load %arg19[%c0_49, %c768] : memref<32x2048xf32, #tpu.memory_space<vmem>>, vector<32x64xf32>
    tpu.vector_store %arg19[%c0_49, %c768], %103 {strides = array<i32>} : memref<32x2048xf32, #tpu.memory_space<vmem>>, vector<32x64xf32>,
    %105 = vector.extract_strided_slice %65 {offsets = [0, 13, 0], sizes = [32, 1, 64], strides = [1, 1, 1]} : vector<32x32x64xf32> to vector<32x1x64xf32>
    %106 = vector.shape_cast %105 : vector<32x1x64xf32> to vector<32x64xf32>
    %c0_50 = arith.constant 0 : index
    %c832 = arith.constant 832 : index
    %107 = vector.load %arg19[%c0_50, %c832] : memref<32x2048xf32, #tpu.memory_space<vmem>>, vector<32x64xf32>
    tpu.vector_store %arg19[%c0_50, %c832], %106 {strides = array<i32>} : memref<32x2048xf32, #tpu.memory_space<vmem>>, vector<32x64xf32>,
    %108 = vector.extract_strided_slice %65 {offsets = [0, 14, 0], sizes = [32, 1, 64], strides = [1, 1, 1]} : vector<32x32x64xf32> to vector<32x1x64xf32>
    %109 = vector.shape_cast %108 : vector<32x1x64xf32> to vector<32x64xf32>
    %c0_51 = arith.constant 0 : index
    %c896 = arith.constant 896 : index
    %110 = vector.load %arg19[%c0_51, %c896] : memref<32x2048xf32, #tpu.memory_space<vmem>>, vector<32x64xf32>
    tpu.vector_store %arg19[%c0_51, %c896], %109 {strides = array<i32>} : memref<32x2048xf32, #tpu.memory_space<vmem>>, vector<32x64xf32>,
    %111 = vector.extract_strided_slice %65 {offsets = [0, 15, 0], sizes = [32, 1, 64], strides = [1, 1, 1]} : vector<32x32x64xf32> to vector<32x1x64xf32>
    %112 = vector.shape_cast %111 : vector<32x1x64xf32> to vector<32x64xf32>
    %c0_52 = arith.constant 0 : index
    %c960 = arith.constant 960 : index
    %113 = vector.load %arg19[%c0_52, %c960] : memref<32x2048xf32, #tpu.memory_space<vmem>>, vector<32x64xf32>
    tpu.vector_store %arg19[%c0_52, %c960], %112 {strides = array<i32>} : memref<32x2048xf32, #tpu.memory_space<vmem>>, vector<32x64xf32>,
    %114 = vector.extract_strided_slice %65 {offsets = [0, 16, 0], sizes = [32, 1, 64], strides = [1, 1, 1]} : vector<32x32x64xf32> to vector<32x1x64xf32>
    %115 = vector.shape_cast %114 : vector<32x1x64xf32> to vector<32x64xf32>
    %c0_53 = arith.constant 0 : index
    %c1024 = arith.constant 1024 : index
    %116 = vector.load %arg19[%c0_53, %c1024] : memref<32x2048xf32, #tpu.memory_space<vmem>>, vector<32x64xf32>
    tpu.vector_store %arg19[%c0_53, %c1024], %115 {strides = array<i32>} : memref<32x2048xf32, #tpu.memory_space<vmem>>, vector<32x64xf32>,
    %117 = vector.extract_strided_slice %65 {offsets = [0, 17, 0], sizes = [32, 1, 64], strides = [1, 1, 1]} : vector<32x32x64xf32> to vector<32x1x64xf32>
    %118 = vector.shape_cast %117 : vector<32x1x64xf32> to vector<32x64xf32>
    %c0_54 = arith.constant 0 : index
    %c1088 = arith.constant 1088 : index
    %119 = vector.load %arg19[%c0_54, %c1088] : memref<32x2048xf32, #tpu.memory_space<vmem>>, vector<32x64xf32>
    tpu.vector_store %arg19[%c0_54, %c1088], %118 {strides = array<i32>} : memref<32x2048xf32, #tpu.memory_space<vmem>>, vector<32x64xf32>,
    %120 = vector.extract_strided_slice %65 {offsets = [0, 18, 0], sizes = [32, 1, 64], strides = [1, 1, 1]} : vector<32x32x64xf32> to vector<32x1x64xf32>
    %121 = vector.shape_cast %120 : vector<32x1x64xf32> to vector<32x64xf32>
    %c0_55 = arith.constant 0 : index
    %c1152 = arith.constant 1152 : index
    %122 = vector.load %arg19[%c0_55, %c1152] : memref<32x2048xf32, #tpu.memory_space<vmem>>, vector<32x64xf32>
    tpu.vector_store %arg19[%c0_55, %c1152], %121 {strides = array<i32>} : memref<32x2048xf32, #tpu.memory_space<vmem>>, vector<32x64xf32>,
    %123 = vector.extract_strided_slice %65 {offsets = [0, 19, 0], sizes = [32, 1, 64], strides = [1, 1, 1]} : vector<32x32x64xf32> to vector<32x1x64xf32>
    %124 = vector.shape_cast %123 : vector<32x1x64xf32> to vector<32x64xf32>
    %c0_56 = arith.constant 0 : index
    %c1216 = arith.constant 1216 : index
    %125 = vector.load %arg19[%c0_56, %c1216] : memref<32x2048xf32, #tpu.memory_space<vmem>>, vector<32x64xf32>
    tpu.vector_store %arg19[%c0_56, %c1216], %124 {strides = array<i32>} : memref<32x2048xf32, #tpu.memory_space<vmem>>, vector<32x64xf32>,
    %126 = vector.extract_strided_slice %65 {offsets = [0, 20, 0], sizes = [32, 1, 64], strides = [1, 1, 1]} : vector<32x32x64xf32> to vector<32x1x64xf32>
    %127 = vector.shape_cast %126 : vector<32x1x64xf32> to vector<32x64xf32>
    %c0_57 = arith.constant 0 : index
    %c1280 = arith.constant 1280 : index
    %128 = vector.load %arg19[%c0_57, %c1280] : memref<32x2048xf32, #tpu.memory_space<vmem>>, vector<32x64xf32>
    tpu.vector_store %arg19[%c0_57, %c1280], %127 {strides = array<i32>} : memref<32x2048xf32, #tpu.memory_space<vmem>>, vector<32x64xf32>,
    %129 = vector.extract_strided_slice %65 {offsets = [0, 21, 0], sizes = [32, 1, 64], strides = [1, 1, 1]} : vector<32x32x64xf32> to vector<32x1x64xf32>
    %130 = vector.shape_cast %129 : vector<32x1x64xf32> to vector<32x64xf32>
    %c0_58 = arith.constant 0 : index
    %c1344 = arith.constant 1344 : index
    %131 = vector.load %arg19[%c0_58, %c1344] : memref<32x2048xf32, #tpu.memory_space<vmem>>, vector<32x64xf32>
    tpu.vector_store %arg19[%c0_58, %c1344], %130 {strides = array<i32>} : memref<32x2048xf32, #tpu.memory_space<vmem>>, vector<32x64xf32>,
    %132 = vector.extract_strided_slice %65 {offsets = [0, 22, 0], sizes = [32, 1, 64], strides = [1, 1, 1]} : vector<32x32x64xf32> to vector<32x1x64xf32>
    %133 = vector.shape_cast %132 : vector<32x1x64xf32> to vector<32x64xf32>
    %c0_59 = arith.constant 0 : index
    %c1408 = arith.constant 1408 : index
    %134 = vector.load %arg19[%c0_59, %c1408] : memref<32x2048xf32, #tpu.memory_space<vmem>>, vector<32x64xf32>
    tpu.vector_store %arg19[%c0_59, %c1408], %133 {strides = array<i32>} : memref<32x2048xf32, #tpu.memory_space<vmem>>, vector<32x64xf32>,
    %135 = vector.extract_strided_slice %65 {offsets = [0, 23, 0], sizes = [32, 1, 64], strides = [1, 1, 1]} : vector<32x32x64xf32> to vector<32x1x64xf32>
    %136 = vector.shape_cast %135 : vector<32x1x64xf32> to vector<32x64xf32>
    %c0_60 = arith.constant 0 : index
    %c1472 = arith.constant 1472 : index
    %137 = vector.load %arg19[%c0_60, %c1472] : memref<32x2048xf32, #tpu.memory_space<vmem>>, vector<32x64xf32>
    tpu.vector_store %arg19[%c0_60, %c1472], %136 {strides = array<i32>} : memref<32x2048xf32, #tpu.memory_space<vmem>>, vector<32x64xf32>,
    %138 = vector.extract_strided_slice %65 {offsets = [0, 24, 0], sizes = [32, 1, 64], strides = [1, 1, 1]} : vector<32x32x64xf32> to vector<32x1x64xf32>
    %139 = vector.shape_cast %138 : vector<32x1x64xf32> to vector<32x64xf32>
    %c0_61 = arith.constant 0 : index
    %c1536 = arith.constant 1536 : index
    %140 = vector.load %arg19[%c0_61, %c1536] : memref<32x2048xf32, #tpu.memory_space<vmem>>, vector<32x64xf32>
    tpu.vector_store %arg19[%c0_61, %c1536], %139 {strides = array<i32>} : memref<32x2048xf32, #tpu.memory_space<vmem>>, vector<32x64xf32>,
    %141 = vector.extract_strided_slice %65 {offsets = [0, 25, 0], sizes = [32, 1, 64], strides = [1, 1, 1]} : vector<32x32x64xf32> to vector<32x1x64xf32>
    %142 = vector.shape_cast %141 : vector<32x1x64xf32> to vector<32x64xf32>
    %c0_62 = arith.constant 0 : index
    %c1600 = arith.constant 1600 : index
    %143 = vector.load %arg19[%c0_62, %c1600] : memref<32x2048xf32, #tpu.memory_space<vmem>>, vector<32x64xf32>
    tpu.vector_store %arg19[%c0_62, %c1600], %142 {strides = array<i32>} : memref<32x2048xf32, #tpu.memory_space<vmem>>, vector<32x64xf32>,
    %144 = vector.extract_strided_slice %65 {offsets = [0, 26, 0], sizes = [32, 1, 64], strides = [1, 1, 1]} : vector<32x32x64xf32> to vector<32x1x64xf32>
    %145 = vector.shape_cast %144 : vector<32x1x64xf32> to vector<32x64xf32>
    %c0_63 = arith.constant 0 : index
    %c1664 = arith.constant 1664 : index
    %146 = vector.load %arg19[%c0_63, %c1664] : memref<32x2048xf32, #tpu.memory_space<vmem>>, vector<32x64xf32>
    tpu.vector_store %arg19[%c0_63, %c1664], %145 {strides = array<i32>} : memref<32x2048xf32, #tpu.memory_space<vmem>>, vector<32x64xf32>,
    %147 = vector.extract_strided_slice %65 {offsets = [0, 27, 0], sizes = [32, 1, 64], strides = [1, 1, 1]} : vector<32x32x64xf32> to vector<32x1x64xf32>
    %148 = vector.shape_cast %147 : vector<32x1x64xf32> to vector<32x64xf32>
    %c0_64 = arith.constant 0 : index
    %c1728 = arith.constant 1728 : index
    %149 = vector.load %arg19[%c0_64, %c1728] : memref<32x2048xf32, #tpu.memory_space<vmem>>, vector<32x64xf32>
    tpu.vector_store %arg19[%c0_64, %c1728], %148 {strides = array<i32>} : memref<32x2048xf32, #tpu.memory_space<vmem>>, vector<32x64xf32>,
    %150 = vector.extract_strided_slice %65 {offsets = [0, 28, 0], sizes = [32, 1, 64], strides = [1, 1, 1]} : vector<32x32x64xf32> to vector<32x1x64xf32>
    %151 = vector.shape_cast %150 : vector<32x1x64xf32> to vector<32x64xf32>
    %c0_65 = arith.constant 0 : index
    %c1792 = arith.constant 1792 : index
    %152 = vector.load %arg19[%c0_65, %c1792] : memref<32x2048xf32, #tpu.memory_space<vmem>>, vector<32x64xf32>
    tpu.vector_store %arg19[%c0_65, %c1792], %151 {strides = array<i32>} : memref<32x2048xf32, #tpu.memory_space<vmem>>, vector<32x64xf32>,
    %153 = vector.extract_strided_slice %65 {offsets = [0, 29, 0], sizes = [32, 1, 64], strides = [1, 1, 1]} : vector<32x32x64xf32> to vector<32x1x64xf32>
    %154 = vector.shape_cast %153 : vector<32x1x64xf32> to vector<32x64xf32>
    %c0_66 = arith.constant 0 : index
    %c1856 = arith.constant 1856 : index
    %155 = vector.load %arg19[%c0_66, %c1856] : memref<32x2048xf32, #tpu.memory_space<vmem>>, vector<32x64xf32>
    tpu.vector_store %arg19[%c0_66, %c1856], %154 {strides = array<i32>} : memref<32x2048xf32, #tpu.memory_space<vmem>>, vector<32x64xf32>,
    %156 = vector.extract_strided_slice %65 {offsets = [0, 30, 0], sizes = [32, 1, 64], strides = [1, 1, 1]} : vector<32x32x64xf32> to vector<32x1x64xf32>
    %157 = vector.shape_cast %156 : vector<32x1x64xf32> to vector<32x64xf32>
    %c0_67 = arith.constant 0 : index
    %c1920 = arith.constant 1920 : index
    %158 = vector.load %arg19[%c0_67, %c1920] : memref<32x2048xf32, #tpu.memory_space<vmem>>, vector<32x64xf32>
    tpu.vector_store %arg19[%c0_67, %c1920], %157 {strides = array<i32>} : memref<32x2048xf32, #tpu.memory_space<vmem>>, vector<32x64xf32>,
    %159 = vector.extract_strided_slice %65 {offsets = [0, 31, 0], sizes = [32, 1, 64], strides = [1, 1, 1]} : vector<32x32x64xf32> to vector<32x1x64xf32>
    %160 = vector.shape_cast %159 : vector<32x1x64xf32> to vector<32x64xf32>
    %c0_68 = arith.constant 0 : index
    %c1984 = arith.constant 1984 : index
    %161 = vector.load %arg19[%c0_68, %c1984] : memref<32x2048xf32, #tpu.memory_space<vmem>>, vector<32x64xf32>
    tpu.vector_store %arg19[%c0_68, %c1984], %160 {strides = array<i32>} : memref<32x2048xf32, #tpu.memory_space<vmem>>, vector<32x64xf32>,
    %c0_69 = arith.constant 0 : index
    %c0_70 = arith.constant 0 : index
    %162 = vector.load %arg19[%c0_69, %c0_70] : memref<32x2048xf32, #tpu.memory_space<vmem>>, vector<32x2048xf32>
    %163 = arith.truncf %162 : vector<32x2048xf32> to vector<32x2048xbf16>
    %c0_71 = arith.constant 0 : index
    %c0_72 = arith.constant 0 : index
    %164 = vector.load %arg14[%c0_71, %c0_72] : memref<2048x128xbf16, #tpu.memory_space<vmem>>, vector<2048x128xbf16>
    %cst_73 = arith.constant dense<0.000000e+00> : vector<32x128xf32>
    %165 = tpu.matmul %163, %164, %cst_73 {dimension_numbers = #tpu.dot_dimension_numbers<[1], [0], [0], [1], [0, 0, 1, 1], [], []>} : vector<32x2048xbf16>, vector<2048x128xbf16>, vector<32x128xf32> -> vector<32x128xf32>
    %c0_74 = arith.constant 0 : index
    %c0_75 = arith.constant 0 : index
    %166 = vector.load %arg15[%c0_74, %c0_75] : memref<1x128xf32, #tpu.memory_space<vmem>>, vector<1x128xf32>
    %167 = vector.broadcast %166 : vector<1x128xf32> to vector<32x128xf32>
    %168 = arith.addf %165, %167 : vector<32x128xf32>
    %cst_76 = arith.constant 0.000000e+00 : f32
    %169 = vector.broadcast %cst_76 : f32 to vector<32x128xf32>
    %170 = arith.maximumf %168, %169 : vector<32x128xf32>
    %171 = arith.truncf %170 : vector<32x128xf32> to vector<32x128xbf16>
    %c0_77 = arith.constant 0 : index
    %c0_78 = arith.constant 0 : index
    %172 = vector.load %arg16[%c0_77, %c0_78] : memref<128x128xbf16, #tpu.memory_space<vmem>>, vector<128x128xbf16>
    %cst_79 = arith.constant dense<0.000000e+00> : vector<32x128xf32>
    %173 = tpu.matmul %171, %172, %cst_79 {dimension_numbers = #tpu.dot_dimension_numbers<[1], [0], [0], [1], [0, 0, 1, 1], [], []>} : vector<32x128xbf16>, vector<128x128xbf16>, vector<32x128xf32> -> vector<32x128xf32>
    %c0_80 = arith.constant 0 : index
    %c0_81 = arith.constant 0 : index
    %174 = vector.load %arg17[%c0_80, %c0_81] : memref<1x128xf32, #tpu.memory_space<vmem>>, vector<1x128xf32>
    %175 = vector.broadcast %174 : vector<1x128xf32> to vector<32x128xf32>
    %176 = arith.addf %173, %175 : vector<32x128xf32>
    %cst_82 = arith.constant dense<0xFF800000> : vector<32xf32>
    %177 = vector.multi_reduction <maximumf>, %176, %cst_82 [1] : vector<32x128xf32> to vector<32xf32>
    %178 = vector.shape_cast %177 : vector<32xf32> to vector<32x1xf32>
    %179 = vector.broadcast %178 : vector<32x1xf32> to vector<32x128xf32>
    %180 = arith.subf %176, %179 : vector<32x128xf32>
    %181 = math.exp %180 : vector<32x128xf32>
    %cst_83 = arith.constant dense<0.000000e+00> : vector<32xf32>
    %182 = vector.multi_reduction <add>, %181, %cst_83 [1] : vector<32x128xf32> to vector<32xf32>
    %183 = vector.shape_cast %182 : vector<32xf32> to vector<32x1xf32>
    %184 = math.log %183 : vector<32x1xf32>
    %185 = vector.broadcast %184 : vector<32x1xf32> to vector<32x128xf32>
    %186 = arith.subf %180, %185 : vector<32x128xf32>
    %c0_84 = arith.constant 0 : index
    %c0_85 = arith.constant 0 : index
    %187 = vector.load %arg18[%c0_84, %c0_85] : memref<32x128xf32, #tpu.memory_space<vmem>>, vector<32x128xf32>
    tpu.vector_store %arg18[%c0_84, %c0_85], %186 {strides = array<i32>} : memref<32x128xf32, #tpu.memory_space<vmem>>, vector<32x128xf32>,
    return
  }
  func.func @transform_0(%arg0: i32) -> (i32, i32) {
    %c0_i32 = arith.constant 0 : i32
    %c0_i32_0 = arith.constant 0 : i32
    return %arg0, %c0_i32 : i32, i32
  }
  func.func @transform_1(%arg0: i32) -> (i32, i32) {
    %c0_i32 = arith.constant 0 : i32
    %c0_i32_0 = arith.constant 0 : i32
    %c0_i32_1 = arith.constant 0 : i32
    return %c0_i32, %c0_i32_0 : i32, i32
  }
  func.func @transform_2(%arg0: i32) -> (i32, i32) {
    %c0_i32 = arith.constant 0 : i32
    %c0_i32_0 = arith.constant 0 : i32
    %c0_i32_1 = arith.constant 0 : i32
    return %c0_i32, %c0_i32_0 : i32, i32
  }
  func.func @transform_3(%arg0: i32) -> (i32, i32) {
    %c0_i32 = arith.constant 0 : i32
    %c0_i32_0 = arith.constant 0 : i32
    %c0_i32_1 = arith.constant 0 : i32
    return %c0_i32, %c0_i32_0 : i32, i32
  }
  func.func @transform_4(%arg0: i32) -> (i32, i32) {
    %c0_i32 = arith.constant 0 : i32
    %c0_i32_0 = arith.constant 0 : i32
    %c0_i32_1 = arith.constant 0 : i32
    return %c0_i32, %c0_i32_0 : i32, i32
  }
  func.func @transform_5(%arg0: i32) -> (i32, i32) {
    %c0_i32 = arith.constant 0 : i32
    %c0_i32_0 = arith.constant 0 : i32
    %c0_i32_1 = arith.constant 0 : i32
    return %c0_i32, %c0_i32_0 : i32, i32
  }
  func.func @transform_6(%arg0: i32) -> (i32, i32) {
    %c0_i32 = arith.constant 0 : i32
    %c0_i32_0 = arith.constant 0 : i32
    %c0_i32_1 = arith.constant 0 : i32
    return %c0_i32, %c0_i32_0 : i32, i32
  }
  func.func @transform_7(%arg0: i32) -> (i32, i32, i32) {
    %c0_i32 = arith.constant 0 : i32
    %c0_i32_0 = arith.constant 0 : i32
    %c0_i32_1 = arith.constant 0 : i32
    %c0_i32_2 = arith.constant 0 : i32
    return %c0_i32, %c0_i32_0, %c0_i32_1 : i32, i32, i32
  }
  func.func @transform_8(%arg0: i32) -> (i32, i32) {
    %c0_i32 = arith.constant 0 : i32
    %c0_i32_0 = arith.constant 0 : i32
    %c0_i32_1 = arith.constant 0 : i32
    return %c0_i32, %c0_i32_0 : i32, i32
  }
  func.func @transform_9(%arg0: i32) -> (i32, i32) {
    %c0_i32 = arith.constant 0 : i32
    %c0_i32_0 = arith.constant 0 : i32
    %c0_i32_1 = arith.constant 0 : i32
    return %c0_i32, %c0_i32_0 : i32, i32
  }
  func.func @transform_10(%arg0: i32) -> (i32, i32) {
    %c0_i32 = arith.constant 0 : i32
    %c0_i32_0 = arith.constant 0 : i32
    %c0_i32_1 = arith.constant 0 : i32
    return %c0_i32, %c0_i32_0 : i32, i32
  }
  func.func @transform_11(%arg0: i32) -> (i32, i32) {
    %c0_i32 = arith.constant 0 : i32
    %c0_i32_0 = arith.constant 0 : i32
    %c0_i32_1 = arith.constant 0 : i32
    return %c0_i32, %c0_i32_0 : i32, i32
  }
  func.func @transform_12(%arg0: i32) -> (i32, i32) {
    %c0_i32 = arith.constant 0 : i32
    %c0_i32_0 = arith.constant 0 : i32
    %c0_i32_1 = arith.constant 0 : i32
    return %c0_i32, %c0_i32_0 : i32, i32
  }
  func.func @transform_13(%arg0: i32) -> (i32, i32) {
    %c0_i32 = arith.constant 0 : i32
    %c0_i32_0 = arith.constant 0 : i32
    %c0_i32_1 = arith.constant 0 : i32
    return %c0_i32, %c0_i32_0 : i32, i32
  }
  func.func @transform_14(%arg0: i32) -> (i32, i32) {
    %c0_i32 = arith.constant 0 : i32
    %c0_i32_0 = arith.constant 0 : i32
    %c0_i32_1 = arith.constant 0 : i32
    return %c0_i32, %c0_i32_0 : i32, i32
  }
  func.func @transform_15(%arg0: i32) -> (i32, i32) {
    %c0_i32 = arith.constant 0 : i32
    %c0_i32_0 = arith.constant 0 : i32
    %c0_i32_1 = arith.constant 0 : i32
    return %c0_i32, %c0_i32_0 : i32, i32
  }
  func.func @transform_16(%arg0: i32) -> (i32, i32) {
    %c0_i32 = arith.constant 0 : i32
    %c0_i32_0 = arith.constant 0 : i32
    %c0_i32_1 = arith.constant 0 : i32
    return %c0_i32, %c0_i32_0 : i32, i32
  }
  func.func @transform_17(%arg0: i32) -> (i32, i32) {
    %c0_i32 = arith.constant 0 : i32
    %c0_i32_0 = arith.constant 0 : i32
    return %arg0, %c0_i32 : i32, i32
  }
}

</mosaic_0001>

<bundles_post_ra>
// kernel: compressed_net_forward.1
= control target key start
LH: loop header
LB: loop body
LE: loop exit
PB: predicated region body
PF: predicated region fallthrough
CT: control target
= control target key end

     0   :  { %s15574_s24 = smov 0   ;;  %s22198_s0 = inlined_call_operand.vmem [shape: f32[64,256], index: 0, kind: input, shape index: {}]   ;;  %s22199_s1 = inlined_call_operand.vmem [shape: f32[16,3], index: 1, kind: input, shape index: {}]   ;;  %s22200_s2 = inlined_call_operand.vmem [shape: f32[16,1], index: 2, kind: input, shape index: {}]   ;;  %s22201_s3 = inlined_call_operand.vmem [shape: f32[256,256], index: 3, kind: input, shape index: {}]   ;;  %s22202_s4 = inlined_call_operand.vmem [shape: f32[256,256], index: 4, kind: input, shape index: {}]   ;;  %s22203_s5 = inlined_call_operand.vmem [shape: bf16[256,128], index: 5, kind: input, shape index: {}]   ;;  %s22204_s6 = inlined_call_operand.vmem [shape: bf16[256,128], index: 6, kind: input, shape index: {}]   ;;  %s22205_s7 = inlined_call_operand.vmem [shape: bf16[32,32,48], index: 7, kind: input, shape index: {}]   ;;  %s22206_s8 = inlined_call_operand.vmem [shape: f32[32,1], index: 8, kind: input, shape index: {}]   ;;  %s22207_s9 = inlined_call_operand.vmem [shape: f32[128,128], index: 9, kind: input, shape index: {}]   ;;  %s22208_s10 = inlined_call_operand.vmem [shape: f32[128,128], index: 10, kind: input, shape index: {}]   ;;  %s22209_s11 = inlined_call_operand.vmem [shape: bf16[128,64], index: 11, kind: input, shape index: {}]   ;;  %s22210_s12 = inlined_call_operand.vmem [shape: bf16[128,64], index: 12, kind: input, shape index: {}]   ;;  %s22211_s13 = inlined_call_operand.vmem [shape: bf16[2048,128], index: 13, kind: input, shape index: {}]   ;;  %s22212_s14 = inlined_call_operand.vmem [shape: f32[1,128], index: 14, kind: input, shape index: {}]   ;;  %s22213_s15 = inlined_call_operand.vmem [shape: bf16[128,128], index: 15, kind: input, shape index: {}]   ;;  %s22214_s16 = inlined_call_operand.vmem [shape: f32[1,128], index: 16, kind: input, shape index: {}]   ;;  %s22215_s17 = inlined_call_operand.vmem [shape: f32[64,128], index: 17, kind: output, shape index: {}]  }
   0x1   :  { %22469 = sst [smem:[#allocation102_spill]] %s22198_s0 }
   0x2   :  { %22470 = sst [smem:[#allocation103_spill]] %s22199_s1 }
   0x3 LB: > { %s13079_s25 = sadd.s32 4294967295, %s15477_s24   ;;  %p13083_p0 = scmp.ge.s32.totalorder %s15477_s24, 1  ;;  %s15477_s24 = sphi %s15574_s24, %s27_s24  }
   0x4   : > { %p489_p1 = scmp.lt.s32.totalorder %s15477_s24, 3 }
   0x6   : > { %p490_p2 = pnand %p13083_p0, %p489_p1 }
   0x8   : > { %493 = sbr.rel (%p490_p2) target bundleno = 2595 (0xa23), region = 88 }
   0xf   : > { %v565_v0 = vld [vmem:[%s22201_s3 + $0x8] sm:$0xff]  ;;  %v567_v1 = vld [vmem:[%s22201_s3 + $0x18] sm:$0xff]  ;;  %v564_v5 = vld [vmem:[%s22201_s3] sm:$0xff]  ;;  %v15479_v12 = vmov 1   ;;  %v15480_v13 = vmov 0   ;;  %s13084_s20 = sshll.u32 %s13079_s25, 2 }
  0x10   : > { %v718_v2 = vld [vmem:[%s22202_s4 + $0x8] sm:$0xff]  ;;  %v14988_v3 = vpack.c.bf16 %v567_v1, %v565_v0  ;;  %v720_v4 = vld [vmem:[%s22202_s4 + $0x18] sm:$0xff]  ;;  %v566_v6 = vld [vmem:[%s22201_s3 + $0x10] sm:$0xff]  ;;  %15194 = vset.pattern.permute.xlu1 %v15479_v12  ;;  %15193 = vset.pattern.permute.xlu0 %v15480_v13  ;;  %p543_p3 = scmp.lt.s32.totalorder %s13084_s20, 7  ;;  %s22471_s1 = sld [smem:[#allocation102_spill]]  ;;  %vm5412_vm0 = vcmask 392192  }
  0x11   : > { %v15052_v7 = vpack.c.bf16 %v720_v4, %v718_v2  ;;  %v14990_v8 = vpack.c.bf16 %v566_v6, %v564_v5  ;;  %v717_v9 = vld [vmem:[%s22202_s4] sm:$0xff]  ;;  %v719_v10 = vld [vmem:[%s22202_s4 + $0x10] sm:$0xff]  ;;  %v569_v11 = vld [vmem:[%s22201_s3 + $0x28] sm:$0xff]  ;;  %s22472_s29 = sld [smem:[#allocation103_spill]]  ;;  %vm9054_vm1 = vcmask 1041409   ;;  %vm9057_vm2 = vcmask 1042434  }
  0x12   : > { %14989 = vmatprep.subr.bf16.mxu0 %v14988_v3  ;;  %v15054_v14 = vpack.c.bf16 %v719_v10, %v717_v9  ;;  %v571_v15 = vld [vmem:[%s22201_s3 + $0x38] sm:$0xff]  ;;  %v722_v16 = vld [vmem:[%s22202_s4 + $0x28] sm:$0xff]  ;;  %v568_v20 = vld [vmem:[%s22201_s3 + $0x20] sm:$0xff]  ;;  %s22924_s20 = smov (!%p543_p3, %s13084_s20), 7  ;;  %vm9060_vm3 = vcmask 1043459   ;;  %vm9063_vm4 = vcmask 1044484  }
  0x13   : > { %v724_v17 = vld [vmem:[%s22202_s4 + $0x38] sm:$0xff]  ;;  %15053 = vmatprep.subr.bf16.mxu1 %v15052_v7  ;;  %14991 = vmatpush1.bf16.msra.mxu0 %v14990_v8  ;;  %v14992_v18 = vpack.c.bf16 %v571_v15, %v569_v11  ;;  %v570_v21 = vld [vmem:[%s22201_s3 + $0x30] sm:$0xff]  ;;  %v721_v22 = vld [vmem:[%s22202_s4 + $0x20] sm:$0xff]  ;;  %s13405_s26 = sshll.u32 %s22924_s20, 4  ;;  %vm9066_vm5 = vcmask 1045509   ;;  %vm9069_vm6 = vcmask 1046534  }
  0x14   : > { %v15056_v19 = vpack.c.bf16 %v724_v17, %v722_v16  ;;  %15055 = vmatpush1.bf16.msra.mxu1 %v15054_v14  ;;  %v14994_v23 = vpack.c.bf16 %v570_v21, %v568_v20  ;;  %v723_v24 = vld [vmem:[%s22202_s4 + $0x30] sm:$0xff]  ;;  %v573_v25 = vld [vmem:[%s22201_s3 + $0x48] sm:$0xff]  ;;  %v575_v26 = vld [vmem:[%s22201_s3 + $0x58] sm:$0xff]  ;;  %vm9072_vm7 = vcmask 1047559   ;;  %vm9120_vm8 = vcmask 523264   ;;  %s15483_s27 = smov 64  }
  0x15   : > { %14993 = vmatprep.subr.bf16.mxu0 %v14992_v18  ;;  %v15058_v27 = vpack.c.bf16 %v723_v24, %v721_v22  ;;  %v14996_v28 = vpack.c.bf16 %v575_v26, %v573_v25  ;;  %v726_v29 = vld [vmem:[%s22202_s4 + $0x48] sm:$0xff]  ;;  %v728_v30 = vld [vmem:[%s22202_s4 + $0x58] sm:$0xff]  ;;  %v572_v31 = vld [vmem:[%s22201_s3 + $0x40] sm:$0xff]  ;;  %vm9193_vm9 = vcmask 1048064  }
  0x16   : > { %15057 = vmatprep.subr.bf16.mxu1 %v15056_v19  ;;  %v15060_v32 = vpack.c.bf16 %v728_v30, %v726_v29  ;;  %v574_v33 = vld [vmem:[%s22201_s3 + $0x50] sm:$0xff]  ;;  %v725_v34 = vld [vmem:[%s22202_s4 + $0x40] sm:$0xff]  ;;  %v577_v37 = vld [vmem:[%s22201_s3 + $0x68] sm:$0xff]  ;;  %s15871_s21 = scalar_lea.vmem %s22471_s1, %s13405_s26 }
  0x17   : > { %v727_v35 = vld [vmem:[%s22202_s4 + $0x50] sm:$0xff]  ;;  %14995 = vmatpush1.bf16.msra.mxu0 %v14994_v23  ;;  %v14998_v36 = vpack.c.bf16 %v574_v33, %v572_v31  ;;  %v579_v38 = vld [vmem:[%s22201_s3 + $0x78] sm:$0xff]  ;;  %v730_v39 = vld [vmem:[%s22202_s4 + $0x68] sm:$0xff] }
  0x18   : > { %15059 = vmatpush1.bf16.msra.mxu1 %v15058_v27  ;;  %14997 = vmatprep.subr.bf16.mxu0 %v14996_v28  ;;  %v15062_v40 = vpack.c.bf16 %v727_v35, %v725_v34  ;;  %v15000_v41 = vpack.c.bf16 %v579_v38, %v577_v37  ;;  %v732_v42 = vld [vmem:[%s22202_s4 + $0x78] sm:$0xff]  ;;  %v576_v43 = vld [vmem:[%s22201_s3 + $0x60] sm:$0xff]  ;;  %v578_v44 = vld [vmem:[%s22201_s3 + $0x70] sm:$0xff] }
  0x19   : > { %15061 = vmatprep.subr.bf16.mxu1 %v15060_v32  ;;  %v15064_v45 = vpack.c.bf16 %v732_v42, %v730_v39  ;;  %v729_v46 = vld [vmem:[%s22202_s4 + $0x60] sm:$0xff]  ;;  %v731_v47 = vld [vmem:[%s22202_s4 + $0x70] sm:$0xff]  ;;  %v581_v48 = vld [vmem:[%s22201_s3 + $0x88] sm:$0xff]  ;;  %v15002_v52 = vpack.c.bf16 %v578_v44, %v576_v43 }
  0x1a   : > { %v583_v49 = vld [vmem:[%s22201_s3 + $0x98] sm:$0xff]  ;;  %v734_v50 = vld [vmem:[%s22202_s4 + $0x88] sm:$0xff]  ;;  %v15066_v53 = vpack.c.bf16 %v731_v47, %v729_v46  ;;  %v580_v55 = vld [vmem:[%s22201_s3 + $0x80] sm:$0xff] }
  0x1b   : > { %v736_v51 = vld [vmem:[%s22202_s4 + $0x98] sm:$0xff]  ;;  %14999 = vmatpush1.bf16.msra.mxu0 %v14998_v36  ;;  %v15004_v54 = vpack.c.bf16 %v583_v49, %v581_v48  ;;  %v582_v56 = vld [vmem:[%s22201_s3 + $0x90] sm:$0xff]  ;;  %v733_v57 = vld [vmem:[%s22202_s4 + $0x80] sm:$0xff] }
  0x1c   : > { %15063 = vmatpush1.bf16.msra.mxu1 %v15062_v40  ;;  %15001 = vmatprep.subr.bf16.mxu0 %v15000_v41  ;;  %v15068_v58 = vpack.c.bf16 %v736_v51, %v734_v50  ;;  %v735_v59 = vld [vmem:[%s22202_s4 + $0x90] sm:$0xff]  ;;  %v585_v60 = vld [vmem:[%s22201_s3 + $0xa8] sm:$0xff]  ;;  %v587_v61 = vld [vmem:[%s22201_s3 + $0xb8] sm:$0xff]  ;;  %v15006_v0 = vpack.c.bf16 %v582_v56, %v580_v55 }
  0x1d   : > { %15065 = vmatprep.subr.bf16.mxu1 %v15064_v45  ;;  %v738_v62 = vld [vmem:[%s22202_s4 + $0xa8] sm:$0xff]  ;;  %v740_v63 = vld [vmem:[%s22202_s4 + $0xb8] sm:$0xff]  ;;  %v15070_v1 = vpack.c.bf16 %v735_v59, %v733_v57  ;;  %v15008_v2 = vpack.c.bf16 %v587_v61, %v585_v60  ;;  %v584_v3 = vld [vmem:[%s22201_s3 + $0xa0] sm:$0xff] }
  0x1e   : > { %v586_v4 = vld [vmem:[%s22201_s3 + $0xb0] sm:$0xff]  ;;  %v737_v5 = vld [vmem:[%s22202_s4 + $0xa0] sm:$0xff]  ;;  %v15072_v6 = vpack.c.bf16 %v740_v63, %v738_v62  ;;  %v589_v8 = vld [vmem:[%s22201_s3 + $0xc8] sm:$0xff] }
  0x1f   : > { %15003 = vmatpush1.bf16.msra.mxu0 %v15002_v52  ;;  %v739_v7 = vld [vmem:[%s22202_s4 + $0xb0] sm:$0xff]  ;;  %v591_v9 = vld [vmem:[%s22201_s3 + $0xd8] sm:$0xff]  ;;  %v742_v10 = vld [vmem:[%s22202_s4 + $0xc8] sm:$0xff]  ;;  %v15010_v12 = vpack.c.bf16 %v586_v4, %v584_v3 }
  0x20   : > { %15067 = vmatpush1.bf16.msra.mxu1 %v15066_v53  ;;  %15005 = vmatprep.subr.bf16.mxu0 %v15004_v54  ;;  %v744_v11 = vld [vmem:[%s22202_s4 + $0xd8] sm:$0xff]  ;;  %v15074_v14 = vpack.c.bf16 %v739_v7, %v737_v5  ;;  %v15012_v15 = vpack.c.bf16 %v591_v9, %v589_v8  ;;  %v588_v16 = vld [vmem:[%s22201_s3 + $0xc0] sm:$0xff]  ;;  %v590_v17 = vld [vmem:[%s22201_s3 + $0xd0] sm:$0xff] }
  0x21   : > { %15069 = vmatprep.subr.bf16.mxu1 %v15068_v58  ;;  %v741_v18 = vld [vmem:[%s22202_s4 + $0xc0] sm:$0xff]  ;;  %v15076_v19 = vpack.c.bf16 %v744_v11, %v742_v10  ;;  %v743_v20 = vld [vmem:[%s22202_s4 + $0xd0] sm:$0xff]  ;;  %v593_v21 = vld [vmem:[%s22201_s3 + $0xe8] sm:$0xff]  ;;  %v15014_v25 = vpack.c.bf16 %v590_v17, %v588_v16 }
  0x22   : > { %v595_v22 = vld [vmem:[%s22201_s3 + $0xf8] sm:$0xff]  ;;  %v746_v23 = vld [vmem:[%s22202_s4 + $0xe8] sm:$0xff]  ;;  %v15078_v26 = vpack.c.bf16 %v743_v20, %v741_v18  ;;  %v592_v28 = vld [vmem:[%s22201_s3 + $0xe0] sm:$0xff] }
  0x23   : > { %15007 = vmatpush1.bf16.msra.mxu0 %v15006_v0  ;;  %v748_v24 = vld [vmem:[%s22202_s4 + $0xf8] sm:$0xff]  ;;  %v15016_v27 = vpack.c.bf16 %v595_v22, %v593_v21  ;;  %v594_v29 = vld [vmem:[%s22201_s3 + $0xf0] sm:$0xff]  ;;  %v745_v30 = vld [vmem:[%s22202_s4 + $0xe0] sm:$0xff] }
  0x24   : > { %15071 = vmatpush1.bf16.msra.mxu1 %v15070_v1  ;;  %15009 = vmatprep.subr.bf16.mxu0 %v15008_v2  ;;  %v15080_v31 = vpack.c.bf16 %v748_v24, %v746_v23  ;;  %v747_v32 = vld [vmem:[%s22202_s4 + $0xf0] sm:$0xff]  ;;  %v597_v33 = vld [vmem:[%s22201_s3 + $0x108] sm:$0xff]  ;;  %v599_v34 = vld [vmem:[%s22201_s3 + $0x118] sm:$0xff]  ;;  %v15018_v37 = vpack.c.bf16 %v594_v29, %v592_v28 }
  0x25   : > { %15073 = vmatprep.subr.bf16.mxu1 %v15072_v6  ;;  %v750_v35 = vld [vmem:[%s22202_s4 + $0x108] sm:$0xff]  ;;  %v752_v36 = vld [vmem:[%s22202_s4 + $0x118] sm:$0xff]  ;;  %v15082_v38 = vpack.c.bf16 %v747_v32, %v745_v30  ;;  %v15020_v39 = vpack.c.bf16 %v599_v34, %v597_v33  ;;  %v596_v40 = vld [vmem:[%s22201_s3 + $0x100] sm:$0xff] }
  0x26   : > { %v598_v41 = vld [vmem:[%s22201_s3 + $0x110] sm:$0xff]  ;;  %v749_v42 = vld [vmem:[%s22202_s4 + $0x100] sm:$0xff]  ;;  %v15084_v43 = vpack.c.bf16 %v752_v36, %v750_v35  ;;  %v601_v45 = vld [vmem:[%s22201_s3 + $0x128] sm:$0xff] }
  0x27   : > { %15011 = vmatpush1.bf16.msra.mxu0 %v15010_v12  ;;  %v751_v44 = vld [vmem:[%s22202_s4 + $0x110] sm:$0xff]  ;;  %v603_v46 = vld [vmem:[%s22201_s3 + $0x138] sm:$0xff]  ;;  %v754_v47 = vld [vmem:[%s22202_s4 + $0x128] sm:$0xff]  ;;  %v15022_v49 = vpack.c.bf16 %v598_v41, %v596_v40 }
  0x28   : > { %15075 = vmatpush1.bf16.msra.mxu1 %v15074_v14  ;;  %15013 = vmatprep.subr.bf16.mxu0 %v15012_v15  ;;  %v756_v48 = vld [vmem:[%s22202_s4 + $0x138] sm:$0xff]  ;;  %v15086_v50 = vpack.c.bf16 %v751_v44, %v749_v42  ;;  %v15024_v51 = vpack.c.bf16 %v603_v46, %v601_v45  ;;  %v600_v52 = vld [vmem:[%s22201_s3 + $0x120] sm:$0xff]  ;;  %v602_v53 = vld [vmem:[%s22201_s3 + $0x130] sm:$0xff] }
  0x29   : > { %15077 = vmatprep.subr.bf16.mxu1 %v15076_v19  ;;  %v753_v54 = vld [vmem:[%s22202_s4 + $0x120] sm:$0xff]  ;;  %v15088_v55 = vpack.c.bf16 %v756_v48, %v754_v47  ;;  %v755_v56 = vld [vmem:[%s22202_s4 + $0x130] sm:$0xff]  ;;  %v605_v57 = vld [vmem:[%s22201_s3 + $0x148] sm:$0xff]  ;;  %v15026_v61 = vpack.c.bf16 %v602_v53, %v600_v52 }
  0x2a   : > { %v607_v58 = vld [vmem:[%s22201_s3 + $0x158] sm:$0xff]  ;;  %v758_v59 = vld [vmem:[%s22202_s4 + $0x148] sm:$0xff]  ;;  %v15090_v62 = vpack.c.bf16 %v755_v56, %v753_v54  ;;  %v604_v0 = vld [vmem:[%s22201_s3 + $0x140] sm:$0xff] }
  0x2b   : > { %15015 = vmatpush1.bf16.msra.mxu0 %v15014_v25  ;;  %v760_v60 = vld [vmem:[%s22202_s4 + $0x158] sm:$0xff]  ;;  %v15028_v63 = vpack.c.bf16 %v607_v58, %v605_v57  ;;  %v606_v1 = vld [vmem:[%s22201_s3 + $0x150] sm:$0xff]  ;;  %v757_v2 = vld [vmem:[%s22202_s4 + $0x140] sm:$0xff] }
  0x2c   : > { %15079 = vmatpush1.bf16.msra.mxu1 %v15078_v26  ;;  %15017 = vmatprep.subr.bf16.mxu0 %v15016_v27  ;;  %v15092_v3 = vpack.c.bf16 %v760_v60, %v758_v59  ;;  %v759_v4 = vld [vmem:[%s22202_s4 + $0x150] sm:$0xff]  ;;  %v609_v5 = vld [vmem:[%s22201_s3 + $0x168] sm:$0xff]  ;;  %v611_v6 = vld [vmem:[%s22201_s3 + $0x178] sm:$0xff]  ;;  %v15030_v10 = vpack.c.bf16 %v606_v1, %v604_v0 }
  0x2d   : > { %15081 = vmatprep.subr.bf16.mxu1 %v15080_v31  ;;  %v762_v7 = vld [vmem:[%s22202_s4 + $0x168] sm:$0xff]  ;;  %v764_v8 = vld [vmem:[%s22202_s4 + $0x178] sm:$0xff]  ;;  %v608_v9 = vld [vmem:[%s22201_s3 + $0x160] sm:$0xff]  ;;  %v15094_v15 = vpack.c.bf16 %v759_v4, %v757_v2  ;;  %v15032_v16 = vpack.c.bf16 %v611_v6, %v609_v5 }
  0x2e   : > { %v610_v11 = vld [vmem:[%s22201_s3 + $0x170] sm:$0xff]  ;;  %v761_v12 = vld [vmem:[%s22202_s4 + $0x160] sm:$0xff]  ;;  %v613_v17 = vld [vmem:[%s22201_s3 + $0x188] sm:$0xff]  ;;  %v15096_v19 = vpack.c.bf16 %v764_v8, %v762_v7 }
  0x2f   : > { %15019 = vmatpush1.bf16.msra.mxu0 %v15018_v37  ;;  %v763_v14 = vld [vmem:[%s22202_s4 + $0x170] sm:$0xff]  ;;  %v615_v18 = vld [vmem:[%s22201_s3 + $0x198] sm:$0xff]  ;;  %v766_v20 = vld [vmem:[%s22202_s4 + $0x188] sm:$0xff]  ;;  %v15034_v23 = vpack.c.bf16 %v610_v11, %v608_v9 }
  0x30   : > { %15083 = vmatpush1.bf16.msra.mxu1 %v15082_v38  ;;  %15021 = vmatprep.subr.bf16.mxu0 %v15020_v39  ;;  %v768_v21 = vld [vmem:[%s22202_s4 + $0x198] sm:$0xff]  ;;  %v15895_v22 = vld [vmem:[%s15871_s21 + $0x8] sm:$0xff]  ;;  %v15098_v24 = vpack.c.bf16 %v763_v14, %v761_v12  ;;  %v612_v25 = vld [vmem:[%s22201_s3 + $0x180] sm:$0xff]  ;;  %v15036_v38 = vpack.c.bf16 %v615_v18, %v613_v17  ;;  %v15481_v14 = vmov 2  }
  0x31   : > { %15085 = vmatprep.subr.bf16.mxu1 %v15084_v43  ;;  %v614_v26 = vld [vmem:[%s22201_s3 + $0x190] sm:$0xff]  ;;  %692 = vmatprep.mubr.f32.mxu0 %v15895_v22  ;;  %v15906_v27 = vld [vmem:[%s15871_s21] sm:$0xff]  ;;  %v15909_v28 = vld [vmem:[%s15871_s21 + $0x18] sm:$0xff]  ;;  %v15100_v44 = vpack.c.bf16 %v768_v21, %v766_v20 }
  0x32   : > { %845 = vmatprep.mubr.f32.mxu1 %v15895_v22  ;;  %v15912_v29 = vld [vmem:[%s15871_s21 + $0x10] sm:$0xff]  ;;  %v765_v30 = vld [vmem:[%s22202_s4 + $0x180] sm:$0xff]  ;;  %v1546_v32 = vcombine.low %v15906_v27, %v15895_v22  ;;  %v1547_v33 = vcombine.high %v15906_v27, %v15895_v22  ;;  %v15929_v36 = vld [vmem:[%s15871_s21 + $0x28] sm:$0xff]  ;;  %v15038_v53 = vpack.c.bf16 %v614_v26, %v612_v25 }
  0x33   : > { %15023 = vmatpush1.bf16.msra.mxu0 %v15022_v49  ;;  %v767_v31 = vld [vmem:[%s22202_s4 + $0x190] sm:$0xff]  ;;  %v1596_v34 = vcombine.low %v15912_v29, %v15909_v28  ;;  %v1597_v35 = vcombine.high %v15912_v29, %v15909_v28  ;;  %v15932_v37 = vld [vmem:[%s15871_s21 + $0x20] sm:$0xff]  ;;  %v617_v39 = vld [vmem:[%s22201_s3 + $0x1a8] sm:$0xff] }
  0x34   : > { %15087 = vmatpush1.bf16.msra.mxu1 %v15086_v50  ;;  %15025 = vmatprep.subr.bf16.mxu0 %v15024_v51  ;;  %v619_v40 = vld [vmem:[%s22201_s3 + $0x1b8] sm:$0xff]  ;;  %v1646_v41 = vcombine.low %v15932_v37, %v15929_v36  ;;  %v1647_v42 = vcombine.high %v15932_v37, %v15929_v36  ;;  %v15947_v43 = vld [vmem:[%s22472_s29] sm:$0xff]  ;;  %v770_v45 = vld [vmem:[%s22202_s4 + $0x1a8] sm:$0xff]  ;;  %v15102_v59 = vpack.c.bf16 %v767_v31, %v765_v30 }
  0x35   : > { %15089 = vmatprep.subr.bf16.mxu1 %v15088_v55  ;;  %v15953_v46 = vld [vmem:[%s15871_s21 + $0x38] sm:$0xff]  ;;  %v15956_v47 = vld [vmem:[%s15871_s21 + $0x30] sm:$0xff]  ;;  %v616_v49 = vld [vmem:[%s22201_s3 + $0x1a0] sm:$0xff]  ;;  %2067 = vperm.xlu1 %15194, %v15947_v43   ;;  %v15040_v60 = vpack.c.bf16 %v619_v40, %v617_v39 }
  0x36   : > { %v772_v48 = vld [vmem:[%s22202_s4 + $0x1b8] sm:$0xff]  ;;  %v618_v50 = vld [vmem:[%s22201_s3 + $0x1b0] sm:$0xff]  ;;  %v1696_v51 = vcombine.low %v15956_v47, %v15953_v46  ;;  %v1697_v52 = vcombine.high %v15956_v47, %v15953_v46  ;;  %v769_v54 = vld [vmem:[%s22202_s4 + $0x1a0] sm:$0xff]  ;;  %1402 = vperm.xlu0 %15193, %v15947_v43  }
  0x37   : > { %15027 = vmatpush1.bf16.msra.mxu0 %v15026_v61  ;;  %v771_v55 = vld [vmem:[%s22202_s4 + $0x1b0] sm:$0xff]  ;;  %v621_v56 = vld [vmem:[%s22201_s3 + $0x1c8] sm:$0xff]  ;;  %v623_v57 = vld [vmem:[%s22201_s3 + $0x1d8] sm:$0xff]  ;;  %v15042_v2 = vpack.c.bf16 %v618_v50, %v616_v49 }
  0x38   : > { %15091 = vmatpush1.bf16.msra.mxu1 %v15090_v62  ;;  %15029 = vmatprep.subr.bf16.mxu0 %v15028_v63  ;;  %v871_v58 = vld [vmem:[%s22472_s29 + $0x8] sm:$0xff]  ;;  %v15104_v62 = vpack.c.bf16 %v772_v48, %v770_v45  ;;  %v776_v63 = vld [vmem:[%s22202_s4 + $0x1d8] sm:$0xff]  ;;  %v620_v0 = vld [vmem:[%s22201_s3 + $0x1c0] sm:$0xff]  ;;  %v15106_v7 = vpack.c.bf16 %v771_v55, %v769_v54  ;;  %v15044_v8 = vpack.c.bf16 %v623_v57, %v621_v56 }
  0x39   : > { %15093 = vmatprep.subr.bf16.mxu1 %v15092_v3  ;;  %v774_v61 = vld [vmem:[%s22202_s4 + $0x1c8] sm:$0xff]  ;;  %v622_v1 = vld [vmem:[%s22201_s3 + $0x1d0] sm:$0xff]  ;;  %2071 = vperm.xlu1 %15194, %v871_v58   ;;  %v773_v3 = vld [vmem:[%s22202_s4 + $0x1c0] sm:$0xff] }
  0x3a   : > { %v775_v4 = vld [vmem:[%s22202_s4 + $0x1d0] sm:$0xff]  ;;  %v625_v5 = vld [vmem:[%s22201_s3 + $0x1e8] sm:$0xff]  ;;  %v627_v6 = vld [vmem:[%s22201_s3 + $0x1f8] sm:$0xff]  ;;  %1407 = vperm.xlu0 %15193, %v871_v58  }
  0x3b   : > { %15031 = vmatpush1.bf16.msra.mxu0 %v15030_v10  ;;  %v778_v9 = vld [vmem:[%s22202_s4 + $0x1e8] sm:$0xff]  ;;  %v15108_v10 = vpack.c.bf16 %v776_v63, %v774_v61  ;;  %v780_v11 = vld [vmem:[%s22202_s4 + $0x1f8] sm:$0xff]  ;;  %v624_v12 = vld [vmem:[%s22201_s3 + $0x1e0] sm:$0xff]  ;;  %v15110_v17 = vpack.c.bf16 %v775_v4, %v773_v3  ;;  %v15048_v18 = vpack.c.bf16 %v627_v6, %v625_v5 }
  0x3c   : > { %15095 = vmatpush1.bf16.msra.mxu1 %v15094_v15  ;;  %15033 = vmatprep.subr.bf16.mxu0 %v15032_v16  ;;  %v15046_v15 = vpack.c.bf16 %v622_v1, %v620_v0  ;;  %v626_v16 = vld [vmem:[%s22201_s3 + $0x1f0] sm:$0xff]  ;;  %v15112_v20 = vpack.c.bf16 %v780_v11, %v778_v9  ;;  %v5378_v26 = vld [vmem:[%s22206_s8] sm:$0xff]  ;;  %v5379_v30 = vld [vmem:[%s22206_s8 + $0x8] sm:$0xff] }
  0x3d   : > { %15097 = vmatprep.subr.bf16.mxu1 %v15096_v19  ;;  %15196 = vset.pattern.permute.xlu1 %v15481_v14  ;;  %v777_v19 = vld [vmem:[%s22202_s4 + $0x1e0] sm:$0xff]  ;;  %v779_v21 = vld [vmem:[%s22202_s4 + $0x1f0] sm:$0xff]  ;;  %v3123_v31 = vld [vmem:[%s22200_s2 + $0x8] sm:$0xff] }
  0x3e   : > { %2863 = vperm.xlu1 %15196, %v871_v58   ;;  %v15114_v25 = vpack.c.bf16 %v779_v21, %v777_v19  ;;  %15195 = vset.pattern.permute.xlu0 %v15481_v14  ;;  %v15208_v39 = vld [vmem:[%s22204_s6] sm:$0xff]   ;;  %v5381_v40 = vld [vmem:[%s22206_s8 + $0x18] sm:$0xff]  ;;  %v15210_v45 = vld [vmem:[%s22204_s6 + $0x8] sm:$0xff]  }
  0x3f   : > { %15035 = vmatpush1.bf16.msra.mxu0 %v15034_v23  ;;  %v3122_v23 = vld [vmem:[%s22200_s2] sm:$0xff]  ;;  %2859 = vperm.xlu0 %15195, %v15947_v43   ;;  %v5380_v43 = vld [vmem:[%s22206_s8 + $0x10] sm:$0xff]  ;;  %v15213_v50 = vld [vmem:[%s22203_s5 + $0x18] sm:$0xff]  }
  0x40   : > { %15099 = vmatpush1.bf16.msra.mxu1 %v15098_v24  ;;  %15037 = vmatprep.subr.bf16.mxu0 %v15036_v38  ;;  %v15050_v24 = vpack.c.bf16 %v626_v16, %v624_v12  ;;  %v15207_v38 = vld [vmem:[%s22203_s5] sm:$0xff]   ;;  %v15211_v48 = vld [vmem:[%s22203_s5 + $0x10] sm:$0xff]   ;;  %v15217_v56 = vld [vmem:[%s22203_s5 + $0x28] sm:$0xff]  }
  0x41   : > { %15101 = vmatprep.subr.bf16.mxu1 %v15100_v44  ;;  %v15209_v44 = vld [vmem:[%s22203_s5 + $0x8] sm:$0xff]   ;;  %v15212_v49 = vld [vmem:[%s22204_s6 + $0x10] sm:$0xff]   ;;  %v15215_v54 = vld [vmem:[%s22203_s5 + $0x20] sm:$0xff]  }
  0x42   : > { %15197 = vset.pattern.permute.xlu1 %v15480_v13  ;;  %v15216_v55 = vld [vmem:[%s22204_s6 + $0x20] sm:$0xff]   ;;  %v15218_v57 = vld [vmem:[%s22204_s6 + $0x28] sm:$0xff]   ;;  %v15219_v58 = vld [vmem:[%s22203_s5 + $0x30] sm:$0xff]  }
  0x43   : > { %15039 = vmatpush1.bf16.msra.mxu0 %v15038_v53  ;;  %3126 = vperm.xlu1 %15197, %v3122_v23   ;;  %v15214_v53 = vld [vmem:[%s22204_s6 + $0x18] sm:$0xff]   ;;  %v15224_v63 = vld [vmem:[%s22204_s6 + $0x40] sm:$0xff]   ;;  %v15225_v0 = vld [vmem:[%s22203_s5 + $0x48] sm:$0xff]  }
  0x44   : > { %15103 = vmatpush1.bf16.msra.mxu1 %v15102_v59  ;;  %15041 = vmatprep.subr.bf16.mxu0 %v15040_v60  ;;  %v15220_v59 = vld [vmem:[%s22204_s6 + $0x30] sm:$0xff]   ;;  %v15221_v60 = vld [vmem:[%s22203_s5 + $0x38] sm:$0xff]   ;;  %v15226_v1 = vld [vmem:[%s22204_s6 + $0x48] sm:$0xff]  }
  0x45   : > { %15105 = vmatprep.subr.bf16.mxu1 %v15104_v62  ;;  %15198 = vset.pattern.permute.xlu0 %v15480_v13  ;;  %v15222_v61 = vld [vmem:[%s22204_s6 + $0x38] sm:$0xff]   ;;  %v15223_v62 = vld [vmem:[%s22203_s5 + $0x40] sm:$0xff]   ;;  %v15228_v3 = vld [vmem:[%s22204_s6 + $0x50] sm:$0xff]  }
  0x46   : > { %3131 = vperm.xlu0 %15198, %v3123_v31   ;;  %v15229_v4 = vld [vmem:[%s22203_s5 + $0x58] sm:$0xff]   ;;  %v15231_v6 = vld [vmem:[%s22203_s5 + $0x60] sm:$0xff]   ;;  %v15234_v9 = vld [vmem:[%s22204_s6 + $0x68] sm:$0xff]  }
  0x47   : > { %15043 = vmatpush1.bf16.msra.mxu0 %v15042_v2  ;;  %5384 = vperm.xlu1 %15197, %v5378_v26   ;;  %v15227_v2 = vld [vmem:[%s22203_s5 + $0x50] sm:$0xff]   ;;  %v15230_v5 = vld [vmem:[%s22204_s6 + $0x58] sm:$0xff]  }
  0x48   : > { %15107 = vmatpush1.bf16.msra.mxu1 %v15106_v7  ;;  %15045 = vmatprep.subr.bf16.mxu0 %v15044_v8  ;;  %v15232_v7 = vld [vmem:[%s22204_s6 + $0x60] sm:$0xff]   ;;  %v15233_v8 = vld [vmem:[%s22203_s5 + $0x68] sm:$0xff]   ;;  %v15236_v11 = vld [vmem:[%s22204_s6 + $0x70] sm:$0xff]  }
  0x49   : > { %15109 = vmatprep.subr.bf16.mxu1 %v15108_v10  ;;  %v15235_v10 = vld [vmem:[%s22203_s5 + $0x70] sm:$0xff]   ;;  %v15237_v12 = vld [vmem:[%s22203_s5 + $0x78] sm:$0xff]  }
  0x4a   : > { %5394 = vperm.xlu0 %15198, %v5380_v43   ;;  %v15238_v14 = vld [vmem:[%s22204_s6 + $0x78] sm:$0xff]  }
  0x4b   : > { %15047 = vmatpush1.bf16.msra.mxu0 %v15046_v15  ;;  %5389 = vperm.xlu1 %15197, %v5379_v30   ;;  %v15482_v15 = vmov 1966171168  }
  0x4c   : > { %15111 = vmatpush1.bf16.msra.mxu1 %v15110_v17  ;;  %15049 = vmatprep.subr.bf16.mxu0 %v15048_v18  ;;  %v883_v16 = vunpack.c.l.s4 %v15482_v15  ;;  %v885_v17 = vlaneseq }
  0x4d   : > { %15113 = vmatprep.subr.bf16.mxu1 %v15112_v20 }
  0x4e   : > { %v884_v18 = vunpack.c.0.s8 %v883_v16  ;;  %v886_v19 = vshrl.u32 %v885_v17, 7 }
  0x4f   : > { %15051 = vmatpush1.bf16.msra.mxu0 %v15050_v24  ;;  %5399 = vperm.xlu1 %15197, %v5381_v40  }
  0x50   : > { %15115 = vmatpush1.bf16.msra.mxu1 %v15114_v25  ;;  %3582 = vmatprep.subr.bf16.mxu0 %v15480_v13  ;;  %v16193_v20 = vsub.s32 %v884_v18, %v886_v19 }
  0x51   : > { %3999 = vmatprep.subr.bf16.mxu1 %v15480_v13 }
  0x52   : > { %693 = vmatmul.mubr.f32.vlgmr.msra.gmra.mrb[0].mxu0 %v15906_v27  ;;  %v1561_v21 = vrot.slane %v1547_v33, %v16193_v20  ;;  %v1604_v23 = vrot.slane %v1596_v34, %v16193_v20  ;;  %v1611_v25 = vrot.slane %v1597_v35, %v16193_v20  ;;  %v1654_v22 = vrot.slane %v1646_v41, %v16193_v20 }
  0x53   : > { %846 = vmatmul.mubr.f32.vlgmr.msra.gmra.mrb[0].mxu1 %v15906_v27  ;;  %698 = vmatprep.mubr.f32.mxu0 %v15909_v28  ;;  %v1661_v27 = vrot.slane %v1647_v42, %v16193_v20  ;;  %v16221_v33 = vsub.s32 0, %v886_v19 }
  0x54   : > { %851 = vmatprep.mubr.f32.mxu1 %v15909_v28  ;;  %4000 = vmatpush1.bf16.msra.mxu1 %v15208_v39  ;;  %v1563_v26 = vcombine.high %v1561_v21, %v1561_v21  ;;  %v1612_v34 = vcombine.high %v1604_v23, %v1604_v23  ;;  %v1704_v28 = vrot.slane %v1696_v51, %v16193_v20 }
  0x55   : > { %3583 = vmatpush1.bf16.msra.mxu0 %v15207_v38  ;;  %4001 = vmatprep.subr.bf16.mxu1 %v15480_v13  ;;  %v1613_v35 = vcombine.high %v1611_v25, %v1611_v25  ;;  %v16229_v31 = vrot.slane %v1604_v23, %v16193_v20  ;;  %v16237_v42 = vrot.slane %v1611_v25, %v16193_v20  ;;  %v16239_v38 = vsub.s32 1, %v886_v19 }
  0x56   : > { %699 = vmatmul.mubr.f32.gmra.mrb[2].mxu0 %v15912_v29  ;;  %3584 = vmatprep.subr.bf16.mxu0 %v15480_v13  ;;  %v1662_v39 = vcombine.high %v1654_v22, %v1654_v22  ;;  %v1663_v40 = vcombine.high %v1661_v27, %v1661_v27  ;;  %v16242_v43 = vrot.slane %v1654_v22, %v16193_v20 }
  0x57   : > { %852 = vmatmul.mubr.f32.gmra.mrb[2].mxu1 %v15912_v29  ;;  %704 = vmatprep.mubr.f32.mxu0 %v15929_v36 }
  0x58   : > { %857 = vmatprep.mubr.f32.mxu1 %v15929_v36  ;;  %4002 = vmatpush1.bf16.msra.mxu1 %v15210_v45  ;;  %v1711_v36 = vrot.slane %v1697_v52, %v16193_v20  ;;  %22473 = vst [vmem:[#allocation3_spill] sm:$0xff] %v16242_v43  ;;  %v16251_v52 = vrot.slane %v1704_v28, %v16193_v20 }
  0x59   : > { %3585 = vmatpush1.bf16.msra.mxu0 %v15209_v44  ;;  %4003 = vmatprep.subr.bf16.mxu1 %v15480_v13 }
  0x5a   : > { %705 = vmatmul.mubr.f32.gmra.mrb[4].mxu0 %v15932_v37  ;;  %3586 = vmatprep.subr.bf16.mxu0 %v15480_v13  ;;  %22476 = vst [vmem:[#allocation6_spill] sm:$0xff] %v16251_v52 }
  0x5b   : > { %858 = vmatmul.mubr.f32.gmra.mrb[4].mxu1 %v15932_v37  ;;  %710 = vmatprep.mubr.f32.mxu0 %v15953_v46  ;;  %v1591_v37 = vrot.slane %v1563_v26, %v16193_v20 }
  0x5c   : > { %863 = vmatprep.mubr.f32.mxu1 %v15953_v46  ;;  %4004 = vmatpush1.bf16.msra.mxu1 %v15212_v49  ;;  %v16248_v46 = vrot.slane %v1661_v27, %v16193_v20  ;;  %v16257_v49 = vrot.slane %v1613_v35, %v16193_v20 }
  0x5d   : > { %3587 = vmatpush1.bf16.msra.mxu0 %v15211_v48  ;;  %4005 = vmatprep.subr.bf16.mxu1 %v15480_v13  ;;  %v16254_v48 = vrot.slane %v1612_v34, %v16193_v20  ;;  %v1595_v19 = vcombine.high %v1591_v37, %v1591_v37  ;;  %v1789_v22 = vrot.slane %v1591_v37, %v16221_v33 }
  0x5e   : > { %711 = vmatmul.mubr.f32.gmra.mrb[6].mxu0 %v15956_v47  ;;  %3588 = vmatprep.subr.bf16.mxu0 %v15480_v13  ;;  %22475 = vst [vmem:[#allocation5_spill] sm:$0xff] %v16248_v46 }
  0x5f   : > { %864 = vmatmul.mubr.f32.gmra.mrb[6].mxu1 %v15956_v47  ;;  %v1712_v47 = vcombine.high %v1704_v28, %v1704_v28 }
  0x60   : > { %4006 = vmatpush1.bf16.msra.mxu1 %v15214_v53  ;;  %v16260_v53 = vrot.slane %v1711_v36, %v16193_v20 }
  0x61   : > { %3589 = vmatpush1.bf16.msra.mxu0 %v15213_v50  ;;  %4007 = vmatprep.subr.bf16.mxu1 %v15480_v13  ;;  %v1713_v50 = vcombine.high %v1711_v36, %v1711_v36 }
  0x62   : > { %3590 = vmatprep.subr.bf16.mxu0 %v15480_v13  ;;  %22477 = vst [vmem:[#allocation7_spill] sm:$0xff] %v16260_v53 }
  0x64   : > { %4008 = vmatpush1.bf16.msra.mxu1 %v15216_v55  ;;  %v16268_v55 = vcombine.high %v16237_v42, %v16237_v42 }
  0x65   : > { %3591 = vmatpush1.bf16.msra.mxu0 %v15215_v54  ;;  %4009 = vmatprep.subr.bf16.mxu1 %v15480_v13  ;;  %v16264_v54 = vcombine.high %v16229_v31, %v16229_v31 }
  0x66   : > { %3592 = vmatprep.subr.bf16.mxu0 %v15480_v13 }
  0x68   : > { %4010 = vmatpush1.bf16.msra.mxu1 %v15218_v57 }
  0x69   : > { %3593 = vmatpush1.bf16.msra.mxu0 %v15217_v56  ;;  %4011 = vmatprep.subr.bf16.mxu1 %v15480_v13 }
  0x6a   : > { %3594 = vmatprep.subr.bf16.mxu0 %v15480_v13 }
  0x6c   : > { %4012 = vmatpush1.bf16.msra.mxu1 %v15220_v59  ;;  %v16275_v59 = vrot.slane %v1663_v40, %v16193_v20 }
  0x6d   : > { %3595 = vmatpush1.bf16.msra.mxu0 %v15219_v58  ;;  %4013 = vmatprep.subr.bf16.mxu1 %v15480_v13  ;;  %v16272_v58 = vrot.slane %v1662_v39, %v16193_v20 }
  0x6e   : > { %3596 = vmatprep.subr.bf16.mxu0 %v15480_v13  ;;  %22479 = vst [vmem:[#allocation9_spill] sm:$0xff] %v16275_v59  ;;  %v1853_v59 = vrot.slane %v16257_v49, %v16221_v33 }
  0x6f   : > { %22478 = vst [vmem:[#allocation8_spill] sm:$0xff] %v16272_v58 }
  0x70   : > { %4014 = vmatpush1.bf16.msra.mxu1 %v15222_v61 }
  0x71   : > { %3597 = vmatpush1.bf16.msra.mxu0 %v15221_v60  ;;  %4015 = vmatprep.subr.bf16.mxu1 %v15480_v13  ;;  %v16279_v60 = vcombine.high %v16242_v43, %v16242_v43 }
  0x72   : > { %3598 = vmatprep.subr.bf16.mxu0 %v15480_v13 }
  0x73   : > { %22480 = vst [vmem:[#allocation10_spill] sm:$0xff] %v16279_v60 }
  0x74   : > { %4016 = vmatpush1.bf16.msra.mxu1 %v15224_v63  ;;  %v16287_v63 = vrot.slane %v1712_v47, %v16193_v20 }
  0x75   : > { %3599 = vmatpush1.bf16.msra.mxu0 %v15223_v62  ;;  %4017 = vmatprep.subr.bf16.mxu1 %v15480_v13  ;;  %v16284_v62 = vcombine.high %v16248_v46, %v16248_v46 }
  0x76   : > { %3600 = vmatprep.subr.bf16.mxu0 %v15480_v13  ;;  %22482 = vst [vmem:[#allocation12_spill] sm:$0xff] %v16287_v63 }
  0x77   : > { %22481 = vst [vmem:[#allocation11_spill] sm:$0xff] %v16284_v62 }
  0x78   : > { %4018 = vmatpush1.bf16.msra.mxu1 %v15226_v1 }
  0x79   : > { %3601 = vmatpush1.bf16.msra.mxu0 %v15225_v0  ;;  %4019 = vmatprep.subr.bf16.mxu1 %v15480_v13  ;;  %v16291_v0 = vcombine.high %v16251_v52, %v16251_v52  ;;  %v1857_v52 = vrot.slane %v16257_v49, %v16239_v38 }
  0x7a   : > { %3602 = vmatprep.subr.bf16.mxu0 %v15480_v13 }
  0x7b   : > { %22483 = vst [vmem:[#allocation13_spill] sm:$0xff] %v16291_v0 }
  0x7c   : > { %4020 = vmatpush1.bf16.msra.mxu1 %v15228_v3  ;;  %v16299_v3 = vcombine.high %v16260_v53, %v16260_v53 }
  0x7d   : > { %3603 = vmatpush1.bf16.msra.mxu0 %v15227_v2  ;;  %4021 = vmatprep.subr.bf16.mxu1 %v15480_v13  ;;  %v16295_v2 = vrot.slane %v1713_v50, %v16193_v20 }
  0x7e   : > { %3604 = vmatprep.subr.bf16.mxu0 %v15480_v13  ;;  %22485 = vst [vmem:[#allocation15_spill] sm:$0xff] %v16299_v3 }
  0x7f   : > { %22484 = vst [vmem:[#allocation14_spill] sm:$0xff] %v16295_v2 }
  0x80   : > { %4022 = vmatpush1.bf16.msra.mxu1 %v15230_v5 }
  0x81   : > { %3605 = vmatpush1.bf16.msra.mxu0 %v15229_v4  ;;  %4023 = vmatprep.subr.bf16.mxu1 %v15480_v13 }
  0x82   : > { %3606 = vmatprep.subr.bf16.mxu0 %v15480_v13 }
  0x84   : > { %4024 = vmatpush1.bf16.msra.mxu1 %v15232_v7 }
  0x85   : > { %3607 = vmatpush1.bf16.msra.mxu0 %v15231_v6  ;;  %4025 = vmatprep.subr.bf16.mxu1 %v15480_v13 }
  0x86   : > { %3608 = vmatprep.subr.bf16.mxu0 %v15480_v13 }
  0x88   : > { %4026 = vmatpush1.bf16.msra.mxu1 %v15234_v9 }
  0x89   : > { %3609 = vmatpush1.bf16.msra.mxu0 %v15233_v8  ;;  %4027 = vmatprep.subr.bf16.mxu1 %v15480_v13 }
  0x8a   : > { %3610 = vmatprep.subr.bf16.mxu0 %v15480_v13 }
  0x8c   : > { %4028 = vmatpush1.bf16.msra.mxu1 %v15236_v11 }
  0x8d   : > { %3611 = vmatpush1.bf16.msra.mxu0 %v15235_v10  ;;  %4029 = vmatprep.subr.bf16.mxu1 %v15480_v13 }
  0x8e   : > { %3612 = vmatprep.subr.bf16.mxu0 %v15480_v13  ;;  %v1554_v13 = vrot.slane %v1546_v32, %v16193_v20  ;;  %v1577_v32 = vrot.slane %v1561_v21, %v16193_v20 }
  0x90   : > { %4030 = vmatpush1.bf16.msra.mxu1 %v15238_v14  ;;  %v1562_v24 = vcombine.high %v1554_v13, %v1554_v13  ;;  %v1570_v30 = vrot.slane %v1554_v13, %v16193_v20  ;;  %v1593_v51 = vcombine.high %v1577_v32, %v1577_v32  ;;  %v1785_v18 = vrot.slane %v1577_v32, %v16239_v38 }
  0x91   : > { %3613 = vmatpush1.bf16.msra.mxu0 %v15237_v12  ;;  %v1781_v23 = vrot.slane %v1577_v32, %v16221_v33 }
  0x92   : > { %v1584_v29 = vrot.slane %v1562_v24, %v16193_v20  ;;  %v1592_v41 = vcombine.high %v1570_v30, %v1570_v30  ;;  %v1749_v45 = vrot.slane %v1570_v30, %v16221_v33  ;;  %v1753_v56 = vrot.slane %v1570_v30, %v16239_v38 }
  0x93   : > { %v1793_v24 = vrot.slane %v1591_v37, %v16239_v38  ;;  %v1801_v28 = vrot.slane %v1593_v51, %v16239_v38  ;;  %v1797_v36 = vrot.slane %v1593_v51, %v16221_v33  ;;  %v1809_v37 = vrot.slane %v1595_v19, %v16239_v38 }
  0x94   : > { %v1594_v57 = vcombine.high %v1584_v29, %v1584_v29  ;;  %v1761_v61 = vrot.slane %v1584_v29, %v16239_v38  ;;  %v1757_v1 = vrot.slane %v1584_v29, %v16221_v33  ;;  %v1769_v6 = vrot.slane %v1592_v41, %v16239_v38 }
  0x95   : > { %v1765_v9 = vrot.slane %v1592_v41, %v16221_v33 }
  0x96   : > { %v1777_v10 = vrot.slane %v1594_v57, %v16239_v38  ;;  %v1773_v15 = vrot.slane %v1594_v57, %v16221_v33 }
  0xb4   : > { %v16244_v44 = vpop.permute.xlu1 %2067 }
  0xb5   : > { %22474 = vst [vmem:[#allocation4_spill] sm:$0xff] %v16244_v44  ;;  %v16304_v5 = vmul.f32 %v16244_v44, %v1749_v45  ;;  %v16311_v8 = vmul.f32 %v16244_v44, %v1753_v56  ;;  %v16319_v12 = vmul.f32 %v16244_v44, %v1761_v61  ;;  %v16326_v16 = vmul.f32 %v16244_v44, %v1757_v1 }
  0xb6   : > { %v16333_v13 = vmul.f32 %v16244_v44, %v1769_v6  ;;  %v16341_v25 = vmul.f32 %v16244_v44, %v1765_v9  ;;  %v16347_v30 = vmul.f32 %v16244_v44, %v1777_v10  ;;  %v16354_v34 = vmul.f32 %v16244_v44, %v1773_v15 }
  0xb7   : > { %v16361_v29 = vmul.f32 %v16244_v44, %v1785_v18  ;;  %v16369_v41 = vmul.f32 %v16244_v44, %v1781_v23  ;;  %v16375_v40 = vmul.f32 %v16244_v44, %v1793_v24  ;;  %v16382_v50 = vmul.f32 %v16244_v44, %v1789_v22 }
  0xb8   : > { %v16301_v4 = vpop.permute.xlu1 %2071  ;;  %v16390_v57 = vmul.f32 %v16244_v44, %v1801_v28 }
  0xb9   : > { %22486 = vst [vmem:[#allocation16_spill] sm:$0xff] %v16301_v4  ;;  %v16308_v7 = vmul.f32 %v16301_v4, %v1749_v45  ;;  %v16316_v11 = vmul.f32 %v16301_v4, %v1753_v56  ;;  %v16322_v14 = vmul.f32 %v16301_v4, %v1761_v61  ;;  %v16329_v17 = vmul.f32 %v16301_v4, %v1757_v1 }
  0xba   : > { %v16336_v21 = vmul.f32 %v16301_v4, %v1769_v6  ;;  %v16344_v26 = vmul.f32 %v16301_v4, %v1765_v9  ;;  %v16351_v27 = vmul.f32 %v16301_v4, %v1777_v10  ;;  %v16357_v32 = vmul.f32 %v16301_v4, %v1773_v15  ;;  %22487 = vst [vmem:[#allocation17_spill] sm:$0xff] %v16375_v40 }
  0xbb   : > { %v16364_v35 = vmul.f32 %v16301_v4, %v1785_v18  ;;  %v16372_v39 = vmul.f32 %v16301_v4, %v1781_v23  ;;  %v1805_v45 = vrot.slane %v1595_v19, %v16221_v33  ;;  %v16379_v47 = vmul.f32 %v16301_v4, %v1793_v24  ;;  %22489 = vst [vmem:[#allocation19_spill] sm:$0xff] %v16382_v50 }
  0xbc   : > { %v16385_v51 = vmul.f32 %v16301_v4, %v1789_v22  ;;  %v1817_v56 = vrot.slane %v16229_v31, %v16239_v38  ;;  %22491 = vst [vmem:[#allocation21_spill] sm:$0xff] %v16390_v57  ;;  %v16393_v61 = vmul.f32 %v16301_v4, %v1801_v28  ;;  %v1813_v1 = vrot.slane %v16229_v31, %v16221_v33 }
  0xbd   : > { %22488 = vst [vmem:[#allocation18_spill] sm:$0xff] %v16379_v47  ;;  %v1644_v6 = vcombine.high %v16254_v48, %v16254_v48  ;;  %v16400_v9 = vmul.f32 %v16244_v44, %v1797_v36  ;;  %v16403_v10 = vmul.f32 %v16301_v4, %v1797_v36  ;;  %v16406_v15 = vmul.f32 %v16244_v44, %v1809_v37 }
  0xbe   : > { %22490 = vst [vmem:[#allocation20_spill] sm:$0xff] %v16385_v51  ;;  %22492 = vst [vmem:[#allocation22_spill] sm:$0xff] %v16393_v61  ;;  %v1825_v18 = vrot.slane %v16254_v48, %v16239_v38  ;;  %v16411_v19 = vmul.f32 %v16301_v4, %v1809_v37  ;;  %v16414_v31 = vmul.f32 %v16244_v44, %v1805_v45 }
  0xbf   : > { %22493 = vst [vmem:[#allocation23_spill] sm:$0xff] %v16400_v9  ;;  %22494 = vst [vmem:[#allocation24_spill] sm:$0xff] %v16403_v10  ;;  %v1821_v23 = vrot.slane %v16254_v48, %v16221_v33  ;;  %v1833_v24 = vrot.slane %v16264_v54, %v16239_v38  ;;  %v16421_v22 = vmul.f32 %v16301_v4, %v1805_v45 }
  0xc0   : > { %22495 = vst [vmem:[#allocation25_spill] sm:$0xff] %v16406_v15  ;;  %22496 = vst [vmem:[#allocation26_spill] sm:$0xff] %v16411_v19  ;;  %v16424_v28 = vmul.f32 %v16244_v44, %v1817_v56  ;;  %v16427_v36 = vmul.f32 %v16301_v4, %v1817_v56  ;;  %v1829_v37 = vrot.slane %v16264_v54, %v16221_v33 }
  0xc1   : > { %22497 = vst [vmem:[#allocation27_spill] sm:$0xff] %v16414_v31  ;;  %22498 = vst [vmem:[#allocation28_spill] sm:$0xff] %v16421_v22  ;;  %v16432_v3 = vmul.f32 %v16244_v44, %v1813_v1  ;;  %v16435_v48 = vmul.f32 %v16301_v4, %v1813_v1  ;;  %v1841_v2 = vrot.slane %v1644_v6, %v16239_v38  ;;  %v16593_v31 = vpop.permute.xlu1 %2863 }
  0xc2   : > { %22499 = vst [vmem:[#allocation29_spill] sm:$0xff] %v16424_v28  ;;  %22500 = vst [vmem:[#allocation30_spill] sm:$0xff] %v16427_v36  ;;  %v1837_v45 = vrot.slane %v1644_v6, %v16221_v33  ;;  %v16440_v53 = vmul.f32 %v16244_v44, %v1825_v18  ;;  %v16443_v0 = vmul.f32 %v16301_v4, %v1825_v18 }
  0xc3   : > { %22501 = vst [vmem:[#allocation31_spill] sm:$0xff] %v16432_v3  ;;  %22502 = vst [vmem:[#allocation32_spill] sm:$0xff] %v16435_v48  ;;  %v1849_v56 = vrot.slane %v16237_v42, %v16239_v38  ;;  %v1845_v54 = vrot.slane %v16237_v42, %v16221_v33  ;;  %v16450_v63 = vmul.f32 %v16244_v44, %v1821_v23 }
  0xc4   : > { %22503 = vst [vmem:[#allocation33_spill] sm:$0xff] %v16440_v53  ;;  %22504 = vst [vmem:[#allocation34_spill] sm:$0xff] %v16443_v0  ;;  %v16453_v1 = vmul.f32 %v16301_v4, %v1821_v23  ;;  %v16456_v6 = vmul.f32 %v16244_v44, %v1833_v24  ;;  %v16461_v18 = vmul.f32 %v16301_v4, %v1833_v24 }
  0xc5   : > { %22505 = vst [vmem:[#allocation35_spill] sm:$0xff] %v16450_v63  ;;  %v16464_v62 = vmul.f32 %v16244_v44, %v1829_v37  ;;  %v16467_v42 = vmul.f32 %v16301_v4, %v1829_v37  ;;  %v16472_v23 = vmul.f32 %v16244_v44, %v1841_v2  ;;  %v16475_v46 = vmul.f32 %v16301_v4, %v1841_v2 }
  0xc6   : > { %22506 = vst [vmem:[#allocation36_spill] sm:$0xff] %v16453_v1  ;;  %22507 = vst [vmem:[#allocation37_spill] sm:$0xff] %v16456_v6  ;;  %v16478_v60 = vmul.f32 %v16244_v44, %v1837_v45  ;;  %v1865_v24 = vrot.slane %v16268_v55, %v16239_v38  ;;  %v16483_v43 = vmul.f32 %v16301_v4, %v1837_v45  ;;  %v16518_v6 = vpop.permute.xlu0 %1402 }
  0xc7   : > { %22508 = vst [vmem:[#allocation38_spill] sm:$0xff] %v16461_v18  ;;  %22509 = vst [vmem:[#allocation39_spill] sm:$0xff] %v16464_v62  ;;  %v16486_v37 = vmul.f32 %v16244_v44, %v1849_v56  ;;  %v16498_v62 = vmul.f32 %v16244_v44, %v1857_v52  ;;  %v1861_v45 = vrot.slane %v16268_v55, %v16221_v33 }
  0xc8   : > { %22510 = vst [vmem:[#allocation40_spill] sm:$0xff] %v16467_v42  ;;  %22511 = vst [vmem:[#allocation41_spill] sm:$0xff] %v16472_v23  ;;  %v16489_v42 = vmul.f32 %v16301_v4, %v1849_v56  ;;  %v16492_v23 = vmul.f32 %v16244_v44, %v1845_v54  ;;  %v16510_v18 = vmul.f32 %v16244_v44, %v1853_v59 }
  0xc9   : > { %22512 = vst [vmem:[#allocation42_spill] sm:$0xff] %v16475_v46  ;;  %22513 = vst [vmem:[#allocation43_spill] sm:$0xff] %v16478_v60  ;;  %v16495_v60 = vmul.f32 %v16301_v4, %v1845_v54  ;;  %v16516_v55 = vmul.f32 %v16244_v44, %v1865_v24 }
  0xca   : > { %22514 = vst [vmem:[#allocation44_spill] sm:$0xff] %v16483_v43  ;;  %22515 = vst [vmem:[#allocation45_spill] sm:$0xff] %v16486_v37  ;;  %v16504_v37 = vcombine.high %v16257_v49, %v16257_v49  ;;  %v16567_v63 = vpop.permute.xlu0 %1407 }
  0xcb   : > { %22516 = vst [vmem:[#allocation46_spill] sm:$0xff] %v16489_v42  ;;  %22517 = vst [vmem:[#allocation47_spill] sm:$0xff] %v16492_v23  ;;  %v16507_v23 = vmul.f32 %v16301_v4, %v1857_v52  ;;  %v16523_v52 = vmul.f32 %v16301_v4, %v1865_v24 }
  0xcc   : > { %22518 = vst [vmem:[#allocation48_spill] sm:$0xff] %v16495_v60  ;;  %22519 = vst [vmem:[#allocation49_spill] sm:$0xff] %v16498_v62  ;;  %v16513_v62 = vmul.f32 %v16301_v4, %v1853_v59 }
  0xcd   : > { %22520 = vst [vmem:[#allocation50_spill] sm:$0xff] %v16504_v37  ;;  %22521 = vst [vmem:[#allocation51_spill] sm:$0xff] %v16507_v23 }
  0xce   : > { %22522 = vst [vmem:[#allocation52_spill] sm:$0xff] %v16510_v18  ;;  %22523 = vst [vmem:[#allocation53_spill] sm:$0xff] %v16513_v62  ;;  %v16526_v18 = vmul.f32 %v16244_v44, %v1861_v45 }
  0xcf   : > { %22524 = vst [vmem:[#allocation54_spill] sm:$0xff] %v16516_v55  ;;  %22525 = vst [vmem:[#allocation55_spill] sm:$0xff] %v16523_v52  ;;  %v16531_v55 = vmul.f32 %v16301_v4, %v1861_v45 }
  0xd0   : > { %22526 = vst [vmem:[#allocation56_spill] sm:$0xff] %v16526_v18 }
  0xd1   : > { %22527 = vst [vmem:[#allocation57_spill] sm:$0xff] %v16531_v55 }
 0x125   : > { %v694_v58 = vpop.f32.mrb[0].mxu0 }
 0x126   : > { %v847_v2 = vpop.f32.mrb[0].mxu1  ;;  %v696_v46 = vpop.f32.mrb[1].mxu0 }
 0x127   : > { %v880_v56 = vcombine.low %v694_v58, %v696_v46  ;;  %v881_v42 = vcombine.high %v694_v58, %v696_v46  ;;  %v849_v43 = vpop.f32.mrb[1].mxu1 }
 0x128   : > { %v2338_v54 = vcombine.low %v847_v2, %v849_v43  ;;  %v2339_v60 = vcombine.high %v847_v2, %v849_v43 }
 0x129   : > { %v888_v49 = vrot.slane %v880_v56, %v16193_v20  ;;  %v895_v46 = vrot.slane %v881_v42, %v16193_v20  ;;  %v700_v58 = vpop.f32.mrb[2].mxu0  ;;  %v16535_v56 = vrot.slane %v16504_v37, %v16239_v38 }
 0x12a   : > { %v2346_v43 = vrot.slane %v2338_v54, %v16193_v20  ;;  %v2353_v59 = vrot.slane %v2339_v60, %v16193_v20  ;;  %v853_v2 = vpop.f32.mrb[2].mxu1  ;;  %v702_v62 = vpop.f32.mrb[3].mxu0 }
 0x12b   : > { %22528 = vst [vmem:[#allocation58_spill] sm:$0xff] %v16535_v56  ;;  %v896_v42 = vcombine.high %v888_v49, %v888_v49  ;;  %v897_v23 = vcombine.high %v895_v46, %v895_v46  ;;  %v904_v24 = vrot.slane %v888_v49, %v16193_v20  ;;  %v911_v44 = vrot.slane %v895_v46, %v16193_v20  ;;  %v855_v18 = vpop.f32.mrb[3].mxu1 }
 0x12c   : > { %v2354_v52 = vcombine.high %v2346_v43, %v2346_v43  ;;  %v2355_v54 = vcombine.high %v2353_v59, %v2353_v59  ;;  %v16540_v60 = vrot.slane %v2346_v43, %v16193_v20  ;;  %v16543_v1 = vrot.slane %v2353_v59, %v16193_v20 }
 0x12d   : > { %v16546_v45 = vrot.slane %v896_v42, %v16193_v20  ;;  %v16549_v37 = vrot.slane %v897_v23, %v16193_v20  ;;  %v16551_v4 = vcombine.high %v904_v24, %v904_v24  ;;  %v16553_v49 = vcombine.high %v911_v44, %v911_v44  ;;  %v706_v46 = vpop.f32.mrb[4].mxu0 }
 0x12e   : > { %v1083_v56 = vrot.slane %v904_v24, %v16221_v33  ;;  %v16557_v55 = vrot.slane %v904_v24, %v16239_v38  ;;  %v16560_v43 = vrot.slane %v911_v44, %v16221_v33  ;;  %v16563_v59 = vrot.slane %v911_v44, %v16239_v38  ;;  %v16565_v42 = vpop.f32.mrb[4].mxu1  ;;  %v708_v23 = vpop.f32.mrb[5].mxu0 }
 0x12f   : > { %22529 = vst [vmem:[#allocation59_spill] sm:$0xff] %v16553_v49  ;;  %v16571_v0 = vcombine.high %v16546_v45, %v16546_v45  ;;  %v16575_v53 = vcombine.high %v16549_v37, %v16549_v37  ;;  %v16578_v24 = vrot.slane %v2354_v52, %v16193_v20  ;;  %v16581_v48 = vrot.slane %v2355_v54, %v16193_v20  ;;  %v861_v44 = vpop.f32.mrb[5].mxu1 }
 0x130   : > { %v1410_v3 = vmul.f32 %v16518_v6, %v1083_v56  ;;  %v1412_v36 = vmul.f32 %v16567_v63, %v1083_v56  ;;  %v16587_v28 = vcombine.high %v16540_v60, %v16540_v60  ;;  %v16591_v22 = vcombine.high %v16543_v1, %v16543_v1 }
 0x131   : > { %22530 = vst [vmem:[#allocation60_spill] sm:$0xff] %v16575_v53  ;;  %22531 = vst [vmem:[#allocation61_spill] sm:$0xff] %v16581_v48  ;;  %v16597_v52 = vrot.slane %v16540_v60, %v16221_v33  ;;  %v930_v54 = vcombine.low %v700_v58, %v702_v62  ;;  %v931_v19 = vcombine.high %v700_v58, %v702_v62  ;;  %v16599_v53 = vpop.f32.mrb[6].mxu0 }
 0x132   : > { %22532 = vst [vmem:[#allocation62_spill] sm:$0xff] %v16591_v22  ;;  %v2388_v15 = vcombine.low %v853_v2, %v855_v18  ;;  %v16602_v56 = vadd.f32 %v16304_v5, %v1410_v3  ;;  %v16605_v10 = vadd.f32 %v16308_v7, %v1412_v36  ;;  %v2389_v9 = vcombine.high %v853_v2, %v855_v18  ;;  %v16607_v57 = vpop.f32.mrb[6].mxu1  ;;  %v714_v22 = vpop.f32.mrb[7].mxu0 }
 0x133   : > { %v980_v61 = vcombine.low %v706_v46, %v708_v23  ;;  %v16611_v51 = vmul.f32 %v16593_v31, %v16597_v52  ;;  %v938_v62 = vrot.slane %v930_v54, %v16193_v20  ;;  %v945_v58 = vrot.slane %v931_v19, %v16193_v20  ;;  %v16616_v3 = vpop.f32.mrb[7].mxu1 }
 0x134   : > { %v2396_v50 = vrot.slane %v2388_v15, %v16193_v20  ;;  %v2403_v5 = vrot.slane %v2389_v9, %v16193_v20  ;;  %v981_v7 = vcombine.high %v706_v46, %v708_v23  ;;  %v2438_v18 = vcombine.low %v16565_v42, %v861_v44 }
 0x135   : > { %v988_v36 = vrot.slane %v980_v61, %v16193_v20  ;;  %v946_v2 = vcombine.high %v938_v62, %v938_v62  ;;  %v947_v49 = vcombine.high %v945_v58, %v945_v58  ;;  %v954_v47 = vrot.slane %v938_v62, %v16193_v20 }
 0x136   : > { %v961_v48 = vrot.slane %v945_v58, %v16193_v20  ;;  %v2404_v54 = vcombine.high %v2396_v50, %v2396_v50  ;;  %v2405_v40 = vcombine.high %v2403_v5, %v2403_v5  ;;  %v16624_v19 = vrot.slane %v2396_v50, %v16193_v20 }
 0x137   : > { %v16627_v15 = vrot.slane %v2403_v5, %v16193_v20  ;;  %v16630_v9 = vrot.slane %v946_v2, %v16193_v20  ;;  %v16633_v61 = vrot.slane %v947_v49, %v16193_v20  ;;  %v16635_v46 = vcombine.high %v954_v47, %v954_v47 }
 0x138   : > { %v16637_v23 = vcombine.high %v961_v48, %v961_v48  ;;  %v16640_v62 = vrot.slane %v954_v47, %v16221_v33  ;;  %v16643_v58 = vrot.slane %v954_v47, %v16239_v38  ;;  %v16646_v50 = vrot.slane %v961_v48, %v16221_v33 }
 0x139   : > { %22533 = vst [vmem:[#allocation63_spill] sm:$0xff] %v16627_v15  ;;  %22534 = vst [vmem:[#allocation64_spill] sm:$0xff] %v16633_v61  ;;  %v16649_v5 = vrot.slane %v961_v48, %v16239_v38  ;;  %v16653_v49 = vcombine.high %v16630_v9, %v16630_v9  ;;  %v16657_v2 = vcombine.high %v16633_v61, %v16633_v61 }
 0x13a   : > { %22535 = vst [vmem:[#allocation65_spill] sm:$0xff] %v16635_v46  ;;  %22536 = vst [vmem:[#allocation66_spill] sm:$0xff] %v16637_v23  ;;  %v16660_v23 = vrot.slane %v2404_v54, %v16193_v20  ;;  %v16663_v47 = vrot.slane %v2405_v40, %v16193_v20  ;;  %v16671_v48 = vcombine.high %v16627_v15, %v16627_v15 }
 0x13b   : > { %22537 = vst [vmem:[#allocation67_spill] sm:$0xff] %v16646_v50  ;;  %22538 = vst [vmem:[#allocation68_spill] sm:$0xff] %v16649_v5  ;;  %v16667_v50 = vcombine.high %v16624_v19, %v16624_v19  ;;  %v995_v5 = vrot.slane %v981_v7, %v16193_v20  ;;  %v1004_v61 = vrot.slane %v988_v36, %v16193_v20 }
 0x13c   : > { %22539 = vst [vmem:[#allocation69_spill] sm:$0xff] %v16653_v49  ;;  %22540 = vst [vmem:[#allocation70_spill] sm:$0xff] %v16657_v2  ;;  %v996_v49 = vcombine.high %v988_v36, %v988_v36  ;;  %v2439_v2 = vcombine.high %v16565_v42, %v861_v44  ;;  %v2446_v54 = vrot.slane %v2438_v18, %v16193_v20 }
 0x13d   : > { %22541 = vst [vmem:[#allocation71_spill] sm:$0xff] %v16663_v47  ;;  %22542 = vst [vmem:[#allocation72_spill] sm:$0xff] %v16667_v50  ;;  %v1030_v40 = vcombine.low %v16599_v53, %v714_v22  ;;  %v997_v47 = vcombine.high %v995_v5, %v995_v5  ;;  %v1011_v46 = vrot.slane %v995_v5, %v16193_v20 }
 0x13e   : > { %22543 = vst [vmem:[#allocation73_spill] sm:$0xff] %v16671_v48  ;;  %v16680_v50 = vrot.slane %v996_v49, %v16193_v20  ;;  %v1031_v15 = vcombine.high %v16599_v53, %v714_v22  ;;  %v16683_v48 = vcombine.high %v1004_v61, %v1004_v61  ;;  %v16686_v7 = vrot.slane %v1004_v61, %v16221_v33 }
 0x13f   : > { %v16689_v36 = vrot.slane %v1004_v61, %v16239_v38  ;;  %v2453_v42 = vrot.slane %v2439_v2, %v16193_v20  ;;  %v16693_v44 = vrot.slane %v997_v47, %v16193_v20  ;;  %v16695_v18 = vcombine.high %v1011_v46, %v1011_v46 }
 0x140   : > { %22544 = vst [vmem:[#allocation74_spill] sm:$0xff] %v16683_v48  ;;  %v16699_v5 = vcombine.high %v16680_v50, %v16680_v50  ;;  %v16702_v53 = vrot.slane %v1011_v46, %v16221_v33  ;;  %v16705_v22 = vrot.slane %v1011_v46, %v16239_v38  ;;  %v2454_v49 = vcombine.high %v2446_v54, %v2446_v54 }
 0x141   : > { %22545 = vst [vmem:[#allocation75_spill] sm:$0xff] %v16693_v44  ;;  %22546 = vst [vmem:[#allocation76_spill] sm:$0xff] %v16695_v18  ;;  %v2455_v61 = vcombine.high %v2453_v42, %v2453_v42  ;;  %v16708_v48 = vrot.slane %v2446_v54, %v16193_v20  ;;  %v16712_v2 = vcombine.high %v16693_v44, %v16693_v44 }
 0x142   : > { %22547 = vst [vmem:[#allocation77_spill] sm:$0xff] %v16699_v5  ;;  %22548 = vst [vmem:[#allocation78_spill] sm:$0xff] %v16702_v53  ;;  %v16715_v47 = vrot.slane %v2453_v42, %v16193_v20  ;;  %v1038_v18 = vrot.slane %v1030_v40, %v16193_v20  ;;  %v1045_v5 = vrot.slane %v1031_v15, %v16193_v20 }
 0x143   : > { %22549 = vst [vmem:[#allocation79_spill] sm:$0xff] %v16705_v22  ;;  %22550 = vst [vmem:[#allocation80_spill] sm:$0xff] %v16712_v2  ;;  %v16720_v53 = vrot.slane %v2454_v49, %v16193_v20  ;;  %v16723_v46 = vrot.slane %v2455_v61, %v16193_v20  ;;  %v16727_v54 = vcombine.high %v16708_v48, %v16708_v48 }
 0x144   : > { %22551 = vst [vmem:[#allocation81_spill] sm:$0xff] %v16715_v47  ;;  %v2488_v2 = vcombine.low %v16607_v57, %v16616_v3  ;;  %v16733_v42 = vcombine.high %v16715_v47, %v16715_v47  ;;  %v1046_v40 = vcombine.high %v1038_v18, %v1038_v18  ;;  %v1047_v44 = vcombine.high %v1045_v5, %v1045_v5 }
 0x145   : > { %22552 = vst [vmem:[#allocation82_spill] sm:$0xff] %v16720_v53  ;;  %22553 = vst [vmem:[#allocation83_spill] sm:$0xff] %v16723_v46  ;;  %v1054_v15 = vrot.slane %v1038_v18, %v16193_v20  ;;  %v1061_v49 = vrot.slane %v1045_v5, %v16193_v20  ;;  %v2489_v61 = vcombine.high %v16607_v57, %v16616_v3  ;;  %v16753_v5 = vpop.permute.xlu0 %2859 }
 0x146   : > { %22554 = vst [vmem:[#allocation84_spill] sm:$0xff] %v16727_v54  ;;  %22555 = vst [vmem:[#allocation85_spill] sm:$0xff] %v16733_v42  ;;  %v2496_v46 = vrot.slane %v2488_v2, %v16193_v20  ;;  %v1411_v22 = vmul.f32 %v16518_v6, %v16557_v55  ;;  %v16743_v54 = vrot.slane %v1046_v40, %v16193_v20 }
 0x147   : > { %v16746_v47 = vrot.slane %v1047_v44, %v16193_v20  ;;  %v16748_v42 = vcombine.high %v1054_v15, %v1054_v15  ;;  %v16751_v18 = vrot.slane %v1054_v15, %v16221_v33  ;;  %v16755_v53 = vcombine.high %v1061_v49, %v1061_v49 }
 0x148   : > { %22556 = vst [vmem:[#allocation86_spill] sm:$0xff] %v16743_v54  ;;  %v16758_v57 = vrot.slane %v1054_v15, %v16239_v38  ;;  %v16761_v3 = vrot.slane %v1061_v49, %v16221_v33  ;;  %v16764_v2 = vrot.slane %v1061_v49, %v16239_v38  ;;  %v16768_v44 = vcombine.high %v16743_v54, %v16743_v54 }
 0x149   : > { %22557 = vst [vmem:[#allocation87_spill] sm:$0xff] %v16746_v47  ;;  %22558 = vst [vmem:[#allocation88_spill] sm:$0xff] %v16748_v42  ;;  %v16772_v40 = vcombine.high %v16746_v47, %v16746_v47  ;;  %v2503_v42 = vrot.slane %v2489_v61, %v16193_v20  ;;  %v16776_v15 = vrot.slane %v2496_v46, %v16193_v20  ;;  %v16808_v47 = vpop.permute.xlu1 %3126 }
 0x14a   : > { %22559 = vst [vmem:[#allocation89_spill] sm:$0xff] %v16751_v18  ;;  %22560 = vst [vmem:[#allocation90_spill] sm:$0xff] %v16755_v53  ;;  %v2504_v53 = vcombine.high %v2496_v46, %v2496_v46  ;;  %v2203_v49 = vadd.f32 %v16311_v8, %v1411_v22  ;;  %v2866_v61 = vmul.f32 %v16753_v5, %v16597_v52 }
 0x14b   : > { %22561 = vst [vmem:[#allocation91_spill] sm:$0xff] %v16758_v57  ;;  %22562 = vst [vmem:[#allocation92_spill] sm:$0xff] %v16761_v3  ;;  %v1413_v3 = vmul.f32 %v16567_v63, %v16557_v55  ;;  %v2505_v54 = vcombine.high %v2503_v42, %v2503_v42  ;;  %v16793_v46 = vcombine.high %v16776_v15, %v16776_v15 }
 0x14c   : > { %22563 = vst [vmem:[#allocation93_spill] sm:$0xff] %v16764_v2  ;;  %22564 = vst [vmem:[#allocation94_spill] sm:$0xff] %v16768_v44  ;;  %v2545_v2 = vrot.slane %v16540_v60, %v16239_v38  ;;  %v16784_v44 = vrot.slane %v2503_v42, %v16193_v20  ;;  %v2994_v42 = vadd.f32 %v2866_v61, %v16602_v56 }
 0x14d   : > { %22565 = vst [vmem:[#allocation95_spill] sm:$0xff] %v16772_v40  ;;  %22566 = vst [vmem:[#allocation96_spill] sm:$0xff] %v16776_v15  ;;  %v16787_v40 = vrot.slane %v2504_v53, %v16193_v20  ;;  %v2205_v55 = vadd.f32 %v16316_v11, %v1413_v3  ;;  %v16799_v22 = vrot.slane %v2505_v54, %v16193_v20 }
 0x14e   : > { %22567 = vst [vmem:[#allocation97_spill] sm:$0xff] %v16784_v44  ;;  %22569 = vst [vmem:[#allocation99_spill] sm:$0xff] %v16793_v46  ;;  %v2867_v8 = vmul.f32 %v16753_v5, %v2545_v2  ;;  %v2869_v60 = vmul.f32 %v16593_v31, %v2545_v2  ;;  %v16803_v53 = vcombine.high %v16784_v44, %v16784_v44  ;;  %v16810_v46 = vpop.permute.xlu0 %3131 }
 0x14f   : > { %22568 = vst [vmem:[#allocation98_spill] sm:$0xff] %v16787_v40  ;;  %22570 = vst [vmem:[#allocation100_spill] sm:$0xff] %v16799_v22  ;;  %v2996_v52 = vadd.f32 %v16611_v51, %v16605_v10  ;;  %v1095_v2 = vrot.slane %v16546_v45, %v16239_v38  ;;  %v2553_v20 = vrot.slane %v16578_v24, %v16239_v38 }
 0x150   : > { %22571 = vst [vmem:[#allocation101_spill] sm:$0xff] %v16803_v53  ;;  %v2995_v11 = vadd.f32 %v2867_v8, %v2203_v49  ;;  %v2997_v3 = vadd.f32 %v2869_v60, %v2205_v55  ;;  %v3134_v54 = vadd.f32 %v16808_v47, %v2994_v42  ;;  %v1091_v56 = vrot.slane %v16546_v45, %v16221_v33 }
 0x151   : > { %v3136_v53 = vadd.f32 %v16810_v46, %v2996_v52  ;;  %v2549_v51 = vrot.slane %v16578_v24, %v16221_v33  ;;  %v1415_v61 = vmul.f32 %v16518_v6, %v1095_v2  ;;  %v1417_v55 = vmul.f32 %v16567_v63, %v1095_v2 }
 0x152   : > { %v3135_v10 = vadd.f32 %v16808_v47, %v2995_v11  ;;  %v3137_v49 = vadd.f32 %v16810_v46, %v2997_v3  ;;  %v3262_v8 = vmax.f32 %v3134_v54, 0.0  ;;  %v2871_v42 = vmul.f32 %v16753_v5, %v2553_v20 }
 0x153   : > { %v3264_v60 = vmax.f32 %v3136_v53, 0.0  ;;  %v2873_v52 = vmul.f32 %v16593_v31, %v2553_v20  ;;  %v2207_v45 = vadd.f32 %v16319_v12, %v1415_v61  ;;  %v2209_v40 = vadd.f32 %v16322_v14, %v1417_v55 }
 0x154   : > { %v3263_v22 = vmax.f32 %v3135_v10, 0.0  ;;  %v3265_v44 = vmax.f32 %v3137_v49, 0.0  ;;  %v1414_v11 = vmul.f32 %v16518_v6, %v1091_v56  ;;  %v1416_v3 = vmul.f32 %v16567_v63, %v1091_v56 }
 0x155   : > { %v3390_v18 = vpack.c.bf16 %v3264_v60, %v3262_v8  ;;  %v2870_v15 = vmul.f32 %v16753_v5, %v2549_v51  ;;  %v2999_v54 = vadd.f32 %v2871_v42, %v2207_v45  ;;  %v3001_v53 = vadd.f32 %v2873_v52, %v2209_v40 }
 0x156   : > { %v3391_v2 = vpack.c.bf16 %v3265_v44, %v3263_v22  ;;  %v2872_v57 = vmul.f32 %v16593_v31, %v2549_v51  ;;  %v2206_v20 = vadd.f32 %v16326_v16, %v1414_v11  ;;  %v2208_v10 = vadd.f32 %v16329_v17, %v1416_v3 }
 0x157   : > { %v1103_v12 = vrot.slane %v16551_v4, %v16239_v38  ;;  %v2561_v14 = vrot.slane %v16587_v28, %v16239_v38  ;;  %v3139_v56 = vadd.f32 %v16808_v47, %v2999_v54  ;;  %v3141_v44 = vadd.f32 %v16810_v46, %v3001_v53 }
 0x158   : > { %3614 = vmatprep.mubr.bf16.mxu0 %v3391_v2  ;;  %4031 = vmatprep.mubr.bf16.mxu1 %v3391_v2  ;;  %v1099_v40 = vrot.slane %v16551_v4, %v16221_v33  ;;  %v2998_v16 = vadd.f32 %v2870_v15, %v2206_v20  ;;  %v3000_v22 = vadd.f32 %v2872_v57, %v2208_v10 }
 0x159   : > { %3615 = vmatmul.mubr.bf16.vlgmr.msra.gmra.mrb[8].mxu0 %v3390_v18  ;;  %4032 = vmatmul.mubr.bf16.vlgmr.msra.gmra.mrb[8].mxu1 %v3390_v18  ;;  %v1419_v17 = vmul.f32 %v16518_v6, %v1103_v12  ;;  %v3267_v51 = vmax.f32 %v3139_v56, 0.0  ;;  %v3269_v49 = vmax.f32 %v3141_v44, 0.0  ;;  %v1421_v61 = vmul.f32 %v16567_v63, %v1103_v12 }
 0x15a   : > { %v2875_v55 = vmul.f32 %v16753_v5, %v2561_v14  ;;  %v3138_v8 = vadd.f32 %v16808_v47, %v2998_v16  ;;  %v3140_v60 = vadd.f32 %v16810_v46, %v3000_v22  ;;  %v2877_v4 = vmul.f32 %v16593_v31, %v2561_v14 }
 0x15b   : > { %v2211_v42 = vadd.f32 %v16333_v13, %v1419_v17  ;;  %v3393_v52 = vpack.c.bf16 %v3269_v49, %v3267_v51  ;;  %v2213_v18 = vadd.f32 %v16336_v21, %v1421_v61  ;;  %v1418_v57 = vmul.f32 %v16518_v6, %v1099_v40 }
 0x15c   : > { %v1420_v15 = vmul.f32 %v16567_v63, %v1099_v40  ;;  %v3266_v45 = vmax.f32 %v3138_v8, 0.0  ;;  %v3268_v11 = vmax.f32 %v3140_v60, 0.0  ;;  %v2557_v2 = vrot.slane %v16587_v28, %v16221_v33 }
 0x15d   : > { %v3003_v3 = vadd.f32 %v2875_v55, %v2211_v42  ;;  %3622 = vmatprep.mubr.bf16.mxu0 %v3393_v52  ;;  %4039 = vmatprep.mubr.bf16.mxu1 %v3393_v52  ;;  %v3005_v54 = vadd.f32 %v2877_v4, %v2213_v18  ;;  %v2210_v13 = vadd.f32 %v16341_v25, %v1418_v57 }
 0x15e   : > { %v2212_v53 = vadd.f32 %v16344_v26, %v1420_v15  ;;  %v3392_v20 = vpack.c.bf16 %v3268_v11, %v3266_v45  ;;  %v2874_v10 = vmul.f32 %v16753_v5, %v2557_v2  ;;  %v2876_v12 = vmul.f32 %v16593_v31, %v2557_v2 }
 0x15f   : > { %v3143_v21 = vadd.f32 %v16808_v47, %v3003_v3  ;;  %v3145_v14 = vadd.f32 %v16810_v46, %v3005_v54  ;;  %v1111_v56 = vrot.slane %v16571_v0, %v16239_v38  ;;  %v2386_v28 = vcombine.high %v16578_v24, %v16578_v24 }
 0x160   : > { %v1107_v25 = vrot.slane %v16571_v0, %v16221_v33  ;;  %v3002_v44 = vadd.f32 %v2874_v10, %v2210_v13  ;;  %v3004_v40 = vadd.f32 %v2876_v12, %v2212_v53  ;;  %v1427_v16 = vmul.f32 %v16518_v6, %v16563_v59 }
 0x161   : > { %3623 = vmatmul.mubr.bf16.gmra.mrb[12].mxu0 %v3392_v20  ;;  %4040 = vmatmul.mubr.bf16.gmra.mrb[12].mxu1 %v3392_v20  ;;  %v3271_v26 = vmax.f32 %v3143_v21, 0.0  ;;  %v3273_v22 = vmax.f32 %v3145_v14, 0.0  ;;  %v1423_v17 = vmul.f32 %v16518_v6, %v1111_v56  ;;  %v1425_v51 = vmul.f32 %v16567_v63, %v1111_v56 }
 0x162   : > { %v2569_v49 = vrot.slane %v2386_v28, %v16239_v38  ;;  %v3142_v24 = vadd.f32 %v16808_v47, %v3002_v44  ;;  %v3144_v61 = vadd.f32 %v16810_v46, %v3004_v40  ;;  %v1422_v0 = vmul.f32 %v16518_v6, %v1107_v25 }
 0x163   : > { %v1424_v55 = vmul.f32 %v16567_v63, %v1107_v25  ;;  %v3395_v8 = vpack.c.bf16 %v3273_v22, %v3271_v26  ;;  %v2215_v60 = vadd.f32 %v16347_v30, %v1423_v17  ;;  %v2217_v42 = vadd.f32 %v16351_v27, %v1425_v51 }
 0x164   : > { %v2879_v4 = vmul.f32 %v16753_v5, %v2569_v49  ;;  %v3270_v52 = vmax.f32 %v3142_v24, 0.0  ;;  %v3272_v18 = vmax.f32 %v3144_v61, 0.0  ;;  %v2881_v57 = vmul.f32 %v16593_v31, %v2569_v49 }
 0x165   : > { %v2214_v15 = vadd.f32 %v16354_v34, %v1422_v0  ;;  %3630 = vmatprep.mubr.bf16.mxu0 %v3395_v8  ;;  %4047 = vmatprep.mubr.bf16.mxu1 %v3395_v8  ;;  %v2216_v11 = vadd.f32 %v16357_v32, %v1424_v55  ;;  %v2565_v3 = vrot.slane %v2386_v28, %v16221_v33 }
 0x166   : > { %v3007_v45 = vadd.f32 %v2879_v4, %v2215_v60  ;;  %v3394_v2 = vpack.c.bf16 %v3272_v18, %v3270_v52  ;;  %v3009_v54 = vadd.f32 %v2881_v57, %v2217_v42  ;;  %v1429_v30 = vmul.f32 %v16567_v63, %v16563_v59  ;;  %v22572_v18 = vld [vmem:[#allocation17_spill] sm:$0xff] }
 0x167   : > { %v2219_v27 = vadd.f32 %v16361_v29, %v1427_v16  ;;  %v2878_v53 = vmul.f32 %v16753_v5, %v2565_v3  ;;  %v2880_v34 = vmul.f32 %v16593_v31, %v2565_v3  ;;  %v2577_v20 = vrot.slane %v16543_v1, %v16239_v38  ;;  %v22574_v3 = vld [vmem:[#allocation18_spill] sm:$0xff] }
 0x168   : > { %v3147_v13 = vadd.f32 %v16808_v47, %v3007_v45  ;;  %v3149_v32 = vadd.f32 %v16810_v46, %v3009_v54  ;;  %v2221_v21 = vadd.f32 %v16364_v35, %v1429_v30  ;;  %v1426_v59 = vmul.f32 %v16518_v6, %v16560_v43 }
 0x169   : > { %3631 = vmatmul.mubr.bf16.gmra.mrb[16].mxu0 %v3394_v2  ;;  %4048 = vmatmul.mubr.bf16.gmra.mrb[16].mxu1 %v3394_v2  ;;  %v3006_v29 = vadd.f32 %v2878_v53, %v2214_v15  ;;  %v3008_v12 = vadd.f32 %v2880_v34, %v2216_v11  ;;  %v2883_v14 = vmul.f32 %v16753_v5, %v2577_v20  ;;  %v22573_v15 = vld [vmem:[#allocation61_spill] sm:$0xff] }
 0x16a   : > { %v3275_v10 = vmax.f32 %v3147_v13, 0.0  ;;  %v3277_v56 = vmax.f32 %v3149_v32, 0.0  ;;  %v2885_v28 = vmul.f32 %v16593_v31, %v2577_v20  ;;  %v1428_v25 = vmul.f32 %v16567_v63, %v16560_v43 }
 0x16b   : > { %v2218_v26 = vadd.f32 %v16369_v41, %v1426_v59  ;;  %v3146_v44 = vadd.f32 %v16808_v47, %v3006_v29  ;;  %v3148_v35 = vadd.f32 %v16810_v46, %v3008_v12  ;;  %v3011_v40 = vadd.f32 %v2883_v14, %v2219_v27  ;;  %v22575_v29 = vld [vmem:[#allocation59_spill] sm:$0xff] }
 0x16c   : > { %v2573_v16 = vrot.slane %v16543_v1, %v16221_v33  ;;  %v3397_v22 = vpack.c.bf16 %v3277_v56, %v3275_v10  ;;  %v3013_v17 = vadd.f32 %v2885_v28, %v2221_v21  ;;  %v2220_v51 = vadd.f32 %v16372_v39, %v1428_v25  ;;  %v22576_v14 = vld [vmem:[#allocation19_spill] sm:$0xff]  ;;  %v22577_v28 = vld [vmem:[#allocation20_spill] sm:$0xff] }
 0x16d   : > { %v1127_v49 = vrot.slane %v16549_v37, %v16239_v38  ;;  %v3274_v24 = vmax.f32 %v3146_v44, 0.0  ;;  %v3276_v61 = vmax.f32 %v3148_v35, 0.0  ;;  %v3151_v43 = vadd.f32 %v16808_v47, %v3011_v40 }
 0x16e   : > { %v2882_v41 = vmul.f32 %v16753_v5, %v2573_v16  ;;  %3638 = vmatprep.mubr.bf16.mxu0 %v3397_v22  ;;  %4055 = vmatprep.mubr.bf16.mxu1 %v3397_v22  ;;  %v3153_v0 = vadd.f32 %v16810_v46, %v3013_v17  ;;  %v2884_v55 = vmul.f32 %v16593_v31, %v2573_v16 }
 0x16f   : > { %v1431_v1 = vmul.f32 %v16518_v6, %v1127_v49  ;;  %v3396_v8 = vpack.c.bf16 %v3276_v61, %v3274_v24  ;;  %v3279_v60 = vmax.f32 %v3151_v43, 0.0  ;;  %v1433_v42 = vmul.f32 %v16567_v63, %v1127_v49  ;;  %v22578_v24 = vld [vmem:[#allocation62_spill] sm:$0xff] }
 0x170   : > { %v3010_v39 = vadd.f32 %v2882_v41, %v2218_v26  ;;  %v3281_v4 = vmax.f32 %v3153_v0, 0.0  ;;  %v3012_v52 = vadd.f32 %v2884_v55, %v2220_v51  ;;  %v2585_v45 = vrot.slane %v22573_v15, %v16239_v38  ;;  %v22579_v0 = vld [vmem:[#allocation21_spill] sm:$0xff] }
 0x171   : > { %v2223_v57 = vadd.f32 %v22572_v18, %v1431_v1  ;;  %3639 = vmatmul.mubr.bf16.gmra.mrb[20].mxu0 %v3396_v8  ;;  %4056 = vmatmul.mubr.bf16.gmra.mrb[20].mxu1 %v3396_v8  ;;  %v2225_v2 = vadd.f32 %v22574_v3, %v1433_v42  ;;  %v1123_v54 = vrot.slane %v16549_v37, %v16221_v33 }
 0x172   : > { %v3150_v11 = vadd.f32 %v16808_v47, %v3010_v39  ;;  %v3399_v30 = vpack.c.bf16 %v3281_v4, %v3279_v60  ;;  %v3152_v27 = vadd.f32 %v16810_v46, %v3012_v52  ;;  %v2887_v13 = vmul.f32 %v16753_v5, %v2585_v45  ;;  %v22580_v39 = vld [vmem:[#allocation22_spill] sm:$0xff] }
 0x173   : > { %v2889_v53 = vmul.f32 %v16593_v31, %v2585_v45  ;;  %v1430_v20 = vmul.f32 %v16518_v6, %v1123_v54  ;;  %v1432_v32 = vmul.f32 %v16567_v63, %v1123_v54  ;;  %v2581_v21 = vrot.slane %v22573_v15, %v16221_v33 }
 0x174   : > { %v3278_v34 = vmax.f32 %v3150_v11, 0.0  ;;  %3646 = vmatprep.mubr.bf16.mxu0 %v3399_v30  ;;  %4063 = vmatprep.mubr.bf16.mxu1 %v3399_v30  ;;  %v3280_v59 = vmax.f32 %v3152_v27, 0.0  ;;  %v3015_v10 = vadd.f32 %v2887_v13, %v2223_v57  ;;  %v1135_v12 = vrot.slane %v22575_v29, %v16239_v38  ;;  %v22581_v27 = vld [vmem:[#allocation23_spill] sm:$0xff] }
 0x175   : > { %v3017_v37 = vadd.f32 %v2889_v53, %v2225_v2  ;;  %v2222_v56 = vadd.f32 %v22576_v14, %v1430_v20  ;;  %v2224_v25 = vadd.f32 %v22577_v28, %v1432_v32  ;;  %v2886_v26 = vmul.f32 %v16753_v5, %v2581_v21 }
 0x176   : > { %v2888_v44 = vmul.f32 %v16593_v31, %v2581_v21  ;;  %v3398_v35 = vpack.c.bf16 %v3280_v59, %v3278_v34  ;;  %v3155_v40 = vadd.f32 %v16808_v47, %v3015_v10  ;;  %v1435_v22 = vmul.f32 %v16518_v6, %v1135_v12  ;;  %v22582_v34 = vld [vmem:[#allocation24_spill] sm:$0xff] }
 0x177   : > { %v3157_v16 = vadd.f32 %v16810_v46, %v3017_v37  ;;  %v3014_v17 = vadd.f32 %v2886_v26, %v2222_v56  ;;  %v1437_v49 = vmul.f32 %v16567_v63, %v1135_v12  ;;  %v2593_v61 = vrot.slane %v22578_v24, %v16239_v38  ;;  %v22583_v37 = vld [vmem:[#allocation60_spill] sm:$0xff] }
 0x178   : > { %v3016_v51 = vadd.f32 %v2888_v44, %v2224_v25  ;;  %v3283_v43 = vmax.f32 %v3155_v40, 0.0  ;;  %v2227_v55 = vadd.f32 %v22579_v0, %v1435_v22  ;;  %v1131_v1 = vrot.slane %v22575_v29, %v16221_v33 }
 0x179   : > { %v3285_v41 = vmax.f32 %v3157_v16, 0.0  ;;  %3647 = vmatmul.mubr.bf16.gmra.mrb[24].mxu0 %v3398_v35  ;;  %4064 = vmatmul.mubr.bf16.gmra.mrb[24].mxu1 %v3398_v35  ;;  %v3154_v8 = vadd.f32 %v16808_v47, %v3014_v17  ;;  %v2229_v42 = vadd.f32 %v22580_v39, %v1437_v49  ;;  %v2891_v52 = vmul.f32 %v16753_v5, %v2593_v61 }
 0x17a   : > { %v3156_v60 = vadd.f32 %v16810_v46, %v3016_v51  ;;  %v2893_v18 = vmul.f32 %v16593_v31, %v2593_v61  ;;  %v1434_v57 = vmul.f32 %v16518_v6, %v1131_v1  ;;  %v1436_v3 = vmul.f32 %v16567_v63, %v1131_v1  ;;  %v22584_v51 = vld [vmem:[#allocation25_spill] sm:$0xff] }
 0x17b   : > { %v3401_v4 = vpack.c.bf16 %v3285_v41, %v3283_v43  ;;  %v3282_v45 = vmax.f32 %v3154_v8, 0.0  ;;  %v2589_v2 = vrot.slane %v22578_v24, %v16221_v33  ;;  %v3019_v54 = vadd.f32 %v2891_v52, %v2227_v55  ;;  %v22585_v24 = vld [vmem:[#allocation26_spill] sm:$0xff] }
 0x17c   : > { %v3284_v11 = vmax.f32 %v3156_v60, 0.0  ;;  %v3021_v30 = vadd.f32 %v2893_v18, %v2229_v42  ;;  %v2226_v13 = vadd.f32 %v22581_v27, %v1434_v57  ;;  %v2228_v20 = vadd.f32 %v22582_v34, %v1436_v3  ;;  %v22586_v60 = vld [vmem:[#allocation27_spill] sm:$0xff] }
 0x17d   : > { %3654 = vmatprep.mubr.bf16.mxu0 %v3401_v4  ;;  %4071 = vmatprep.mubr.bf16.mxu1 %v3401_v4  ;;  %v2890_v32 = vmul.f32 %v16753_v5, %v2589_v2  ;;  %v2892_v21 = vmul.f32 %v16593_v31, %v2589_v2  ;;  %v3159_v59 = vadd.f32 %v16808_v47, %v3019_v54  ;;  %v22588_v54 = vld [vmem:[#allocation29_spill] sm:$0xff] }
 0x17e   : > { %v3400_v53 = vpack.c.bf16 %v3284_v11, %v3282_v45  ;;  %v3161_v10 = vadd.f32 %v16810_v46, %v3021_v30  ;;  %v1143_v29 = vrot.slane %v22583_v37, %v16239_v38  ;;  %v2387_v12 = vcombine.high %v22573_v15, %v22573_v15  ;;  %v22587_v45 = vld [vmem:[#allocation28_spill] sm:$0xff] }
 0x17f   : > { %v3018_v14 = vadd.f32 %v2890_v32, %v2226_v13  ;;  %v3020_v56 = vadd.f32 %v2892_v21, %v2228_v20  ;;  %v1139_v28 = vrot.slane %v22583_v37, %v16221_v33  ;;  %v1443_v25 = vmul.f32 %v16518_v6, %v16643_v58 }
 0x180   : > { %v3287_v26 = vmax.f32 %v3159_v59, 0.0  ;;  %v3289_v44 = vmax.f32 %v3161_v10, 0.0  ;;  %v1439_v35 = vmul.f32 %v16518_v6, %v1143_v29  ;;  %v1441_v40 = vmul.f32 %v16567_v63, %v1143_v29 }
 0x181   : > { %3655 = vmatmul.mubr.bf16.gmra.mrb[28].mxu0 %v3400_v53  ;;  %4072 = vmatmul.mubr.bf16.gmra.mrb[28].mxu1 %v3400_v53  ;;  %v3158_v16 = vadd.f32 %v16808_v47, %v3018_v14  ;;  %v3160_v15 = vadd.f32 %v16810_v46, %v3020_v56  ;;  %v2601_v22 = vrot.slane %v2387_v12, %v16239_v38  ;;  %v22589_v53 = vld [vmem:[#allocation30_spill] sm:$0xff] }
 0x182   : > { %v3403_v17 = vpack.c.bf16 %v3289_v44, %v3287_v26  ;;  %v2231_v49 = vadd.f32 %v22584_v51, %v1439_v35  ;;  %v2233_v61 = vadd.f32 %v22585_v24, %v1441_v40  ;;  %v1438_v43 = vmul.f32 %v16518_v6, %v1139_v28  ;;  %v22591_v26 = vld [vmem:[#allocation32_spill] sm:$0xff] }
 0x183   : > { %v3286_v41 = vmax.f32 %v3158_v16, 0.0  ;;  %v3288_v0 = vmax.f32 %v3160_v15, 0.0  ;;  %v2895_v55 = vmul.f32 %v16753_v5, %v2601_v22  ;;  %v2897_v1 = vmul.f32 %v16593_v31, %v2601_v22 }
 0x184   : > { %3662 = vmatprep.mubr.bf16.mxu0 %v3403_v17  ;;  %4079 = vmatprep.mubr.bf16.mxu1 %v3403_v17  ;;  %v1440_v8 = vmul.f32 %v16567_v63, %v1139_v28  ;;  %v2230_v39 = vadd.f32 %v22586_v60, %v1438_v43  ;;  %v2597_v42 = vrot.slane %v2387_v12, %v16221_v33  ;;  %v22590_v28 = vld [vmem:[#allocation31_spill] sm:$0xff] }
 0x185   : > { %v3402_v4 = vpack.c.bf16 %v3288_v0, %v3286_v41  ;;  %v3023_v52 = vadd.f32 %v2895_v55, %v2231_v49  ;;  %v3025_v18 = vadd.f32 %v2897_v1, %v2233_v61  ;;  %v1445_v57 = vmul.f32 %v16567_v63, %v16643_v58 }
 0x186   : > { %v2232_v11 = vadd.f32 %v22587_v45, %v1440_v8  ;;  %v2894_v3 = vmul.f32 %v16753_v5, %v2597_v42  ;;  %v2896_v2 = vmul.f32 %v16593_v31, %v2597_v42  ;;  %v2235_v30 = vadd.f32 %v22588_v54, %v1443_v25  ;;  %v22592_v42 = vld [vmem:[#allocation33_spill] sm:$0xff] }
 0x187   : > { %v3163_v27 = vadd.f32 %v16808_v47, %v3023_v52  ;;  %v3165_v13 = vadd.f32 %v16810_v46, %v3025_v18  ;;  %v2237_v34 = vadd.f32 %v22589_v53, %v1445_v57  ;;  %v2609_v20 = vrot.slane %v16624_v19, %v16239_v38  ;;  %v22593_v52 = vld [vmem:[#allocation34_spill] sm:$0xff] }
 0x188   : > { %v3022_v32 = vadd.f32 %v2894_v3, %v2230_v39  ;;  %v3024_v21 = vadd.f32 %v2896_v2, %v2232_v11  ;;  %v1442_v58 = vmul.f32 %v16518_v6, %v16640_v62  ;;  %v1444_v59 = vmul.f32 %v16567_v63, %v16640_v62 }
 0x189   : > { %3663 = vmatmul.mubr.bf16.gmra.mrb[32].mxu0 %v3402_v4  ;;  %4080 = vmatmul.mubr.bf16.gmra.mrb[32].mxu1 %v3402_v4  ;;  %v3291_v10 = vmax.f32 %v3163_v27, 0.0  ;;  %v3293_v37 = vmax.f32 %v3165_v13, 0.0  ;;  %v2899_v29 = vmul.f32 %v16753_v5, %v2609_v20  ;;  %v2901_v12 = vmul.f32 %v16593_v31, %v2609_v20  ;;  %v22594_v20 = vld [vmem:[#allocation65_spill] sm:$0xff] }
 0x18a   : > { %v3162_v14 = vadd.f32 %v16808_v47, %v3022_v32  ;;  %v3164_v56 = vadd.f32 %v16810_v46, %v3024_v21  ;;  %v2234_v25 = vadd.f32 %v22590_v28, %v1442_v58  ;;  %v2236_v44 = vadd.f32 %v22591_v26, %v1444_v59 }
 0x18b   : > { %v3405_v35 = vpack.c.bf16 %v3293_v37, %v3291_v10  ;;  %v3027_v40 = vadd.f32 %v2899_v29, %v2235_v30  ;;  %v3029_v16 = vadd.f32 %v2901_v12, %v2237_v34  ;;  %v2605_v62 = vrot.slane %v16624_v19, %v16221_v33  ;;  %v22595_v10 = vld [vmem:[#allocation35_spill] sm:$0xff]  ;;  %v22596_v29 = vld [vmem:[#allocation36_spill] sm:$0xff] }
 0x18c   : > { %v3290_v15 = vmax.f32 %v3162_v14, 0.0  ;;  %v3292_v22 = vmax.f32 %v3164_v56, 0.0  ;;  %v1159_v17 = vrot.slane %v16630_v9, %v16239_v38  ;;  %v2617_v51 = vrot.slane %v16660_v23, %v16239_v38 }
 0x18d   : > { %3670 = vmatprep.mubr.bf16.mxu0 %v3405_v35  ;;  %4087 = vmatprep.mubr.bf16.mxu1 %v3405_v35  ;;  %v3167_v49 = vadd.f32 %v16808_v47, %v3027_v40  ;;  %v3169_v24 = vadd.f32 %v16810_v46, %v3029_v16  ;;  %v2898_v61 = vmul.f32 %v16753_v5, %v2605_v62  ;;  %v22597_v16 = vld [vmem:[#allocation37_spill] sm:$0xff] }
 0x18e   : > { %v3404_v43 = vpack.c.bf16 %v3292_v22, %v3290_v15  ;;  %v2900_v41 = vmul.f32 %v16593_v31, %v2605_v62  ;;  %v1447_v19 = vmul.f32 %v16518_v6, %v1159_v17  ;;  %v1449_v0 = vmul.f32 %v16567_v63, %v1159_v17  ;;  %v22598_v15 = vld [vmem:[#allocation72_spill] sm:$0xff] }
 0x18f   : > { %v3295_v55 = vmax.f32 %v3167_v49, 0.0  ;;  %v3297_v1 = vmax.f32 %v3169_v24, 0.0  ;;  %v3026_v8 = vadd.f32 %v2898_v61, %v2234_v25  ;;  %v2903_v60 = vmul.f32 %v16753_v5, %v2617_v51 }
 0x190   : > { %v3028_v39 = vadd.f32 %v2900_v41, %v2236_v44  ;;  %v2239_v4 = vadd.f32 %v22592_v42, %v1447_v19  ;;  %v2241_v18 = vadd.f32 %v22593_v52, %v1449_v0  ;;  %v2905_v57 = vmul.f32 %v16593_v31, %v2617_v51  ;;  %v22599_v51 = vld [vmem:[#allocation38_spill] sm:$0xff]  ;;  %v22600_v52 = vld [vmem:[#allocation39_spill] sm:$0xff] }
 0x191   : > { %3671 = vmatmul.mubr.bf16.gmra.mrb[36].mxu0 %v3404_v43  ;;  %4088 = vmatmul.mubr.bf16.gmra.mrb[36].mxu1 %v3404_v43  ;;  %v3407_v45 = vpack.c.bf16 %v3297_v1, %v3295_v55  ;;  %v3166_v11 = vadd.f32 %v16808_v47, %v3026_v8  ;;  %v1155_v3 = vrot.slane %v16630_v9, %v16221_v33 }
 0x192   : > { %v3168_v2 = vadd.f32 %v16810_v46, %v3028_v39  ;;  %v3031_v54 = vadd.f32 %v2903_v60, %v2239_v4  ;;  %v3033_v30 = vadd.f32 %v2905_v57, %v2241_v18  ;;  %v2613_v27 = vrot.slane %v16660_v23, %v16221_v33  ;;  %v22601_v57 = vld [vmem:[#allocation40_spill] sm:$0xff] }
 0x193   : > { %3678 = vmatprep.mubr.bf16.mxu0 %v3407_v45  ;;  %4095 = vmatprep.mubr.bf16.mxu1 %v3407_v45  ;;  %v3294_v13 = vmax.f32 %v3166_v11, 0.0  ;;  %v1446_v53 = vmul.f32 %v16518_v6, %v1155_v3  ;;  %v1448_v34 = vmul.f32 %v16567_v63, %v1155_v3  ;;  %v1167_v32 = vrot.slane %v22594_v20, %v16239_v38 }
 0x194   : > { %v3296_v21 = vmax.f32 %v3168_v2, 0.0  ;;  %v3171_v9 = vadd.f32 %v16808_v47, %v3031_v54  ;;  %v3173_v58 = vadd.f32 %v16810_v46, %v3033_v30  ;;  %v2902_v59 = vmul.f32 %v16753_v5, %v2613_v27  ;;  %v22602_v54 = vld [vmem:[#allocation69_spill] sm:$0xff] }
 0x195   : > { %v2238_v37 = vadd.f32 %v22595_v10, %v1446_v53  ;;  %v2240_v12 = vadd.f32 %v22596_v29, %v1448_v34  ;;  %v2904_v14 = vmul.f32 %v16593_v31, %v2613_v27  ;;  %v1451_v56 = vmul.f32 %v16518_v6, %v1167_v32  ;;  %v22603_v29 = vld [vmem:[#allocation41_spill] sm:$0xff] }
 0x196   : > { %v3406_v28 = vpack.c.bf16 %v3296_v21, %v3294_v13  ;;  %v3299_v25 = vmax.f32 %v3171_v9, 0.0  ;;  %v3301_v26 = vmax.f32 %v3173_v58, 0.0  ;;  %v1453_v44 = vmul.f32 %v16567_v63, %v1167_v32 }
 0x197   : > { %v3030_v35 = vadd.f32 %v2902_v59, %v2238_v37  ;;  %v3032_v40 = vadd.f32 %v2904_v14, %v2240_v12  ;;  %v2243_v62 = vadd.f32 %v22597_v16, %v1451_v56  ;;  %v2625_v22 = vrot.slane %v22598_v15, %v16239_v38  ;;  %v22604_v14 = vld [vmem:[#allocation42_spill] sm:$0xff] }
 0x198   : > { %v3409_v17 = vpack.c.bf16 %v3301_v26, %v3299_v25  ;;  %v2245_v49 = vadd.f32 %v22599_v51, %v1453_v44  ;;  %v1163_v24 = vrot.slane %v22594_v20, %v16221_v33  ;;  %v2621_v61 = vrot.slane %v22598_v15, %v16221_v33 }
 0x199   : > { %3679 = vmatmul.mubr.bf16.gmra.mrb[40].mxu0 %v3406_v28  ;;  %4096 = vmatmul.mubr.bf16.gmra.mrb[40].mxu1 %v3406_v28  ;;  %v3170_v43 = vadd.f32 %v16808_v47, %v3030_v35  ;;  %v3172_v41 = vadd.f32 %v16810_v46, %v3032_v40  ;;  %v2907_v19 = vmul.f32 %v16753_v5, %v2625_v22 }
 0x19a   : > { %3686 = vmatprep.mubr.bf16.mxu0 %v3409_v17  ;;  %4103 = vmatprep.mubr.bf16.mxu1 %v3409_v17  ;;  %v2909_v0 = vmul.f32 %v16593_v31, %v2625_v22  ;;  %v1450_v55 = vmul.f32 %v16518_v6, %v1163_v24  ;;  %v1452_v1 = vmul.f32 %v16567_v63, %v1163_v24 }
 0x19b   : > { %v3298_v8 = vmax.f32 %v3170_v43, 0.0  ;;  %v3300_v60 = vmax.f32 %v3172_v41, 0.0  ;;  %v3035_v39 = vadd.f32 %v2907_v19, %v2243_v62  ;;  %v2906_v42 = vmul.f32 %v16753_v5, %v2621_v61  ;;  %v22605_v62 = vld [vmem:[#allocation43_spill] sm:$0xff]  ;;  %v22607_v43 = vld [vmem:[#allocation44_spill] sm:$0xff] }
 0x19c   : > { %v3037_v4 = vadd.f32 %v2909_v0, %v2245_v49  ;;  %v2242_v18 = vadd.f32 %v22600_v52, %v1450_v55  ;;  %v2244_v45 = vadd.f32 %v22601_v57, %v1452_v1  ;;  %v2908_v11 = vmul.f32 %v16593_v31, %v2621_v61  ;;  %v22606_v49 = vld [vmem:[#allocation68_spill] sm:$0xff]  ;;  %v22610_v57 = vld [vmem:[#allocation67_spill] sm:$0xff] }
 0x19d   : > { %v3408_v3 = vpack.c.bf16 %v3300_v60, %v3298_v8  ;;  %v3175_v2 = vadd.f32 %v16808_v47, %v3035_v39  ;;  %v1175_v30 = vrot.slane %v22602_v54, %v16239_v38  ;;  %v2436_v27 = vcombine.high %v16660_v23, %v16660_v23  ;;  %v22608_v8 = vld [vmem:[#allocation45_spill] sm:$0xff]  ;;  %v22609_v39 = vld [vmem:[#allocation63_spill] sm:$0xff] }
 0x19e   : > { %v3177_v13 = vadd.f32 %v16810_v46, %v3037_v4  ;;  %v3034_v53 = vadd.f32 %v2906_v42, %v2242_v18  ;;  %v3036_v34 = vadd.f32 %v2908_v11, %v2244_v45  ;;  %v1171_v20 = vrot.slane %v22602_v54, %v16221_v33 }
 0x19f   : > { %v3303_v32 = vmax.f32 %v3175_v2, 0.0  ;;  %v1455_v21 = vmul.f32 %v16518_v6, %v1175_v30  ;;  %v1457_v9 = vmul.f32 %v16567_v63, %v1175_v30  ;;  %v2633_v58 = vrot.slane %v2436_v27, %v16239_v38 }
 0x1a0   : > { %v3305_v59 = vmax.f32 %v3177_v13, 0.0  ;;  %v3174_v10 = vadd.f32 %v16808_v47, %v3034_v53  ;;  %v3176_v37 = vadd.f32 %v16810_v46, %v3036_v34  ;;  %v1454_v23 = vmul.f32 %v16518_v6, %v1171_v20 }
 0x1a1   : > { %3687 = vmatmul.mubr.bf16.gmra.mrb[44].mxu0 %v3408_v3  ;;  %4104 = vmatmul.mubr.bf16.gmra.mrb[44].mxu1 %v3408_v3  ;;  %v2247_v12 = vadd.f32 %v22603_v29, %v1455_v21  ;;  %v2249_v56 = vadd.f32 %v22604_v14, %v1457_v9  ;;  %v2911_v28 = vmul.f32 %v16753_v5, %v2633_v58  ;;  %v22611_v3 = vld [vmem:[#allocation46_spill] sm:$0xff]  ;;  %v22612_v21 = vld [vmem:[#allocation47_spill] sm:$0xff]  ;;  %v22614_v14 = vld [vmem:[#allocation64_spill] sm:$0xff] }
 0x1a2   : > { %v3411_v25 = vpack.c.bf16 %v3305_v59, %v3303_v32  ;;  %v3302_v26 = vmax.f32 %v3174_v10, 0.0  ;;  %v3304_v44 = vmax.f32 %v3176_v37, 0.0  ;;  %v2913_v35 = vmul.f32 %v16593_v31, %v2633_v58  ;;  %v22613_v10 = vld [vmem:[#allocation48_spill] sm:$0xff] }
 0x1a3   : > { %v3039_v40 = vadd.f32 %v2911_v28, %v2247_v12  ;;  %v1456_v16 = vmul.f32 %v16567_v63, %v1171_v20  ;;  %v2246_v15 = vadd.f32 %v22605_v62, %v1454_v23  ;;  %v2629_v22 = vrot.slane %v2436_v27, %v16221_v33 }
 0x1a4   : > { %3694 = vmatprep.mubr.bf16.mxu0 %v3411_v25  ;;  %4111 = vmatprep.mubr.bf16.mxu1 %v3411_v25  ;;  %v3410_v17 = vpack.c.bf16 %v3304_v44, %v3302_v26  ;;  %v3041_v51 = vadd.f32 %v2913_v35, %v2249_v56  ;;  %v1459_v24 = vmul.f32 %v16518_v6, %v22606_v49  ;;  %v22615_v44 = vld [vmem:[#allocation71_spill] sm:$0xff] }
 0x1a5   : > { %v3179_v61 = vadd.f32 %v16808_v47, %v3039_v40  ;;  %v2248_v41 = vadd.f32 %v22607_v43, %v1456_v16  ;;  %v2910_v19 = vmul.f32 %v16753_v5, %v2629_v22  ;;  %v2912_v0 = vmul.f32 %v16593_v31, %v2629_v22 }
 0x1a6   : > { %v3181_v55 = vadd.f32 %v16810_v46, %v3041_v51  ;;  %v1461_v1 = vmul.f32 %v16567_v63, %v22606_v49  ;;  %v2251_v60 = vadd.f32 %v22608_v8, %v1459_v24  ;;  %v2641_v42 = vrot.slane %v22609_v39, %v16239_v38 }
 0x1a7   : > { %v3307_v4 = vmax.f32 %v3179_v61, 0.0  ;;  %v3038_v52 = vadd.f32 %v2910_v19, %v2246_v15  ;;  %v3040_v18 = vadd.f32 %v2912_v0, %v2248_v41  ;;  %v1458_v45 = vmul.f32 %v16518_v6, %v22610_v57  ;;  %v22616_v61 = vld [vmem:[#allocation49_spill] sm:$0xff]  ;;  %v22617_v41 = vld [vmem:[#allocation51_spill] sm:$0xff] }
 0x1a8   : > { %v3309_v11 = vmax.f32 %v3181_v55, 0.0  ;;  %v2253_v2 = vadd.f32 %v22611_v3, %v1461_v1  ;;  %v2915_v54 = vmul.f32 %v16753_v5, %v2641_v42  ;;  %v2917_v30 = vmul.f32 %v16593_v31, %v2641_v42  ;;  %v22618_v3 = vld [vmem:[#allocation52_spill] sm:$0xff] }
 0x1a9   : > { %3695 = vmatmul.mubr.bf16.gmra.mrb[48].mxu0 %v3410_v17  ;;  %4112 = vmatmul.mubr.bf16.gmra.mrb[48].mxu1 %v3410_v17  ;;  %v3178_v27 = vadd.f32 %v16808_v47, %v3038_v52  ;;  %v3180_v13 = vadd.f32 %v16810_v46, %v3040_v18  ;;  %v1460_v53 = vmul.f32 %v16567_v63, %v22610_v57 }
 0x1aa   : > { %v3413_v34 = vpack.c.bf16 %v3309_v11, %v3307_v4  ;;  %v3043_v20 = vadd.f32 %v2915_v54, %v2251_v60  ;;  %v3045_v32 = vadd.f32 %v2917_v30, %v2253_v2  ;;  %v2250_v9 = vadd.f32 %v22612_v21, %v1458_v45 }
 0x1ab   : > { %v3306_v58 = vmax.f32 %v3178_v27, 0.0  ;;  %v3308_v59 = vmax.f32 %v3180_v13, 0.0  ;;  %v2252_v37 = vadd.f32 %v22613_v10, %v1460_v53  ;;  %v2637_v23 = vrot.slane %v22609_v39, %v16221_v33  ;;  %v22619_v27 = vld [vmem:[#allocation53_spill] sm:$0xff]  ;;  %v22620_v53 = vld [vmem:[#allocation66_spill] sm:$0xff] }
 0x1ac   : > { %3702 = vmatprep.mubr.bf16.mxu0 %v3413_v34  ;;  %4119 = vmatprep.mubr.bf16.mxu1 %v3413_v34  ;;  %v3183_v29 = vadd.f32 %v16808_v47, %v3043_v20  ;;  %v3185_v12 = vadd.f32 %v16810_v46, %v3045_v32  ;;  %v1191_v56 = vrot.slane %v22614_v14, %v16239_v38  ;;  %v22621_v20 = vld [vmem:[#allocation73_spill] sm:$0xff] }
 0x1ad   : > { %v3412_v28 = vpack.c.bf16 %v3308_v59, %v3306_v58  ;;  %v2914_v25 = vmul.f32 %v16753_v5, %v2637_v23  ;;  %v2916_v26 = vmul.f32 %v16593_v31, %v2637_v23  ;;  %v2649_v35 = vrot.slane %v22615_v44, %v16239_v38 }
 0x1ae   : > { %v3311_v40 = vmax.f32 %v3183_v29, 0.0  ;;  %v3313_v16 = vmax.f32 %v3185_v12, 0.0  ;;  %v1463_v62 = vmul.f32 %v16518_v6, %v1191_v56  ;;  %v1465_v15 = vmul.f32 %v16567_v63, %v1191_v56 }
 0x1af   : > { %v3042_v22 = vadd.f32 %v2914_v25, %v2250_v9  ;;  %v3044_v17 = vadd.f32 %v2916_v26, %v2252_v37  ;;  %v2919_v51 = vmul.f32 %v16753_v5, %v2649_v35  ;;  %v2921_v49 = vmul.f32 %v16593_v31, %v2649_v35  ;;  %v22622_v26 = vld [vmem:[#allocation54_spill] sm:$0xff] }
 0x1b0   : > { %v3415_v24 = vpack.c.bf16 %v3313_v16, %v3311_v40  ;;  %v2255_v43 = vadd.f32 %v22616_v61, %v1463_v62  ;;  %v2257_v19 = vadd.f32 %v22617_v41, %v1465_v15  ;;  %v1187_v0 = vrot.slane %v22614_v14, %v16221_v33  ;;  %v22623_v40 = vld [vmem:[#allocation55_spill] sm:$0xff] }
 0x1b1   : > { %3703 = vmatmul.mubr.bf16.gmra.mrb[52].mxu0 %v3412_v28  ;;  %4120 = vmatmul.mubr.bf16.gmra.mrb[52].mxu1 %v3412_v28  ;;  %v3182_v55 = vadd.f32 %v16808_v47, %v3042_v22  ;;  %v3184_v1 = vadd.f32 %v16810_v46, %v3044_v17  ;;  %v2645_v8 = vrot.slane %v22615_v44, %v16221_v33  ;;  %v22624_v22 = vld [vmem:[#allocation56_spill] sm:$0xff] }
 0x1b2   : > { %3710 = vmatprep.mubr.bf16.mxu0 %v3415_v24  ;;  %4127 = vmatprep.mubr.bf16.mxu1 %v3415_v24  ;;  %v3047_v60 = vadd.f32 %v2919_v51, %v2255_v43  ;;  %v3049_v39 = vadd.f32 %v2921_v49, %v2257_v19  ;;  %v1462_v42 = vmul.f32 %v16518_v6, %v1187_v0  ;;  %v22625_v43 = vld [vmem:[#allocation70_spill] sm:$0xff]  ;;  %v22626_v19 = vld [vmem:[#allocation57_spill] sm:$0xff] }
 0x1b3   : > { %v3310_v4 = vmax.f32 %v3182_v55, 0.0  ;;  %v3312_v52 = vmax.f32 %v3184_v1, 0.0  ;;  %v1464_v18 = vmul.f32 %v16567_v63, %v1187_v0  ;;  %v2918_v57 = vmul.f32 %v16753_v5, %v2645_v8 }
 0x1b4   : > { %v3187_v45 = vadd.f32 %v16808_v47, %v3047_v60  ;;  %v3189_v11 = vadd.f32 %v16810_v46, %v3049_v39  ;;  %v2254_v2 = vadd.f32 %v22618_v3, %v1462_v42  ;;  %v2920_v54 = vmul.f32 %v16593_v31, %v2645_v8  ;;  %v22627_v8 = vld [vmem:[#allocation58_spill] sm:$0xff]  ;;  %v22628_v60 = vld [vmem:[#allocation4_spill] sm:$0xff] }
 0x1b5   : > { %v3414_v30 = vpack.c.bf16 %v3312_v52, %v3310_v4  ;;  %v2256_v13 = vadd.f32 %v22619_v27, %v1464_v18  ;;  %v1199_v34 = vrot.slane %v22620_v53, %v16239_v38  ;;  %v2657_v32 = vrot.slane %v22621_v20, %v16239_v38 }
 0x1b6   : > { %v3315_v21 = vmax.f32 %v3187_v45, 0.0  ;;  %v3317_v9 = vmax.f32 %v3189_v11, 0.0  ;;  %v3046_v58 = vadd.f32 %v2918_v57, %v2254_v2  ;;  %v1195_v59 = vrot.slane %v22620_v53, %v16221_v33  ;;  %v4352_v57 = vld [vmem:[%s22207_s9] sm:$0xff]  ;;  %v4353_v45 = vld [vmem:[%s22207_s9 + $0x8] sm:$0xff] }
 0x1b7   : > { %v3048_v10 = vadd.f32 %v2920_v54, %v2256_v13  ;;  %v1467_v37 = vmul.f32 %v16518_v6, %v1199_v34  ;;  %v1469_v23 = vmul.f32 %v16567_v63, %v1199_v34  ;;  %v2923_v29 = vmul.f32 %v16753_v5, %v2657_v32  ;;  %v22629_v54 = vld [vmem:[#allocation16_spill] sm:$0xff] }
 0x1b8   : > { %v3417_v12 = vpack.c.bf16 %v3317_v9, %v3315_v21  ;;  %v3186_v14 = vadd.f32 %v16808_v47, %v3046_v58  ;;  %v2925_v56 = vmul.f32 %v16593_v31, %v2657_v32  ;;  %v1466_v28 = vmul.f32 %v16518_v6, %v1195_v59 }
 0x1b9   : > { %3711 = vmatmul.mubr.bf16.gmra.mrb[56].mxu0 %v3414_v30  ;;  %4128 = vmatmul.mubr.bf16.gmra.mrb[56].mxu1 %v3414_v30  ;;  %v3188_v25 = vadd.f32 %v16810_v46, %v3048_v10  ;;  %v2259_v35 = vadd.f32 %v22622_v26, %v1467_v37  ;;  %v2261_v16 = vadd.f32 %v22623_v40, %v1469_v23 }
 0x1ba   : > { %3718 = vmatprep.mubr.bf16.mxu0 %v3417_v12  ;;  %4135 = vmatprep.mubr.bf16.mxu1 %v3417_v12  ;;  %v3314_v62 = vmax.f32 %v3186_v14, 0.0  ;;  %v1468_v15 = vmul.f32 %v16567_v63, %v1195_v59  ;;  %v2258_v17 = vadd.f32 %v22624_v22, %v1466_v28  ;;  %v2653_v51 = vrot.slane %v22621_v20, %v16221_v33 }
 0x1bb   : > { %v3316_v49 = vmax.f32 %v3188_v25, 0.0  ;;  %v3051_v24 = vadd.f32 %v2923_v29, %v2259_v35  ;;  %v3053_v61 = vadd.f32 %v2925_v56, %v2261_v16  ;;  %v1207_v41 = vrot.slane %v22625_v43, %v16239_v38  ;;  %v22630_v29 = vld [vmem:[#allocation50_spill] sm:$0xff] }
 0x1bc   : > { %v2260_v0 = vadd.f32 %v22626_v19, %v1468_v15  ;;  %v2922_v55 = vmul.f32 %v16753_v5, %v2653_v51  ;;  %v2924_v1 = vmul.f32 %v16593_v31, %v2653_v51  ;;  %v2135_v39 = vmul.f32 %v22628_v60, %v22627_v8  ;;  %v4754_v51 = vld [vmem:[%s22208_s10 + $0x8] sm:$0xff] }
 0x1bd   : > { %v3416_v42 = vpack.c.bf16 %v3316_v49, %v3314_v62  ;;  %v3191_v4 = vadd.f32 %v16808_v47, %v3051_v24  ;;  %v3193_v52 = vadd.f32 %v16810_v46, %v3053_v61  ;;  %v1471_v18 = vmul.f32 %v16518_v6, %v1207_v41 }
 0x1be   : > { %v3050_v11 = vadd.f32 %v2922_v55, %v2258_v17  ;;  %v3052_v3 = vadd.f32 %v2924_v1, %v2260_v0  ;;  %v1473_v2 = vmul.f32 %v16567_v63, %v1207_v41  ;;  %v2137_v30 = vmul.f32 %v22629_v54, %v22627_v8  ;;  %v4753_v17 = vld [vmem:[%s22208_s10] sm:$0xff] }
 0x1bf   : > { %v3319_v27 = vmax.f32 %v3191_v4, 0.0  ;;  %v3321_v13 = vmax.f32 %v3193_v52, 0.0  ;;  %v2263_v53 = vadd.f32 %v2135_v39, %v1471_v18  ;;  %v2437_v34 = vcombine.high %v22615_v44, %v22615_v44  ;;  %v22631_v0 = vld [vmem:[#allocation3_spill] sm:$0xff] }
 0x1c0   : > { %v3190_v20 = vadd.f32 %v16808_v47, %v3050_v11  ;;  %v3192_v32 = vadd.f32 %v16810_v46, %v3052_v3  ;;  %v2265_v21 = vadd.f32 %v2137_v30, %v1473_v2  ;;  %v15116_v9 = vpack.c.bf16 %v4353_v45, %v4352_v57 }
 0x1c1   : > { %3719 = vmatmul.mubr.bf16.gmra.mrb[60].mxu0 %v3416_v42  ;;  %4136 = vmatmul.mubr.bf16.gmra.mrb[60].mxu1 %v3416_v42  ;;  %v3419_v58 = vpack.c.bf16 %v3321_v13, %v3319_v27  ;;  %v2665_v59 = vrot.slane %v2437_v34, %v16239_v38  ;;  %v1203_v10 = vrot.slane %v22625_v43, %v16221_v33 }
 0x1c2   : > { %v3318_v37 = vmax.f32 %v3190_v20, 0.0  ;;  %v3320_v23 = vmax.f32 %v3192_v32, 0.0  ;;  %15117 = vmatprep.subr.bf16.mxu0 %v15116_v9  ;;  %v1869_v44 = vrot.slane %v22630_v29, %v16221_v33  ;;  %v2661_v12 = vrot.slane %v2437_v34, %v16221_v33 }
 0x1c3   : > { %3726 = vmatprep.mubr.bf16.mxu0 %v3419_v58  ;;  %4143 = vmatprep.mubr.bf16.mxu1 %v3419_v58  ;;  %v2927_v14 = vmul.f32 %v16753_v5, %v2665_v59  ;;  %v2929_v56 = vmul.f32 %v16593_v31, %v2665_v59  ;;  %v1470_v28 = vmul.f32 %v16518_v6, %v1203_v10 }
 0x1c4   : > { %v3418_v25 = vpack.c.bf16 %v3320_v23, %v3318_v37  ;;  %15119 = vmatpush3.bf16.msra.mxu0 %v15116_v9  ;;  %v1472_v26 = vmul.f32 %v16567_v63, %v1203_v10  ;;  %v2134_v35 = vmul.f32 %v22628_v60, %v1869_v44  ;;  %v2136_v40 = vmul.f32 %v22629_v54, %v1869_v44 }
 0x1c5   : > { %v3055_v16 = vadd.f32 %v2927_v14, %v2263_v53  ;;  %v3057_v62 = vadd.f32 %v2929_v56, %v2265_v21  ;;  %v2926_v15 = vmul.f32 %v16753_v5, %v2661_v12  ;;  %v2928_v22 = vmul.f32 %v16593_v31, %v2661_v12 }
 0x1c6   : > { %v2262_v49 = vadd.f32 %v2134_v35, %v1470_v28  ;;  %v2264_v24 = vadd.f32 %v2136_v40, %v1472_v26  ;;  %v1475_v61 = vmul.f32 %v16518_v6, %v16689_v36  ;;  %v1477_v43 = vmul.f32 %v16567_v63, %v16689_v36 }
 0x1c7   : > { %v3195_v41 = vadd.f32 %v16808_v47, %v3055_v16  ;;  %v3197_v19 = vadd.f32 %v16810_v46, %v3057_v62  ;;  %v1881_v55 = vrot.slane %v22631_v0, %v16239_v38  ;;  %v2673_v1 = vrot.slane %v16708_v48, %v16239_v38  ;;  %v22633_v16 = vld [vmem:[#allocation82_spill] sm:$0xff] }
 0x1c8   : > { %v3054_v8 = vadd.f32 %v2926_v15, %v2262_v49  ;;  %v3056_v39 = vadd.f32 %v2928_v22, %v2264_v24  ;;  %v15148_v42 = vpack.c.bf16 %v4754_v51, %v4753_v17  ;;  %v1474_v4 = vmul.f32 %v16518_v6, %v16686_v7 }
 0x1c9   : > { %3727 = vmatmul.mubr.bf16.gmra.mrb[64].mxu0 %v3418_v25  ;;  %4144 = vmatmul.mubr.bf16.gmra.mrb[64].mxu1 %v3418_v25  ;;  %v3323_v52 = vmax.f32 %v3195_v41, 0.0  ;;  %v3325_v36 = vmax.f32 %v3197_v19, 0.0  ;;  %v2139_v18 = vmul.f32 %v22628_v60, %v1881_v55  ;;  %v2141_v57 = vmul.f32 %v22629_v54, %v1881_v55  ;;  %v22632_v25 = vld [vmem:[#allocation8_spill] sm:$0xff] }
 0x1ca   : > { %v3194_v45 = vadd.f32 %v16808_v47, %v3054_v8  ;;  %v3196_v11 = vadd.f32 %v16810_v46, %v3056_v39  ;;  %v2931_v3 = vmul.f32 %v16753_v5, %v2673_v1  ;;  %v2933_v2 = vmul.f32 %v16593_v31, %v2673_v1  ;;  %15149 = vmatprep.subr.bf16.mxu1 %v15148_v42 }
 0x1cb   : > { %v3421_v30 = vpack.c.bf16 %v3325_v36, %v3323_v52  ;;  %v2267_v27 = vadd.f32 %v2139_v18, %v1475_v61  ;;  %v2269_v13 = vadd.f32 %v2141_v57, %v1477_v43  ;;  %15151 = vmatpush3.bf16.msra.mxu1 %v15148_v42  ;;  %v1476_v53 = vmul.f32 %v16567_v63, %v16686_v7 }
 0x1cc   : > { %v3322_v34 = vmax.f32 %v3194_v45, 0.0  ;;  %v3324_v20 = vmax.f32 %v3196_v11, 0.0  ;;  %v1877_v32 = vrot.slane %v22631_v0, %v16221_v33  ;;  %v2669_v21 = vrot.slane %v16708_v48, %v16221_v33 }
 0x1cd   : > { %3734 = vmatprep.mubr.bf16.mxu0 %v3421_v30  ;;  %4151 = vmatprep.mubr.bf16.mxu1 %v3421_v30  ;;  %v3059_v9 = vadd.f32 %v2931_v3, %v2267_v27  ;;  %v3061_v58 = vadd.f32 %v2933_v2, %v2269_v13  ;;  %v1223_v59 = vrot.slane %v16680_v50, %v16239_v38  ;;  %v22634_v27 = vld [vmem:[#allocation74_spill] sm:$0xff] }
 0x1ce   : > { %v3420_v10 = vpack.c.bf16 %v3324_v20, %v3322_v34  ;;  %v2138_v37 = vmul.f32 %v22628_v60, %v1877_v32  ;;  %v2140_v7 = vmul.f32 %v22629_v54, %v1877_v32  ;;  %v2930_v23 = vmul.f32 %v16753_v5, %v2669_v21  ;;  %v22635_v20 = vld [vmem:[#allocation10_spill] sm:$0xff] }
 0x1cf   : > { %v3199_v29 = vadd.f32 %v16808_v47, %v3059_v9  ;;  %v3201_v44 = vadd.f32 %v16810_v46, %v3061_v58  ;;  %v2932_v48 = vmul.f32 %v16593_v31, %v2669_v21  ;;  %v1479_v12 = vmul.f32 %v16518_v6, %v1223_v59  ;;  %v22636_v21 = vld [vmem:[#allocation84_spill] sm:$0xff] }
 0x1d0   : > { %v2266_v14 = vadd.f32 %v2138_v37, %v1474_v4  ;;  %v2268_v56 = vadd.f32 %v2140_v7, %v1476_v53  ;;  %v1481_v28 = vmul.f32 %v16567_v63, %v1223_v59  ;;  %v1889_v26 = vrot.slane %v22632_v25, %v16239_v38 }
 0x1d1   : > { %3735 = vmatmul.mubr.bf16.gmra.mrb[68].mxu0 %v3420_v10  ;;  %4152 = vmatmul.mubr.bf16.gmra.mrb[68].mxu1 %v3420_v10  ;;  %v3327_v35 = vmax.f32 %v3199_v29, 0.0  ;;  %v3329_v40 = vmax.f32 %v3201_v44, 0.0  ;;  %v2681_v62 = vrot.slane %v22633_v16, %v16239_v38  ;;  %v1219_v15 = vrot.slane %v16680_v50, %v16221_v33 }
 0x1d2   : > { %v3058_v22 = vadd.f32 %v2930_v23, %v2266_v14  ;;  %v3060_v17 = vadd.f32 %v2932_v48, %v2268_v56  ;;  %v2143_v51 = vmul.f32 %v22628_v60, %v1889_v26  ;;  %v2145_v49 = vmul.f32 %v22629_v54, %v1889_v26 }
 0x1d3   : > { %v3423_v24 = vpack.c.bf16 %v3329_v40, %v3327_v35  ;;  %v2935_v61 = vmul.f32 %v16753_v5, %v2681_v62  ;;  %v2937_v43 = vmul.f32 %v16593_v31, %v2681_v62  ;;  %v1478_v41 = vmul.f32 %v16518_v6, %v1219_v15 }
 0x1d4   : > { %v3198_v19 = vadd.f32 %v16808_v47, %v3058_v22  ;;  %v3200_v0 = vadd.f32 %v16810_v46, %v3060_v17  ;;  %v2271_v55 = vadd.f32 %v2143_v51, %v1479_v12  ;;  %v2273_v1 = vadd.f32 %v2145_v49, %v1481_v28 }
 0x1d5   : > { %3742 = vmatprep.mubr.bf16.mxu0 %v3423_v24  ;;  %4159 = vmatprep.mubr.bf16.mxu1 %v3423_v24  ;;  %v1480_v50 = vmul.f32 %v16567_v63, %v1219_v15  ;;  %v1885_v8 = vrot.slane %v22632_v25, %v16221_v33  ;;  %v2677_v39 = vrot.slane %v22633_v16, %v16221_v33 }
 0x1d6   : > { %v3326_v42 = vmax.f32 %v3198_v19, 0.0  ;;  %v3328_v4 = vmax.f32 %v3200_v0, 0.0  ;;  %v3063_v52 = vadd.f32 %v2935_v61, %v2271_v55  ;;  %v3065_v36 = vadd.f32 %v2937_v43, %v2273_v1  ;;  %v22637_v19 = vld [vmem:[#allocation77_spill] sm:$0xff] }
 0x1d7   : > { %v2142_v18 = vmul.f32 %v22628_v60, %v1885_v8  ;;  %v2144_v57 = vmul.f32 %v22629_v54, %v1885_v8  ;;  %v2934_v45 = vmul.f32 %v16753_v5, %v2677_v39  ;;  %v2936_v11 = vmul.f32 %v16593_v31, %v2677_v39 }
 0x1d8   : > { %v3422_v3 = vpack.c.bf16 %v3328_v4, %v3326_v42  ;;  %v3203_v2 = vadd.f32 %v16808_v47, %v3063_v52  ;;  %v3205_v30 = vadd.f32 %v16810_v46, %v3065_v36  ;;  %v1231_v13 = vrot.slane %v22634_v27, %v16239_v38  ;;  %v4354_v36 = vld [vmem:[%s22207_s9 + $0x10] sm:$0xff] }
 0x1d9   : > { %v2270_v53 = vadd.f32 %v2142_v18, %v1478_v41  ;;  %v2272_v34 = vadd.f32 %v2144_v57, %v1480_v50  ;;  %v1897_v32 = vrot.slane %v22635_v20, %v16239_v38  ;;  %v2689_v9 = vrot.slane %v22636_v21, %v16239_v38  ;;  %v4355_v18 = vld [vmem:[%s22207_s9 + $0x18] sm:$0xff] }
 0x1da   : > { %3743 = vmatmul.mubr.bf16.gmra.mrb[72].mxu0 %v3422_v3  ;;  %4160 = vmatmul.mubr.bf16.gmra.mrb[72].mxu1 %v3422_v3  ;;  %v3331_v58 = vmax.f32 %v3203_v2, 0.0  ;;  %v3333_v59 = vmax.f32 %v3205_v30, 0.0  ;;  %v1483_v10 = vmul.f32 %v16518_v6, %v1231_v13  ;;  %v1485_v37 = vmul.f32 %v16567_v63, %v1231_v13 }
 0x1db   : > { %v3062_v7 = vadd.f32 %v2934_v45, %v2270_v53  ;;  %v3064_v23 = vadd.f32 %v2936_v11, %v2272_v34  ;;  %v2147_v29 = vmul.f32 %v22628_v60, %v1897_v32  ;;  %v2149_v44 = vmul.f32 %v22629_v54, %v1897_v32 }
 0x1dc   : > { %v3425_v48 = vpack.c.bf16 %v3333_v59, %v3331_v58  ;;  %v2939_v12 = vmul.f32 %v16753_v5, %v2689_v9  ;;  %v2941_v14 = vmul.f32 %v16593_v31, %v2689_v9  ;;  %v1227_v56 = vrot.slane %v22634_v27, %v16221_v33 }
 0x1dd   : > { %v3202_v28 = vadd.f32 %v16808_v47, %v3062_v7  ;;  %v3204_v26 = vadd.f32 %v16810_v46, %v3064_v23  ;;  %v2275_v35 = vadd.f32 %v2147_v29, %v1483_v10  ;;  %v2277_v40 = vadd.f32 %v2149_v44, %v1485_v37 }
 0x1de   : > { %3750 = vmatprep.mubr.bf16.mxu0 %v3425_v48  ;;  %4167 = vmatprep.mubr.bf16.mxu1 %v3425_v48  ;;  %v1482_v62 = vmul.f32 %v16518_v6, %v1227_v56  ;;  %v1484_v15 = vmul.f32 %v16567_v63, %v1227_v56  ;;  %v1893_v22 = vrot.slane %v22635_v20, %v16221_v33 }
 0x1df   : > { %v3330_v17 = vmax.f32 %v3202_v28, 0.0  ;;  %v3332_v51 = vmax.f32 %v3204_v26, 0.0  ;;  %v3067_v49 = vadd.f32 %v2939_v12, %v2275_v35  ;;  %v3069_v24 = vadd.f32 %v2941_v14, %v2277_v40  ;;  %v22638_v26 = vld [vmem:[#allocation79_spill] sm:$0xff] }
 0x1e0   : > { %v2146_v61 = vmul.f32 %v22628_v60, %v1893_v22  ;;  %v2148_v43 = vmul.f32 %v22629_v54, %v1893_v22  ;;  %v2685_v41 = vrot.slane %v22636_v21, %v16221_v33  ;;  %v1239_v0 = vrot.slane %v22637_v19, %v16239_v38 }
 0x1e1   : > { %v3424_v55 = vpack.c.bf16 %v3332_v51, %v3330_v17  ;;  %v3207_v1 = vadd.f32 %v16808_v47, %v3067_v49  ;;  %v3209_v50 = vadd.f32 %v16810_v46, %v3069_v24  ;;  %v1694_v8 = vcombine.high %v22632_v25, %v22632_v25 }
 0x1e2   : > { %v2274_v39 = vadd.f32 %v2146_v61, %v1482_v62  ;;  %v2276_v42 = vadd.f32 %v2148_v43, %v1484_v15  ;;  %v2938_v4 = vmul.f32 %v16753_v5, %v2685_v41  ;;  %v2940_v52 = vmul.f32 %v16593_v31, %v2685_v41  ;;  %v4755_v62 = vld [vmem:[%s22208_s10 + $0x10] sm:$0xff]  ;;  %v4756_v15 = vld [vmem:[%s22208_s10 + $0x18] sm:$0xff] }
 0x1e3   : > { %3751 = vmatmul.mubr.bf16.gmra.mrb[76].mxu0 %v3424_v55  ;;  %4168 = vmatmul.mubr.bf16.gmra.mrb[76].mxu1 %v3424_v55  ;;  %v3335_v57 = vmax.f32 %v3207_v1, 0.0  ;;  %v3337_v45 = vmax.f32 %v3209_v50, 0.0  ;;  %v1487_v25 = vmul.f32 %v16518_v6, %v1239_v0  ;;  %v1489_v11 = vmul.f32 %v16567_v63, %v1239_v0  ;;  %v22639_v43 = vld [vmem:[#allocation5_spill] sm:$0xff] }
 0x1e4   : > { %v3066_v3 = vadd.f32 %v2938_v4, %v2274_v39  ;;  %v3068_v2 = vadd.f32 %v2940_v52, %v2276_v42  ;;  %v1905_v30 = vrot.slane %v1694_v8, %v16239_v38  ;;  %v2486_v27 = vcombine.high %v22633_v16, %v22633_v16  ;;  %v22640_v55 = vld [vmem:[#allocation81_spill] sm:$0xff] }
 0x1e5   : > { %v3427_v13 = vpack.c.bf16 %v3337_v45, %v3335_v57  ;;  %v15120_v53 = vpack.c.bf16 %v4355_v18, %v4354_v36  ;;  %v1235_v34 = vrot.slane %v22637_v19, %v16221_v33  ;;  %v1901_v20 = vrot.slane %v1694_v8, %v16221_v33 }
 0x1e6   : > { %v3206_v32 = vadd.f32 %v16808_v47, %v3066_v3  ;;  %v3208_v21 = vadd.f32 %v16810_v46, %v3068_v2  ;;  %v2151_v9 = vmul.f32 %v22628_v60, %v1905_v30  ;;  %v2153_v58 = vmul.f32 %v22629_v54, %v1905_v30  ;;  %v22641_v30 = vld [vmem:[#allocation78_spill] sm:$0xff] }
 0x1e7   : > { %3758 = vmatprep.mubr.bf16.mxu0 %v3427_v13  ;;  %4175 = vmatprep.mubr.bf16.mxu1 %v3427_v13  ;;  %v2697_v59 = vrot.slane %v2486_v27, %v16239_v38  ;;  %v1486_v16 = vmul.f32 %v16518_v6, %v1235_v34  ;;  %v1488_v10 = vmul.f32 %v16567_v63, %v1235_v34 }
 0x1e8   : > { %v3334_v37 = vmax.f32 %v3206_v32, 0.0  ;;  %v3336_v7 = vmax.f32 %v3208_v21, 0.0  ;;  %v2279_v23 = vadd.f32 %v2151_v9, %v1487_v25  ;;  %v2281_v29 = vadd.f32 %v2153_v58, %v1489_v11  ;;  %15121 = vmatprep.subr.bf16.mxu0 %v15120_v53 }
 0x1e9   : > { %v2943_v44 = vmul.f32 %v16753_v5, %v2697_v59  ;;  %v2945_v48 = vmul.f32 %v16593_v31, %v2697_v59  ;;  %15123 = vmatpush3.bf16.msra.mxu0 %v15120_v53  ;;  %v2150_v12 = vmul.f32 %v22628_v60, %v1901_v20  ;;  %v2152_v14 = vmul.f32 %v22629_v54, %v1901_v20 }
 0x1ea   : > { %v3426_v56 = vpack.c.bf16 %v3336_v7, %v3334_v37  ;;  %v2693_v28 = vrot.slane %v2486_v27, %v16221_v33  ;;  %v1491_v35 = vmul.f32 %v16518_v6, %v22638_v26  ;;  %v1493_v40 = vmul.f32 %v16567_v63, %v22638_v26  ;;  %v22642_v7 = vld [vmem:[#allocation75_spill] sm:$0xff] }
 0x1eb   : > { %v3071_v22 = vadd.f32 %v2943_v44, %v2279_v23  ;;  %v3073_v17 = vadd.f32 %v2945_v48, %v2281_v29  ;;  %v2278_v51 = vadd.f32 %v2150_v12, %v1486_v16  ;;  %v2280_v49 = vadd.f32 %v2152_v14, %v1488_v10 }
 0x1ec   : > { %3759 = vmatmul.mubr.bf16.gmra.mrb[80].mxu0 %v3426_v56  ;;  %4176 = vmatmul.mubr.bf16.gmra.mrb[80].mxu1 %v3426_v56  ;;  %v2942_v24 = vmul.f32 %v16753_v5, %v2693_v28  ;;  %v2944_v61 = vmul.f32 %v16593_v31, %v2693_v28  ;;  %v1913_v41 = vrot.slane %v22639_v43, %v16239_v38 }
 0x1ed   : > { %v3211_v19 = vadd.f32 %v16808_v47, %v3071_v22  ;;  %v3213_v0 = vadd.f32 %v16810_v46, %v3073_v17  ;;  %v2705_v1 = vrot.slane %v22640_v55, %v16239_v38  ;;  %v15152_v50 = vpack.c.bf16 %v4756_v15, %v4755_v62  ;;  %v22643_v62 = vld [vmem:[#allocation9_spill] sm:$0xff]  ;;  %v22644_v22 = vld [vmem:[#allocation83_spill] sm:$0xff] }
 0x1ee   : > { %v3070_v8 = vadd.f32 %v2942_v24, %v2278_v51  ;;  %v3072_v39 = vadd.f32 %v2944_v61, %v2280_v49  ;;  %v2155_v42 = vmul.f32 %v22628_v60, %v1913_v41  ;;  %v2157_v4 = vmul.f32 %v22629_v54, %v1913_v41 }
 0x1ef   : > { %v3339_v52 = vmax.f32 %v3211_v19, 0.0  ;;  %v3341_v36 = vmax.f32 %v3213_v0, 0.0  ;;  %v2947_v18 = vmul.f32 %v16753_v5, %v2705_v1  ;;  %v2949_v57 = vmul.f32 %v16593_v31, %v2705_v1  ;;  %15153 = vmatprep.subr.bf16.mxu1 %v15152_v50 }
 0x1f0   : > { %v3210_v45 = vadd.f32 %v16808_v47, %v3070_v8  ;;  %v3212_v25 = vadd.f32 %v16810_v46, %v3072_v39  ;;  %v2283_v11 = vadd.f32 %v2155_v42, %v1491_v35  ;;  %v2285_v3 = vadd.f32 %v2157_v4, %v1493_v40  ;;  %15155 = vmatpush3.bf16.msra.mxu1 %v15152_v50 }
 0x1f1   : > { %v3429_v2 = vpack.c.bf16 %v3341_v36, %v3339_v52  ;;  %v1490_v27 = vmul.f32 %v16518_v6, %v22641_v30  ;;  %v1492_v13 = vmul.f32 %v16567_v63, %v22641_v30  ;;  %v1909_v53 = vrot.slane %v22639_v43, %v16221_v33 }
 0x1f2   : > { %v3338_v34 = vmax.f32 %v3210_v45, 0.0  ;;  %v3340_v20 = vmax.f32 %v3212_v25, 0.0  ;;  %v3075_v32 = vadd.f32 %v2947_v18, %v2283_v11  ;;  %v3077_v21 = vadd.f32 %v2949_v57, %v2285_v3 }
 0x1f3   : > { %3766 = vmatprep.mubr.bf16.mxu0 %v3429_v2  ;;  %4183 = vmatprep.mubr.bf16.mxu1 %v3429_v2  ;;  %v2154_v9 = vmul.f32 %v22628_v60, %v1909_v53  ;;  %v2156_v58 = vmul.f32 %v22629_v54, %v1909_v53  ;;  %v2701_v59 = vrot.slane %v22640_v55, %v16221_v33  ;;  %v22646_v53 = vld [vmem:[#allocation11_spill] sm:$0xff] }
 0x1f4   : > { %v3428_v16 = vpack.c.bf16 %v3340_v20, %v3338_v34  ;;  %v3215_v10 = vadd.f32 %v16808_v47, %v3075_v32  ;;  %v3217_v37 = vadd.f32 %v16810_v46, %v3077_v21  ;;  %v1255_v23 = vrot.slane %v22642_v7, %v16239_v38  ;;  %v22647_v21 = vld [vmem:[#allocation85_spill] sm:$0xff] }
 0x1f5   : > { %v2282_v29 = vadd.f32 %v2154_v9, %v1490_v27  ;;  %v2284_v44 = vadd.f32 %v2156_v58, %v1492_v13  ;;  %v2946_v48 = vmul.f32 %v16753_v5, %v2701_v59  ;;  %v2948_v12 = vmul.f32 %v16593_v31, %v2701_v59  ;;  %v22645_v27 = vld [vmem:[#allocation76_spill] sm:$0xff] }
 0x1f6   : > { %3767 = vmatmul.mubr.bf16.gmra.mrb[84].mxu0 %v3428_v16  ;;  %4184 = vmatmul.mubr.bf16.gmra.mrb[84].mxu1 %v3428_v16  ;;  %v3343_v14 = vmax.f32 %v3215_v10, 0.0  ;;  %v3345_v56 = vmax.f32 %v3217_v37, 0.0  ;;  %v1495_v28 = vmul.f32 %v16518_v6, %v1255_v23  ;;  %v1497_v26 = vmul.f32 %v16567_v63, %v1255_v23 }
 0x1f7   : > { %v3074_v35 = vadd.f32 %v2946_v48, %v2282_v29  ;;  %v3076_v40 = vadd.f32 %v2948_v12, %v2284_v44  ;;  %v1921_v15 = vrot.slane %v22643_v62, %v16239_v38  ;;  %v2713_v17 = vrot.slane %v22644_v22, %v16239_v38 }
 0x1f8   : > { %v3431_v51 = vpack.c.bf16 %v3345_v56, %v3343_v14  ;;  %v1251_v49 = vrot.slane %v22642_v7, %v16221_v33  ;;  %v1917_v24 = vrot.slane %v22643_v62, %v16221_v33  ;;  %v2709_v61 = vrot.slane %v22644_v22, %v16221_v33 }
 0x1f9   : > { %v3214_v43 = vadd.f32 %v16808_v47, %v3074_v35  ;;  %v3216_v41 = vadd.f32 %v16810_v46, %v3076_v40  ;;  %v2159_v19 = vmul.f32 %v22628_v60, %v1921_v15  ;;  %v2161_v0 = vmul.f32 %v22629_v54, %v1921_v15 }
 0x1fa   : > { %3774 = vmatprep.mubr.bf16.mxu0 %v3431_v51  ;;  %4191 = vmatprep.mubr.bf16.mxu1 %v3431_v51  ;;  %v2951_v55 = vmul.f32 %v16753_v5, %v2713_v17  ;;  %v2953_v1 = vmul.f32 %v16593_v31, %v2713_v17  ;;  %v1494_v50 = vmul.f32 %v16518_v6, %v1251_v49 }
 0x1fb   : > { %v3342_v8 = vmax.f32 %v3214_v43, 0.0  ;;  %v3344_v39 = vmax.f32 %v3216_v41, 0.0  ;;  %v2287_v42 = vadd.f32 %v2159_v19, %v1495_v28  ;;  %v2289_v4 = vadd.f32 %v2161_v0, %v1497_v26 }
 0x1fc   : > { %v1496_v52 = vmul.f32 %v16567_v63, %v1251_v49  ;;  %v2158_v36 = vmul.f32 %v22628_v60, %v1917_v24  ;;  %v2160_v18 = vmul.f32 %v22629_v54, %v1917_v24  ;;  %v2950_v57 = vmul.f32 %v16753_v5, %v2709_v61 }
 0x1fd   : > { %v3430_v45 = vpack.c.bf16 %v3344_v39, %v3342_v8  ;;  %v3079_v25 = vadd.f32 %v2951_v55, %v2287_v42  ;;  %v3081_v11 = vadd.f32 %v2953_v1, %v2289_v4  ;;  %v2952_v3 = vmul.f32 %v16593_v31, %v2709_v61  ;;  %v22648_v4 = vld [vmem:[#allocation80_spill] sm:$0xff] }
 0x1fe   : > { %v2286_v2 = vadd.f32 %v2158_v36, %v1494_v50  ;;  %v2288_v30 = vadd.f32 %v2160_v18, %v1496_v52  ;;  %v1263_v13 = vrot.slane %v22645_v27, %v16239_v38  ;;  %v1929_v34 = vrot.slane %v22646_v53, %v16239_v38  ;;  %v4356_v36 = vld [vmem:[%s22207_s9 + $0x20] sm:$0xff]  ;;  %v4357_v18 = vld [vmem:[%s22207_s9 + $0x28] sm:$0xff] }
 0x1ff   : > { %3775 = vmatmul.mubr.bf16.gmra.mrb[88].mxu0 %v3430_v45  ;;  %4192 = vmatmul.mubr.bf16.gmra.mrb[88].mxu1 %v3430_v45  ;;  %v3219_v20 = vadd.f32 %v16808_v47, %v3079_v25  ;;  %v3221_v32 = vadd.f32 %v16810_v46, %v3081_v11  ;;  %v2721_v9 = vrot.slane %v22647_v21, %v16239_v38 }
 0x200   : > { %v3078_v58 = vadd.f32 %v2950_v57, %v2286_v2  ;;  %v3080_v59 = vadd.f32 %v2952_v3, %v2288_v30  ;;  %v1499_v16 = vmul.f32 %v16518_v6, %v1263_v13  ;;  %v1501_v10 = vmul.f32 %v16567_v63, %v1263_v13 }
 0x201   : > { %v3347_v37 = vmax.f32 %v3219_v20, 0.0  ;;  %v3349_v7 = vmax.f32 %v3221_v32, 0.0  ;;  %v2163_v23 = vmul.f32 %v22628_v60, %v1929_v34  ;;  %v2165_v29 = vmul.f32 %v22629_v54, %v1929_v34 }
 0x202   : > { %v3218_v44 = vadd.f32 %v16808_v47, %v3078_v58  ;;  %v3220_v48 = vadd.f32 %v16810_v46, %v3080_v59  ;;  %v2955_v12 = vmul.f32 %v16753_v5, %v2721_v9  ;;  %v2957_v14 = vmul.f32 %v16593_v31, %v2721_v9 }
 0x203   : > { %v3433_v56 = vpack.c.bf16 %v3349_v7, %v3347_v37  ;;  %v2291_v28 = vadd.f32 %v2163_v23, %v1499_v16  ;;  %v2293_v26 = vadd.f32 %v2165_v29, %v1501_v10  ;;  %v1259_v35 = vrot.slane %v22645_v27, %v16221_v33 }
 0x204   : > { %v3346_v40 = vmax.f32 %v3218_v44, 0.0  ;;  %v3348_v15 = vmax.f32 %v3220_v48, 0.0  ;;  %v1925_v17 = vrot.slane %v22646_v53, %v16221_v33  ;;  %v2717_v51 = vrot.slane %v22647_v21, %v16221_v33 }
 0x205   : > { %3782 = vmatprep.mubr.bf16.mxu0 %v3433_v56  ;;  %4199 = vmatprep.mubr.bf16.mxu1 %v3433_v56  ;;  %v3083_v49 = vadd.f32 %v2955_v12, %v2291_v28  ;;  %v3085_v24 = vadd.f32 %v2957_v14, %v2293_v26  ;;  %v1498_v61 = vmul.f32 %v16518_v6, %v1259_v35  ;;  %v22649_v28 = vld [vmem:[#allocation91_spill] sm:$0xff] }
 0x206   : > { %v3432_v43 = vpack.c.bf16 %v3348_v15, %v3346_v40  ;;  %v1500_v41 = vmul.f32 %v16567_v63, %v1259_v35  ;;  %v2162_v19 = vmul.f32 %v22628_v60, %v1925_v17  ;;  %v2164_v0 = vmul.f32 %v22629_v54, %v1925_v17 }
 0x207   : > { %v3223_v55 = vadd.f32 %v16808_v47, %v3083_v49  ;;  %v3225_v1 = vadd.f32 %v16810_v46, %v3085_v24  ;;  %v2954_v50 = vmul.f32 %v16753_v5, %v2717_v51  ;;  %v2956_v8 = vmul.f32 %v16593_v31, %v2717_v51  ;;  %v4757_v51 = vld [vmem:[%s22208_s10 + $0x20] sm:$0xff]  ;;  %v4758_v49 = vld [vmem:[%s22208_s10 + $0x28] sm:$0xff] }
 0x208   : > { %3783 = vmatmul.mubr.bf16.gmra.mrb[92].mxu0 %v3432_v43  ;;  %4200 = vmatmul.mubr.bf16.gmra.mrb[92].mxu1 %v3432_v43  ;;  %v2290_v39 = vadd.f32 %v2162_v19, %v1498_v61  ;;  %v2292_v42 = vadd.f32 %v2164_v0, %v1500_v41  ;;  %v1271_v52 = vrot.slane %v22648_v4, %v16239_v38  ;;  %v22650_v0 = vld [vmem:[#allocation6_spill] sm:$0xff] }
 0x209   : > { %v3351_v57 = vmax.f32 %v3223_v55, 0.0  ;;  %v3353_v45 = vmax.f32 %v3225_v1, 0.0  ;;  %v1695_v25 = vcombine.high %v22643_v62, %v22643_v62  ;;  %v2487_v11 = vcombine.high %v22644_v22, %v22644_v22  ;;  %v22651_v1 = vld [vmem:[#allocation96_spill] sm:$0xff] }
 0x20a   : > { %v3082_v3 = vadd.f32 %v2954_v50, %v2290_v39  ;;  %v3084_v2 = vadd.f32 %v2956_v8, %v2292_v42  ;;  %v1503_v30 = vmul.f32 %v16518_v6, %v1271_v52  ;;  %v1505_v27 = vmul.f32 %v16567_v63, %v1271_v52 }
 0x20b   : > { %v3435_v13 = vpack.c.bf16 %v3353_v45, %v3351_v57  ;;  %v1937_v53 = vrot.slane %v1695_v25, %v16239_v38  ;;  %v2729_v34 = vrot.slane %v2487_v11, %v16239_v38  ;;  %v15124_v20 = vpack.c.bf16 %v4357_v18, %v4356_v36 }
 0x20c   : > { %v3222_v32 = vadd.f32 %v16808_v47, %v3082_v3  ;;  %v3224_v21 = vadd.f32 %v16810_v46, %v3084_v2  ;;  %v1267_v62 = vrot.slane %v22648_v4, %v16221_v33  ;;  %v1933_v22 = vrot.slane %v1695_v25, %v16221_v33  ;;  %v22652_v4 = vld [vmem:[#allocation89_spill] sm:$0xff] }
 0x20d   : > { %3790 = vmatprep.mubr.bf16.mxu0 %v3435_v13  ;;  %4207 = vmatprep.mubr.bf16.mxu1 %v3435_v13  ;;  %v2167_v9 = vmul.f32 %v22628_v60, %v1937_v53  ;;  %v2169_v58 = vmul.f32 %v22629_v54, %v1937_v53  ;;  %v2959_v59 = vmul.f32 %v16753_v5, %v2729_v34 }
 0x20e   : > { %v3350_v16 = vmax.f32 %v3222_v32, 0.0  ;;  %v3352_v10 = vmax.f32 %v3224_v21, 0.0  ;;  %v2961_v37 = vmul.f32 %v16593_v31, %v2729_v34  ;;  %15125 = vmatprep.subr.bf16.mxu0 %v15124_v20  ;;  %v1502_v7 = vmul.f32 %v16518_v6, %v1267_v62 }
 0x20f   : > { %v2295_v23 = vadd.f32 %v2167_v9, %v1503_v30  ;;  %v2297_v29 = vadd.f32 %v2169_v58, %v1505_v27  ;;  %15127 = vmatpush3.bf16.msra.mxu0 %v15124_v20  ;;  %v1504_v44 = vmul.f32 %v16567_v63, %v1267_v62  ;;  %v2166_v48 = vmul.f32 %v22628_v60, %v1933_v22  ;;  %v22653_v9 = vld [vmem:[#allocation86_spill] sm:$0xff] }
 0x210   : > { %v3434_v12 = vpack.c.bf16 %v3352_v10, %v3350_v16  ;;  %v2168_v14 = vmul.f32 %v22629_v54, %v1933_v22  ;;  %v2725_v56 = vrot.slane %v2487_v11, %v16221_v33  ;;  %v1507_v26 = vmul.f32 %v16518_v6, %v22649_v28 }
 0x211   : > { %v3087_v35 = vadd.f32 %v2959_v59, %v2295_v23  ;;  %v3089_v40 = vadd.f32 %v2961_v37, %v2297_v29  ;;  %v2294_v15 = vadd.f32 %v2166_v48, %v1502_v7  ;;  %v1509_v17 = vmul.f32 %v16567_v63, %v22649_v28 }
 0x212   : > { %3791 = vmatmul.mubr.bf16.gmra.mrb[96].mxu0 %v3434_v12  ;;  %4208 = vmatmul.mubr.bf16.gmra.mrb[96].mxu1 %v3434_v12  ;;  %v2296_v24 = vadd.f32 %v2168_v14, %v1504_v44  ;;  %v2958_v61 = vmul.f32 %v16753_v5, %v2725_v56  ;;  %v2960_v43 = vmul.f32 %v16593_v31, %v2725_v56 }
 0x213   : > { %v3227_v41 = vadd.f32 %v16808_v47, %v3087_v35  ;;  %v3229_v19 = vadd.f32 %v16810_v46, %v3089_v40  ;;  %v1945_v55 = vrot.slane %v22650_v0, %v16239_v38  ;;  %v2737_v50 = vrot.slane %v22651_v1, %v16239_v38  ;;  %v22655_v40 = vld [vmem:[#allocation98_spill] sm:$0xff] }
 0x214   : > { %v3086_v8 = vadd.f32 %v2958_v61, %v2294_v15  ;;  %v3088_v39 = vadd.f32 %v2960_v43, %v2296_v24  ;;  %v15156_v42 = vpack.c.bf16 %v4758_v49, %v4757_v51  ;;  %v1506_v52 = vmul.f32 %v16518_v6, %v22652_v4 }
 0x215   : > { %v3355_v36 = vmax.f32 %v3227_v41, 0.0  ;;  %v3357_v18 = vmax.f32 %v3229_v19, 0.0  ;;  %v2171_v57 = vmul.f32 %v22628_v60, %v1945_v55  ;;  %v2173_v45 = vmul.f32 %v22629_v54, %v1945_v55 }
 0x216   : > { %v3226_v25 = vadd.f32 %v16808_v47, %v3086_v8  ;;  %v3228_v11 = vadd.f32 %v16810_v46, %v3088_v39  ;;  %v2963_v3 = vmul.f32 %v16753_v5, %v2737_v50  ;;  %v2965_v2 = vmul.f32 %v16593_v31, %v2737_v50  ;;  %15157 = vmatprep.subr.bf16.mxu1 %v15156_v42 }
 0x217   : > { %v3437_v30 = vpack.c.bf16 %v3357_v18, %v3355_v36  ;;  %v2299_v27 = vadd.f32 %v2171_v57, %v1507_v26  ;;  %v2301_v13 = vadd.f32 %v2173_v45, %v1509_v17  ;;  %15159 = vmatpush3.bf16.msra.mxu1 %v15156_v42  ;;  %v1508_v53 = vmul.f32 %v16567_v63, %v22652_v4  ;;  %v22654_v26 = vld [vmem:[#allocation12_spill] sm:$0xff] }
 0x218   : > { %v3354_v34 = vmax.f32 %v3226_v25, 0.0  ;;  %v3356_v20 = vmax.f32 %v3228_v11, 0.0  ;;  %v1941_v32 = vrot.slane %v22650_v0, %v16221_v33  ;;  %v2733_v21 = vrot.slane %v22651_v1, %v16221_v33  ;;  %v22656_v11 = vld [vmem:[#allocation88_spill] sm:$0xff] }
 0x219   : > { %3798 = vmatprep.mubr.bf16.mxu0 %v3437_v30  ;;  %4215 = vmatprep.mubr.bf16.mxu1 %v3437_v30  ;;  %v3091_v62 = vadd.f32 %v2963_v3, %v2299_v27  ;;  %v3093_v22 = vadd.f32 %v2965_v2, %v2301_v13  ;;  %v1287_v58 = vrot.slane %v22653_v9, %v16239_v38  ;;  %v22657_v13 = vld [vmem:[#allocation13_spill] sm:$0xff] }
 0x21a   : > { %v3436_v59 = vpack.c.bf16 %v3356_v20, %v3354_v34  ;;  %v2170_v16 = vmul.f32 %v22628_v60, %v1941_v32  ;;  %v2172_v10 = vmul.f32 %v22629_v54, %v1941_v32  ;;  %v2962_v37 = vmul.f32 %v16753_v5, %v2733_v21 }
 0x21b   : > { %v3231_v7 = vadd.f32 %v16808_v47, %v3091_v62  ;;  %v3233_v23 = vadd.f32 %v16810_v46, %v3093_v22  ;;  %v2964_v29 = vmul.f32 %v16593_v31, %v2733_v21  ;;  %v1511_v44 = vmul.f32 %v16518_v6, %v1287_v58 }
 0x21c   : > { %3799 = vmatmul.mubr.bf16.gmra.mrb[100].mxu0 %v3436_v59  ;;  %4216 = vmatmul.mubr.bf16.gmra.mrb[100].mxu1 %v3436_v59  ;;  %v2298_v48 = vadd.f32 %v2170_v16, %v1506_v52  ;;  %v2300_v12 = vadd.f32 %v2172_v10, %v1508_v53  ;;  %v1513_v14 = vmul.f32 %v16567_v63, %v1287_v58 }
 0x21d   : > { %v3359_v56 = vmax.f32 %v3231_v7, 0.0  ;;  %v3361_v28 = vmax.f32 %v3233_v23, 0.0  ;;  %v1953_v35 = vrot.slane %v22654_v26, %v16239_v38  ;;  %v2745_v15 = vrot.slane %v22655_v40, %v16239_v38  ;;  %v22658_v23 = vld [vmem:[#allocation99_spill] sm:$0xff] }
 0x21e   : > { %v3090_v17 = vadd.f32 %v2962_v37, %v2298_v48  ;;  %v3092_v51 = vadd.f32 %v2964_v29, %v2300_v12  ;;  %v1283_v49 = vrot.slane %v22653_v9, %v16221_v33  ;;  %v1949_v24 = vrot.slane %v22654_v26, %v16221_v33 }
 0x21f   : > { %v3439_v61 = vpack.c.bf16 %v3361_v28, %v3359_v56  ;;  %v2175_v43 = vmul.f32 %v22628_v60, %v1953_v35  ;;  %v2177_v41 = vmul.f32 %v22629_v54, %v1953_v35  ;;  %v2967_v19 = vmul.f32 %v16753_v5, %v2745_v15 }
 0x220   : > { %v3230_v0 = vadd.f32 %v16808_v47, %v3090_v17  ;;  %v3232_v55 = vadd.f32 %v16810_v46, %v3092_v51  ;;  %v2969_v1 = vmul.f32 %v16593_v31, %v2745_v15  ;;  %v1510_v50 = vmul.f32 %v16518_v6, %v1283_v49 }
 0x221   : > { %3806 = vmatprep.mubr.bf16.mxu0 %v3439_v61  ;;  %4223 = vmatprep.mubr.bf16.mxu1 %v3439_v61  ;;  %v2303_v8 = vadd.f32 %v2175_v43, %v1511_v44  ;;  %v2305_v39 = vadd.f32 %v2177_v41, %v1513_v14  ;;  %v1512_v42 = vmul.f32 %v16567_v63, %v1283_v49 }
 0x222   : > { %v3358_v4 = vmax.f32 %v3230_v0, 0.0  ;;  %v3360_v52 = vmax.f32 %v3232_v55, 0.0  ;;  %v2174_v36 = vmul.f32 %v22628_v60, %v1949_v24  ;;  %v2176_v18 = vmul.f32 %v22629_v54, %v1949_v24 }
 0x223   : > { %v3095_v57 = vadd.f32 %v2967_v19, %v2303_v8  ;;  %v3097_v45 = vadd.f32 %v2969_v1, %v2305_v39  ;;  %v2741_v25 = vrot.slane %v22655_v40, %v16221_v33  ;;  %v1295_v3 = vrot.slane %v22656_v11, %v16239_v38 }
 0x224   : > { %v3438_v2 = vpack.c.bf16 %v3360_v52, %v3358_v4  ;;  %v2302_v30 = vadd.f32 %v2174_v36, %v1510_v50  ;;  %v2304_v27 = vadd.f32 %v2176_v18, %v1512_v42  ;;  %v1961_v53 = vrot.slane %v22657_v13, %v16239_v38  ;;  %v22659_v4 = vld [vmem:[#allocation94_spill] sm:$0xff] }
 0x225   : > { %v3235_v34 = vadd.f32 %v16808_v47, %v3095_v57  ;;  %v3237_v20 = vadd.f32 %v16810_v46, %v3097_v45  ;;  %v2966_v32 = vmul.f32 %v16753_v5, %v2741_v25  ;;  %v2968_v21 = vmul.f32 %v16593_v31, %v2741_v25 }
 0x226   : > { %3807 = vmatmul.mubr.bf16.gmra.mrb[104].mxu0 %v3438_v2  ;;  %4224 = vmatmul.mubr.bf16.gmra.mrb[104].mxu1 %v3438_v2  ;;  %v1515_v62 = vmul.f32 %v16518_v6, %v1295_v3  ;;  %v1517_v22 = vmul.f32 %v16567_v63, %v1295_v3  ;;  %v2179_v9 = vmul.f32 %v22628_v60, %v1961_v53  ;;  %v4358_v2 = vld [vmem:[%s22207_s9 + $0x30] sm:$0xff] }
 0x227   : > { %v3363_v58 = vmax.f32 %v3235_v34, 0.0  ;;  %v3365_v59 = vmax.f32 %v3237_v20, 0.0  ;;  %v3094_v16 = vadd.f32 %v2966_v32, %v2302_v30  ;;  %v3096_v10 = vadd.f32 %v2968_v21, %v2304_v27  ;;  %v4359_v30 = vld [vmem:[%s22207_s9 + $0x38] sm:$0xff] }
 0x228   : > { %v2181_v37 = vmul.f32 %v22629_v54, %v1961_v53  ;;  %v2307_v7 = vadd.f32 %v2179_v9, %v1515_v62  ;;  %v2753_v29 = vrot.slane %v22658_v23, %v16239_v38  ;;  %v1291_v44 = vrot.slane %v22656_v11, %v16221_v33 }
 0x229   : > { %v3441_v48 = vpack.c.bf16 %v3365_v59, %v3363_v58  ;;  %v3234_v12 = vadd.f32 %v16808_v47, %v3094_v16  ;;  %v3236_v14 = vadd.f32 %v16810_v46, %v3096_v10  ;;  %v1957_v56 = vrot.slane %v22657_v13, %v16221_v33 }
 0x22a   : > { %v2309_v28 = vadd.f32 %v2181_v37, %v1517_v22  ;;  %v2971_v35 = vmul.f32 %v16753_v5, %v2753_v29  ;;  %v2973_v15 = vmul.f32 %v16593_v31, %v2753_v29  ;;  %v1514_v17 = vmul.f32 %v16518_v6, %v1291_v44 }
 0x22b   : > { %3814 = vmatprep.mubr.bf16.mxu0 %v3441_v48  ;;  %4231 = vmatprep.mubr.bf16.mxu1 %v3441_v48  ;;  %v3362_v51 = vmax.f32 %v3234_v12, 0.0  ;;  %v3364_v49 = vmax.f32 %v3236_v14, 0.0  ;;  %v1516_v24 = vmul.f32 %v16567_v63, %v1291_v44  ;;  %v2178_v61 = vmul.f32 %v22628_v60, %v1957_v56 }
 0x22c   : > { %v3616_v43 = vpop.f32.mrb[8].mxu0  ;;  %v4033_v41 = vpop.f32.mrb[8].mxu1  ;;  %v3099_v19 = vadd.f32 %v2971_v35, %v2307_v7  ;;  %v3101_v0 = vadd.f32 %v2973_v15, %v2309_v28  ;;  %v2180_v55 = vmul.f32 %v22629_v54, %v1957_v56  ;;  %v2749_v1 = vrot.slane %v22658_v23, %v16221_v33 }
 0x22d   : > { %v3618_v50 = vpop.f32.mrb[9].mxu0  ;;  %v4035_v8 = vpop.f32.mrb[9].mxu1  ;;  %v3440_v39 = vpack.c.bf16 %v3364_v49, %v3362_v51  ;;  %v2306_v42 = vadd.f32 %v2178_v61, %v1514_v17  ;;  %v1303_v52 = vrot.slane %v22659_v4, %v16239_v38  ;;  %v1744_v36 = vcombine.high %v22654_v26, %v22654_v26 }
 0x22e   : > { %v3619_v18 = vpop.f32.mrb[10].mxu0  ;;  %v4036_v57 = vpop.f32.mrb[10].mxu1  ;;  %v3239_v45 = vadd.f32 %v16808_v47, %v3099_v19  ;;  %v3241_v25 = vadd.f32 %v16810_v46, %v3101_v0  ;;  %v2308_v11 = vadd.f32 %v2180_v55, %v1516_v24  ;;  %v2970_v3 = vmul.f32 %v16753_v5, %v2749_v1 }
 0x22f   : > { %v3621_v27 = vpop.f32.mrb[11].mxu0  ;;  %v4038_v13 = vpop.f32.mrb[11].mxu1  ;;  %3815 = vmatmul.mubr.bf16.gmra.mrb[108].mxu0 %v3440_v39  ;;  %4232 = vmatmul.mubr.bf16.gmra.mrb[108].mxu1 %v3440_v39  ;;  %v2972_v26 = vmul.f32 %v16593_v31, %v2749_v1  ;;  %v1519_v53 = vmul.f32 %v16518_v6, %v1303_v52  ;;  %v1521_v34 = vmul.f32 %v16567_v63, %v1303_v52  ;;  %v22660_v52 = vld [vmem:[#allocation93_spill] sm:$0xff] }
 0x230   : > { %v3367_v20 = vmax.f32 %v3239_v45, 0.0  ;;  %v3369_v32 = vmax.f32 %v3241_v25, 0.0  ;;  %v3098_v21 = vadd.f32 %v2970_v3, %v2306_v42  ;;  %v1969_v62 = vrot.slane %v1744_v36, %v16239_v38  ;;  %v4760_v3 = vld [vmem:[%s22208_s10 + $0x38] sm:$0xff] }
 0x231   : > { %v3100_v22 = vadd.f32 %v2972_v26, %v2308_v11  ;;  %v2536_v9 = vcombine.high %v22655_v40, %v22655_v40  ;;  %v17537_v58 = vmax.f32 %v3616_v43, %v4033_v41  ;;  %v15128_v59 = vpack.c.bf16 %v4359_v30, %v4358_v2  ;;  %v4759_v11 = vld [vmem:[%s22208_s10 + $0x30] sm:$0xff] }
 0x232   : > { %v3443_v16 = vpack.c.bf16 %v3369_v32, %v3367_v20  ;;  %v3238_v10 = vadd.f32 %v16808_v47, %v3098_v21  ;;  %v2183_v37 = vmul.f32 %v22628_v60, %v1969_v62  ;;  %v2185_v7 = vmul.f32 %v22629_v54, %v1969_v62  ;;  %v22662_v20 = vld [vmem:[#allocation97_spill] sm:$0xff] }
 0x233   : > { %v3240_v23 = vadd.f32 %v16810_v46, %v3100_v22  ;;  %v2761_v29 = vrot.slane %v2536_v9, %v16239_v38  ;;  %15129 = vmatprep.subr.bf16.mxu0 %v15128_v59  ;;  %v17544_v44 = vmax.f32 %v3619_v18, %v4036_v57  ;;  %v1299_v40 = vrot.slane %v22659_v4, %v16221_v33 }
 0x234   : > { %v3624_v48 = vpop.f32.mrb[12].mxu0  ;;  %v4041_v12 = vpop.f32.mrb[12].mxu1  ;;  %3822 = vmatprep.mubr.bf16.mxu0 %v3443_v16  ;;  %4239 = vmatprep.mubr.bf16.mxu1 %v3443_v16  ;;  %v3366_v14 = vmax.f32 %v3238_v10, 0.0  ;;  %v2311_v56 = vadd.f32 %v2183_v37, %v1519_v53  ;;  %v2313_v28 = vadd.f32 %v2185_v7, %v1521_v34  ;;  %v1965_v35 = vrot.slane %v1744_v36, %v16221_v33  ;;  %v22661_v53 = vld [vmem:[#allocation7_spill] sm:$0xff] }
 0x235   : > { %v3626_v15 = vpop.f32.mrb[13].mxu0  ;;  %v4043_v17 = vpop.f32.mrb[13].mxu1  ;;  %v3368_v51 = vmax.f32 %v3240_v23, 0.0  ;;  %v2975_v49 = vmul.f32 %v16753_v5, %v2761_v29  ;;  %v2977_v24 = vmul.f32 %v16593_v31, %v2761_v29  ;;  %15131 = vmatpush3.bf16.msra.mxu0 %v15128_v59  ;;  %v1518_v61 = vmul.f32 %v16518_v6, %v1299_v40 }
 0x236   : > { %v3627_v43 = vpop.f32.mrb[14].mxu0  ;;  %v4044_v41 = vpop.f32.mrb[14].mxu1  ;;  %v1520_v19 = vmul.f32 %v16567_v63, %v1299_v40  ;;  %v2182_v0 = vmul.f32 %v22628_v60, %v1965_v35  ;;  %v2184_v55 = vmul.f32 %v22629_v54, %v1965_v35  ;;  %v2757_v1 = vrot.slane %v2536_v9, %v16221_v33 }
 0x237   : > { %v3629_v50 = vpop.f32.mrb[15].mxu0  ;;  %v4046_v8 = vpop.f32.mrb[15].mxu1  ;;  %v3442_v39 = vpack.c.bf16 %v3368_v51, %v3366_v14  ;;  %v3103_v42 = vadd.f32 %v2975_v49, %v2311_v56  ;;  %v3105_v4 = vadd.f32 %v2977_v24, %v2313_v28  ;;  %v1523_v36 = vmul.f32 %v16518_v6, %v22660_v52 }
 0x238   : > { %v2310_v18 = vadd.f32 %v2182_v0, %v1518_v61  ;;  %v2312_v57 = vadd.f32 %v2184_v55, %v1520_v19  ;;  %v2974_v45 = vmul.f32 %v16753_v5, %v2757_v1  ;;  %v2976_v25 = vmul.f32 %v16593_v31, %v2757_v1  ;;  %v22663_v19 = vld [vmem:[#allocation92_spill] sm:$0xff] }
 0x239   : > { %3823 = vmatmul.mubr.bf16.gmra.mrb[112].mxu0 %v3442_v39  ;;  %4240 = vmatmul.mubr.bf16.gmra.mrb[112].mxu1 %v3442_v39  ;;  %v3243_v2 = vadd.f32 %v16808_v47, %v3103_v42  ;;  %v3245_v30 = vadd.f32 %v16810_v46, %v3105_v4  ;;  %v1525_v27 = vmul.f32 %v16567_v63, %v22660_v52  ;;  %v22664_v4 = vld [vmem:[#allocation87_spill] sm:$0xff] }
 0x23a   : > { %v3102_v13 = vadd.f32 %v2974_v45, %v2310_v18  ;;  %v3104_v26 = vadd.f32 %v2976_v25, %v2312_v57  ;;  %v1977_v34 = vrot.slane %v22661_v53, %v16239_v38  ;;  %v2769_v32 = vrot.slane %v22662_v20, %v16239_v38 }
 0x23b   : > { %v3371_v21 = vmax.f32 %v3243_v2, 0.0  ;;  %v3373_v62 = vmax.f32 %v3245_v30, 0.0  ;;  %v17574_v22 = vmax.f32 %v3624_v48, %v4041_v12  ;;  %v15160_v9 = vpack.c.bf16 %v4760_v3, %v4759_v11 }
 0x23c   : > { %v3632_v59 = vpop.f32.mrb[16].mxu0  ;;  %v4049_v16 = vpop.f32.mrb[16].mxu1  ;;  %v3242_v10 = vadd.f32 %v16808_v47, %v3102_v13  ;;  %v3244_v37 = vadd.f32 %v16810_v46, %v3104_v26  ;;  %v2187_v7 = vmul.f32 %v22628_v60, %v1977_v34  ;;  %v2189_v23 = vmul.f32 %v22629_v54, %v1977_v34 }
 0x23d   : > { %v3634_v29 = vpop.f32.mrb[17].mxu0  ;;  %v4051_v40 = vpop.f32.mrb[17].mxu1  ;;  %v3445_v14 = vpack.c.bf16 %v3373_v62, %v3371_v21  ;;  %v2979_v56 = vmul.f32 %v16753_v5, %v2769_v32  ;;  %v2981_v28 = vmul.f32 %v16593_v31, %v2769_v32  ;;  %15161 = vmatprep.subr.bf16.mxu1 %v15160_v9  ;;  %v17582_v48 = vmax.f32 %v3627_v43, %v4044_v41 }
 0x23e   : > { %v3635_v12 = vpop.f32.mrb[18].mxu0  ;;  %v4052_v35 = vpop.f32.mrb[18].mxu1  ;;  %v3370_v15 = vmax.f32 %v3242_v10, 0.0  ;;  %v3372_v17 = vmax.f32 %v3244_v37, 0.0  ;;  %v2315_v51 = vadd.f32 %v2187_v7, %v1523_v36  ;;  %v2317_v49 = vadd.f32 %v2189_v23, %v1525_v27  ;;  %15163 = vmatpush3.bf16.msra.mxu1 %v15160_v9  ;;  %v22665_v36 = vld [vmem:[#allocation14_spill] sm:$0xff]  ;;  %v22666_v9 = vld [vmem:[#allocation100_spill] sm:$0xff] }
 0x23f   : > { %v3637_v24 = vpop.f32.mrb[19].mxu0  ;;  %v4054_v61 = vpop.f32.mrb[19].mxu1  ;;  %3830 = vmatprep.mubr.bf16.mxu0 %v3445_v14  ;;  %4247 = vmatprep.mubr.bf16.mxu1 %v3445_v14  ;;  %v1522_v0 = vmul.f32 %v16518_v6, %v22663_v19  ;;  %v1524_v55 = vmul.f32 %v16567_v63, %v22663_v19  ;;  %v1973_v43 = vrot.slane %v22661_v53, %v16221_v33 }
 0x240   : > { %v3444_v41 = vpack.c.bf16 %v3372_v17, %v3370_v15  ;;  %v3107_v1 = vadd.f32 %v2979_v56, %v2315_v51  ;;  %v3109_v50 = vadd.f32 %v2981_v28, %v2317_v49  ;;  %v2765_v8 = vrot.slane %v22662_v20, %v16221_v33 }
 0x241   : > { %v2186_v39 = vmul.f32 %v22628_v60, %v1973_v43  ;;  %v2188_v42 = vmul.f32 %v22629_v54, %v1973_v43  ;;  %v1319_v52 = vrot.slane %v22664_v4, %v16239_v38  ;;  %v1985_v18 = vrot.slane %v22665_v36, %v16239_v38 }
 0x242   : > { %3831 = vmatmul.mubr.bf16.gmra.mrb[116].mxu0 %v3444_v41  ;;  %4248 = vmatmul.mubr.bf16.gmra.mrb[116].mxu1 %v3444_v41  ;;  %v3247_v57 = vadd.f32 %v16808_v47, %v3107_v1  ;;  %v3249_v45 = vadd.f32 %v16810_v46, %v3109_v50  ;;  %v2978_v25 = vmul.f32 %v16753_v5, %v2765_v8 }
 0x243   : > { %v2314_v11 = vadd.f32 %v2186_v39, %v1522_v0  ;;  %v2316_v3 = vadd.f32 %v2188_v42, %v1524_v55  ;;  %v2980_v2 = vmul.f32 %v16593_v31, %v2765_v8  ;;  %v1527_v30 = vmul.f32 %v16518_v6, %v1319_v52 }
 0x244   : > { %v3375_v27 = vmax.f32 %v3247_v57, 0.0  ;;  %v3377_v13 = vmax.f32 %v3249_v45, 0.0  ;;  %v1529_v26 = vmul.f32 %v16567_v63, %v1319_v52  ;;  %v2191_v53 = vmul.f32 %v22628_v60, %v1985_v18  ;;  %v17605_v34 = vpop.f32.mrb[20].mxu0  ;;  %v17607_v20 = vpop.f32.mrb[20].mxu1  ;;  %v22667_v45 = vld [vmem:[#allocation90_spill] sm:$0xff] }
 0x245   : > { %v3106_v32 = vadd.f32 %v2978_v25, %v2314_v11  ;;  %v3108_v21 = vadd.f32 %v2980_v2, %v2316_v3  ;;  %v2193_v62 = vmul.f32 %v22629_v54, %v1985_v18  ;;  %v2777_v10 = vrot.slane %v22666_v9, %v16239_v38  ;;  %v3642_v37 = vpop.f32.mrb[21].mxu0  ;;  %v4059_v7 = vpop.f32.mrb[21].mxu1 }
 0x246   : > { %v3447_v23 = vpack.c.bf16 %v3377_v13, %v3375_v27  ;;  %v2319_v29 = vadd.f32 %v2191_v53, %v1527_v30  ;;  %v17612_v40 = vmax.f32 %v3632_v59, %v4049_v16  ;;  %v17614_v14 = vmax.f32 %v3635_v12, %v4052_v35  ;;  %v3643_v56 = vpop.f32.mrb[22].mxu0  ;;  %v4060_v28 = vpop.f32.mrb[22].mxu1  ;;  %v22668_v27 = vld [vmem:[#allocation15_spill] sm:$0xff] }
 0x247   : > { %v3246_v15 = vadd.f32 %v16808_v47, %v3106_v32  ;;  %v3248_v17 = vadd.f32 %v16810_v46, %v3108_v21  ;;  %v2321_v51 = vadd.f32 %v2193_v62, %v1529_v26  ;;  %v2983_v49 = vmul.f32 %v16753_v5, %v2777_v10  ;;  %v3645_v24 = vpop.f32.mrb[23].mxu0  ;;  %v4062_v61 = vpop.f32.mrb[23].mxu1  ;;  %v22669_v26 = vld [vmem:[#allocation101_spill] sm:$0xff] }
 0x248   : > { %3838 = vmatprep.mubr.bf16.mxu0 %v3447_v23  ;;  %4255 = vmatprep.mubr.bf16.mxu1 %v3447_v23  ;;  %v2985_v19 = vmul.f32 %v16593_v31, %v2777_v10  ;;  %v1315_v59 = vrot.slane %v22664_v4, %v16221_v33  ;;  %v1981_v16 = vrot.slane %v22665_v36, %v16221_v33 }
 0x249   : > { %v3374_v12 = vmax.f32 %v3246_v15, 0.0  ;;  %v3376_v35 = vmax.f32 %v3248_v17, 0.0  ;;  %v3111_v0 = vadd.f32 %v2983_v49, %v2319_v29  ;;  %v2773_v55 = vrot.slane %v22666_v9, %v16221_v33 }
 0x24a   : > { %v3113_v43 = vadd.f32 %v2985_v19, %v2321_v51  ;;  %v1526_v41 = vmul.f32 %v16518_v6, %v1315_v59  ;;  %v1528_v1 = vmul.f32 %v16567_v63, %v1315_v59  ;;  %v2190_v50 = vmul.f32 %v22628_v60, %v1981_v16 }
 0x24b   : > { %v3446_v8 = vpack.c.bf16 %v3376_v35, %v3374_v12  ;;  %v3251_v39 = vadd.f32 %v16808_v47, %v3111_v0  ;;  %v2192_v42 = vmul.f32 %v22629_v54, %v1981_v16  ;;  %v2982_v4 = vmul.f32 %v16753_v5, %v2773_v55  ;;  %v4360_v35 = vld [vmem:[%s22207_s9 + $0x40] sm:$0xff]  ;;  %v4361_v0 = vld [vmem:[%s22207_s9 + $0x48] sm:$0xff] }
 0x24c   : > { %v3253_v52 = vadd.f32 %v16810_v46, %v3113_v43  ;;  %v2318_v18 = vadd.f32 %v2190_v50, %v1526_v41  ;;  %v2984_v57 = vmul.f32 %v16593_v31, %v2773_v55  ;;  %v1327_v25 = vrot.slane %v22667_v45, %v16239_v38  ;;  %v17636_v11 = vpop.f32.mrb[24].mxu0  ;;  %v17638_v3 = vpop.f32.mrb[24].mxu1 }
 0x24d   : > { %3839 = vmatmul.mubr.bf16.gmra.mrb[120].mxu0 %v3446_v8  ;;  %4256 = vmatmul.mubr.bf16.gmra.mrb[120].mxu1 %v3446_v8  ;;  %v3379_v2 = vmax.f32 %v3251_v39, 0.0  ;;  %v2320_v30 = vadd.f32 %v2192_v42, %v1528_v1  ;;  %v1993_v13 = vrot.slane %v22668_v27, %v16239_v38  ;;  %v2785_v53 = vrot.slane %v22669_v26, %v16239_v38  ;;  %v3650_v32 = vpop.f32.mrb[25].mxu0  ;;  %v4067_v21 = vpop.f32.mrb[25].mxu1 }
 0x24e   : > { %v3381_v62 = vmax.f32 %v3253_v52, 0.0  ;;  %v3110_v10 = vadd.f32 %v2982_v4, %v2318_v18  ;;  %v1531_v37 = vmul.f32 %v16518_v6, %v1327_v25  ;;  %v1533_v7 = vmul.f32 %v16567_v63, %v1327_v25  ;;  %v17646_v23 = vpop.f32.mrb[26].mxu0  ;;  %v17648_v29 = vpop.f32.mrb[26].mxu1 }
 0x24f   : > { %v3112_v15 = vadd.f32 %v2984_v57, %v2320_v30  ;;  %v2195_v17 = vmul.f32 %v22628_v60, %v1993_v13  ;;  %v2197_v51 = vmul.f32 %v22629_v54, %v1993_v13  ;;  %v2987_v49 = vmul.f32 %v16753_v5, %v2785_v53  ;;  %v3653_v24 = vpop.f32.mrb[27].mxu0  ;;  %v4070_v61 = vpop.f32.mrb[27].mxu1 }
 0x250   : > { %v3449_v19 = vpack.c.bf16 %v3381_v62, %v3379_v2  ;;  %v3250_v59 = vadd.f32 %v16808_v47, %v3110_v10  ;;  %v2989_v16 = vmul.f32 %v16593_v31, %v2785_v53  ;;  %v17657_v12 = vmax.f32 %v17605_v34, %v17607_v20  ;;  %v22670_v24 = vld [vmem:[#allocation95_spill] sm:$0xff] }
 0x251   : > { %v3252_v55 = vadd.f32 %v16810_v46, %v3112_v15  ;;  %v2323_v43 = vadd.f32 %v2195_v17, %v1531_v37  ;;  %v2325_v41 = vadd.f32 %v2197_v51, %v1533_v7  ;;  %v17666_v1 = vmax.f32 %v3643_v56, %v4060_v28  ;;  %v4761_v56 = vld [vmem:[%s22208_s10 + $0x40] sm:$0xff]  ;;  %v4762_v28 = vld [vmem:[%s22208_s10 + $0x48] sm:$0xff] }
 0x252   : > { %3846 = vmatprep.mubr.bf16.mxu0 %v3449_v19  ;;  %4263 = vmatprep.mubr.bf16.mxu1 %v3449_v19  ;;  %v3378_v50 = vmax.f32 %v3250_v59, 0.0  ;;  %v1323_v34 = vrot.slane %v22667_v45, %v16221_v33  ;;  %v1989_v20 = vrot.slane %v22668_v27, %v16221_v33  ;;  %v2781_v8 = vrot.slane %v22669_v26, %v16221_v33  ;;  %v4362_v59 = vld [vmem:[%s22207_s9 + $0x50] sm:$0xff] }
 0x253   : > { %v3380_v39 = vmax.f32 %v3252_v55, 0.0  ;;  %v3115_v42 = vadd.f32 %v2987_v49, %v2323_v43  ;;  %v3117_v4 = vadd.f32 %v2989_v16, %v2325_v41  ;;  %v15132_v52 = vpack.c.bf16 %v4361_v0, %v4360_v35  ;;  %v4363_v16 = vld [vmem:[%s22207_s9 + $0x58] sm:$0xff] }
 0x254   : > { %v1530_v18 = vmul.f32 %v16518_v6, %v1323_v34  ;;  %v1532_v57 = vmul.f32 %v16567_v63, %v1323_v34  ;;  %v2194_v45 = vmul.f32 %v22628_v60, %v1989_v20  ;;  %v2196_v25 = vmul.f32 %v22629_v54, %v1989_v20  ;;  %v17684_v2 = vpop.f32.mrb[28].mxu0  ;;  %v17686_v30 = vpop.f32.mrb[28].mxu1  ;;  %v4764_v34 = vld [vmem:[%s22208_s10 + $0x58] sm:$0xff] }
 0x255   : > { %v3448_v27 = vpack.c.bf16 %v3380_v39, %v3378_v50  ;;  %v3255_v13 = vadd.f32 %v16808_v47, %v3115_v42  ;;  %v3257_v26 = vadd.f32 %v16810_v46, %v3117_v4  ;;  %v2986_v53 = vmul.f32 %v16753_v5, %v2781_v8  ;;  %15133 = vmatprep.subr.bf16.mxu0 %v15132_v52  ;;  %v3658_v32 = vpop.f32.mrb[29].mxu0  ;;  %v4075_v21 = vpop.f32.mrb[29].mxu1 }
 0x256   : > { %v2322_v62 = vadd.f32 %v2194_v45, %v1530_v18  ;;  %v2324_v10 = vadd.f32 %v2196_v25, %v1532_v57  ;;  %v2988_v37 = vmul.f32 %v16593_v31, %v2781_v8  ;;  %v15164_v7 = vpack.c.bf16 %v4762_v28, %v4761_v56  ;;  %15135 = vmatpush3.bf16.msra.mxu0 %v15132_v52  ;;  %v17692_v15 = vpop.f32.mrb[30].mxu0  ;;  %v17694_v17 = vpop.f32.mrb[30].mxu1  ;;  %v4364_v18 = vld [vmem:[%s22207_s9 + $0x60] sm:$0xff]  ;;  %v4365_v57 = vld [vmem:[%s22207_s9 + $0x68] sm:$0xff] }
 0x257   : > { %3847 = vmatmul.mubr.bf16.gmra.mrb[124].mxu0 %v3448_v27  ;;  %4264 = vmatmul.mubr.bf16.gmra.mrb[124].mxu1 %v3448_v27  ;;  %v3383_v51 = vmax.f32 %v3255_v13, 0.0  ;;  %v3385_v49 = vmax.f32 %v3257_v26, 0.0  ;;  %v1335_v61 = vrot.slane %v22670_v24, %v16239_v38  ;;  %v1745_v19 = vcombine.high %v22665_v36, %v22665_v36  ;;  %v3661_v35 = vpop.f32.mrb[31].mxu0  ;;  %v4078_v0 = vpop.f32.mrb[31].mxu1  ;;  %v4763_v36 = vld [vmem:[%s22208_s10 + $0x50] sm:$0xff]  ;;  %v4765_v13 = vld [vmem:[%s22208_s10 + $0x60] sm:$0xff] }
 0x258   : > { %v3114_v55 = vadd.f32 %v2986_v53, %v2322_v62  ;;  %v3116_v43 = vadd.f32 %v2988_v37, %v2324_v10  ;;  %15165 = vmatprep.subr.bf16.mxu1 %v15164_v7  ;;  %v2537_v41 = vcombine.high %v22666_v9, %v22666_v9  ;;  %v17710_v50 = vmax.f32 %v17636_v11, %v17638_v3  ;;  %v4766_v26 = vld [vmem:[%s22208_s10 + $0x68] sm:$0xff] }
 0x259   : > { %v3451_v20 = vpack.c.bf16 %v3385_v49, %v3383_v51  ;;  %v1535_v8 = vmul.f32 %v16518_v6, %v1335_v61  ;;  %v1537_v39 = vmul.f32 %v16567_v63, %v1335_v61  ;;  %v2001_v42 = vrot.slane %v1745_v19, %v16239_v38  ;;  %15167 = vmatpush3.bf16.msra.mxu1 %v15164_v7 }
 0x25a   : > { %v3254_v9 = vadd.f32 %v16808_v47, %v3114_v55  ;;  %v3256_v11 = vadd.f32 %v16810_v46, %v3116_v43  ;;  %v2793_v3 = vrot.slane %v2537_v41, %v16239_v38  ;;  %v15136_v4 = vpack.c.bf16 %v4363_v16, %v4362_v59 }
 0x25b   : > { %3854 = vmatprep.mubr.bf16.mxu0 %v3451_v20  ;;  %4271 = vmatprep.mubr.bf16.mxu1 %v3451_v20  ;;  %v2199_v52 = vmul.f32 %v22628_v60, %v2001_v42  ;;  %v2201_v56 = vmul.f32 %v22629_v54, %v2001_v42  ;;  %v15168_v28 = vpack.c.bf16 %v4764_v34, %v4763_v36 }
 0x25c   : > { %v3382_v45 = vmax.f32 %v3254_v9, 0.0  ;;  %v3384_v25 = vmax.f32 %v3256_v11, 0.0  ;;  %v2991_v38 = vmul.f32 %v16753_v5, %v2793_v3  ;;  %v2993_v27 = vmul.f32 %v16593_v31, %v2793_v3  ;;  %15137 = vmatprep.subr.bf16.mxu0 %v15136_v4  ;;  %v3664_v53 = vpop.f32.mrb[32].mxu0  ;;  %v4081_v32 = vpop.f32.mrb[32].mxu1 }
 0x25d   : > { %v2327_v21 = vadd.f32 %v2199_v52, %v1535_v8  ;;  %v2329_v62 = vadd.f32 %v2201_v56, %v1537_v39  ;;  %15169 = vmatprep.subr.bf16.mxu1 %v15168_v28  ;;  %v17742_v10 = vmax.f32 %v17646_v23, %v17648_v29  ;;  %15139 = vmatpush3.bf16.msra.mxu0 %v15136_v4  ;;  %v3666_v37 = vpop.f32.mrb[33].mxu0  ;;  %v4083_v7 = vpop.f32.mrb[33].mxu1 }
 0x25e   : > { %v3450_v51 = vpack.c.bf16 %v3384_v25, %v3382_v45  ;;  %15171 = vmatpush3.bf16.msra.mxu1 %v15168_v28  ;;  %v1331_v49 = vrot.slane %v22670_v24, %v16221_v33  ;;  %v1997_v61 = vrot.slane %v1745_v19, %v16221_v33  ;;  %v2789_v59 = vrot.slane %v2537_v41, %v16221_v33  ;;  %v3667_v16 = vpop.f32.mrb[34].mxu0  ;;  %v4084_v35 = vpop.f32.mrb[34].mxu1  ;;  %v4366_v33 = vld [vmem:[%s22207_s9 + $0x70] sm:$0xff]  ;;  %v4367_v19 = vld [vmem:[%s22207_s9 + $0x78] sm:$0xff] }
 0x25f   : > { %v3119_v0 = vadd.f32 %v2991_v38, %v2327_v21  ;;  %v3121_v55 = vadd.f32 %v2993_v27, %v2329_v62  ;;  %v15140_v43 = vpack.c.bf16 %v4365_v57, %v4364_v18  ;;  %v15172_v36 = vpack.c.bf16 %v4766_v26, %v4765_v13  ;;  %v3669_v23 = vpop.f32.mrb[35].mxu0  ;;  %v4086_v29 = vpop.f32.mrb[35].mxu1 }
 0x260   : > { %3855 = vmatmul.mubr.bf16.gmra.mrb[128].mxu0 %v3450_v51  ;;  %4272 = vmatmul.mubr.bf16.gmra.mrb[128].mxu1 %v3450_v51  ;;  %v1534_v34 = vmul.f32 %v16518_v6, %v1331_v49  ;;  %v1536_v20 = vmul.f32 %v16567_v63, %v1331_v49  ;;  %v2198_v24 = vmul.f32 %v22628_v60, %v1997_v61  ;;  %v4767_v63 = vld [vmem:[%s22208_s10 + $0x70] sm:$0xff]  ;;  %v4768_v60 = vld [vmem:[%s22208_s10 + $0x78] sm:$0xff] }
 0x261   : > { %v3259_v41 = vadd.f32 %v16808_v47, %v3119_v0  ;;  %v3261_v8 = vadd.f32 %v16810_v46, %v3121_v55  ;;  %v2200_v39 = vmul.f32 %v22629_v54, %v1997_v61  ;;  %v2990_v6 = vmul.f32 %v16753_v5, %v2789_v59  ;;  %15141 = vmatprep.subr.bf16.mxu0 %v15140_v43 }
 0x262   : > { %v2326_v42 = vadd.f32 %v2198_v24, %v1534_v34  ;;  %v2992_v9 = vmul.f32 %v16593_v31, %v2789_v59  ;;  %15173 = vmatprep.subr.bf16.mxu1 %v15172_v36  ;;  %15143 = vmatpush3.bf16.msra.mxu0 %v15140_v43  ;;  %v17770_v11 = vmax.f32 %v17684_v2, %v17686_v30 }
 0x263   : > { %v3387_v54 = vmax.f32 %v3259_v41, 0.0  ;;  %v3389_v5 = vmax.f32 %v3261_v8, 0.0  ;;  %v2328_v3 = vadd.f32 %v2200_v39, %v1536_v20  ;;  %15175 = vmatpush3.bf16.msra.mxu1 %v15172_v36  ;;  %v15144_v4 = vpack.c.bf16 %v4367_v19, %v4366_v33 }
 0x264   : > { %v3118_v52 = vadd.f32 %v2990_v6, %v2326_v42  ;;  %v15176_v56 = vpack.c.bf16 %v4768_v60, %v4767_v63  ;;  %v17774_v28 = vmax.f32 %v17692_v15, %v17694_v17  ;;  %v17776_v18 = vmax.f32 %v3664_v53, %v4081_v32  ;;  %v3672_v31 = vpop.f32.mrb[36].mxu0  ;;  %v4089_v57 = vpop.f32.mrb[36].mxu1 }
 0x265   : > { %v3453_v45 = vpack.c.bf16 %v3389_v5, %v3387_v54  ;;  %v3120_v25 = vadd.f32 %v2992_v9, %v2328_v3  ;;  %15145 = vmatprep.subr.bf16.mxu0 %v15144_v4  ;;  %v17778_v2 = vmax.f32 %v3667_v16, %v4084_v35  ;;  %v17780_v30 = vmax.f32 %v3672_v31, %v4089_v57  ;;  %v3674_v38 = vpop.f32.mrb[37].mxu0  ;;  %v4091_v27 = vpop.f32.mrb[37].mxu1 }
 0x266   : > { %v3258_v13 = vadd.f32 %v16808_v47, %v3118_v52  ;;  %15177 = vmatprep.subr.bf16.mxu1 %v15176_v56  ;;  %15147 = vmatpush3.bf16.msra.mxu0 %v15144_v4  ;;  %v3675_v26 = vpop.f32.mrb[38].mxu0  ;;  %v4092_v15 = vpop.f32.mrb[38].mxu1 }
 0x267   : > { %3862 = vmatprep.mubr.bf16.mxu0 %v3453_v45  ;;  %4279 = vmatprep.mubr.bf16.mxu1 %v3453_v45  ;;  %v3260_v17 = vadd.f32 %v16810_v46, %v3120_v25  ;;  %v17784_v53 = vmax.f32 %v3675_v26, %v4092_v15  ;;  %v3677_v32 = vpop.f32.mrb[39].mxu0  ;;  %v4094_v21 = vpop.f32.mrb[39].mxu1 }
 0x268   : > { %v3386_v62 = vmax.f32 %v3258_v13, 0.0  ;;  %15179 = vmatpush3.bf16.msra.mxu1 %v15176_v56 }
 0x269   : > { %v3388_v37 = vmax.f32 %v3260_v17, 0.0 }
 0x26b   : > { %v3452_v7 = vpack.c.bf16 %v3388_v37, %v3386_v62 }
 0x26c   : > { %v3680_v51 = vpop.f32.mrb[40].mxu0  ;;  %v4097_v49 = vpop.f32.mrb[40].mxu1 }
 0x26d   : > { %3863 = vmatmul.mubr.bf16.gmra.mrb[132].mxu0 %v3452_v7  ;;  %4280 = vmatmul.mubr.bf16.gmra.mrb[132].mxu1 %v3452_v7  ;;  %v17786_v47 = vmax.f32 %v3680_v51, %v4097_v49  ;;  %v3682_v61 = vpop.f32.mrb[41].mxu0  ;;  %v4099_v59 = vpop.f32.mrb[41].mxu1 }
 0x26e   : > { %14136 = vmatprep.mubr.f32.mxu0 %v17537_v58  ;;  %14264 = vmatprep.mubr.f32.mxu1 %v17537_v58  ;;  %v3683_v46 = vpop.f32.mrb[42].mxu0  ;;  %v4100_v16 = vpop.f32.mrb[42].mxu1 }
 0x26f   : > { %v17790_v35 = vmax.f32 %v3683_v46, %v4100_v16  ;;  %v3685_v0 = vpop.f32.mrb[43].mxu0  ;;  %v4102_v55 = vpop.f32.mrb[43].mxu1 }
 0x274   : > { %v3688_v43 = vpop.f32.mrb[44].mxu0  ;;  %v4105_v36 = vpop.f32.mrb[44].mxu1 }
 0x275   : > { %14137 = vmatmul.mubr.f32.vlgmr.msra.gmra.mrb[136].mxu0 %v17544_v44  ;;  %14265 = vmatmul.mubr.f32.vlgmr.msra.gmra.mrb[136].mxu1 %v17544_v44  ;;  %v17794_v23 = vmax.f32 %v3688_v43, %v4105_v36  ;;  %v3690_v29 = vpop.f32.mrb[45].mxu0  ;;  %v4107_v34 = vpop.f32.mrb[45].mxu1 }
 0x276   : > { %14139 = vmatprep.mubr.f32.mxu0 %v17574_v22  ;;  %14267 = vmatprep.mubr.f32.mxu1 %v17574_v22  ;;  %v3691_v20 = vpop.f32.mrb[46].mxu0  ;;  %v4108_v24 = vpop.f32.mrb[46].mxu1 }
 0x277   : > { %v17798_v33 = vmax.f32 %v3691_v20, %v4108_v24  ;;  %v3693_v19 = vpop.f32.mrb[47].mxu0  ;;  %v4110_v41 = vpop.f32.mrb[47].mxu1 }
 0x279   : > { %14140 = vmatmul.mubr.f32.gmra.mrb[138].mxu0 %v17582_v48  ;;  %14268 = vmatmul.mubr.f32.gmra.mrb[138].mxu1 %v17582_v48 }
 0x27a   : > { %14142 = vmatprep.mubr.f32.mxu0 %v17612_v40  ;;  %14270 = vmatprep.mubr.f32.mxu1 %v17612_v40 }
 0x27c   : > { %v3696_v8 = vpop.f32.mrb[48].mxu0  ;;  %v4113_v39 = vpop.f32.mrb[48].mxu1 }
 0x27d   : > { %14143 = vmatmul.mubr.f32.gmra.mrb[140].mxu0 %v17614_v14  ;;  %14271 = vmatmul.mubr.f32.gmra.mrb[140].mxu1 %v17614_v14  ;;  %v17806_v6 = vmax.f32 %v3696_v8, %v4113_v39  ;;  %v3698_v63 = vpop.f32.mrb[49].mxu0  ;;  %v4115_v60 = vpop.f32.mrb[49].mxu1 }
 0x27e   : > { %14145 = vmatprep.mubr.f32.mxu0 %v17657_v12  ;;  %14273 = vmatprep.mubr.f32.mxu1 %v17657_v12  ;;  %v3699_v42 = vpop.f32.mrb[50].mxu0  ;;  %v4116_v9 = vpop.f32.mrb[50].mxu1 }
 0x27f   : > { %v17810_v54 = vmax.f32 %v3699_v42, %v4116_v9  ;;  %v3701_v5 = vpop.f32.mrb[51].mxu0  ;;  %v4118_v3 = vpop.f32.mrb[51].mxu1 }
 0x281   : > { %14146 = vmatmul.mubr.f32.gmra.mrb[142].mxu0 %v17666_v1  ;;  %14274 = vmatmul.mubr.f32.gmra.mrb[142].mxu1 %v17666_v1 }
 0x282   : > { %14148 = vmatprep.mubr.f32.mxu0 %v17710_v50  ;;  %14276 = vmatprep.mubr.f32.mxu1 %v17710_v50 }
 0x284   : > { %v3704_v4 = vpop.f32.mrb[52].mxu0  ;;  %v4121_v52 = vpop.f32.mrb[52].mxu1 }
 0x285   : > { %14149 = vmatmul.mubr.f32.gmra.mrb[144].mxu0 %v17742_v10  ;;  %14277 = vmatmul.mubr.f32.gmra.mrb[144].mxu1 %v17742_v10  ;;  %v17818_v56 = vmax.f32 %v3704_v4, %v4121_v52  ;;  %v3706_v31 = vpop.f32.mrb[53].mxu0  ;;  %v4123_v57 = vpop.f32.mrb[53].mxu1 }
 0x286   : > { %14151 = vmatprep.mubr.f32.mxu0 %v17770_v11  ;;  %14279 = vmatprep.mubr.f32.mxu1 %v17770_v11  ;;  %v3707_v45 = vpop.f32.mrb[54].mxu0  ;;  %v4124_v25 = vpop.f32.mrb[54].mxu1 }
 0x287   : > { %v17822_v38 = vmax.f32 %v3707_v45, %v4124_v25  ;;  %v3709_v27 = vpop.f32.mrb[55].mxu0  ;;  %v4126_v13 = vpop.f32.mrb[55].mxu1 }
 0x289   : > { %14152 = vmatmul.mubr.f32.gmra.mrb[146].mxu0 %v17774_v28  ;;  %14280 = vmatmul.mubr.f32.gmra.mrb[146].mxu1 %v17774_v28 }
 0x28a   : > { %14154 = vmatprep.mubr.f32.mxu0 %v17776_v18  ;;  %14282 = vmatprep.mubr.f32.mxu1 %v17776_v18 }
 0x28c   : > { %v3712_v26 = vpop.f32.mrb[56].mxu0  ;;  %v4129_v15 = vpop.f32.mrb[56].mxu1 }
 0x28d   : > { %14155 = vmatmul.mubr.f32.gmra.mrb[148].mxu0 %v17778_v2  ;;  %14283 = vmatmul.mubr.f32.gmra.mrb[148].mxu1 %v17778_v2  ;;  %v17830_v17 = vmax.f32 %v3712_v26, %v4129_v15  ;;  %v3714_v32 = vpop.f32.mrb[57].mxu0  ;;  %v4131_v21 = vpop.f32.mrb[57].mxu1 }
 0x28e   : > { %14157 = vmatprep.mubr.f32.mxu0 %v17780_v30  ;;  %14285 = vmatprep.mubr.f32.mxu1 %v17780_v30  ;;  %v3715_v62 = vpop.f32.mrb[58].mxu0  ;;  %v4132_v37 = vpop.f32.mrb[58].mxu1 }
 0x28f   : > { %v17834_v7 = vmax.f32 %v3715_v62, %v4132_v37  ;;  %v3717_v51 = vpop.f32.mrb[59].mxu0  ;;  %v4134_v49 = vpop.f32.mrb[59].mxu1 }
 0x291   : > { %14158 = vmatmul.mubr.f32.gmra.mrb[150].mxu0 %v17784_v53  ;;  %14286 = vmatmul.mubr.f32.gmra.mrb[150].mxu1 %v17784_v53 }
 0x292   : > { %14160 = vmatprep.mubr.f32.mxu0 %v17786_v47  ;;  %14288 = vmatprep.mubr.f32.mxu1 %v17786_v47 }
 0x294   : > { %v3720_v61 = vpop.f32.mrb[60].mxu0  ;;  %v4137_v59 = vpop.f32.mrb[60].mxu1 }
 0x295   : > { %14161 = vmatmul.mubr.f32.gmra.mrb[152].mxu0 %v17790_v35  ;;  %14289 = vmatmul.mubr.f32.gmra.mrb[152].mxu1 %v17790_v35  ;;  %v17842_v46 = vmax.f32 %v3720_v61, %v4137_v59  ;;  %v3722_v16 = vpop.f32.mrb[61].mxu0  ;;  %v4139_v0 = vpop.f32.mrb[61].mxu1 }
 0x296   : > { %14163 = vmatprep.mubr.f32.mxu0 %v17794_v23  ;;  %14291 = vmatprep.mubr.f32.mxu1 %v17794_v23  ;;  %v3723_v55 = vpop.f32.mrb[62].mxu0  ;;  %v4140_v43 = vpop.f32.mrb[62].mxu1 }
 0x297   : > { %v17846_v36 = vmax.f32 %v3723_v55, %v4140_v43  ;;  %v3725_v29 = vpop.f32.mrb[63].mxu0  ;;  %v4142_v34 = vpop.f32.mrb[63].mxu1 }
 0x299   : > { %14164 = vmatmul.mubr.f32.gmra.mrb[154].mxu0 %v17798_v33  ;;  %14292 = vmatmul.mubr.f32.gmra.mrb[154].mxu1 %v17798_v33 }
 0x29a   : > { %14166 = vmatprep.mubr.f32.mxu0 %v17806_v6  ;;  %14294 = vmatprep.mubr.f32.mxu1 %v17806_v6 }
 0x29c   : > { %v3728_v20 = vpop.f32.mrb[64].mxu0  ;;  %v4145_v24 = vpop.f32.mrb[64].mxu1 }
 0x29d   : > { %14167 = vmatmul.mubr.f32.gmra.mrb[156].mxu0 %v17810_v54  ;;  %14295 = vmatmul.mubr.f32.gmra.mrb[156].mxu1 %v17810_v54  ;;  %v17854_v19 = vmax.f32 %v3728_v20, %v4145_v24  ;;  %v3730_v41 = vpop.f32.mrb[65].mxu0  ;;  %v4147_v8 = vpop.f32.mrb[65].mxu1 }
 0x29e   : > { %14169 = vmatprep.mubr.f32.mxu0 %v17818_v56  ;;  %14297 = vmatprep.mubr.f32.mxu1 %v17818_v56  ;;  %v3731_v39 = vpop.f32.mrb[66].mxu0  ;;  %v4148_v63 = vpop.f32.mrb[66].mxu1 }
 0x29f   : > { %v17858_v60 = vmax.f32 %v3731_v39, %v4148_v63  ;;  %v3733_v42 = vpop.f32.mrb[67].mxu0  ;;  %v4150_v9 = vpop.f32.mrb[67].mxu1 }
 0x2a1   : > { %14170 = vmatmul.mubr.f32.gmra.mrb[158].mxu0 %v17822_v38  ;;  %14298 = vmatmul.mubr.f32.gmra.mrb[158].mxu1 %v17822_v38 }
 0x2a2   : > { %14172 = vmatprep.mubr.f32.mxu0 %v17830_v17  ;;  %14300 = vmatprep.mubr.f32.mxu1 %v17830_v17 }
 0x2a4   : > { %v3736_v5 = vpop.f32.mrb[68].mxu0  ;;  %v4153_v3 = vpop.f32.mrb[68].mxu1 }
 0x2a5   : > { %14173 = vmatmul.mubr.f32.gmra.mrb[160].mxu0 %v17834_v7  ;;  %14301 = vmatmul.mubr.f32.gmra.mrb[160].mxu1 %v17834_v7  ;;  %v17866_v4 = vmax.f32 %v3736_v5, %v4153_v3  ;;  %v3738_v52 = vpop.f32.mrb[69].mxu0  ;;  %v4155_v31 = vpop.f32.mrb[69].mxu1 }
 0x2a6   : > { %14175 = vmatprep.mubr.f32.mxu0 %v17842_v46  ;;  %14303 = vmatprep.mubr.f32.mxu1 %v17842_v46  ;;  %v3739_v57 = vpop.f32.mrb[70].mxu0  ;;  %v4156_v45 = vpop.f32.mrb[70].mxu1 }
 0x2a7   : > { %v17870_v25 = vmax.f32 %v3739_v57, %v4156_v45  ;;  %v3741_v27 = vpop.f32.mrb[71].mxu0  ;;  %v4158_v13 = vpop.f32.mrb[71].mxu1 }
 0x2a9   : > { %14176 = vmatmul.mubr.f32.gmra.mrb[162].mxu0 %v17846_v36  ;;  %14304 = vmatmul.mubr.f32.gmra.mrb[162].mxu1 %v17846_v36 }
 0x2aa   : > { %14178 = vmatprep.mubr.f32.mxu0 %v17854_v19  ;;  %14306 = vmatprep.mubr.f32.mxu1 %v17854_v19 }
 0x2ad   : > { %14179 = vmatmul.mubr.f32.gmra.mrb[164].mxu0 %v17858_v60  ;;  %14307 = vmatmul.mubr.f32.gmra.mrb[164].mxu1 %v17858_v60  ;;  %v3744_v26 = vpop.f32.mrb[72].mxu0  ;;  %v4161_v15 = vpop.f32.mrb[72].mxu1 }
 0x2ae   : > { %14181 = vmatprep.mubr.f32.mxu0 %v17866_v4  ;;  %14309 = vmatprep.mubr.f32.mxu1 %v17866_v4  ;;  %v17880_v32 = vmax.f32 %v3744_v26, %v4161_v15  ;;  %v3746_v21 = vpop.f32.mrb[73].mxu0  ;;  %v4163_v62 = vpop.f32.mrb[73].mxu1 }
 0x2af   : > { %v3747_v37 = vpop.f32.mrb[74].mxu0  ;;  %v4164_v51 = vpop.f32.mrb[74].mxu1 }
 0x2b0   : > { %v17882_v49 = vmax.f32 %v3747_v37, %v4164_v51  ;;  %v3749_v61 = vpop.f32.mrb[75].mxu0  ;;  %v4166_v59 = vpop.f32.mrb[75].mxu1 }
 0x2b1   : > { %14182 = vmatmul.mubr.f32.gmra.mrb[166].mxu0 %v17870_v25  ;;  %14310 = vmatmul.mubr.f32.gmra.mrb[166].mxu1 %v17870_v25 }
 0x2b2   : > { %14184 = vmatprep.mubr.f32.mxu0 %v17880_v32  ;;  %14312 = vmatprep.mubr.f32.mxu1 %v17880_v32 }
 0x2b5   : > { %14185 = vmatmul.mubr.f32.gmra.mrb[168].mxu0 %v17882_v49  ;;  %14313 = vmatmul.mubr.f32.gmra.mrb[168].mxu1 %v17882_v49 }
 0x2b6   : > { %v3752_v16 = vpop.f32.mrb[76].mxu0  ;;  %v4169_v0 = vpop.f32.mrb[76].mxu1 }
 0x2b7   : > { %v17890_v55 = vmax.f32 %v3752_v16, %v4169_v0  ;;  %v3754_v43 = vpop.f32.mrb[77].mxu0  ;;  %v4171_v29 = vpop.f32.mrb[77].mxu1 }
 0x2b8   : > { %v3755_v34 = vpop.f32.mrb[78].mxu0  ;;  %v4172_v20 = vpop.f32.mrb[78].mxu1 }
 0x2b9   : > { %v17892_v24 = vmax.f32 %v3755_v34, %v4172_v20  ;;  %v3757_v41 = vpop.f32.mrb[79].mxu0  ;;  %v4174_v8 = vpop.f32.mrb[79].mxu1  ;;  %14187 = vmatprep.mubr.f32.mxu0 %v17890_v55  ;;  %14315 = vmatprep.mubr.f32.mxu1 %v17890_v55 }
 0x2bb   : > { %14188 = vmatmul.mubr.f32.gmra.mrb[170].mxu0 %v17892_v24  ;;  %14316 = vmatmul.mubr.f32.gmra.mrb[170].mxu1 %v17892_v24 }
 0x2bf   : > { %v3760_v39 = vpop.f32.mrb[80].mxu0  ;;  %v4177_v63 = vpop.f32.mrb[80].mxu1 }
 0x2c0   : > { %v17898_v42 = vmax.f32 %v3760_v39, %v4177_v63  ;;  %v3762_v9 = vpop.f32.mrb[81].mxu0  ;;  %v4179_v5 = vpop.f32.mrb[81].mxu1 }
 0x2c1   : > { %v3763_v3 = vpop.f32.mrb[82].mxu0  ;;  %v4180_v52 = vpop.f32.mrb[82].mxu1 }
 0x2c2   : > { %v17900_v31 = vmax.f32 %v3763_v3, %v4180_v52  ;;  %v3765_v57 = vpop.f32.mrb[83].mxu0  ;;  %v4182_v45 = vpop.f32.mrb[83].mxu1  ;;  %14190 = vmatprep.mubr.f32.mxu0 %v17898_v42  ;;  %14318 = vmatprep.mubr.f32.mxu1 %v17898_v42 }
 0x2c4   : > { %14191 = vmatmul.mubr.f32.gmra.mrb[172].mxu0 %v17900_v31  ;;  %14319 = vmatmul.mubr.f32.gmra.mrb[172].mxu1 %v17900_v31 }
 0x2c9   : > { %v3768_v27 = vpop.f32.mrb[84].mxu0  ;;  %v4185_v13 = vpop.f32.mrb[84].mxu1 }
 0x2ca   : > { %v17906_v26 = vmax.f32 %v3768_v27, %v4185_v13  ;;  %v3770_v15 = vpop.f32.mrb[85].mxu0  ;;  %v4187_v21 = vpop.f32.mrb[85].mxu1 }
 0x2cb   : > { %v3771_v62 = vpop.f32.mrb[86].mxu0  ;;  %v4188_v37 = vpop.f32.mrb[86].mxu1 }
 0x2cc   : > { %v17908_v51 = vmax.f32 %v3771_v62, %v4188_v37  ;;  %v3773_v61 = vpop.f32.mrb[87].mxu0  ;;  %v4190_v59 = vpop.f32.mrb[87].mxu1  ;;  %14193 = vmatprep.mubr.f32.mxu0 %v17906_v26  ;;  %14321 = vmatprep.mubr.f32.mxu1 %v17906_v26 }
 0x2ce   : > { %14194 = vmatmul.mubr.f32.gmra.mrb[174].mxu0 %v17908_v51  ;;  %14322 = vmatmul.mubr.f32.gmra.mrb[174].mxu1 %v17908_v51 }
 0x2d2   : > { %v3776_v16 = vpop.f32.mrb[88].mxu0  ;;  %v4193_v0 = vpop.f32.mrb[88].mxu1 }
 0x2d3   : > { %v17914_v43 = vmax.f32 %v3776_v16, %v4193_v0  ;;  %v3778_v29 = vpop.f32.mrb[89].mxu0  ;;  %v4195_v34 = vpop.f32.mrb[89].mxu1 }
 0x2d4   : > { %v3779_v20 = vpop.f32.mrb[90].mxu0  ;;  %v4196_v41 = vpop.f32.mrb[90].mxu1 }
 0x2d5   : > { %v17916_v8 = vmax.f32 %v3779_v20, %v4196_v41  ;;  %v3781_v39 = vpop.f32.mrb[91].mxu0  ;;  %v4198_v63 = vpop.f32.mrb[91].mxu1  ;;  %14196 = vmatprep.mubr.f32.mxu0 %v17914_v43  ;;  %14324 = vmatprep.mubr.f32.mxu1 %v17914_v43 }
 0x2d7   : > { %14197 = vmatmul.mubr.f32.gmra.mrb[176].mxu0 %v17916_v8  ;;  %14325 = vmatmul.mubr.f32.gmra.mrb[176].mxu1 %v17916_v8 }
 0x2db   : > { %v3784_v9 = vpop.f32.mrb[92].mxu0  ;;  %v4201_v5 = vpop.f32.mrb[92].mxu1 }
 0x2dc   : > { %v17922_v3 = vmax.f32 %v3784_v9, %v4201_v5  ;;  %v3786_v52 = vpop.f32.mrb[93].mxu0  ;;  %v4203_v57 = vpop.f32.mrb[93].mxu1 }
 0x2dd   : > { %v3787_v45 = vpop.f32.mrb[94].mxu0  ;;  %v4204_v27 = vpop.f32.mrb[94].mxu1 }
 0x2de   : > { %v17924_v13 = vmax.f32 %v3787_v45, %v4204_v27  ;;  %v3789_v15 = vpop.f32.mrb[95].mxu0  ;;  %v4206_v21 = vpop.f32.mrb[95].mxu1  ;;  %14199 = vmatprep.mubr.f32.mxu0 %v17922_v3  ;;  %14327 = vmatprep.mubr.f32.mxu1 %v17922_v3 }
 0x2e0   : > { %14200 = vmatmul.mubr.f32.gmra.mrb[178].mxu0 %v17924_v13  ;;  %14328 = vmatmul.mubr.f32.gmra.mrb[178].mxu1 %v17924_v13 }
 0x2e5   : > { %v3792_v62 = vpop.f32.mrb[96].mxu0  ;;  %v4209_v37 = vpop.f32.mrb[96].mxu1 }
 0x2e6   : > { %v17930_v61 = vmax.f32 %v3792_v62, %v4209_v37  ;;  %v3794_v59 = vpop.f32.mrb[97].mxu0  ;;  %v4211_v16 = vpop.f32.mrb[97].mxu1 }
 0x2e7   : > { %v3795_v0 = vpop.f32.mrb[98].mxu0  ;;  %v4212_v29 = vpop.f32.mrb[98].mxu1 }
 0x2e8   : > { %v17932_v34 = vmax.f32 %v3795_v0, %v4212_v29  ;;  %v3797_v20 = vpop.f32.mrb[99].mxu0  ;;  %v4214_v41 = vpop.f32.mrb[99].mxu1  ;;  %14202 = vmatprep.mubr.f32.mxu0 %v17930_v61  ;;  %14330 = vmatprep.mubr.f32.mxu1 %v17930_v61 }
 0x2ea   : > { %14203 = vmatmul.mubr.f32.gmra.mrb[180].mxu0 %v17932_v34  ;;  %14331 = vmatmul.mubr.f32.gmra.mrb[180].mxu1 %v17932_v34 }
 0x2ef   : > { %v3800_v39 = vpop.f32.mrb[100].mxu0  ;;  %v4217_v63 = vpop.f32.mrb[100].mxu1 }
 0x2f0   : > { %v17938_v9 = vmax.f32 %v3800_v39, %v4217_v63  ;;  %v3802_v5 = vpop.f32.mrb[101].mxu0  ;;  %v4219_v52 = vpop.f32.mrb[101].mxu1 }
 0x2f1   : > { %v3803_v57 = vpop.f32.mrb[102].mxu0  ;;  %v4220_v45 = vpop.f32.mrb[102].mxu1 }
 0x2f2   : > { %22671 = vst [vmem:[#allocation17_spill] sm:$0xff] %v17938_v9  ;;  %v17940_v27 = vmax.f32 %v3803_v57, %v4220_v45  ;;  %v3805_v15 = vpop.f32.mrb[103].mxu0  ;;  %v4222_v21 = vpop.f32.mrb[103].mxu1  ;;  %14205 = vmatprep.mubr.f32.mxu0 %v17938_v9  ;;  %14333 = vmatprep.mubr.f32.mxu1 %v17938_v9 }
 0x2f4   : > { %22672 = vst [vmem:[#allocation61_spill] sm:$0xff] %v17940_v27  ;;  %14206 = vmatmul.mubr.f32.gmra.mrb[182].mxu0 %v17940_v27  ;;  %14334 = vmatmul.mubr.f32.gmra.mrb[182].mxu1 %v17940_v27 }
 0x2f9   : > { %v3808_v62 = vpop.f32.mrb[104].mxu0  ;;  %v4225_v37 = vpop.f32.mrb[104].mxu1 }
 0x2fa   : > { %v17946_v59 = vmax.f32 %v3808_v62, %v4225_v37  ;;  %v3810_v16 = vpop.f32.mrb[105].mxu0  ;;  %v4227_v0 = vpop.f32.mrb[105].mxu1 }
 0x2fb   : > { %v3811_v29 = vpop.f32.mrb[106].mxu0  ;;  %v4228_v20 = vpop.f32.mrb[106].mxu1 }
 0x2fc   : > { %22673 = vst [vmem:[#allocation18_spill] sm:$0xff] %v17946_v59  ;;  %v17948_v41 = vmax.f32 %v3811_v29, %v4228_v20  ;;  %v3813_v39 = vpop.f32.mrb[107].mxu0  ;;  %v4230_v63 = vpop.f32.mrb[107].mxu1  ;;  %14208 = vmatprep.mubr.f32.mxu0 %v17946_v59  ;;  %14336 = vmatprep.mubr.f32.mxu1 %v17946_v59 }
 0x2fe   : > { %22674 = vst [vmem:[#allocation59_spill] sm:$0xff] %v17948_v41  ;;  %14209 = vmatmul.mubr.f32.gmra.mrb[184].mxu0 %v17948_v41  ;;  %14337 = vmatmul.mubr.f32.gmra.mrb[184].mxu1 %v17948_v41 }
 0x302   : > { %v3816_v5 = vpop.f32.mrb[108].mxu0  ;;  %v4233_v52 = vpop.f32.mrb[108].mxu1 }
 0x303   : > { %v17954_v57 = vmax.f32 %v3816_v5, %v4233_v52  ;;  %v3818_v45 = vpop.f32.mrb[109].mxu0  ;;  %v4235_v15 = vpop.f32.mrb[109].mxu1 }
 0x304   : > { %v3819_v21 = vpop.f32.mrb[110].mxu0  ;;  %v4236_v62 = vpop.f32.mrb[110].mxu1 }
 0x305   : > { %22675 = vst [vmem:[#allocation19_spill] sm:$0xff] %v17954_v57  ;;  %v17956_v37 = vmax.f32 %v3819_v21, %v4236_v62  ;;  %v3821_v16 = vpop.f32.mrb[111].mxu0  ;;  %v4238_v0 = vpop.f32.mrb[111].mxu1  ;;  %14211 = vmatprep.mubr.f32.mxu0 %v17954_v57  ;;  %14339 = vmatprep.mubr.f32.mxu1 %v17954_v57 }
 0x307   : > { %22676 = vst [vmem:[#allocation20_spill] sm:$0xff] %v17956_v37  ;;  %14212 = vmatmul.mubr.f32.gmra.mrb[186].mxu0 %v17956_v37  ;;  %14340 = vmatmul.mubr.f32.gmra.mrb[186].mxu1 %v17956_v37 }
 0x30c   : > { %v3824_v29 = vpop.f32.mrb[112].mxu0  ;;  %v4241_v20 = vpop.f32.mrb[112].mxu1 }
 0x30d   : > { %v17962_v39 = vmax.f32 %v3824_v29, %v4241_v20  ;;  %v3826_v63 = vpop.f32.mrb[113].mxu0  ;;  %v4243_v5 = vpop.f32.mrb[113].mxu1 }
 0x30e   : > { %v3827_v52 = vpop.f32.mrb[114].mxu0  ;;  %v4244_v45 = vpop.f32.mrb[114].mxu1 }
 0x30f   : > { %22677 = vst [vmem:[#allocation62_spill] sm:$0xff] %v17962_v39  ;;  %v17964_v15 = vmax.f32 %v3827_v52, %v4244_v45  ;;  %v3829_v21 = vpop.f32.mrb[115].mxu0  ;;  %v4246_v62 = vpop.f32.mrb[115].mxu1  ;;  %14214 = vmatprep.mubr.f32.mxu0 %v17962_v39  ;;  %14342 = vmatprep.mubr.f32.mxu1 %v17962_v39 }
 0x311   : > { %22678 = vst [vmem:[#allocation21_spill] sm:$0xff] %v17964_v15  ;;  %14215 = vmatmul.mubr.f32.gmra.mrb[188].mxu0 %v17964_v15  ;;  %14343 = vmatmul.mubr.f32.gmra.mrb[188].mxu1 %v17964_v15 }
 0x315   : > { %v3832_v16 = vpop.f32.mrb[116].mxu0  ;;  %v4249_v0 = vpop.f32.mrb[116].mxu1 }
 0x316   : > { %v17970_v29 = vmax.f32 %v3832_v16, %v4249_v0  ;;  %v3834_v20 = vpop.f32.mrb[117].mxu0  ;;  %v4251_v63 = vpop.f32.mrb[117].mxu1 }
 0x317   : > { %v3835_v5 = vpop.f32.mrb[118].mxu0  ;;  %v4252_v37 = vpop.f32.mrb[118].mxu1 }
 0x318   : > { %22679 = vst [vmem:[#allocation22_spill] sm:$0xff] %v17970_v29  ;;  %v17972_v52 = vmax.f32 %v3835_v5, %v4252_v37  ;;  %v3837_v45 = vpop.f32.mrb[119].mxu0  ;;  %v4254_v21 = vpop.f32.mrb[119].mxu1  ;;  %14217 = vmatprep.mubr.f32.mxu0 %v17970_v29  ;;  %14345 = vmatprep.mubr.f32.mxu1 %v17970_v29 }
 0x31a   : > { %22680 = vst [vmem:[#allocation23_spill] sm:$0xff] %v17972_v52  ;;  %14218 = vmatmul.mubr.f32.gmra.mrb[190].mxu0 %v17972_v52  ;;  %14346 = vmatmul.mubr.f32.gmra.mrb[190].mxu1 %v17972_v52 }
 0x320   : > { %v3840_v62 = vpop.f32.mrb[120].mxu0  ;;  %v4257_v15 = vpop.f32.mrb[120].mxu1 }
 0x321   : > { %v17978_v16 = vmax.f32 %v3840_v62, %v4257_v15  ;;  %v3842_v0 = vpop.f32.mrb[121].mxu0  ;;  %v4259_v20 = vpop.f32.mrb[121].mxu1 }
 0x322   : > { %v3843_v63 = vpop.f32.mrb[122].mxu0  ;;  %v4260_v39 = vpop.f32.mrb[122].mxu1 }
 0x323   : > { %22681 = vst [vmem:[#allocation24_spill] sm:$0xff] %v17978_v16  ;;  %v17980_v37 = vmax.f32 %v3843_v63, %v4260_v39  ;;  %v3845_v5 = vpop.f32.mrb[123].mxu0  ;;  %v4262_v45 = vpop.f32.mrb[123].mxu1  ;;  %14220 = vmatprep.mubr.f32.mxu0 %v17978_v16  ;;  %14348 = vmatprep.mubr.f32.mxu1 %v17978_v16 }
 0x325   : > { %22682 = vst [vmem:[#allocation60_spill] sm:$0xff] %v17980_v37  ;;  %14221 = vmatmul.mubr.f32.gmra.mrb[192].mxu0 %v17980_v37  ;;  %14349 = vmatmul.mubr.f32.gmra.mrb[192].mxu1 %v17980_v37 }
 0x32a   : > { %v3848_v21 = vpop.f32.mrb[124].mxu0  ;;  %v4265_v52 = vpop.f32.mrb[124].mxu1 }
 0x32b   : > { %v17986_v15 = vmax.f32 %v3848_v21, %v4265_v52  ;;  %v3850_v62 = vpop.f32.mrb[125].mxu0  ;;  %v4267_v0 = vpop.f32.mrb[125].mxu1 }
 0x32c   : > { %v3851_v20 = vpop.f32.mrb[126].mxu0  ;;  %v4268_v29 = vpop.f32.mrb[126].mxu1 }
 0x32d   : > { %22683 = vst [vmem:[#allocation25_spill] sm:$0xff] %v17986_v15  ;;  %v17988_v39 = vmax.f32 %v3851_v20, %v4268_v29  ;;  %v3853_v63 = vpop.f32.mrb[127].mxu0  ;;  %v4270_v5 = vpop.f32.mrb[127].mxu1  ;;  %14223 = vmatprep.mubr.f32.mxu0 %v17986_v15  ;;  %14351 = vmatprep.mubr.f32.mxu1 %v17986_v15 }
 0x32f   : > { %22684 = vst [vmem:[#allocation26_spill] sm:$0xff] %v17988_v39  ;;  %14224 = vmatmul.mubr.f32.gmra.mrb[194].mxu0 %v17988_v39  ;;  %14352 = vmatmul.mubr.f32.gmra.mrb[194].mxu1 %v17988_v39 }
 0x333   : > { %v3856_v45 = vpop.f32.mrb[128].mxu0  ;;  %v4273_v37 = vpop.f32.mrb[128].mxu1 }
 0x334   : > { %v17994_v52 = vmax.f32 %v3856_v45, %v4273_v37  ;;  %v3858_v21 = vpop.f32.mrb[129].mxu0  ;;  %v4275_v62 = vpop.f32.mrb[129].mxu1 }
 0x335   : > { %v3859_v0 = vpop.f32.mrb[130].mxu0  ;;  %v4276_v16 = vpop.f32.mrb[130].mxu1 }
 0x336   : > { %22685 = vst [vmem:[#allocation27_spill] sm:$0xff] %v17994_v52  ;;  %v17996_v29 = vmax.f32 %v3859_v0, %v4276_v16  ;;  %v3861_v20 = vpop.f32.mrb[131].mxu0  ;;  %v4278_v63 = vpop.f32.mrb[131].mxu1  ;;  %14226 = vmatprep.mubr.f32.mxu0 %v17994_v52  ;;  %14354 = vmatprep.mubr.f32.mxu1 %v17994_v52  ;;  %v15239_v16 = vld [vmem:[%s22205_s7] sm:$0xff]  }
 0x337   : > { %v15241_v0 = vld [vmem:[%s22205_s7 + $0x20] sm:$0xff]  }
 0x338   : > { %22686 = vst [vmem:[#allocation28_spill] sm:$0xff] %v17996_v29  ;;  %14227 = vmatmul.mubr.f32.gmra.mrb[196].mxu0 %v17996_v29  ;;  %14355 = vmatmul.mubr.f32.gmra.mrb[196].mxu1 %v17996_v29 }
 0x340   : > { %v3864_v5 = vpop.f32.mrb[132].mxu0  ;;  %v4281_v39 = vpop.f32.mrb[132].mxu1 }
 0x341   : > { %v18002_v37 = vmax.f32 %v3864_v5, %v4281_v39  ;;  %v3866_v45 = vpop.f32.mrb[133].mxu0  ;;  %v4283_v21 = vpop.f32.mrb[133].mxu1 }
 0x342   : > { %v3867_v62 = vpop.f32.mrb[134].mxu0  ;;  %v4284_v15 = vpop.f32.mrb[134].mxu1 }
 0x343   : > { %22687 = vst [vmem:[#allocation29_spill] sm:$0xff] %v18002_v37  ;;  %v18010_v20 = vmax.f32 %v3867_v62, %v4284_v15  ;;  %v3869_v63 = vpop.f32.mrb[135].mxu0  ;;  %v4286_v29 = vpop.f32.mrb[135].mxu1  ;;  %14229 = vmatprep.mubr.f32.mxu0 %v18002_v37  ;;  %14357 = vmatprep.mubr.f32.mxu1 %v18002_v37  ;;  %v5186_v37 = vpack.c.bf16 %v17544_v44, %v17537_v58  ;;  %v15240_v44 = vld [vmem:[%s22205_s7 + $0x8] sm:$0xff]  }
 0x344   : > { %v5188_v58 = vpack.c.bf16 %v17614_v14, %v17612_v40  ;;  %v5187_v40 = vpack.c.bf16 %v17582_v48, %v17574_v22 }
 0x345   : > { %22688 = vst [vmem:[#allocation30_spill] sm:$0xff] %v18010_v20  ;;  %14230 = vmatmul.mubr.f32.gmra.mrb[198].mxu0 %v18010_v20  ;;  %14358 = vmatmul.mubr.f32.gmra.mrb[198].mxu1 %v18010_v20 }
 0x346   : > { %14366 = vmatprep.mubr.msk.bf16.mxu1 %vm5412_vm0, %v15239_v16  ;;  %14386 = vmatprep.mubr.msk.bf16.mxu0 %vm5412_vm0, %v15241_v0 }
 0x348   : > { %v14138_v39 = vpop.f32.mrb[136].mxu0  ;;  %v14266_v5 = vpop.f32.mrb[136].mxu1 }
 0x349   : > { %v4434_v45 = vpop.f32.mrb[137].mxu0  ;;  %v4835_v15 = vpop.f32.mrb[137].mxu1 }
 0x34a   : > { %v5154_v21 = vpack.c.bf16 %v14138_v39, %v4434_v45  ;;  %v5218_v62 = vpack.c.bf16 %v14266_v5, %v4835_v15 }
 0x34c   : > { %v14141_v29 = vpop.f32.mrb[138].mxu0  ;;  %v14269_v63 = vpop.f32.mrb[138].mxu1  ;;  %14360 = vmatprep.subr.bf16.mxu1 %v5154_v21 }
 0x34d   : > { %v4444_v52 = vpop.f32.mrb[139].mxu0  ;;  %v4845_v57 = vpop.f32.mrb[139].mxu1  ;;  %14361 = vmatpush3.bf16.msra.mxu1 %v5154_v21 }
 0x34e   : > { %v5155_v20 = vpack.c.bf16 %v14141_v29, %v4444_v52  ;;  %v5219_v27 = vpack.c.bf16 %v14269_v63, %v4845_v57  ;;  %14362 = vmatprep.subr.bf16.mxu1 %v5186_v37 }
 0x350   : > { %v14144_v16 = vpop.f32.mrb[140].mxu0  ;;  %v14272_v0 = vpop.f32.mrb[140].mxu1 }
 0x351   : > { %v4454_v9 = vpop.f32.mrb[141].mxu0  ;;  %v4855_v41 = vpop.f32.mrb[141].mxu1  ;;  %14363 = vmatpush3.bf16.msra.mxu1 %v5186_v37 }
 0x352   : > { %v5156_v59 = vpack.c.bf16 %v14144_v16, %v4454_v9  ;;  %v5220_v39 = vpack.c.bf16 %v14272_v0, %v4855_v41  ;;  %14364 = vmatprep.subr.bf16.mxu1 %v5218_v62  ;;  %v15243_v9 = vld [vmem:[%s22205_s7 + $0x10] sm:$0xff]   ;;  %v15242_v0 = vld [vmem:[%s22205_s7 + $0x28] sm:$0xff]  }
 0x354   : > { %v14147_v5 = vpop.f32.mrb[142].mxu0  ;;  %v14275_v45 = vpop.f32.mrb[142].mxu1  ;;  %14380 = vmatprep.subr.bf16.mxu0 %v5156_v59 }
 0x355   : > { %v4464_v57 = vpop.f32.mrb[143].mxu0  ;;  %v4865_v52 = vpop.f32.mrb[143].mxu1  ;;  %14365 = vmatpush3.bf16.msra.mxu1 %v5218_v62  ;;  %14381 = vmatpush3.bf16.msra.mxu0 %v5156_v59 }
 0x356   : > { %v5157_v15 = vpack.c.bf16 %v14147_v5, %v4464_v57  ;;  %v18025_v21 = vpack.c.bf16 %v14275_v45, %v4865_v52  ;;  %14370 = vmatprep.subr.bf16.mxu1 %v5155_v20  ;;  %14382 = vmatprep.subr.bf16.mxu0 %v5188_v58  ;;  %v5190_v57 = vpack.c.bf16 %v17742_v10, %v17710_v50 }
 0x357   : > { %v5189_v10 = vpack.c.bf16 %v17666_v1, %v17657_v12 }
 0x358   : > { %v14150_v41 = vpop.f32.mrb[144].mxu0  ;;  %v14278_v37 = vpop.f32.mrb[144].mxu1  ;;  %14367 = vmatmul.mubr.msk.bf16.vlgmr.msra.gmra.mrb[200].mxu1 %vm5412_vm0, %v15240_v44 }
 0x359   : > { %v4474_v14 = vpop.f32.mrb[145].mxu0  ;;  %v4875_v29 = vpop.f32.mrb[145].mxu1  ;;  %14371 = vmatpush3.bf16.msra.mxu1 %v5155_v20  ;;  %14383 = vmatpush3.bf16.msra.mxu0 %v5188_v58  ;;  %v15245_v20 = vld [vmem:[%s22205_s7 + $0x40] sm:$0xff]  }
 0x35a   : > { %v5158_v59 = vpack.c.bf16 %v14150_v41, %v4474_v14  ;;  %v5222_v62 = vpack.c.bf16 %v14278_v37, %v4875_v29  ;;  %14372 = vmatprep.subr.bf16.mxu1 %v5187_v40  ;;  %14384 = vmatprep.subr.bf16.mxu0 %v5220_v39 }
 0x35b   : > { %14376 = vmatprep.mubr.msk.bf16.mxu1 %vm5412_vm0, %v15243_v9 }
 0x35c   : > { %v14153_v63 = vpop.f32.mrb[146].mxu0  ;;  %v14281_v16 = vpop.f32.mrb[146].mxu1 }
 0x35d   : > { %v4484_v5 = vpop.f32.mrb[147].mxu0  ;;  %v4885_v45 = vpop.f32.mrb[147].mxu1  ;;  %14373 = vmatpush3.bf16.msra.mxu1 %v5187_v40  ;;  %14385 = vmatpush3.bf16.msra.mxu0 %v5220_v39  ;;  %v15244_v39 = vld [vmem:[%s22205_s7 + $0x18] sm:$0xff]   ;;  %v15247_v40 = vld [vmem:[%s22205_s7 + $0x30] sm:$0xff]  }
 0x35e   : > { %v18037_v22 = vpack.c.bf16 %v14153_v63, %v4484_v5  ;;  %v18039_v48 = vpack.c.bf16 %v14281_v16, %v4885_v45  ;;  %14374 = vmatprep.subr.bf16.mxu1 %v5219_v27  ;;  %14400 = vmatprep.subr.bf16.mxu0 %v5158_v59  ;;  %v15246_v5 = vld [vmem:[%s22205_s7 + $0x48] sm:$0xff]  }
 0x360   : > { %v14156_v58 = vpop.f32.mrb[148].mxu0  ;;  %v14284_v44 = vpop.f32.mrb[148].mxu1  ;;  %14387 = vmatmul.mubr.msk.bf16.vlgmr.msra.gmra.mrb[200].mxu0 %vm5412_vm0, %v15242_v0 }
 0x361   : > { %v4494_v52 = vpop.f32.mrb[149].mxu0  ;;  %v4895_v9 = vpop.f32.mrb[149].mxu1  ;;  %14375 = vmatpush3.bf16.msra.mxu1 %v5219_v27  ;;  %14401 = vmatpush3.bf16.msra.mxu0 %v5158_v59 }
 0x362   : > { %v5160_v41 = vpack.c.bf16 %v14156_v58, %v4494_v52  ;;  %v5224_v37 = vpack.c.bf16 %v14284_v44, %v4895_v9  ;;  %14390 = vmatprep.subr.bf16.mxu1 %v5157_v15  ;;  %14402 = vmatprep.subr.bf16.mxu0 %v5190_v57 }
 0x363   : > { %14406 = vmatprep.mubr.msk.bf16.mxu0 %vm5412_vm0, %v15245_v20  ;;  %v15249_v20 = vld [vmem:[%s22205_s7 + $0x60] sm:$0xff]  }
 0x364   : > { %v14159_v14 = vpop.f32.mrb[150].mxu0  ;;  %v14287_v50 = vpop.f32.mrb[150].mxu1  ;;  %14377 = vmatmul.mubr.msk.bf16.vlgmr.msra.gmra.mrb[204].mxu1 %vm5412_vm0, %v15244_v39 }
 0x365   : > { %v4504_v29 = vpop.f32.mrb[151].mxu0  ;;  %v4905_v27 = vpop.f32.mrb[151].mxu1  ;;  %14391 = vmatpush3.bf16.msra.mxu1 %v5157_v15  ;;  %14403 = vmatpush3.bf16.msra.mxu0 %v5190_v57  ;;  %v5192_v57 = vpack.c.bf16 %v17778_v2, %v17776_v18  ;;  %v15251_v18 = vld [vmem:[%s22205_s7 + $0x50] sm:$0xff]  }
 0x366   : > { %v18057_v59 = vpack.c.bf16 %v14159_v14, %v4504_v29  ;;  %v18059_v63 = vpack.c.bf16 %v14287_v50, %v4905_v27  ;;  %14392 = vmatprep.subr.bf16.mxu1 %v5189_v10  ;;  %14404 = vmatprep.subr.bf16.mxu0 %v5222_v62 }
 0x367   : > { %14396 = vmatprep.mubr.msk.bf16.mxu1 %vm5412_vm0, %v15247_v40 }
 0x368   : > { %v14162_v16 = vpop.f32.mrb[152].mxu0  ;;  %v14290_v0 = vpop.f32.mrb[152].mxu1 }
 0x369   : > { %v4514_v45 = vpop.f32.mrb[153].mxu0  ;;  %v4915_v12 = vpop.f32.mrb[153].mxu1  ;;  %14393 = vmatpush3.bf16.msra.mxu1 %v5189_v10  ;;  %14405 = vmatpush3.bf16.msra.mxu0 %v5222_v62  ;;  %v15248_v62 = vld [vmem:[%s22205_s7 + $0x38] sm:$0xff]  }
 0x36a   : > { %v5162_v1 = vpack.c.bf16 %v14162_v16, %v4514_v45  ;;  %v18065_v15 = vpack.c.bf16 %v14290_v0, %v4915_v12  ;;  %14394 = vmatprep.subr.bf16.mxu1 %v18025_v21  ;;  %14420 = vmatprep.subr.bf16.mxu0 %v5160_v41  ;;  %v15250_v0 = vld [vmem:[%s22205_s7 + $0x68] sm:$0xff]   ;;  %v15253_v45 = vld [vmem:[%s22205_s7 + $0x80] sm:$0xff]   ;;  %v5194_v12 = vpack.c.bf16 %v17790_v35, %v17786_v47  ;;  %v15255_v47 = vld [vmem:[%s22205_s7 + $0x70] sm:$0xff]  }
 0x36b   : > { %v5193_v35 = vpack.c.bf16 %v17784_v53, %v17780_v30  ;;  %v15254_v30 = vld [vmem:[%s22205_s7 + $0x88] sm:$0xff]  }
 0x36c   : > { %v14165_v58 = vpop.f32.mrb[154].mxu0  ;;  %v14293_v44 = vpop.f32.mrb[154].mxu1  ;;  %14407 = vmatmul.mubr.msk.bf16.vlgmr.msra.gmra.mrb[204].mxu0 %vm5412_vm0, %v15246_v5 }
 0x36d   : > { %v4524_v39 = vpop.f32.mrb[155].mxu0  ;;  %v4925_v52 = vpop.f32.mrb[155].mxu1  ;;  %14395 = vmatpush3.bf16.msra.mxu1 %v18025_v21  ;;  %14421 = vmatpush3.bf16.msra.mxu0 %v5160_v41  ;;  %v5191_v21 = vpack.c.bf16 %v17774_v28, %v17770_v11 }
 0x36e   : > { %v18078_v9 = vpack.c.bf16 %v14165_v58, %v4524_v39  ;;  %v18080_v40 = vpack.c.bf16 %v14293_v44, %v4925_v52  ;;  %14410 = vmatprep.subr.bf16.mxu1 %v18037_v22  ;;  %14422 = vmatprep.subr.bf16.mxu0 %v5192_v57 }
 0x36f   : > { %14426 = vmatprep.mubr.msk.bf16.mxu0 %vm5412_vm0, %v15249_v20 }
 0x370   : > { %v14168_v2 = vpop.f32.mrb[156].mxu0  ;;  %v14296_v14 = vpop.f32.mrb[156].mxu1  ;;  %14397 = vmatmul.mubr.msk.bf16.vlgmr.msra.gmra.mrb[208].mxu1 %vm5412_vm0, %v15248_v62 }
 0x371   : > { %v4534_v41 = vpop.f32.mrb[157].mxu0  ;;  %v4935_v50 = vpop.f32.mrb[157].mxu1  ;;  %14411 = vmatpush3.bf16.msra.mxu1 %v18037_v22  ;;  %14423 = vmatpush3.bf16.msra.mxu0 %v5192_v57 }
 0x372   : > { %v5164_v10 = vpack.c.bf16 %v14168_v2, %v4534_v41  ;;  %v18091_v29 = vpack.c.bf16 %v14296_v14, %v4935_v50  ;;  %14412 = vmatprep.subr.bf16.mxu1 %v5191_v21  ;;  %14424 = vmatprep.subr.bf16.mxu0 %v5224_v37 }
 0x373   : > { %14416 = vmatprep.mubr.msk.bf16.mxu1 %vm5412_vm0, %v15251_v18 }
 0x374   : > { %v14171_v27 = vpop.f32.mrb[158].mxu0  ;;  %v14299_v16 = vpop.f32.mrb[158].mxu1 }
 0x375   : > { %14413 = vmatpush3.bf16.msra.mxu1 %v5191_v21  ;;  %14425 = vmatpush3.bf16.msra.mxu0 %v5224_v37  ;;  %v4544_v11 = vpop.f32.mrb[159].mxu0  ;;  %v4945_v28 = vpop.f32.mrb[159].mxu1  ;;  %v15252_v37 = vld [vmem:[%s22205_s7 + $0x58] sm:$0xff]  }
 0x376   : > { %14414 = vmatprep.subr.bf16.mxu1 %v18039_v48  ;;  %14440 = vmatprep.subr.bf16.mxu0 %v5162_v1  ;;  %v18098_v22 = vpack.c.bf16 %v14171_v27, %v4544_v11  ;;  %v18100_v5 = vpack.c.bf16 %v14299_v16, %v4945_v28  ;;  %v15257_v16 = vld [vmem:[%s22205_s7 + $0xa0] sm:$0xff]  }
 0x378   : > { %14427 = vmatmul.mubr.msk.bf16.vlgmr.msra.gmra.mrb[208].mxu0 %vm5412_vm0, %v15250_v0  ;;  %v14174_v20 = vpop.f32.mrb[160].mxu0  ;;  %v14302_v58 = vpop.f32.mrb[160].mxu1  ;;  %v5196_v0 = vpack.c.bf16 %v17810_v54, %v17806_v6  ;;  %v15259_v6 = vld [vmem:[%s22205_s7 + $0x90] sm:$0xff]   ;;  %v5195_v54 = vpack.c.bf16 %v17798_v33, %v17794_v23  ;;  %v15258_v23 = vld [vmem:[%s22205_s7 + $0xa8] sm:$0xff]  }
 0x379   : > { %14415 = vmatpush3.bf16.msra.mxu1 %v18039_v48  ;;  %14441 = vmatpush3.bf16.msra.mxu0 %v5162_v1  ;;  %v4554_v44 = vpop.f32.mrb[161].mxu0  ;;  %v4955_v57 = vpop.f32.mrb[161].mxu1 }
 0x37a   : > { %14430 = vmatprep.subr.bf16.mxu1 %v18057_v59  ;;  %14442 = vmatprep.subr.bf16.mxu0 %v5194_v12  ;;  %v18113_v62 = vpack.c.bf16 %v14174_v20, %v4554_v44  ;;  %v18115_v39 = vpack.c.bf16 %v14302_v58, %v4955_v57 }
 0x37b   : > { %14446 = vmatprep.mubr.msk.bf16.mxu0 %vm5412_vm0, %v15253_v45 }
 0x37c   : > { %14417 = vmatmul.mubr.msk.bf16.vlgmr.msra.gmra.mrb[212].mxu1 %vm5412_vm0, %v15252_v37  ;;  %v14177_v48 = vpop.f32.mrb[162].mxu0  ;;  %v14305_v1 = vpop.f32.mrb[162].mxu1 }
 0x37d   : > { %14431 = vmatpush3.bf16.msra.mxu1 %v18057_v59  ;;  %14443 = vmatpush3.bf16.msra.mxu0 %v5194_v12  ;;  %v4564_v52 = vpop.f32.mrb[163].mxu0  ;;  %v4965_v18 = vpop.f32.mrb[163].mxu1 }
 0x37e   : > { %14432 = vmatprep.subr.bf16.mxu1 %v5193_v35  ;;  %14444 = vmatprep.subr.bf16.mxu0 %v18065_v15  ;;  %v18126_v2 = vpack.c.bf16 %v14177_v48, %v4564_v52  ;;  %v18128_v14 = vpack.c.bf16 %v14305_v1, %v4965_v18  ;;  %v5198_v52 = vpack.c.bf16 %v17834_v7, %v17830_v17  ;;  %v15263_v17 = vld [vmem:[%s22205_s7 + $0xb0] sm:$0xff]  }
 0x37f   : > { %14436 = vmatprep.mubr.msk.bf16.mxu1 %vm5412_vm0, %v15255_v47  ;;  %v5197_v7 = vpack.c.bf16 %v17822_v38, %v17818_v56 }
 0x380   : > { %v14180_v53 = vpop.f32.mrb[164].mxu0  ;;  %v14308_v21 = vpop.f32.mrb[164].mxu1 }
 0x381   : > { %14433 = vmatpush3.bf16.msra.mxu1 %v5193_v35  ;;  %14445 = vmatpush3.bf16.msra.mxu0 %v18065_v15  ;;  %v4574_v59 = vpop.f32.mrb[165].mxu0  ;;  %v4975_v41 = vpop.f32.mrb[165].mxu1  ;;  %v15256_v15 = vld [vmem:[%s22205_s7 + $0x78] sm:$0xff]   ;;  %v15261_v35 = vld [vmem:[%s22205_s7 + $0xc0] sm:$0xff]  }
 0x382   : > { %14434 = vmatprep.subr.bf16.mxu1 %v18059_v63  ;;  %14460 = vmatprep.subr.bf16.mxu0 %v5164_v10  ;;  %v18136_v50 = vpack.c.bf16 %v14180_v53, %v4574_v59  ;;  %v18138_v27 = vpack.c.bf16 %v14308_v21, %v4975_v41  ;;  %v15262_v53 = vld [vmem:[%s22205_s7 + $0xc8] sm:$0xff]   ;;  %v5200_v41 = vpack.c.bf16 %v17858_v60, %v17854_v19 }
 0x383   : > { %v5199_v19 = vpack.c.bf16 %v17846_v36, %v17842_v46  ;;  %v15266_v46 = vld [vmem:[%s22205_s7 + $0xe8] sm:$0xff]   ;;  %v15269_v36 = vld [vmem:[%s22205_s7 + $0x100] sm:$0xff]  }
 0x384   : > { %14447 = vmatmul.mubr.msk.bf16.vlgmr.msra.gmra.mrb[212].mxu0 %vm5412_vm0, %v15254_v30  ;;  %v14183_v11 = vpop.f32.mrb[166].mxu0  ;;  %v14311_v28 = vpop.f32.mrb[166].mxu1 }
 0x385   : > { %14435 = vmatpush3.bf16.msra.mxu1 %v18059_v63  ;;  %14461 = vmatpush3.bf16.msra.mxu0 %v5164_v10  ;;  %v4584_v45 = vpop.f32.mrb[167].mxu0  ;;  %v4985_v12 = vpop.f32.mrb[167].mxu1 }
 0x386   : > { %14450 = vmatprep.subr.bf16.mxu1 %v18078_v9  ;;  %14462 = vmatprep.subr.bf16.mxu0 %v5196_v0  ;;  %v18151_v37 = vpack.c.bf16 %v14183_v11, %v4584_v45  ;;  %v18153_v20 = vpack.c.bf16 %v14311_v28, %v4985_v12  ;;  %v15268_v28 = vld [vmem:[%s22205_s7 + $0xd8] sm:$0xff]   ;;  %v15271_v12 = vld [vmem:[%s22205_s7 + $0xf0] sm:$0xff]  }
 0x387   : > { %14466 = vmatprep.mubr.msk.bf16.mxu0 %vm5412_vm0, %v15257_v16  ;;  %v15267_v16 = vld [vmem:[%s22205_s7 + $0xd0] sm:$0xff]  }
 0x388   : > { %14437 = vmatmul.mubr.msk.bf16.vlgmr.msra.gmra.mrb[216].mxu1 %vm5412_vm0, %v15256_v15  ;;  %v14186_v63 = vpop.f32.mrb[168].mxu0  ;;  %v14314_v10 = vpop.f32.mrb[168].mxu1 }
 0x389   : > { %14451 = vmatpush3.bf16.msra.mxu1 %v18078_v9  ;;  %14463 = vmatpush3.bf16.msra.mxu0 %v5196_v0  ;;  %v4594_v58 = vpop.f32.mrb[169].mxu0  ;;  %v4995_v44 = vpop.f32.mrb[169].mxu1 }
 0x38a   : > { %14452 = vmatprep.subr.bf16.mxu1 %v5195_v54  ;;  %14464 = vmatprep.subr.bf16.mxu0 %v18091_v29  ;;  %v18164_v57 = vpack.c.bf16 %v14186_v63, %v4594_v58  ;;  %v18166_v47 = vpack.c.bf16 %v14314_v10, %v4995_v44  ;;  %v15270_v63 = vld [vmem:[%s22205_s7 + $0x108] sm:$0xff]   ;;  %v5204_v10 = vpack.c.bf16 %v17900_v31, %v17898_v42  ;;  %v15272_v58 = vld [vmem:[%s22205_s7 + $0xf8] sm:$0xff]   ;;  %v15275_v42 = vld [vmem:[%s22205_s7 + $0x110] sm:$0xff]  }
 0x38b   : > { %14456 = vmatprep.mubr.msk.bf16.mxu1 %vm5412_vm0, %v15259_v6  ;;  %v5203_v31 = vpack.c.bf16 %v17892_v24, %v17890_v55 }
 0x38d   : > { %14453 = vmatpush3.bf16.msra.mxu1 %v5195_v54  ;;  %14465 = vmatpush3.bf16.msra.mxu0 %v18091_v29  ;;  %v15260_v29 = vld [vmem:[%s22205_s7 + $0x98] sm:$0xff]  }
 0x38e   : > { %14454 = vmatprep.subr.bf16.mxu1 %v18080_v40  ;;  %14480 = vmatprep.subr.bf16.mxu0 %v18113_v62  ;;  %v14189_v33 = vpop.f32.mrb[170].mxu0  ;;  %v14317_v9 = vpop.f32.mrb[170].mxu1 }
 0x38f   : > { %v4604_v48 = vpop.f32.mrb[171].mxu0  ;;  %v5005_v1 = vpop.f32.mrb[171].mxu1 }
 0x390   : > { %14467 = vmatmul.mubr.msk.bf16.vlgmr.msra.gmra.mrb[216].mxu0 %vm5412_vm0, %v15258_v23  ;;  %v18184_v18 = vpack.c.bf16 %v14189_v33, %v4604_v48  ;;  %v18186_v30 = vpack.c.bf16 %v14317_v9, %v5005_v1 }
 0x391   : > { %14455 = vmatpush3.bf16.msra.mxu1 %v18080_v40  ;;  %14481 = vmatpush3.bf16.msra.mxu0 %v18113_v62 }
 0x392   : > { %14470 = vmatprep.subr.bf16.mxu1 %v18098_v22  ;;  %14482 = vmatprep.subr.bf16.mxu0 %v5198_v52 }
 0x393   : > { %14486 = vmatprep.mubr.msk.bf16.mxu0 %vm5412_vm0, %v15261_v35  ;;  %v15278_v35 = vld [vmem:[%s22205_s7 + $0x140] sm:$0xff]  }
 0x394   : > { %14457 = vmatmul.mubr.msk.bf16.vlgmr.msra.gmra.mrb[220].mxu1 %vm5412_vm0, %v15260_v29  ;;  %v5206_v29 = vpack.c.bf16 %v17916_v8, %v17914_v43 }
 0x395   : > { %14471 = vmatpush3.bf16.msra.mxu1 %v18098_v22  ;;  %14483 = vmatpush3.bf16.msra.mxu0 %v5198_v52  ;;  %v15265_v22 = vld [vmem:[%s22205_s7 + $0xe0] sm:$0xff]   ;;  %v15276_v52 = vld [vmem:[%s22205_s7 + $0x118] sm:$0xff]  }
 0x396   : > { %14472 = vmatprep.subr.bf16.mxu1 %v5197_v7  ;;  %14484 = vmatprep.subr.bf16.mxu0 %v18115_v39 }
 0x397   : > { %14476 = vmatprep.mubr.msk.bf16.mxu1 %vm5412_vm0, %v15263_v17  ;;  %v14192_v40 = vpop.f32.mrb[172].mxu0  ;;  %v14320_v62 = vpop.f32.mrb[172].mxu1  ;;  %v5205_v17 = vpack.c.bf16 %v17908_v51, %v17906_v26 }
 0x398   : > { %v4614_v21 = vpop.f32.mrb[173].mxu0  ;;  %v5015_v59 = vpop.f32.mrb[173].mxu1 }
 0x399   : > { %14473 = vmatpush3.bf16.msra.mxu1 %v5197_v7  ;;  %14485 = vmatpush3.bf16.msra.mxu0 %v18115_v39  ;;  %v18205_v56 = vpack.c.bf16 %v14192_v40, %v4614_v21  ;;  %v18207_v38 = vpack.c.bf16 %v14320_v62, %v5015_v59  ;;  %v15264_v39 = vld [vmem:[%s22205_s7 + $0xb8] sm:$0xff]   ;;  %v15283_v62 = vld [vmem:[%s22205_s7 + $0x160] sm:$0xff]   ;;  %v5208_v21 = vpack.c.bf16 %v17932_v34, %v17930_v61  ;;  %v15281_v59 = vld [vmem:[%s22205_s7 + $0x150] sm:$0xff]  }
 0x39a   : > { %14474 = vmatprep.subr.bf16.mxu1 %v18100_v5  ;;  %14500 = vmatprep.subr.bf16.mxu0 %v18136_v50 }
 0x39c   : > { %14487 = vmatmul.mubr.msk.bf16.vlgmr.msra.gmra.mrb[220].mxu0 %vm5412_vm0, %v15262_v53  ;;  %v15279_v53 = vld [vmem:[%s22205_s7 + $0x138] sm:$0xff]  }
 0x39d   : > { %14475 = vmatpush3.bf16.msra.mxu1 %v18100_v5  ;;  %14501 = vmatpush3.bf16.msra.mxu0 %v18136_v50 }
 0x39e   : > { %14490 = vmatprep.subr.bf16.mxu1 %v18126_v2  ;;  %14502 = vmatprep.subr.bf16.mxu0 %v5200_v41 }
 0x39f   : > { %14506 = vmatprep.mubr.msk.bf16.mxu0 %vm5412_vm0, %v15265_v22 }
 0x3a0   : > { %14477 = vmatmul.mubr.msk.bf16.vlgmr.msra.gmra.mrb[224].mxu1 %vm5412_vm0, %v15264_v39 }
 0x3a1   : > { %14491 = vmatpush3.bf16.msra.mxu1 %v18126_v2  ;;  %14503 = vmatpush3.bf16.msra.mxu0 %v5200_v41  ;;  %v14195_v60 = vpop.f32.mrb[174].mxu0  ;;  %v14323_v5 = vpop.f32.mrb[174].mxu1  ;;  %v5202_v2 = vpack.c.bf16 %v17882_v49, %v17880_v32 }
 0x3a2   : > { %14492 = vmatprep.subr.bf16.mxu1 %v5199_v19  ;;  %14504 = vmatprep.subr.bf16.mxu0 %v18138_v27  ;;  %v4624_v50 = vpop.f32.mrb[175].mxu0  ;;  %v5025_v0 = vpop.f32.mrb[175].mxu1 }
 0x3a3   : > { %14496 = vmatprep.mubr.msk.bf16.mxu1 %vm5412_vm0, %v15267_v16  ;;  %v18233_v15 = vpack.c.bf16 %v14195_v60, %v4624_v50  ;;  %v18235_v11 = vpack.c.bf16 %v14323_v5, %v5025_v0  ;;  %v15284_v16 = vld [vmem:[%s22205_s7 + $0x168] sm:$0xff]   ;;  %v22690_v60 = vld [vmem:[#allocation59_spill] sm:$0xff]  ;;  %v15285_v50 = vld [vmem:[%s22205_s7 + $0x170] sm:$0xff]  }
 0x3a5   : > { %14493 = vmatpush3.bf16.msra.mxu1 %v5199_v19  ;;  %14505 = vmatpush3.bf16.msra.mxu0 %v18138_v27  ;;  %v22689_v19 = vld [vmem:[#allocation18_spill] sm:$0xff] }
 0x3a6   : > { %14494 = vmatprep.subr.bf16.mxu1 %v18128_v14  ;;  %14520 = vmatprep.subr.bf16.mxu0 %v18164_v57  ;;  %v5210_v5 = vpack.c.bf16 %v22690_v60, %v22689_v19 }
 0x3a8   : > { %14507 = vmatmul.mubr.msk.bf16.vlgmr.msra.gmra.mrb[224].mxu0 %vm5412_vm0, %v15266_v46 }
 0x3a9   : > { %14495 = vmatpush3.bf16.msra.mxu1 %v18128_v14  ;;  %14521 = vmatpush3.bf16.msra.mxu0 %v18164_v57  ;;  %v5201_v14 = vpack.c.bf16 %v17870_v25, %v17866_v4  ;;  %v15273_v4 = vld [vmem:[%s22205_s7 + $0x120] sm:$0xff]  }
 0x3aa   : > { %14510 = vmatprep.subr.bf16.mxu1 %v18151_v37  ;;  %14522 = vmatprep.subr.bf16.mxu0 %v5202_v2  ;;  %v14198_v27 = vpop.f32.mrb[176].mxu0  ;;  %v14326_v45 = vpop.f32.mrb[176].mxu1 }
 0x3ab   : > { %14526 = vmatprep.mubr.msk.bf16.mxu0 %vm5412_vm0, %v15269_v36  ;;  %v4634_v32 = vpop.f32.mrb[177].mxu0  ;;  %v5035_v49 = vpop.f32.mrb[177].mxu1  ;;  %v22691_v36 = vld [vmem:[#allocation17_spill] sm:$0xff] }
 0x3ac   : > { %14497 = vmatmul.mubr.msk.bf16.vlgmr.msra.gmra.mrb[228].mxu1 %vm5412_vm0, %v15268_v28  ;;  %v5174_v6 = vpack.c.bf16 %v14198_v27, %v4634_v32  ;;  %v18262_v54 = vpack.c.bf16 %v14326_v45, %v5035_v49  ;;  %v15291_v32 = vld [vmem:[%s22205_s7 + $0x1a0] sm:$0xff]   ;;  %v15286_v49 = vld [vmem:[%s22205_s7 + $0x178] sm:$0xff]  }
 0x3ad   : > { %14511 = vmatpush3.bf16.msra.mxu1 %v18151_v37  ;;  %14523 = vmatpush3.bf16.msra.mxu0 %v5202_v2  ;;  %v22692_v2 = vld [vmem:[#allocation61_spill] sm:$0xff] }
 0x3ae   : > { %14512 = vmatprep.subr.bf16.mxu1 %v5201_v14  ;;  %14524 = vmatprep.subr.bf16.mxu0 %v18166_v47  ;;  %v5209_v28 = vpack.c.bf16 %v22692_v2, %v22691_v36  ;;  %v22704_v36 = vld [vmem:[#allocation28_spill] sm:$0xff] }
 0x3af   : > { %14516 = vmatprep.mubr.msk.bf16.mxu1 %vm5412_vm0, %v15271_v12  ;;  %v15288_v12 = vld [vmem:[%s22205_s7 + $0x188] sm:$0xff]  }
 0x3b1   : > { %14513 = vmatpush3.bf16.msra.mxu1 %v5201_v14  ;;  %14525 = vmatpush3.bf16.msra.mxu0 %v18166_v47 }
 0x3b2   : > { %14514 = vmatprep.subr.bf16.mxu1 %v18153_v20  ;;  %14540 = vmatprep.subr.bf16.mxu0 %v18205_v56 }
 0x3b3   : > { %v14201_v25 = vpop.f32.mrb[178].mxu0  ;;  %v14329_v37 = vpop.f32.mrb[178].mxu1 }
 0x3b4   : > { %14527 = vmatmul.mubr.msk.bf16.vlgmr.msra.gmra.mrb[228].mxu0 %vm5412_vm0, %v15270_v63  ;;  %v4644_v44 = vpop.f32.mrb[179].mxu0  ;;  %v5045_v57 = vpop.f32.mrb[179].mxu1 }
 0x3b5   : > { %14515 = vmatpush3.bf16.msra.mxu1 %v18153_v20  ;;  %14541 = vmatpush3.bf16.msra.mxu0 %v18205_v56  ;;  %v18284_v47 = vpack.c.bf16 %v14201_v25, %v4644_v44  ;;  %v18286_v23 = vpack.c.bf16 %v14329_v37, %v5045_v57  ;;  %v15274_v20 = vld [vmem:[%s22205_s7 + $0x128] sm:$0xff]   ;;  %v5207_v56 = vpack.c.bf16 %v17924_v13, %v17922_v3  ;;  %v15287_v3 = vld [vmem:[%s22205_s7 + $0x180] sm:$0xff]   ;;  %v15282_v13 = vld [vmem:[%s22205_s7 + $0x158] sm:$0xff]  }
 0x3b6   : > { %14530 = vmatprep.subr.bf16.mxu1 %v18184_v18  ;;  %14542 = vmatprep.subr.bf16.mxu0 %v5204_v10  ;;  %v15289_v37 = vld [vmem:[%s22205_s7 + $0x190] sm:$0xff]   ;;  %v22695_v57 = vld [vmem:[#allocation62_spill] sm:$0xff] }
 0x3b7   : > { %14546 = vmatprep.mubr.msk.bf16.mxu0 %vm5412_vm0, %v15273_v4 }
 0x3b8   : > { %14517 = vmatmul.mubr.msk.bf16.vlgmr.msra.gmra.mrb[232].mxu1 %vm5412_vm0, %v15272_v58  ;;  %v22694_v58 = vld [vmem:[#allocation20_spill] sm:$0xff] }
 0x3b9   : > { %14531 = vmatpush3.bf16.msra.mxu1 %v18184_v18  ;;  %14543 = vmatpush3.bf16.msra.mxu0 %v5204_v10  ;;  %v15277_v18 = vld [vmem:[%s22205_s7 + $0x130] sm:$0xff]   ;;  %v22693_v10 = vld [vmem:[#allocation19_spill] sm:$0xff] }
 0x3ba   : > { %14532 = vmatprep.subr.bf16.mxu1 %v5203_v31  ;;  %14544 = vmatprep.subr.bf16.mxu0 %v18207_v38  ;;  %v5211_v44 = vpack.c.bf16 %v22694_v58, %v22693_v10  ;;  %v15305_v10 = vld [vmem:[%s22209_s11 + $0x10] sm:$0xff]   ;;  %v18455_v58 = vpop.permute.xlu1 %5384 }
 0x3bb   : > { %14536 = vmatprep.mubr.msk.bf16.mxu1 %vm5412_vm0, %v15275_v42 }
 0x3bd   : > { %14533 = vmatpush3.bf16.msra.mxu1 %v5203_v31  ;;  %14545 = vmatpush3.bf16.msra.mxu0 %v18207_v38  ;;  %v14204_v33 = vpop.f32.mrb[180].mxu0  ;;  %v14332_v9 = vpop.f32.mrb[180].mxu1 }
 0x3be   : > { %14534 = vmatprep.subr.bf16.mxu1 %v18186_v30  ;;  %14560 = vmatprep.subr.bf16.mxu0 %v5174_v6  ;;  %v4654_v55 = vpop.f32.mrb[181].mxu0  ;;  %v5055_v24 = vpop.f32.mrb[181].mxu1 }
 0x3bf   : > { %v5176_v48 = vpack.c.bf16 %v14204_v33, %v4654_v55  ;;  %v5240_v1 = vpack.c.bf16 %v14332_v9, %v5055_v24  ;;  %v15290_v24 = vld [vmem:[%s22205_s7 + $0x198] sm:$0xff]  }
 0x3c0   : > { %14547 = vmatmul.mubr.msk.bf16.vlgmr.msra.gmra.mrb[232].mxu0 %vm5412_vm0, %v15274_v20 }
 0x3c1   : > { %14535 = vmatpush3.bf16.msra.mxu1 %v18186_v30  ;;  %14561 = vmatpush3.bf16.msra.mxu0 %v5174_v6  ;;  %v15280_v30 = vld [vmem:[%s22205_s7 + $0x148] sm:$0xff]  }
 0x3c2   : > { %14550 = vmatprep.subr.bf16.mxu1 %v18233_v15  ;;  %14562 = vmatprep.subr.bf16.mxu0 %v5206_v29 }
 0x3c3   : > { %14566 = vmatprep.mubr.msk.bf16.mxu0 %vm5412_vm0, %v15278_v35  ;;  %v15292_v35 = vld [vmem:[%s22205_s7 + $0x1a8] sm:$0xff]  }
 0x3c4   : > { %14537 = vmatmul.mubr.msk.bf16.vlgmr.msra.gmra.mrb[236].mxu1 %vm5412_vm0, %v15276_v52  ;;  %v22697_v52 = vld [vmem:[#allocation22_spill] sm:$0xff] }
 0x3c5   : > { %14551 = vmatpush3.bf16.msra.mxu1 %v18233_v15  ;;  %14563 = vmatpush3.bf16.msra.mxu0 %v5206_v29  ;;  %v22698_v29 = vld [vmem:[#allocation23_spill] sm:$0xff] }
 0x3c6   : > { %14552 = vmatprep.subr.bf16.mxu1 %v5205_v17  ;;  %14564 = vmatprep.subr.bf16.mxu0 %v18262_v54 }
 0x3c7   : > { %14556 = vmatprep.mubr.msk.bf16.mxu1 %vm5412_vm0, %v15277_v18  ;;  %v14207_v43 = vpop.f32.mrb[182].mxu0  ;;  %v14335_v8 = vpop.f32.mrb[182].mxu1  ;;  %v5213_v18 = vpack.c.bf16 %v22698_v29, %v22697_v52  ;;  %v15313_v29 = vld [vmem:[%s22209_s11 + $0x30] sm:$0xff]  }
 0x3c8   : > { %v4664_v7 = vpop.f32.mrb[183].mxu0  ;;  %v5065_v40 = vpop.f32.mrb[183].mxu1 }
 0x3c9   : > { %14553 = vmatpush3.bf16.msra.mxu1 %v5205_v17  ;;  %14565 = vmatpush3.bf16.msra.mxu0 %v18262_v54  ;;  %v5177_v26 = vpack.c.bf16 %v14207_v43, %v4664_v7  ;;  %v5241_v51 = vpack.c.bf16 %v14335_v8, %v5065_v40 }
 0x3ca   : > { %14554 = vmatprep.subr.bf16.mxu1 %v18235_v11  ;;  %14580 = vmatprep.subr.bf16.mxu0 %v5176_v48 }
 0x3cc   : > { %14567 = vmatmul.mubr.msk.bf16.vlgmr.msra.gmra.mrb[236].mxu0 %vm5412_vm0, %v15280_v30 }
 0x3cd   : > { %14555 = vmatpush3.bf16.msra.mxu1 %v18235_v11  ;;  %14581 = vmatpush3.bf16.msra.mxu0 %v5176_v48  ;;  %v15293_v48 = vld [vmem:[%s22205_s7 + $0x1b0] sm:$0xff]  }
 0x3ce   : > { %14570 = vmatprep.subr.bf16.mxu1 %v18284_v47  ;;  %14582 = vmatprep.subr.bf16.mxu0 %v5208_v21 }
 0x3cf   : > { %14586 = vmatprep.mubr.msk.bf16.mxu0 %vm5412_vm0, %v15283_v62 }
 0x3d0   : > { %14557 = vmatmul.mubr.msk.bf16.vlgmr.msra.gmra.mrb[240].mxu1 %vm5412_vm0, %v15279_v53  ;;  %v15294_v53 = vld [vmem:[%s22205_s7 + $0x1b8] sm:$0xff]  }
 0x3d1   : > { %14571 = vmatpush3.bf16.msra.mxu1 %v18284_v47  ;;  %14583 = vmatpush3.bf16.msra.mxu0 %v5208_v21  ;;  %v14210_v61 = vpop.f32.mrb[184].mxu0  ;;  %v14338_v34 = vpop.f32.mrb[184].mxu1  ;;  %v22696_v47 = vld [vmem:[#allocation21_spill] sm:$0xff] }
 0x3d2   : > { %14572 = vmatprep.subr.bf16.mxu1 %v5207_v56  ;;  %14584 = vmatprep.subr.bf16.mxu0 %v5240_v1  ;;  %v4674_v38 = vpop.f32.mrb[185].mxu0  ;;  %v5075_v22 = vpop.f32.mrb[185].mxu1  ;;  %v15297_v21 = vld [vmem:[%s22205_s7 + $0x1d0] sm:$0xff]  }
 0x3d3   : > { %14576 = vmatprep.mubr.msk.bf16.mxu1 %vm5412_vm0, %v15281_v59  ;;  %v5178_v41 = vpack.c.bf16 %v14210_v61, %v4674_v38  ;;  %v5242_v39 = vpack.c.bf16 %v14338_v34, %v5075_v22 }
 0x3d5   : > { %14573 = vmatpush3.bf16.msra.mxu1 %v5207_v56  ;;  %14585 = vmatpush3.bf16.msra.mxu0 %v5240_v1  ;;  %v15295_v1 = vld [vmem:[%s22205_s7 + $0x1c0] sm:$0xff]  }
 0x3d6   : > { %14574 = vmatprep.subr.bf16.mxu1 %v18286_v23  ;;  %14600 = vmatprep.subr.bf16.mxu0 %v5178_v41 }
 0x3d8   : > { %14587 = vmatmul.mubr.msk.bf16.vlgmr.msra.gmra.mrb[240].mxu0 %vm5412_vm0, %v15284_v16  ;;  %v22701_v16 = vld [vmem:[#allocation25_spill] sm:$0xff] }
 0x3d9   : > { %14575 = vmatpush3.bf16.msra.mxu1 %v18286_v23  ;;  %14601 = vmatpush3.bf16.msra.mxu0 %v5178_v41  ;;  %v5212_v23 = vpack.c.bf16 %v22696_v47, %v22695_v57  ;;  %v15296_v41 = vld [vmem:[%s22205_s7 + $0x1c8] sm:$0xff]   ;;  %v15306_v57 = vld [vmem:[%s22210_s12] sm:$0xff]   ;;  %v15304_v47 = vld [vmem:[%s22205_s7 + $0x1f8] sm:$0xff]  }
 0x3da   : > { %14590 = vmatprep.subr.bf16.mxu1 %v5177_v26  ;;  %14602 = vmatprep.subr.bf16.mxu0 %v5210_v5  ;;  %v14213_v0 = vpop.f32.mrb[186].mxu0  ;;  %v14341_v15 = vpop.f32.mrb[186].mxu1 }
 0x3db   : > { %v4684_v11 = vpop.f32.mrb[187].mxu0  ;;  %v5085_v46 = vpop.f32.mrb[187].mxu1  ;;  %14606 = vmatprep.mubr.msk.bf16.mxu0 %vm5412_vm0, %v15287_v3  ;;  %v22702_v3 = vld [vmem:[#allocation26_spill] sm:$0xff] }
 0x3dc   : > { %14577 = vmatmul.mubr.msk.bf16.vlgmr.msra.gmra.mrb[244].mxu1 %vm5412_vm0, %v15282_v13  ;;  %v5179_v27 = vpack.c.bf16 %v14213_v0, %v4684_v11  ;;  %v5243_v45 = vpack.c.bf16 %v14341_v15, %v5085_v46  ;;  %v5215_v13 = vpack.c.bf16 %v22702_v3, %v22701_v16  ;;  %v15298_v11 = vld [vmem:[%s22205_s7 + $0x1d8] sm:$0xff]   ;;  %v22703_v46 = vld [vmem:[#allocation27_spill] sm:$0xff] }
 0x3dd   : > { %14591 = vmatpush3.bf16.msra.mxu1 %v5177_v26  ;;  %14596 = vmatprep.mubr.msk.bf16.mxu1 %vm5412_vm0, %v15285_v50  ;;  %v22699_v26 = vld [vmem:[#allocation24_spill] sm:$0xff]  ;;  %v5216_v2 = vpack.c.bf16 %v22704_v36, %v22703_v46 }
 0x3de   : > { %14592 = vmatprep.subr.bf16.mxu1 %v5209_v28  ;;  %14603 = vmatpush3.bf16.msra.mxu0 %v5210_v5 }
 0x3df   : > { %14604 = vmatprep.subr.bf16.mxu0 %v5242_v39 }
 0x3e1   : > { %14593 = vmatpush3.bf16.msra.mxu1 %v5209_v28  ;;  %v15303_v28 = vld [vmem:[%s22205_s7 + $0x1f0] sm:$0xff]  }
 0x3e2   : > { %14594 = vmatprep.subr.bf16.mxu1 %v5241_v51  ;;  %14605 = vmatpush3.bf16.msra.mxu0 %v5242_v39  ;;  %v15299_v39 = vld [vmem:[%s22205_s7 + $0x1e0] sm:$0xff]  }
 0x3e4   : > { %v14216_v14 = vpop.f32.mrb[188].mxu0  ;;  %v14344_v6 = vpop.f32.mrb[188].mxu1 }
 0x3e5   : > { %14595 = vmatpush3.bf16.msra.mxu1 %v5241_v51  ;;  %14607 = vmatmul.mubr.msk.bf16.vlgmr.msra.gmra.mrb[244].mxu0 %vm5412_vm0, %v15288_v12  ;;  %v4694_v54 = vpop.f32.mrb[189].mxu0  ;;  %v5095_v63 = vpop.f32.mrb[189].mxu1  ;;  %v22700_v51 = vld [vmem:[#allocation60_spill] sm:$0xff] }
 0x3e6   : > { %14610 = vmatprep.subr.bf16.mxu1 %v5179_v27  ;;  %v5180_v4 = vpack.c.bf16 %v14216_v14, %v4694_v54  ;;  %v5244_v25 = vpack.c.bf16 %v14344_v6, %v5095_v63  ;;  %14626 = vmatprep.mubr.msk.bf16.mxu0 %vm5412_vm0, %v15291_v32  ;;  %v5214_v62 = vpack.c.bf16 %v22700_v51, %v22699_v26  ;;  %v15302_v6 = vld [vmem:[%s22209_s11 + $0x8] sm:$0xff]  }
 0x3e8   : > { %14597 = vmatmul.mubr.msk.bf16.vlgmr.msra.gmra.mrb[248].mxu1 %vm5412_vm0, %v15286_v49  ;;  %14620 = vmatprep.subr.bf16.mxu0 %v5180_v4 }
 0x3e9   : > { %14611 = vmatpush3.bf16.msra.mxu1 %v5179_v27  ;;  %14621 = vmatpush3.bf16.msra.mxu0 %v5180_v4  ;;  %v15301_v27 = vld [vmem:[%s22209_s11] sm:$0xff]   ;;  %v22705_v4 = vld [vmem:[#allocation29_spill] sm:$0xff] }
 0x3ea   : > { %14612 = vmatprep.subr.bf16.mxu1 %v5211_v44  ;;  %14622 = vmatprep.subr.bf16.mxu0 %v5212_v23 }
 0x3eb   : > { %14616 = vmatprep.mubr.msk.bf16.mxu1 %vm5412_vm0, %v15289_v37 }
 0x3ed   : > { %14613 = vmatpush3.bf16.msra.mxu1 %v5211_v44  ;;  %v14219_v42 = vpop.f32.mrb[190].mxu0  ;;  %v14347_v31 = vpop.f32.mrb[190].mxu1  ;;  %14623 = vmatpush3.bf16.msra.mxu0 %v5212_v23  ;;  %v15307_v44 = vld [vmem:[%s22209_s11 + $0x18] sm:$0xff]   ;;  %v15309_v23 = vld [vmem:[%s22209_s11 + $0x20] sm:$0xff]  }
 0x3ee   : > { %14614 = vmatprep.subr.bf16.mxu1 %v5243_v45  ;;  %v4704_v20 = vpop.f32.mrb[191].mxu0  ;;  %v5105_v33 = vpop.f32.mrb[191].mxu1  ;;  %14624 = vmatprep.subr.bf16.mxu0 %v5244_v25 }
 0x3ef   : > { %v5181_v9 = vpack.c.bf16 %v14219_v42, %v4704_v20  ;;  %v5245_v55 = vpack.c.bf16 %v14347_v31, %v5105_v33  ;;  %v15308_v42 = vld [vmem:[%s22210_s12 + $0x8] sm:$0xff]   ;;  %v18472_v31 = vpop.permute.xlu1 %5389  ;;  %v15310_v33 = vld [vmem:[%s22210_s12 + $0x10] sm:$0xff]  }
 0x3f0   : > { %v15311_v20 = vld [vmem:[%s22209_s11 + $0x28] sm:$0xff]  }
 0x3f1   : > { %14615 = vmatpush3.bf16.msra.mxu1 %v5243_v45  ;;  %14625 = vmatpush3.bf16.msra.mxu0 %v5244_v25  ;;  %v15300_v45 = vld [vmem:[%s22205_s7 + $0x1e8] sm:$0xff]   ;;  %v22706_v25 = vld [vmem:[#allocation30_spill] sm:$0xff] }
 0x3f2   : > { %14630 = vmatprep.subr.bf16.mxu1 %v5181_v9  ;;  %v5217_v37 = vpack.c.bf16 %v22706_v25, %v22705_v4 }
 0x3f4   : > { %14617 = vmatmul.mubr.msk.bf16.vlgmr.msra.gmra.mrb[252].mxu1 %vm5412_vm0, %v15290_v24  ;;  %14627 = vmatmul.mubr.msk.bf16.vlgmr.msra.gmra.mrb[248].mxu0 %vm5412_vm0, %v15292_v35 }
 0x3f5   : > { %14631 = vmatpush3.bf16.msra.mxu1 %v5181_v9  ;;  %14636 = vmatprep.mubr.msk.bf16.mxu1 %vm5412_vm0, %v15293_v48  ;;  %v18481_v9 = vpop.permute.xlu0 %5394  ;;  %v18484_v48 = vpop.permute.xlu1 %5399 }
 0x3f6   : > { %14632 = vmatprep.subr.bf16.mxu1 %v5213_v18  ;;  %14646 = vmatprep.mubr.msk.bf16.mxu0 %vm5412_vm0, %v15295_v1 }
 0x3f8   : > { %v14222_v17 = vpop.f32.mrb[192].mxu0  ;;  %v14350_v43 = vpop.f32.mrb[192].mxu1 }
 0x3f9   : > { %v4714_v8 = vpop.f32.mrb[193].mxu0  ;;  %v5115_v30 = vpop.f32.mrb[193].mxu1  ;;  %14633 = vmatpush3.bf16.msra.mxu1 %v5213_v18 }
 0x3fa   : > { %v5182_v7 = vpack.c.bf16 %v14222_v17, %v4714_v8  ;;  %v5246_v40 = vpack.c.bf16 %v14350_v43, %v5115_v30  ;;  %14634 = vmatprep.subr.bf16.mxu1 %v5245_v55  ;;  %v15312_v43 = vld [vmem:[%s22210_s12 + $0x18] sm:$0xff]  }
 0x3fc   : > { %14640 = vmatprep.subr.bf16.mxu0 %v5182_v7 }
 0x3fd   : > { %14635 = vmatpush3.bf16.msra.mxu1 %v5245_v55  ;;  %14641 = vmatpush3.bf16.msra.mxu0 %v5182_v7 }
 0x3fe   : > { %14642 = vmatprep.subr.bf16.mxu0 %v5214_v62 }
 0x400   : > { %14637 = vmatmul.mubr.msk.bf16.vlgmr.msra.gmra.mrb[0].mxu1 %vm5412_vm0, %v15294_v53 }
 0x401   : > { %14643 = vmatpush3.bf16.msra.mxu0 %v5214_v62  ;;  %14656 = vmatprep.mubr.msk.bf16.mxu1 %vm5412_vm0, %v15297_v21  ;;  %v15314_v62 = vld [vmem:[%s22210_s12 + $0x20] sm:$0xff]  }
 0x402   : > { %v14225_v59 = vpop.f32.mrb[194].mxu0  ;;  %v14353_v56 = vpop.f32.mrb[194].mxu1  ;;  %14644 = vmatprep.subr.bf16.mxu0 %v5246_v40 }
 0x403   : > { %v4724_v61 = vpop.f32.mrb[195].mxu0  ;;  %v5125_v34 = vpop.f32.mrb[195].mxu1 }
 0x404   : > { %v5183_v38 = vpack.c.bf16 %v14225_v59, %v4724_v61  ;;  %v5247_v22 = vpack.c.bf16 %v14353_v56, %v5125_v34  ;;  %v15315_v59 = vld [vmem:[%s22209_s11 + $0x38] sm:$0xff]  }
 0x405   : > { %14645 = vmatpush3.bf16.msra.mxu0 %v5246_v40 }
 0x406   : > { %14650 = vmatprep.subr.bf16.mxu1 %v5183_v38 }
 0x407   : > { %14651 = vmatpush3.bf16.msra.mxu1 %v5183_v38 }
 0x408   : > { %14652 = vmatprep.subr.bf16.mxu1 %v5215_v13  ;;  %14647 = vmatmul.mubr.msk.bf16.vlgmr.msra.gmra.mrb[252].mxu0 %vm5412_vm0, %v15296_v41 }
 0x409   : > { %14666 = vmatprep.mubr.msk.bf16.mxu0 %vm5412_vm0, %v15299_v39  ;;  %v15316_v39 = vld [vmem:[%s22210_s12 + $0x28] sm:$0xff]  }
 0x40b   : > { %v14228_v19 = vpop.f32.mrb[196].mxu0  ;;  %v14356_v60 = vpop.f32.mrb[196].mxu1  ;;  %14653 = vmatpush3.bf16.msra.mxu1 %v5215_v13 }
 0x40c   : > { %v4734_v5 = vpop.f32.mrb[197].mxu0  ;;  %v5135_v50 = vpop.f32.mrb[197].mxu1  ;;  %14654 = vmatprep.subr.bf16.mxu1 %v5247_v22 }
 0x40d   : > { %v5184_v0 = vpack.c.bf16 %v14228_v19, %v4734_v5  ;;  %v5248_v15 = vpack.c.bf16 %v14356_v60, %v5135_v50 }
 0x40f   : > { %14660 = vmatprep.subr.bf16.mxu0 %v5184_v0  ;;  %14655 = vmatpush3.bf16.msra.mxu1 %v5247_v22 }
 0x410   : > { %14661 = vmatpush3.bf16.msra.mxu0 %v5184_v0 }
 0x411   : > { %14662 = vmatprep.subr.bf16.mxu0 %v5216_v2 }
 0x412   : > { %14657 = vmatmul.mubr.msk.bf16.vlgmr.msra.gmra.mrb[4].mxu1 %vm5412_vm0, %v15298_v11 }
 0x413   : > { %14676 = vmatprep.mubr.msk.bf16.mxu1 %vm5412_vm0, %v15303_v28  ;;  %v15317_v28 = vld [vmem:[%s22210_s12 + $0x30] sm:$0xff]  }
 0x414   : > { %14663 = vmatpush3.bf16.msra.mxu0 %v5216_v2 }
 0x415   : > { %14664 = vmatprep.subr.bf16.mxu0 %v5248_v15 }
 0x418   : > { %v14231_v12 = vpop.f32.mrb[198].mxu0  ;;  %v14359_v32 = vpop.f32.mrb[198].mxu1  ;;  %14665 = vmatpush3.bf16.msra.mxu0 %v5248_v15 }
 0x419   : > { %v4744_v49 = vpop.f32.mrb[199].mxu0  ;;  %v5145_v14 = vpop.f32.mrb[199].mxu1  ;;  %14680 = vmatprep.subr.bf16.mxu0 %v15301_v27 }
 0x41a   : > { %v5185_v54 = vpack.c.bf16 %v14231_v12, %v4744_v49  ;;  %v5249_v63 = vpack.c.bf16 %v14359_v32, %v5145_v14 }
 0x41b   : > { %14667 = vmatmul.mubr.msk.bf16.vlgmr.msra.gmra.mrb[0].mxu0 %vm5412_vm0, %v15300_v45 }
 0x41c   : > { %14670 = vmatprep.subr.bf16.mxu1 %v5185_v54  ;;  %14681 = vmatpush3.bf16.msra.mxu0 %v15301_v27 }
 0x41d   : > { %14671 = vmatpush3.bf16.msra.mxu1 %v5185_v54  ;;  %14682 = vmatprep.subr.bf16.mxu0 %v15302_v6  ;;  %v15318_v54 = vld [vmem:[%s22210_s12 + $0x38] sm:$0xff]  }
 0x41e   : > { %14672 = vmatprep.subr.bf16.mxu1 %v5217_v37 }
 0x420   : > { %14683 = vmatpush3.bf16.msra.mxu0 %v15302_v6 }
 0x421   : > { %14673 = vmatpush3.bf16.msra.mxu1 %v5217_v37  ;;  %14684 = vmatprep.subr.bf16.mxu0 %v15305_v10 }
 0x422   : > { %14674 = vmatprep.subr.bf16.mxu1 %v5249_v63 }
 0x424   : > { %14685 = vmatpush3.bf16.msra.mxu0 %v15305_v10 }
 0x425   : > { %14675 = vmatpush3.bf16.msra.mxu1 %v5249_v63  ;;  %14686 = vmatprep.subr.bf16.mxu0 %v15307_v44 }
 0x426   : > { %14824 = vmatprep.subr.bf16.mxu1 %v15306_v57 }
 0x428   : > { %14677 = vmatmul.mubr.msk.bf16.vlgmr.msra.gmra.mrb[8].mxu1 %vm5412_vm0, %v15304_v47  ;;  %14687 = vmatpush3.bf16.msra.mxu0 %v15307_v44 }
 0x429   : > { %14825 = vmatpush3.bf16.msra.mxu1 %v15306_v57  ;;  %14688 = vmatprep.subr.bf16.mxu0 %v15309_v23 }
 0x42a   : > { %14826 = vmatprep.subr.bf16.mxu1 %v15308_v42 }
 0x42b   : > { %v14368_v55 = vpop.f32.mrb[200].mxu1 }
 0x42c   : > { %v5462_v24 = vadd.f32 %v14368_v55, %v18481_v9  ;;  %v5453_v35 = vpop.f32.mrb[201].mxu1  ;;  %14689 = vmatpush3.bf16.msra.mxu0 %v15309_v23 }
 0x42d   : > { %v5454_v1 = vadd.f32 %v5453_v35, %v18455_v58  ;;  %v14369_v52 = vpop.f32.mrb[202].mxu1  ;;  %14827 = vmatpush3.bf16.msra.mxu1 %v15308_v42  ;;  %14690 = vmatprep.subr.bf16.mxu0 %v15311_v20 }
 0x42e   : > { %v5465_v18 = vadd.f32 %v14369_v52, %v18484_v48  ;;  %v5456_v17 = vpop.f32.mrb[203].mxu1  ;;  %14828 = vmatprep.subr.bf16.mxu1 %v15310_v33  ;;  %v7485_v30 = vmax.f32 %v5462_v24, 0.0 }
 0x42f   : > { %v5457_v8 = vadd.f32 %v5456_v17, %v18472_v31  ;;  %v7483_v40 = vmax.f32 %v5454_v1, 0.0 }
 0x430   : > { %v7486_v7 = vmax.f32 %v5465_v18, 0.0  ;;  %14691 = vmatpush3.bf16.msra.mxu0 %v15311_v20 }
 0x431   : > { %v7484_v26 = vmax.f32 %v5457_v8, 0.0  ;;  %14829 = vmatpush3.bf16.msra.mxu1 %v15310_v33  ;;  %14692 = vmatprep.subr.bf16.mxu0 %v15313_v29 }
 0x432   : > { %v18495_v51 = vpack.c.bf16 %v7486_v7, %v7485_v30  ;;  %14830 = vmatprep.subr.bf16.mxu1 %v15312_v43 }
 0x433   : > { %v7611_v53 = vpack.c.bf16 %v7484_v26, %v7483_v40  ;;  %v14388_v21 = vpop.f32.mrb[200].mxu0 }
 0x434   : > { %v5592_v56 = vadd.f32 %v14388_v21, %v18481_v9  ;;  %v5583_v61 = vpop.f32.mrb[201].mxu0  ;;  %14693 = vmatpush3.bf16.msra.mxu0 %v15313_v29 }
 0x435   : > { %v5584_v34 = vadd.f32 %v5583_v61, %v18455_v58  ;;  %v14389_v38 = vpop.f32.mrb[202].mxu0  ;;  %14696 = vmatprep.mubr.bf16.mxu0 %v7611_v53  ;;  %14831 = vmatpush3.bf16.msra.mxu1 %v15312_v43 }
 0x436   : > { %v5595_v22 = vadd.f32 %v14389_v38, %v18484_v48  ;;  %14840 = vmatprep.mubr.bf16.mxu1 %v7611_v53  ;;  %v5586_v41 = vpop.f32.mrb[203].mxu0  ;;  %14832 = vmatprep.subr.bf16.mxu1 %v15314_v62  ;;  %v7493_v13 = vmax.f32 %v5592_v56, 0.0 }
 0x437   : > { %v5587_v16 = vadd.f32 %v5586_v41, %v18472_v31  ;;  %v14378_v3 = vpop.f32.mrb[204].mxu1  ;;  %14694 = vmatprep.subr.bf16.mxu0 %v15315_v59  ;;  %v7491_v50 = vmax.f32 %v5584_v34, 0.0 }
 0x438   : > { %v7494_v19 = vmax.f32 %v5595_v22, 0.0  ;;  %v5527_v60 = vadd.f32 %v14378_v3, %v18481_v9  ;;  %v5518_v5 = vpop.f32.mrb[205].mxu1  ;;  %14695 = vmatpush3.bf16.msra.mxu0 %v15315_v59 }
 0x439   : > { %v7492_v0 = vmax.f32 %v5587_v16, 0.0  ;;  %v5519_v15 = vadd.f32 %v5518_v5, %v18455_v58  ;;  %v14379_v11 = vpop.f32.mrb[206].mxu1  ;;  %14833 = vmatpush3.bf16.msra.mxu1 %v15314_v62 }
 0x43a   : > { %v18512_v46 = vpack.c.bf16 %v7494_v19, %v7493_v13  ;;  %v5530_v36 = vadd.f32 %v14379_v11, %v18484_v48  ;;  %v5521_v2 = vpop.f32.mrb[207].mxu1  ;;  %14834 = vmatprep.subr.bf16.mxu1 %v15316_v39  ;;  %v7489_v12 = vmax.f32 %v5527_v60, 0.0 }
 0x43b   : > { %v18518_v27 = vpack.c.bf16 %v7492_v0, %v7491_v50  ;;  %v5522_v45 = vadd.f32 %v5521_v2, %v18472_v31  ;;  %14697 = vmatmul.mubr.bf16.vlgmr.msra.gmra.mrb[4].mxu0 %v18495_v51  ;;  %v7487_v49 = vmax.f32 %v5519_v15, 0.0 }
 0x43c   : > { %v7490_v32 = vmax.f32 %v5530_v36, 0.0 }
 0x43d   : > { %v7488_v14 = vmax.f32 %v5522_v45, 0.0  ;;  %14835 = vmatpush3.bf16.msra.mxu1 %v15316_v39 }
 0x43e   : > { %v7614_v6 = vpack.c.bf16 %v7490_v32, %v7489_v12  ;;  %14836 = vmatprep.subr.bf16.mxu1 %v15317_v28 }
 0x43f   : > { %v7613_v63 = vpack.c.bf16 %v7488_v14, %v7487_v49  ;;  %v14408_v4 = vpop.f32.mrb[204].mxu0 }
 0x440   : > { %v5722_v25 = vadd.f32 %v14408_v4, %v18481_v9  ;;  %v5713_v37 = vpop.f32.mrb[205].mxu0 }
 0x441   : > { %v5714_v10 = vadd.f32 %v5713_v37, %v18455_v58  ;;  %v14409_v44 = vpop.f32.mrb[206].mxu0  ;;  %14700 = vmatprep.mubr.bf16.mxu0 %v7613_v63  ;;  %14837 = vmatpush3.bf16.msra.mxu1 %v15317_v28 }
 0x442   : > { %v5725_v57 = vadd.f32 %v14409_v44, %v18484_v48  ;;  %v5716_v47 = vpop.f32.mrb[207].mxu0  ;;  %14838 = vmatprep.subr.bf16.mxu1 %v15318_v54  ;;  %v7501_v20 = vmax.f32 %v5722_v25, 0.0 }
 0x443   : > { %v5717_v23 = vadd.f32 %v5716_v47, %v18472_v31  ;;  %v14398_v42 = vpop.f32.mrb[208].mxu1  ;;  %14701 = vmatmul.mubr.bf16.gmra.mrb[8].mxu0 %v7614_v6  ;;  %v7499_v35 = vmax.f32 %v5714_v10, 0.0 }
 0x444   : > { %v7502_v33 = vmax.f32 %v5725_v57, 0.0  ;;  %v5657_v55 = vadd.f32 %v14398_v42, %v18481_v9  ;;  %v5648_v24 = vpop.f32.mrb[209].mxu1  ;;  %14704 = vmatprep.mubr.bf16.mxu0 %v18518_v27 }
 0x445   : > { %v7500_v1 = vmax.f32 %v5717_v23, 0.0  ;;  %v5649_v52 = vadd.f32 %v5648_v24, %v18455_v58  ;;  %v14399_v29 = vpop.f32.mrb[210].mxu1  ;;  %14839 = vmatpush3.bf16.msra.mxu1 %v15318_v54 }
 0x446   : > { %v18532_v18 = vpack.c.bf16 %v7502_v33, %v7501_v20  ;;  %v5660_v17 = vadd.f32 %v14399_v29, %v18484_v48  ;;  %v5651_v43 = vpop.f32.mrb[211].mxu1  ;;  %v7497_v7 = vmax.f32 %v5657_v55, 0.0 }
 0x447   : > { %v18535_v8 = vpack.c.bf16 %v7500_v1, %v7499_v35  ;;  %v5652_v30 = vadd.f32 %v5651_v43, %v18472_v31  ;;  %v7495_v26 = vmax.f32 %v5649_v52, 0.0 }
 0x448   : > { %v7498_v40 = vmax.f32 %v5660_v17, 0.0  ;;  %14841 = vmatmul.mubr.bf16.vlgmr.msra.gmra.mrb[12].mxu1 %v18495_v51 }
 0x449   : > { %v7496_v62 = vmax.f32 %v5652_v30, 0.0  ;;  %14844 = vmatprep.mubr.bf16.mxu1 %v7613_v63 }
 0x44a   : > { %v18539_v53 = vpack.c.bf16 %v7498_v40, %v7497_v7 }
 0x44b   : > { %v7617_v21 = vpack.c.bf16 %v7496_v62, %v7495_v26  ;;  %v14428_v59 = vpop.f32.mrb[208].mxu0  ;;  %14705 = vmatmul.mubr.bf16.gmra.mrb[12].mxu0 %v18512_v46 }
 0x44c   : > { %v5852_v56 = vadd.f32 %v14428_v59, %v18481_v9  ;;  %v5843_v61 = vpop.f32.mrb[209].mxu0 }
 0x44d   : > { %v5844_v34 = vadd.f32 %v5843_v61, %v18455_v58  ;;  %v14429_v38 = vpop.f32.mrb[210].mxu0  ;;  %14708 = vmatprep.mubr.bf16.mxu0 %v7617_v21 }
 0x44e   : > { %v5855_v22 = vadd.f32 %v14429_v38, %v18484_v48  ;;  %v5846_v41 = vpop.f32.mrb[211].mxu0  ;;  %v7509_v16 = vmax.f32 %v5852_v56, 0.0 }
 0x44f   : > { %v5847_v51 = vadd.f32 %v5846_v41, %v18472_v31  ;;  %v14418_v39 = vpop.f32.mrb[212].mxu1  ;;  %v7507_v60 = vmax.f32 %v5844_v34, 0.0 }
 0x450   : > { %v7510_v3 = vmax.f32 %v5855_v22, 0.0  ;;  %v5787_v13 = vadd.f32 %v14418_v39, %v18481_v9  ;;  %v5778_v19 = vpop.f32.mrb[213].mxu1  ;;  %14845 = vmatmul.mubr.bf16.gmra.mrb[16].mxu1 %v7614_v6 }
 0x451   : > { %v7508_v5 = vmax.f32 %v5847_v51, 0.0  ;;  %v5779_v50 = vadd.f32 %v5778_v19, %v18455_v58  ;;  %v14419_v0 = vpop.f32.mrb[214].mxu1  ;;  %14848 = vmatprep.mubr.bf16.mxu1 %v18518_v27 }
 0x452   : > { %v18549_v15 = vpack.c.bf16 %v7510_v3, %v7509_v16  ;;  %v5790_v11 = vadd.f32 %v14419_v0, %v18484_v48  ;;  %v5781_v36 = vpop.f32.mrb[215].mxu1  ;;  %v7505_v45 = vmax.f32 %v5787_v13, 0.0 }
 0x453   : > { %v18552_v2 = vpack.c.bf16 %v7508_v5, %v7507_v60  ;;  %v5782_v28 = vadd.f32 %v5781_v36, %v18472_v31  ;;  %14709 = vmatmul.mubr.bf16.gmra.mrb[16].mxu0 %v18539_v53  ;;  %v7503_v32 = vmax.f32 %v5779_v50, 0.0 }
 0x454   : > { %v7506_v12 = vmax.f32 %v5790_v11, 0.0  ;;  %14712 = vmatprep.mubr.bf16.mxu0 %v18535_v8 }
 0x455   : > { %v7504_v49 = vmax.f32 %v5782_v28, 0.0 }
 0x456   : > { %v18557_v14 = vpack.c.bf16 %v7506_v12, %v7505_v45 }
 0x457   : > { %v7621_v27 = vpack.c.bf16 %v7504_v49, %v7503_v32  ;;  %v14448_v6 = vpop.f32.mrb[212].mxu0 }
 0x458   : > { %v5982_v54 = vadd.f32 %v14448_v6, %v18481_v9  ;;  %v5973_v63 = vpop.f32.mrb[213].mxu0  ;;  %14849 = vmatmul.mubr.bf16.gmra.mrb[20].mxu1 %v18512_v46 }
 0x459   : > { %v5974_v4 = vadd.f32 %v5973_v63, %v18455_v58  ;;  %v14449_v25 = vpop.f32.mrb[214].mxu0  ;;  %14852 = vmatprep.mubr.bf16.mxu1 %v7617_v21 }
 0x45a   : > { %v5985_v37 = vadd.f32 %v14449_v25, %v18484_v48  ;;  %v5976_v10 = vpop.f32.mrb[215].mxu0  ;;  %v7517_v47 = vmax.f32 %v5982_v54, 0.0 }
 0x45b   : > { %v5977_v44 = vadd.f32 %v5976_v10, %v18472_v31  ;;  %v14438_v57 = vpop.f32.mrb[216].mxu1  ;;  %14713 = vmatmul.mubr.bf16.gmra.mrb[20].mxu0 %v18532_v18  ;;  %v7515_v33 = vmax.f32 %v5974_v4, 0.0 }
 0x45c   : > { %v7518_v23 = vmax.f32 %v5985_v37, 0.0  ;;  %v5917_v42 = vadd.f32 %v14438_v57, %v18481_v9  ;;  %v5908_v20 = vpop.f32.mrb[217].mxu1  ;;  %14716 = vmatprep.mubr.bf16.mxu0 %v7621_v27 }
 0x45d   : > { %v7516_v46 = vmax.f32 %v5977_v44, 0.0  ;;  %v5909_v55 = vadd.f32 %v5908_v20, %v18455_v58  ;;  %v14439_v24 = vpop.f32.mrb[218].mxu1 }
 0x45e   : > { %v18567_v35 = vpack.c.bf16 %v7518_v23, %v7517_v47  ;;  %v5920_v1 = vadd.f32 %v14439_v24, %v18484_v48  ;;  %v5911_v52 = vpop.f32.mrb[219].mxu1  ;;  %v7513_v43 = vmax.f32 %v5917_v42, 0.0 }
 0x45f   : > { %v18570_v29 = vpack.c.bf16 %v7516_v46, %v7515_v33  ;;  %v5912_v17 = vadd.f32 %v5911_v52, %v18472_v31  ;;  %v7511_v7 = vmax.f32 %v5909_v55, 0.0 }
 0x460   : > { %v7514_v30 = vmax.f32 %v5920_v1, 0.0  ;;  %14853 = vmatmul.mubr.bf16.gmra.mrb[24].mxu1 %v18539_v53 }
 0x461   : > { %v7512_v40 = vmax.f32 %v5912_v17, 0.0  ;;  %14856 = vmatprep.mubr.bf16.mxu1 %v18535_v8 }
 0x462   : > { %v18575_v26 = vpack.c.bf16 %v7514_v30, %v7513_v43 }
 0x463   : > { %v18577_v62 = vpack.c.bf16 %v7512_v40, %v7511_v7  ;;  %v14468_v21 = vpop.f32.mrb[216].mxu0  ;;  %14717 = vmatmul.mubr.bf16.gmra.mrb[24].mxu0 %v18557_v14 }
 0x464   : > { %v6112_v59 = vadd.f32 %v14468_v21, %v18481_v9  ;;  %v6103_v56 = vpop.f32.mrb[217].mxu0  ;;  %14720 = vmatprep.mubr.bf16.mxu0 %v18552_v2 }
 0x465   : > { %v6104_v61 = vadd.f32 %v6103_v56, %v18455_v58  ;;  %v14469_v34 = vpop.f32.mrb[218].mxu0 }
 0x466   : > { %v6115_v53 = vadd.f32 %v14469_v34, %v18484_v48  ;;  %v6106_v38 = vpop.f32.mrb[219].mxu0  ;;  %v7525_v41 = vmax.f32 %v6112_v59, 0.0 }
 0x467   : > { %v6107_v8 = vadd.f32 %v6106_v38, %v18472_v31  ;;  %v14458_v22 = vpop.f32.mrb[220].mxu1  ;;  %v7523_v3 = vmax.f32 %v6104_v61, 0.0 }
 0x468   : > { %v7526_v51 = vmax.f32 %v6115_v53, 0.0  ;;  %v6047_v39 = vadd.f32 %v14458_v22, %v18481_v9  ;;  %v6038_v16 = vpop.f32.mrb[221].mxu1  ;;  %14857 = vmatmul.mubr.bf16.gmra.mrb[28].mxu1 %v18532_v18 }
 0x469   : > { %v7524_v13 = vmax.f32 %v6107_v8, 0.0  ;;  %v6039_v19 = vadd.f32 %v6038_v16, %v18455_v58  ;;  %v14459_v60 = vpop.f32.mrb[222].mxu1  ;;  %14860 = vmatprep.mubr.bf16.mxu1 %v7621_v27 }
 0x46a   : > { %v18588_v5 = vpack.c.bf16 %v7526_v51, %v7525_v41  ;;  %v6050_v50 = vadd.f32 %v14459_v60, %v18484_v48  ;;  %v6041_v0 = vpop.f32.mrb[223].mxu1  ;;  %v7521_v28 = vmax.f32 %v6047_v39, 0.0 }
 0x46b   : > { %v18591_v11 = vpack.c.bf16 %v7524_v13, %v7523_v3  ;;  %v6042_v36 = vadd.f32 %v6041_v0, %v18472_v31  ;;  %14721 = vmatmul.mubr.bf16.gmra.mrb[28].mxu0 %v18549_v15  ;;  %v7519_v18 = vmax.f32 %v6039_v19, 0.0 }
 0x46c   : > { %v7522_v45 = vmax.f32 %v6050_v50, 0.0  ;;  %14724 = vmatprep.mubr.bf16.mxu0 %v18577_v62 }
 0x46d   : > { %v7520_v12 = vmax.f32 %v6042_v36, 0.0 }
 0x46e   : > { %v18596_v32 = vpack.c.bf16 %v7522_v45, %v7521_v28 }
 0x46f   : > { %v18598_v49 = vpack.c.bf16 %v7520_v12, %v7519_v18  ;;  %v14488_v27 = vpop.f32.mrb[220].mxu0 }
 0x470   : > { %v6242_v6 = vadd.f32 %v14488_v27, %v18481_v9  ;;  %v6233_v54 = vpop.f32.mrb[221].mxu0  ;;  %14861 = vmatmul.mubr.bf16.gmra.mrb[32].mxu1 %v18557_v14 }
 0x471   : > { %v6234_v63 = vadd.f32 %v6233_v54, %v18455_v58  ;;  %v14489_v4 = vpop.f32.mrb[222].mxu0  ;;  %14864 = vmatprep.mubr.bf16.mxu1 %v18552_v2 }
 0x472   : > { %v6245_v25 = vadd.f32 %v14489_v4, %v18484_v48  ;;  %v6236_v37 = vpop.f32.mrb[223].mxu0  ;;  %v7533_v57 = vmax.f32 %v6242_v6, 0.0 }
 0x473   : > { %v6237_v10 = vadd.f32 %v6236_v37, %v18472_v31  ;;  %v14478_v44 = vpop.f32.mrb[224].mxu1  ;;  %14725 = vmatmul.mubr.bf16.gmra.mrb[32].mxu0 %v18575_v26  ;;  %v7531_v14 = vmax.f32 %v6234_v63, 0.0 }
 0x474   : > { %v7534_v47 = vmax.f32 %v6245_v25, 0.0  ;;  %v6177_v23 = vadd.f32 %v14478_v44, %v18481_v9  ;;  %v6168_v42 = vpop.f32.mrb[225].mxu1  ;;  %14728 = vmatprep.mubr.bf16.mxu0 %v18570_v29 }
 0x475   : > { %v7532_v20 = vmax.f32 %v6237_v10, 0.0  ;;  %v6169_v33 = vadd.f32 %v6168_v42, %v18455_v58  ;;  %v14479_v2 = vpop.f32.mrb[226].mxu1 }
 0x476   : > { %v18610_v46 = vpack.c.bf16 %v7534_v47, %v7533_v57  ;;  %v6180_v55 = vadd.f32 %v14479_v2, %v18484_v48  ;;  %v6171_v24 = vpop.f32.mrb[227].mxu1  ;;  %v7529_v17 = vmax.f32 %v6177_v23, 0.0 }
 0x477   : > { %v18613_v1 = vpack.c.bf16 %v7532_v20, %v7531_v14  ;;  %v6172_v52 = vadd.f32 %v6171_v24, %v18472_v31  ;;  %v7527_v30 = vmax.f32 %v6169_v33, 0.0 }
 0x478   : > { %v7530_v43 = vmax.f32 %v6180_v55, 0.0  ;;  %14865 = vmatmul.mubr.bf16.gmra.mrb[36].mxu1 %v18549_v15 }
 0x479   : > { %v7528_v7 = vmax.f32 %v6172_v52, 0.0  ;;  %14868 = vmatprep.mubr.bf16.mxu1 %v18577_v62 }
 0x47a   : > { %v18618_v40 = vpack.c.bf16 %v7530_v43, %v7529_v17 }
 0x47b   : > { %v18620_v21 = vpack.c.bf16 %v7528_v7, %v7527_v30  ;;  %v14508_v59 = vpop.f32.mrb[224].mxu0  ;;  %14729 = vmatmul.mubr.bf16.gmra.mrb[36].mxu0 %v18567_v35 }
 0x47c   : > { %v6372_v56 = vadd.f32 %v14508_v59, %v18481_v9  ;;  %v6363_v61 = vpop.f32.mrb[225].mxu0  ;;  %14732 = vmatprep.mubr.bf16.mxu0 %v18598_v49 }
 0x47d   : > { %v6364_v34 = vadd.f32 %v6363_v61, %v18455_v58  ;;  %v14509_v53 = vpop.f32.mrb[226].mxu0 }
 0x47e   : > { %v6375_v15 = vadd.f32 %v14509_v53, %v18484_v48  ;;  %v6366_v38 = vpop.f32.mrb[227].mxu0  ;;  %v7541_v22 = vmax.f32 %v6372_v56, 0.0 }
 0x47f   : > { %v6367_v62 = vadd.f32 %v6366_v38, %v18472_v31  ;;  %v14498_v8 = vpop.f32.mrb[228].mxu1  ;;  %v7539_v16 = vmax.f32 %v6364_v34, 0.0 }
 0x480   : > { %v7542_v41 = vmax.f32 %v6375_v15, 0.0  ;;  %v6307_v51 = vadd.f32 %v14498_v8, %v18481_v9  ;;  %v6298_v39 = vpop.f32.mrb[229].mxu1  ;;  %14869 = vmatmul.mubr.bf16.gmra.mrb[40].mxu1 %v18575_v26 }
 0x481   : > { %v7540_v3 = vmax.f32 %v6367_v62, 0.0  ;;  %v6299_v13 = vadd.f32 %v6298_v39, %v18455_v58  ;;  %v14499_v19 = vpop.f32.mrb[230].mxu1  ;;  %14872 = vmatprep.mubr.bf16.mxu1 %v18570_v29 }
 0x482   : > { %v18632_v60 = vpack.c.bf16 %v7542_v41, %v7541_v22  ;;  %v6310_v50 = vadd.f32 %v14499_v19, %v18484_v48  ;;  %v6301_v0 = vpop.f32.mrb[231].mxu1  ;;  %v7537_v45 = vmax.f32 %v6307_v51, 0.0 }
 0x483   : > { %v18635_v36 = vpack.c.bf16 %v7540_v3, %v7539_v16  ;;  %v6302_v28 = vadd.f32 %v6301_v0, %v18472_v31  ;;  %14733 = vmatmul.mubr.bf16.gmra.mrb[40].mxu0 %v18596_v32  ;;  %v7535_v18 = vmax.f32 %v6299_v13, 0.0 }
 0x484   : > { %v7538_v26 = vmax.f32 %v6310_v50, 0.0  ;;  %14736 = vmatprep.mubr.bf16.mxu0 %v18591_v11 }
 0x485   : > { %v7536_v12 = vmax.f32 %v6302_v28, 0.0 }
 0x486   : > { %v18640_v27 = vpack.c.bf16 %v7538_v26, %v7537_v45 }
 0x487   : > { %v18642_v29 = vpack.c.bf16 %v7536_v12, %v7535_v18  ;;  %v14528_v6 = vpop.f32.mrb[228].mxu0 }
 0x488   : > { %v6502_v54 = vadd.f32 %v14528_v6, %v18481_v9  ;;  %v6493_v63 = vpop.f32.mrb[229].mxu0  ;;  %14873 = vmatmul.mubr.bf16.gmra.mrb[44].mxu1 %v18567_v35 }
 0x489   : > { %v6494_v4 = vadd.f32 %v6493_v63, %v18455_v58  ;;  %v14529_v25 = vpop.f32.mrb[230].mxu0  ;;  %14876 = vmatprep.mubr.bf16.mxu1 %v18598_v49 }
 0x48a   : > { %v6505_v37 = vadd.f32 %v14529_v25, %v18484_v48  ;;  %v6496_v10 = vpop.f32.mrb[231].mxu0  ;;  %v7549_v47 = vmax.f32 %v6502_v54, 0.0 }
 0x48b   : > { %v6497_v44 = vadd.f32 %v6496_v10, %v18472_v31  ;;  %v14518_v57 = vpop.f32.mrb[232].mxu1  ;;  %14737 = vmatmul.mubr.bf16.gmra.mrb[44].mxu0 %v18588_v5  ;;  %v7547_v35 = vmax.f32 %v6494_v4, 0.0 }
 0x48c   : > { %v7550_v23 = vmax.f32 %v6505_v37, 0.0  ;;  %v6437_v42 = vadd.f32 %v14518_v57, %v18481_v9  ;;  %v6428_v14 = vpop.f32.mrb[233].mxu1  ;;  %14740 = vmatprep.mubr.bf16.mxu0 %v18620_v21 }
 0x48d   : > { %v7548_v20 = vmax.f32 %v6497_v44, 0.0  ;;  %v6429_v33 = vadd.f32 %v6428_v14, %v18455_v58  ;;  %v14519_v49 = vpop.f32.mrb[234].mxu1 }
 0x48e   : > { %v18654_v2 = vpack.c.bf16 %v7550_v23, %v7549_v47  ;;  %v6440_v55 = vadd.f32 %v14519_v49, %v18484_v48  ;;  %v6431_v24 = vpop.f32.mrb[235].mxu1  ;;  %v7545_v43 = vmax.f32 %v6437_v42, 0.0 }
 0x48f   : > { %v18657_v52 = vpack.c.bf16 %v7548_v20, %v7547_v35  ;;  %v6432_v17 = vadd.f32 %v6431_v24, %v18472_v31  ;;  %v7543_v7 = vmax.f32 %v6429_v33, 0.0 }
 0x490   : > { %v7546_v30 = vmax.f32 %v6440_v55, 0.0  ;;  %14877 = vmatmul.mubr.bf16.gmra.mrb[48].mxu1 %v18596_v32 }
 0x491   : > { %v7544_v59 = vmax.f32 %v6432_v17, 0.0  ;;  %14880 = vmatprep.mubr.bf16.mxu1 %v18591_v11 }
 0x492   : > { %v18662_v56 = vpack.c.bf16 %v7546_v30, %v7545_v43 }
 0x493   : > { %v18664_v61 = vpack.c.bf16 %v7544_v59, %v7543_v7  ;;  %v14548_v34 = vpop.f32.mrb[232].mxu0  ;;  %14741 = vmatmul.mubr.bf16.gmra.mrb[48].mxu0 %v18618_v40 }
 0x494   : > { %v6632_v53 = vadd.f32 %v14548_v34, %v18481_v9  ;;  %v6623_v15 = vpop.f32.mrb[233].mxu0  ;;  %14744 = vmatprep.mubr.bf16.mxu0 %v18613_v1 }
 0x495   : > { %v6624_v38 = vadd.f32 %v6623_v15, %v18455_v58  ;;  %v14549_v62 = vpop.f32.mrb[234].mxu0 }
 0x496   : > { %v6635_v32 = vadd.f32 %v14549_v62, %v18484_v48  ;;  %v6626_v8 = vpop.f32.mrb[235].mxu0  ;;  %v7557_v41 = vmax.f32 %v6632_v53, 0.0 }
 0x497   : > { %v6627_v11 = vadd.f32 %v6626_v8, %v18472_v31  ;;  %v14538_v22 = vpop.f32.mrb[236].mxu1  ;;  %v7555_v3 = vmax.f32 %v6624_v38, 0.0 }
 0x498   : > { %v7558_v51 = vmax.f32 %v6635_v32, 0.0  ;;  %v6567_v39 = vadd.f32 %v14538_v22, %v18481_v9  ;;  %v6558_v16 = vpop.f32.mrb[237].mxu1  ;;  %14881 = vmatmul.mubr.bf16.gmra.mrb[52].mxu1 %v18588_v5 }
 0x499   : > { %v7556_v13 = vmax.f32 %v6627_v11, 0.0  ;;  %v6559_v19 = vadd.f32 %v6558_v16, %v18455_v58  ;;  %v14539_v50 = vpop.f32.mrb[238].mxu1  ;;  %14884 = vmatprep.mubr.bf16.mxu1 %v18620_v21 }
 0x49a   : > { %v18676_v0 = vpack.c.bf16 %v7558_v51, %v7557_v41  ;;  %v6570_v28 = vadd.f32 %v14539_v50, %v18484_v48  ;;  %v6561_v45 = vpop.f32.mrb[239].mxu1  ;;  %v7553_v12 = vmax.f32 %v6567_v39, 0.0 }
 0x49b   : > { %v18679_v26 = vpack.c.bf16 %v7556_v13, %v7555_v3  ;;  %v6562_v18 = vadd.f32 %v6561_v45, %v18472_v31  ;;  %14745 = vmatmul.mubr.bf16.gmra.mrb[52].mxu0 %v18610_v46  ;;  %v7551_v6 = vmax.f32 %v6559_v19, 0.0 }
 0x49c   : > { %v7554_v5 = vmax.f32 %v6570_v28, 0.0  ;;  %14748 = vmatprep.mubr.bf16.mxu0 %v18642_v29 }
 0x49d   : > { %v7552_v54 = vmax.f32 %v6562_v18, 0.0 }
 0x49e   : > { %v18684_v63 = vpack.c.bf16 %v7554_v5, %v7553_v12 }
 0x49f   : > { %v18686_v21 = vpack.c.bf16 %v7552_v54, %v7551_v6  ;;  %v14568_v4 = vpop.f32.mrb[236].mxu0 }
 0x4a0   : > { %14885 = vmatmul.mubr.bf16.gmra.mrb[56].mxu1 %v18618_v40  ;;  %v6762_v25 = vadd.f32 %v14568_v4, %v18481_v9  ;;  %v6753_v37 = vpop.f32.mrb[237].mxu0 }
 0x4a1   : > { %14888 = vmatprep.mubr.bf16.mxu1 %v18613_v1  ;;  %v6754_v10 = vadd.f32 %v6753_v37, %v18455_v58  ;;  %v14569_v44 = vpop.f32.mrb[238].mxu0 }
 0x4a2   : > { %v6765_v57 = vadd.f32 %v14569_v44, %v18484_v48  ;;  %v6756_v47 = vpop.f32.mrb[239].mxu0  ;;  %v7565_v35 = vmax.f32 %v6762_v25, 0.0 }
 0x4a3   : > { %v14558_v23 = vpop.f32.mrb[240].mxu1  ;;  %v6757_v42 = vadd.f32 %v6756_v47, %v18472_v31  ;;  %14749 = vmatmul.mubr.bf16.gmra.mrb[56].mxu0 %v18640_v27  ;;  %v7563_v33 = vmax.f32 %v6754_v10, 0.0 }
 0x4a4   : > { %v6697_v14 = vadd.f32 %v14558_v23, %v18481_v9  ;;  %v6688_v40 = vpop.f32.mrb[241].mxu1  ;;  %v7566_v20 = vmax.f32 %v6765_v57, 0.0  ;;  %14752 = vmatprep.mubr.bf16.mxu0 %v18635_v36 }
 0x4a5   : > { %v6689_v1 = vadd.f32 %v6688_v40, %v18455_v58  ;;  %v14559_v49 = vpop.f32.mrb[242].mxu1  ;;  %v7564_v55 = vmax.f32 %v6757_v42, 0.0 }
 0x4a6   : > { %v6700_v24 = vadd.f32 %v14559_v49, %v18484_v48  ;;  %v18699_v17 = vpack.c.bf16 %v7566_v20, %v7565_v35  ;;  %v6691_v43 = vpop.f32.mrb[243].mxu1  ;;  %v7561_v59 = vmax.f32 %v6697_v14, 0.0 }
 0x4a7   : > { %v6692_v30 = vadd.f32 %v6691_v43, %v18472_v31  ;;  %v18702_v7 = vpack.c.bf16 %v7564_v55, %v7563_v33  ;;  %v7559_v53 = vmax.f32 %v6689_v1, 0.0 }
 0x4a8   : > { %v7562_v34 = vmax.f32 %v6700_v24, 0.0  ;;  %14889 = vmatmul.mubr.bf16.gmra.mrb[60].mxu1 %v18610_v46 }
 0x4a9   : > { %v7560_v15 = vmax.f32 %v6692_v30, 0.0  ;;  %14892 = vmatprep.mubr.bf16.mxu1 %v18642_v29 }
 0x4aa   : > { %v18706_v38 = vpack.c.bf16 %v7562_v34, %v7561_v59 }
 0x4ab   : > { %v18708_v62 = vpack.c.bf16 %v7560_v15, %v7559_v53  ;;  %14753 = vmatmul.mubr.bf16.gmra.mrb[60].mxu0 %v18632_v60  ;;  %v14588_v32 = vpop.f32.mrb[240].mxu0 }
 0x4ac   : > { %14756 = vmatprep.mubr.bf16.mxu0 %v18664_v61  ;;  %v6892_v8 = vadd.f32 %v14588_v32, %v18481_v9  ;;  %v6883_v11 = vpop.f32.mrb[241].mxu0 }
 0x4ad   : > { %v6884_v22 = vadd.f32 %v6883_v11, %v18455_v58  ;;  %v14589_v41 = vpop.f32.mrb[242].mxu0 }
 0x4ae   : > { %v6895_v46 = vadd.f32 %v14589_v41, %v18484_v48  ;;  %v6886_v51 = vpop.f32.mrb[243].mxu0  ;;  %v7573_v13 = vmax.f32 %v6892_v8, 0.0 }
 0x4af   : > { %v14578_v39 = vpop.f32.mrb[244].mxu1  ;;  %v6887_v29 = vadd.f32 %v6886_v51, %v18472_v31  ;;  %v7571_v45 = vmax.f32 %v6884_v22, 0.0 }
 0x4b0   : > { %v6827_v16 = vadd.f32 %v14578_v39, %v18481_v9  ;;  %v6818_v3 = vpop.f32.mrb[245].mxu1  ;;  %14893 = vmatmul.mubr.bf16.gmra.mrb[64].mxu1 %v18640_v27  ;;  %v7574_v19 = vmax.f32 %v6895_v46, 0.0 }
 0x4b1   : > { %v6819_v50 = vadd.f32 %v6818_v3, %v18455_v58  ;;  %v14579_v28 = vpop.f32.mrb[246].mxu1  ;;  %14896 = vmatprep.mubr.bf16.mxu1 %v18635_v36  ;;  %v7572_v18 = vmax.f32 %v6887_v29, 0.0 }
 0x4b2   : > { %v6830_v12 = vadd.f32 %v14579_v28, %v18484_v48  ;;  %v6821_v5 = vpop.f32.mrb[247].mxu1  ;;  %v18721_v6 = vpack.c.bf16 %v7574_v19, %v7573_v13  ;;  %v7569_v27 = vmax.f32 %v6827_v16, 0.0 }
 0x4b3   : > { %v6822_v54 = vadd.f32 %v6821_v5, %v18472_v31  ;;  %v18724_v4 = vpack.c.bf16 %v7572_v18, %v7571_v45  ;;  %14757 = vmatmul.mubr.bf16.gmra.mrb[64].mxu0 %v18662_v56  ;;  %v7567_v37 = vmax.f32 %v6819_v50, 0.0 }
 0x4b4   : > { %v7570_v25 = vmax.f32 %v6830_v12, 0.0  ;;  %14760 = vmatprep.mubr.bf16.mxu0 %v18657_v52 }
 0x4b5   : > { %v7568_v10 = vmax.f32 %v6822_v54, 0.0 }
 0x4b6   : > { %v18728_v36 = vpack.c.bf16 %v7570_v25, %v7569_v27 }
 0x4b7   : > { %v18730_v44 = vpack.c.bf16 %v7568_v10, %v7567_v37 }
 0x4b8   : > { %14897 = vmatmul.mubr.bf16.gmra.mrb[68].mxu1 %v18632_v60  ;;  %v14608_v57 = vpop.f32.mrb[244].mxu0 }
 0x4b9   : > { %14900 = vmatprep.mubr.bf16.mxu1 %v18664_v61  ;;  %v7022_v47 = vadd.f32 %v14608_v57, %v18481_v9  ;;  %v7013_v23 = vpop.f32.mrb[245].mxu0 }
 0x4ba   : > { %v7014_v42 = vadd.f32 %v7013_v23, %v18455_v58  ;;  %v14609_v14 = vpop.f32.mrb[246].mxu0 }
 0x4bb   : > { %v14598_v35 = vpop.f32.mrb[248].mxu1  ;;  %14761 = vmatmul.mubr.bf16.gmra.mrb[68].mxu0 %v18654_v2  ;;  %v7025_v40 = vadd.f32 %v14609_v14, %v18484_v48  ;;  %v7016_v20 = vpop.f32.mrb[247].mxu0  ;;  %v7581_v55 = vmax.f32 %v7022_v47, 0.0 }
 0x4bc   : > { %v6957_v1 = vadd.f32 %v14598_v35, %v18481_v9  ;;  %v6948_v33 = vpop.f32.mrb[249].mxu1  ;;  %14764 = vmatprep.mubr.bf16.mxu0 %v18686_v21  ;;  %v7017_v60 = vadd.f32 %v7016_v20, %v18472_v31  ;;  %v7579_v59 = vmax.f32 %v7014_v42, 0.0 }
 0x4bd   : > { %v6949_v61 = vadd.f32 %v6948_v33, %v18455_v58  ;;  %v14599_v49 = vpop.f32.mrb[250].mxu1  ;;  %v7582_v24 = vmax.f32 %v7025_v40, 0.0 }
 0x4be   : > { %v6960_v43 = vadd.f32 %v14599_v49, %v18484_v48  ;;  %v6951_v30 = vpop.f32.mrb[251].mxu1  ;;  %v7580_v34 = vmax.f32 %v7017_v60, 0.0  ;;  %v7577_v32 = vmax.f32 %v6957_v1, 0.0 }
 0x4bf   : > { %v6952_v53 = vadd.f32 %v6951_v30, %v18472_v31  ;;  %v18744_v15 = vpack.c.bf16 %v7582_v24, %v7581_v55  ;;  %v7575_v22 = vmax.f32 %v6949_v61, 0.0 }
 0x4c0   : > { %v7578_v8 = vmax.f32 %v6960_v43, 0.0  ;;  %14901 = vmatmul.mubr.bf16.gmra.mrb[72].mxu1 %v18662_v56  ;;  %v18747_v11 = vpack.c.bf16 %v7580_v34, %v7579_v59 }
 0x4c1   : > { %v7576_v41 = vmax.f32 %v6952_v53, 0.0  ;;  %14904 = vmatprep.mubr.bf16.mxu1 %v18657_v52 }
 0x4c2   : > { %v18750_v46 = vpack.c.bf16 %v7578_v8, %v7577_v32 }
 0x4c3   : > { %v18752_v51 = vpack.c.bf16 %v7576_v41, %v7575_v22  ;;  %14765 = vmatmul.mubr.bf16.gmra.mrb[72].mxu0 %v18684_v63 }
 0x4c4   : > { %14768 = vmatprep.mubr.bf16.mxu0 %v18679_v26 }
 0x4c7   : > { %v14618_v39 = vpop.f32.mrb[252].mxu1  ;;  %v14628_v29 = vpop.f32.mrb[248].mxu0 }
 0x4c8   : > { %14905 = vmatmul.mubr.bf16.gmra.mrb[76].mxu1 %v18654_v2  ;;  %v7087_v56 = vadd.f32 %v14618_v39, %v18481_v9  ;;  %v7078_v16 = vpop.f32.mrb[253].mxu1  ;;  %v7152_v3 = vadd.f32 %v14628_v29, %v18481_v9  ;;  %v7143_v13 = vpop.f32.mrb[249].mxu0 }
 0x4c9   : > { %14908 = vmatprep.mubr.bf16.mxu1 %v18686_v21  ;;  %v7079_v52 = vadd.f32 %v7078_v16, %v18455_v58  ;;  %v14619_v19 = vpop.f32.mrb[254].mxu1  ;;  %v7144_v50 = vadd.f32 %v7143_v13, %v18455_v58  ;;  %v14629_v28 = vpop.f32.mrb[250].mxu0 }
 0x4ca   : > { %v7090_v45 = vadd.f32 %v14619_v19, %v18484_v48  ;;  %v7081_v18 = vpop.f32.mrb[255].mxu1  ;;  %v7155_v12 = vadd.f32 %v14629_v28, %v18484_v48  ;;  %v7146_v2 = vpop.f32.mrb[251].mxu0  ;;  %v7585_v27 = vmax.f32 %v7087_v56, 0.0  ;;  %v7589_v25 = vmax.f32 %v7152_v3, 0.0 }
 0x4cb   : > { %v7082_v5 = vadd.f32 %v7081_v18, %v18472_v31  ;;  %14769 = vmatmul.mubr.bf16.gmra.mrb[76].mxu0 %v18676_v0  ;;  %v7147_v54 = vadd.f32 %v7146_v2, %v18472_v31  ;;  %v7583_v10 = vmax.f32 %v7079_v52, 0.0  ;;  %v7587_v47 = vmax.f32 %v7144_v50, 0.0 }
 0x4cc   : > { %v7586_v21 = vmax.f32 %v7090_v45, 0.0  ;;  %14772 = vmatprep.mubr.bf16.mxu0 %v18708_v62  ;;  %v7590_v37 = vmax.f32 %v7155_v12, 0.0 }
 0x4cd   : > { %v7584_v57 = vmax.f32 %v7082_v5, 0.0  ;;  %v7588_v23 = vmax.f32 %v7147_v54, 0.0 }
 0x4ce   : > { %v18768_v42 = vpack.c.bf16 %v7586_v21, %v7585_v27  ;;  %v18770_v14 = vpack.c.bf16 %v7590_v37, %v7589_v25 }
 0x4cf   : > { %v18772_v35 = vpack.c.bf16 %v7584_v57, %v7583_v10  ;;  %v18774_v40 = vpack.c.bf16 %v7588_v23, %v7587_v47 }
 0x4d0   : > { %14909 = vmatmul.mubr.bf16.gmra.mrb[80].mxu1 %v18684_v63 }
 0x4d1   : > { %14912 = vmatprep.mubr.bf16.mxu1 %v18679_v26 }
 0x4d3   : > { %14773 = vmatmul.mubr.bf16.gmra.mrb[80].mxu0 %v18706_v38  ;;  %v14638_v20 = vpop.f32.mrb[0].mxu1 }
 0x4d4   : > { %14776 = vmatprep.mubr.bf16.mxu0 %v18702_v7  ;;  %v7217_v1 = vadd.f32 %v14638_v20, %v18481_v9  ;;  %v7208_v33 = vpop.f32.mrb[1].mxu1 }
 0x4d5   : > { %v7209_v60 = vadd.f32 %v7208_v33, %v18455_v58  ;;  %v14639_v61 = vpop.f32.mrb[2].mxu1 }
 0x4d6   : > { %v7220_v49 = vadd.f32 %v14639_v61, %v18484_v48  ;;  %v7211_v55 = vpop.f32.mrb[3].mxu1  ;;  %v7593_v63 = vmax.f32 %v7217_v1, 0.0 }
 0x4d7   : > { %v7212_v24 = vadd.f32 %v7211_v55, %v18472_v31  ;;  %v7591_v43 = vmax.f32 %v7209_v60, 0.0 }
 0x4d8   : > { %14913 = vmatmul.mubr.bf16.gmra.mrb[84].mxu1 %v18676_v0  ;;  %v7594_v26 = vmax.f32 %v7220_v49, 0.0 }
 0x4d9   : > { %14916 = vmatprep.mubr.bf16.mxu1 %v18708_v62  ;;  %v7592_v30 = vmax.f32 %v7212_v24, 0.0 }
 0x4da   : > { %v18786_v59 = vpack.c.bf16 %v7594_v26, %v7593_v63 }
 0x4db   : > { %v18788_v34 = vpack.c.bf16 %v7592_v30, %v7591_v43  ;;  %14777 = vmatmul.mubr.bf16.gmra.mrb[84].mxu0 %v18699_v17  ;;  %v14648_v53 = vpop.f32.mrb[252].mxu0 }
 0x4dc   : > { %14780 = vmatprep.mubr.bf16.mxu0 %v18730_v44  ;;  %v7282_v32 = vadd.f32 %v14648_v53, %v18481_v9  ;;  %v7273_v8 = vpop.f32.mrb[253].mxu0 }
 0x4dd   : > { %v7274_v0 = vadd.f32 %v7273_v8, %v18455_v58  ;;  %v14649_v22 = vpop.f32.mrb[254].mxu0 }
 0x4de   : > { %v7285_v41 = vadd.f32 %v14649_v22, %v18484_v48  ;;  %v7276_v62 = vpop.f32.mrb[255].mxu0  ;;  %v7597_v29 = vmax.f32 %v7282_v32, 0.0 }
 0x4df   : > { %v7277_v39 = vadd.f32 %v7276_v62, %v18472_v31  ;;  %v7595_v16 = vmax.f32 %v7274_v0, 0.0 }
 0x4e0   : > { %14917 = vmatmul.mubr.bf16.gmra.mrb[88].mxu1 %v18706_v38  ;;  %v7598_v56 = vmax.f32 %v7285_v41, 0.0 }
 0x4e1   : > { %14920 = vmatprep.mubr.bf16.mxu1 %v18702_v7  ;;  %v7596_v3 = vmax.f32 %v7277_v39, 0.0 }
 0x4e2   : > { %v18798_v13 = vpack.c.bf16 %v7598_v56, %v7597_v29 }
 0x4e3   : > { %v18800_v52 = vpack.c.bf16 %v7596_v3, %v7595_v16  ;;  %14781 = vmatmul.mubr.bf16.gmra.mrb[88].mxu0 %v18728_v36 }
 0x4e4   : > { %14784 = vmatprep.mubr.bf16.mxu0 %v18724_v4 }
 0x4e5   : > { %v14658_v19 = vpop.f32.mrb[4].mxu1 }
 0x4e6   : > { %v7347_v50 = vadd.f32 %v14658_v19, %v18481_v9  ;;  %v7338_v28 = vpop.f32.mrb[5].mxu1 }
 0x4e7   : > { %v7339_v38 = vadd.f32 %v7338_v28, %v18455_v58  ;;  %v14659_v45 = vpop.f32.mrb[6].mxu1 }
 0x4e8   : > { %14921 = vmatmul.mubr.bf16.gmra.mrb[92].mxu1 %v18699_v17  ;;  %v7350_v7 = vadd.f32 %v14659_v45, %v18484_v48  ;;  %v7341_v18 = vpop.f32.mrb[7].mxu1  ;;  %v7601_v2 = vmax.f32 %v7347_v50, 0.0 }
 0x4e9   : > { %14924 = vmatprep.mubr.bf16.mxu1 %v18730_v44  ;;  %v7342_v12 = vadd.f32 %v7341_v18, %v18472_v31  ;;  %v7599_v54 = vmax.f32 %v7339_v38, 0.0 }
 0x4ea   : > { %v7602_v5 = vmax.f32 %v7350_v7, 0.0 }
 0x4eb   : > { %v7600_v27 = vmax.f32 %v7342_v12, 0.0  ;;  %14785 = vmatmul.mubr.bf16.gmra.mrb[92].mxu0 %v18721_v6 }
 0x4ec   : > { %v18811_v21 = vpack.c.bf16 %v7602_v5, %v7601_v2  ;;  %14788 = vmatprep.mubr.bf16.mxu0 %v18752_v51 }
 0x4ed   : > { %v18814_v25 = vpack.c.bf16 %v7600_v27, %v7599_v54 }
 0x4ee   : > { %v14668_v17 = vpop.f32.mrb[0].mxu0 }
 0x4ef   : > { %v7412_v37 = vadd.f32 %v14668_v17, %v18481_v9  ;;  %v7403_v10 = vpop.f32.mrb[1].mxu0 }
 0x4f0   : > { %14925 = vmatmul.mubr.bf16.gmra.mrb[96].mxu1 %v18728_v36  ;;  %v7404_v44 = vadd.f32 %v7403_v10, %v18455_v58  ;;  %v14669_v57 = vpop.f32.mrb[2].mxu0 }
 0x4f1   : > { %14928 = vmatprep.mubr.bf16.mxu1 %v18724_v4  ;;  %v7415_v47 = vadd.f32 %v14669_v57, %v18484_v48  ;;  %v7406_v23 = vpop.f32.mrb[3].mxu0  ;;  %v7605_v1 = vmax.f32 %v7412_v37, 0.0 }
 0x4f2   : > { %v7407_v20 = vadd.f32 %v7406_v23, %v18472_v31  ;;  %v7603_v60 = vmax.f32 %v7404_v44, 0.0 }
 0x4f3   : > { %v7606_v33 = vmax.f32 %v7415_v47, 0.0  ;;  %14789 = vmatmul.mubr.bf16.gmra.mrb[96].mxu0 %v18750_v46 }
 0x4f4   : > { %v7604_v61 = vmax.f32 %v7407_v20, 0.0  ;;  %14792 = vmatprep.mubr.bf16.mxu0 %v18747_v11 }
 0x4f5   : > { %v18824_v49 = vpack.c.bf16 %v7606_v33, %v7605_v1 }
 0x4f6   : > { %v18826_v36 = vpack.c.bf16 %v7604_v61, %v7603_v60 }
 0x4f8   : > { %14929 = vmatmul.mubr.bf16.gmra.mrb[100].mxu1 %v18721_v6 }
 0x4f9   : > { %14932 = vmatprep.mubr.bf16.mxu1 %v18752_v51 }
 0x4fb   : > { %v14678_v4 = vpop.f32.mrb[8].mxu1  ;;  %14793 = vmatmul.mubr.bf16.gmra.mrb[100].mxu0 %v18744_v15 }
 0x4fc   : > { %v7477_v55 = vadd.f32 %v14678_v4, %v18481_v9  ;;  %v7468_v24 = vpop.f32.mrb[9].mxu1  ;;  %14796 = vmatprep.mubr.bf16.mxu0 %v18772_v35 }
 0x4fd   : > { %v7469_v63 = vadd.f32 %v7468_v24, %v18455_v58  ;;  %v14679_v26 = vpop.f32.mrb[10].mxu1 }
 0x4fe   : > { %v7480_v43 = vadd.f32 %v14679_v26, %v18484_v48  ;;  %v7471_v30 = vpop.f32.mrb[11].mxu1  ;;  %v7609_v32 = vmax.f32 %v7477_v55, 0.0 }
 0x4ff   : > { %v7472_v53 = vadd.f32 %v7471_v30, %v18472_v31  ;;  %v7607_v51 = vmax.f32 %v7469_v63, 0.0 }
 0x500   : > { %v7610_v6 = vmax.f32 %v7480_v43, 0.0  ;;  %14933 = vmatmul.mubr.bf16.gmra.mrb[104].mxu1 %v18750_v46 }
 0x501   : > { %v7608_v8 = vmax.f32 %v7472_v53, 0.0  ;;  %14936 = vmatprep.mubr.bf16.mxu1 %v18747_v11 }
 0x502   : > { %v18838_v9 = vpack.c.bf16 %v7610_v6, %v7609_v32 }
 0x503   : > { %v18840_v0 = vpack.c.bf16 %v7608_v8, %v7607_v51  ;;  %14797 = vmatmul.mubr.bf16.gmra.mrb[104].mxu0 %v18768_v42 }
 0x504   : > { %14800 = vmatprep.mubr.bf16.mxu0 %v18774_v40 }
 0x508   : > { %14937 = vmatmul.mubr.bf16.gmra.mrb[108].mxu1 %v18744_v15 }
 0x509   : > { %14940 = vmatprep.mubr.bf16.mxu1 %v18772_v35 }
 0x50b   : > { %14801 = vmatmul.mubr.bf16.gmra.mrb[108].mxu0 %v18770_v14 }
 0x50c   : > { %14804 = vmatprep.mubr.bf16.mxu0 %v18788_v34 }
 0x50e   : > { %v14698_v58 = vpop.f32.mrb[4].mxu0 }
 0x50f   : > { %v7773_v31 = vpop.f32.mrb[5].mxu0 }
 0x510   : > { %14941 = vmatmul.mubr.bf16.gmra.mrb[112].mxu1 %v18768_v42  ;;  %v14699_v48 = vpop.f32.mrb[6].mxu0 }
 0x511   : > { %14944 = vmatprep.mubr.bf16.mxu1 %v18774_v40  ;;  %v7776_v11 = vpop.f32.mrb[7].mxu0 }
 0x513   : > { %14805 = vmatmul.mubr.bf16.gmra.mrb[112].mxu0 %v18786_v59 }
 0x514   : > { %14808 = vmatprep.mubr.bf16.mxu0 %v18800_v52 }
 0x516   : > { %v14702_v46 = vpop.f32.mrb[8].mxu0 }
 0x517   : > { %v7789_v15 = vpop.f32.mrb[9].mxu0 }
 0x518   : > { %14945 = vmatmul.mubr.bf16.gmra.mrb[116].mxu1 %v18770_v14  ;;  %v14703_v35 = vpop.f32.mrb[10].mxu0 }
 0x519   : > { %14948 = vmatprep.mubr.bf16.mxu1 %v18788_v34  ;;  %v7792_v22 = vpop.f32.mrb[11].mxu0 }
 0x51b   : > { %v14842_v41 = vpop.f32.mrb[12].mxu1  ;;  %14809 = vmatmul.mubr.bf16.gmra.mrb[116].mxu0 %v18798_v13 }
 0x51c   : > { %v18855_v42 = vmax.f32 %v14698_v58, %v14842_v41  ;;  %v8382_v62 = vpop.f32.mrb[13].mxu1  ;;  %14812 = vmatprep.mubr.bf16.mxu0 %v18814_v25 }
 0x51d   : > { %v18858_v40 = vmax.f32 %v7773_v31, %v8382_v62  ;;  %v14843_v39 = vpop.f32.mrb[14].mxu1 }
 0x51e   : > { %22707 = vst [vmem:[#allocation31_spill] sm:$0xff] %v18855_v42  ;;  %v18860_v29 = vmax.f32 %v14699_v48, %v14843_v39  ;;  %v8385_v56 = vpop.f32.mrb[15].mxu1  ;;  %v14706_v16 = vpop.f32.mrb[12].mxu0 }
 0x51f   : > { %v18862_v14 = vmax.f32 %v7776_v11, %v8385_v56  ;;  %v7805_v3 = vpop.f32.mrb[13].mxu0  ;;  %v9125_v18 = vrot.slane %v18858_v40, 1  ;;  %v9262_v5 = vrot.slane %v18858_v40, 3  ;;  %v9398_v54 = vrot.slane %v18858_v40, 5 }
 0x520   : > { %14949 = vmatmul.mubr.bf16.gmra.mrb[120].mxu1 %v18786_v59  ;;  %v14707_v34 = vpop.f32.mrb[14].mxu0 }
 0x521   : > { %14952 = vmatprep.mubr.bf16.mxu1 %v18800_v52  ;;  %v7808_v19 = vpop.f32.mrb[15].mxu0  ;;  %v9534_v52 = vrot.slane %v18858_v40, 7  ;;  %v10110_v23 = vrot.slane %v18862_v14, 7  ;;  %v9838_v20 = vrot.slane %v18862_v14, 3  ;;  %v9702_v1 = vrot.slane %v18862_v14, 1 }
 0x522   : > { %v9974_v63 = vrot.slane %v18862_v14, 5 }
 0x523   : > { %v14846_v50 = vpop.f32.mrb[16].mxu1  ;;  %14813 = vmatmul.mubr.bf16.gmra.mrb[120].mxu0 %v18811_v21 }
 0x524   : > { %v18867_v28 = vmax.f32 %v14702_v46, %v14846_v50  ;;  %v8398_v38 = vpop.f32.mrb[17].mxu1  ;;  %14816 = vmatprep.mubr.bf16.mxu0 %v18826_v36 }
 0x525   : > { %v18870_v45 = vmax.f32 %v7789_v15, %v8398_v38  ;;  %v14847_v7 = vpop.f32.mrb[18].mxu1 }
 0x526   : > { %22708 = vst [vmem:[#allocation32_spill] sm:$0xff] %v18867_v28  ;;  %v18873_v12 = vmax.f32 %v14703_v35, %v14847_v7  ;;  %v8401_v59 = vpop.f32.mrb[19].mxu1  ;;  %v14710_v2 = vpop.f32.mrb[16].mxu0 }
 0x527   : > { %v18878_v27 = vmax.f32 %v7792_v22, %v8401_v59  ;;  %v7821_v17 = vpop.f32.mrb[17].mxu0  ;;  %v9535_v37 = vrot.slane %v18870_v45, 6  ;;  %v9263_v10 = vrot.slane %v18870_v45, 2  ;;  %v9126_v44 = vsel %vm9054_vm1, %v18870_v45, %v9125_v18 }
 0x528   : > { %14953 = vmatmul.mubr.bf16.gmra.mrb[124].mxu1 %v18798_v13  ;;  %v14711_v57 = vpop.f32.mrb[18].mxu0  ;;  %v9399_v47 = vrot.slane %v18870_v45, 4 }
 0x529   : > { %14956 = vmatprep.mubr.bf16.mxu1 %v18814_v25  ;;  %v7824_v33 = vpop.f32.mrb[19].mxu0  ;;  %v9536_v60 = vsel %vm9054_vm1, %v9535_v37, %v9534_v52  ;;  %v9264_v61 = vsel %vm9054_vm1, %v9263_v10, %v9262_v5  ;;  %v10111_v4 = vrot.slane %v18878_v27, 6  ;;  %v9839_v13 = vrot.slane %v18878_v27, 2 }
 0x52a   : > { %v9400_v55 = vsel %vm9054_vm1, %v9399_v47, %v9398_v54  ;;  %v9703_v24 = vsel %vm9054_vm1, %v18878_v27, %v9702_v1  ;;  %v9975_v26 = vrot.slane %v18878_v27, 4 }
 0x52b   : > { %v14850_v43 = vpop.f32.mrb[20].mxu1  ;;  %14817 = vmatmul.mubr.bf16.gmra.mrb[124].mxu0 %v18824_v49  ;;  %v10112_v25 = vsel %vm9054_vm1, %v10111_v4, %v10110_v23  ;;  %v9840_v30 = vsel %vm9054_vm1, %v9839_v13, %v9838_v20 }
 0x52c   : > { %v18902_v53 = vmax.f32 %v14706_v16, %v14850_v43  ;;  %v8414_v32 = vpop.f32.mrb[21].mxu1  ;;  %14820 = vmatprep.mubr.bf16.mxu0 %v18840_v0  ;;  %v9976_v6 = vsel %vm9054_vm1, %v9975_v26, %v9974_v63 }
 0x52d   : > { %v18906_v51 = vmax.f32 %v7805_v3, %v8414_v32  ;;  %v14851_v8 = vpop.f32.mrb[22].mxu1 }
 0x52e   : > { %22709 = vst [vmem:[#allocation33_spill] sm:$0xff] %v18902_v53  ;;  %v18908_v58 = vmax.f32 %v14707_v34, %v14851_v8  ;;  %v8417_v31 = vpop.f32.mrb[23].mxu1  ;;  %v14714_v48 = vpop.f32.mrb[20].mxu0 }
 0x52f   : > { %v18910_v11 = vmax.f32 %v7808_v19, %v8417_v31  ;;  %v7837_v46 = vpop.f32.mrb[21].mxu0  ;;  %v9537_v15 = vrot.slane %v18906_v51, 5  ;;  %v9265_v35 = vrot.slane %v18906_v51, 1  ;;  %v9127_v22 = vrot.slane %v18906_v51, 7 }
 0x530   : > { %22710 = vst [vmem:[#allocation34_spill] sm:$0xff] %v18908_v58  ;;  %14957 = vmatmul.mubr.bf16.gmra.mrb[128].mxu1 %v18811_v21  ;;  %v14715_v41 = vpop.f32.mrb[22].mxu0  ;;  %v9401_v62 = vrot.slane %v18906_v51, 3 }
 0x531   : > { %14960 = vmatprep.mubr.bf16.mxu1 %v18826_v36  ;;  %v7840_v39 = vpop.f32.mrb[23].mxu0  ;;  %v9538_v56 = vsel %vm9057_vm2, %v9537_v15, %v9536_v60  ;;  %v9266_v16 = vsel %vm9057_vm2, %v9265_v35, %v9264_v61  ;;  %v9128_v3 = vsel %vm9057_vm2, %v9127_v22, %v9126_v44  ;;  %v10113_v34 = vrot.slane %v18910_v11, 5 }
 0x532   : > { %v9402_v19 = vsel %vm9057_vm2, %v9401_v62, %v9400_v55  ;;  %v9841_v50 = vrot.slane %v18910_v11, 1  ;;  %v9704_v21 = vrot.slane %v18910_v11, 7  ;;  %v9977_v38 = vrot.slane %v18910_v11, 3 }
 0x533   : > { %v14854_v7 = vpop.f32.mrb[24].mxu1  ;;  %14821 = vmatmul.mubr.bf16.gmra.mrb[128].mxu0 %v18838_v9  ;;  %v10114_v36 = vsel %vm9057_vm2, %v10113_v34, %v10112_v25 }
 0x534   : > { %v18928_v18 = vmax.f32 %v14710_v2, %v14854_v7  ;;  %v8430_v59 = vpop.f32.mrb[25].mxu1  ;;  %v9842_v52 = vsel %vm9057_vm2, %v9841_v50, %v9840_v30  ;;  %v9705_v5 = vsel %vm9057_vm2, %v9704_v21, %v9703_v24  ;;  %v9978_v54 = vsel %vm9057_vm2, %v9977_v38, %v9976_v6 }
 0x535   : > { %v18933_v37 = vmax.f32 %v7821_v17, %v8430_v59  ;;  %v14855_v10 = vpop.f32.mrb[26].mxu1 }
 0x536   : > { %22711 = vst [vmem:[#allocation65_spill] sm:$0xff] %v18928_v18  ;;  %v18935_v44 = vmax.f32 %v14711_v57, %v14855_v10  ;;  %v8433_v47 = vpop.f32.mrb[27].mxu1  ;;  %v14718_v23 = vpop.f32.mrb[24].mxu0 }
 0x537   : > { %v18937_v20 = vmax.f32 %v7824_v33, %v8433_v47  ;;  %v7853_v1 = vpop.f32.mrb[25].mxu0  ;;  %v9539_v2 = vrot.slane %v18933_v37, 4  ;;  %v9267_v60 = vsel %vm9060_vm3, %v18933_v37, %v9266_v16  ;;  %v9129_v61 = vrot.slane %v18933_v37, 6 }
 0x538   : > { %22712 = vst [vmem:[#allocation35_spill] sm:$0xff] %v18935_v44  ;;  %14961 = vmatmul.mubr.bf16.gmra.mrb[132].mxu1 %v18824_v49  ;;  %v14719_v4 = vpop.f32.mrb[26].mxu0  ;;  %v9403_v17 = vrot.slane %v18933_v37, 2 }
 0x539   : > { %14964 = vmatprep.mubr.bf16.mxu1 %v18840_v0  ;;  %v7856_v57 = vpop.f32.mrb[27].mxu0  ;;  %v9540_v13 = vsel %vm9060_vm3, %v9539_v2, %v9538_v56  ;;  %v9130_v33 = vsel %vm9060_vm3, %v9129_v61, %v9128_v3  ;;  %v10115_v55 = vrot.slane %v18937_v20, 4  ;;  %v9843_v24 = vsel %vm9060_vm3, %v18937_v20, %v9842_v52 }
 0x53a   : > { %v9404_v63 = vsel %vm9060_vm3, %v9403_v17, %v9402_v19  ;;  %v9706_v26 = vrot.slane %v18937_v20, 6  ;;  %v9979_v49 = vrot.slane %v18937_v20, 2 }
 0x53b   : > { %v14858_v43 = vpop.f32.mrb[28].mxu1  ;;  %v10116_v25 = vsel %vm9060_vm3, %v10115_v55, %v10114_v36 }
 0x53c   : > { %v18955_v0 = vmax.f32 %v14714_v48, %v14858_v43  ;;  %v8446_v30 = vpop.f32.mrb[29].mxu1  ;;  %v9707_v32 = vsel %vm9060_vm3, %v9706_v26, %v9705_v5  ;;  %v9980_v6 = vsel %vm9060_vm3, %v9979_v49, %v9978_v54 }
 0x53d   : > { %v18959_v8 = vmax.f32 %v7837_v46, %v8446_v30  ;;  %v14859_v31 = vpop.f32.mrb[30].mxu1 }
 0x53e   : > { %22713 = vst [vmem:[#allocation36_spill] sm:$0xff] %v18955_v0  ;;  %v18961_v15 = vmax.f32 %v14715_v41, %v14859_v31  ;;  %v8449_v35 = vpop.f32.mrb[31].mxu1  ;;  %v14722_v22 = vpop.f32.mrb[28].mxu0 }
 0x53f   : > { %v18963_v62 = vmax.f32 %v7840_v39, %v8449_v35  ;;  %v7869_v56 = vpop.f32.mrb[29].mxu0  ;;  %v9541_v16 = vrot.slane %v18959_v8, 3  ;;  %v9268_v48 = vrot.slane %v18959_v8, 7  ;;  %v9131_v3 = vrot.slane %v18959_v8, 5 }
 0x540   : > { %22714 = vst [vmem:[#allocation37_spill] sm:$0xff] %v18961_v15  ;;  %14965 = vmatmul.mubr.bf16.gmra.mrb[136].mxu1 %v18838_v9  ;;  %v14723_v34 = vpop.f32.mrb[30].mxu0  ;;  %v9405_v46 = vrot.slane %v18959_v8, 1 }
 0x541   : > { %v7872_v19 = vpop.f32.mrb[31].mxu0  ;;  %v9542_v41 = vsel %vm9063_vm4, %v9541_v16, %v9540_v13  ;;  %v9269_v50 = vsel %vm9063_vm4, %v9268_v48, %v9267_v60  ;;  %v9132_v39 = vsel %vm9063_vm4, %v9131_v3, %v9130_v33  ;;  %v10117_v21 = vrot.slane %v18963_v62, 3 }
 0x542   : > { %v9406_v38 = vsel %vm9063_vm4, %v9405_v46, %v9404_v63  ;;  %v9844_v7 = vrot.slane %v18963_v62, 7  ;;  %v9708_v36 = vrot.slane %v18963_v62, 5  ;;  %v9981_v9 = vrot.slane %v18963_v62, 1 }
 0x543   : > { %v14862_v59 = vpop.f32.mrb[32].mxu1  ;;  %v10118_v52 = vsel %vm9063_vm4, %v10117_v21, %v10116_v25  ;;  %v9471_v16 = vrot.slane %v18870_v45, 5  ;;  %v9473_v46 = vrot.slane %v18906_v51, 4 }
 0x544   : > { %v18979_v5 = vmax.f32 %v14718_v23, %v14862_v59  ;;  %v8462_v54 = vpop.f32.mrb[33].mxu1  ;;  %v9845_v10 = vsel %vm9063_vm4, %v9844_v7, %v9843_v24  ;;  %v9709_v47 = vsel %vm9063_vm4, %v9708_v36, %v9707_v32  ;;  %v9982_v2 = vsel %vm9063_vm4, %v9981_v9, %v9980_v6 }
 0x545   : > { %v18984_v60 = vmax.f32 %v7853_v1, %v8462_v54  ;;  %v14863_v61 = vpop.f32.mrb[34].mxu1 }
 0x546   : > { %22715 = vst [vmem:[#allocation72_spill] sm:$0xff] %v18979_v5  ;;  %v18986_v17 = vmax.f32 %v14719_v4, %v14863_v61  ;;  %v8465_v13 = vpop.f32.mrb[35].mxu1  ;;  %v18988_v33 = vpop.f32.mrb[32].mxu0  ;;  %v9470_v4 = vrot.slane %v18858_v40, 6 }
 0x547   : > { %v18990_v55 = vmax.f32 %v7856_v57, %v8465_v13  ;;  %v18992_v23 = vpop.f32.mrb[33].mxu0  ;;  %v9543_v63 = vrot.slane %v18984_v60, 2  ;;  %v9270_v24 = vrot.slane %v18984_v60, 6  ;;  %v9133_v26 = vrot.slane %v18984_v60, 4 }
 0x548   : > { %22716 = vst [vmem:[#allocation38_spill] sm:$0xff] %v18986_v17  ;;  %v18997_v49 = vpop.f32.mrb[34].mxu0  ;;  %v9407_v1 = vsel %vm9066_vm5, %v18984_v60, %v9406_v38  ;;  %v9472_v36 = vsel %vm9054_vm1, %v9471_v16, %v9470_v4  ;;  %v9479_v54 = vrot.slane %v18984_v60, 1 }
 0x549   : > { %v19002_v43 = vpop.f32.mrb[35].mxu0  ;;  %v9544_v57 = vsel %vm9066_vm5, %v9543_v63, %v9542_v41  ;;  %v9271_v25 = vsel %vm9066_vm5, %v9270_v24, %v9269_v50  ;;  %v9134_v30 = vsel %vm9066_vm5, %v9133_v26, %v9132_v39  ;;  %v10119_v32 = vrot.slane %v18990_v55, 2 }
 0x54a   : > { %v9846_v6 = vrot.slane %v18990_v55, 6  ;;  %v9710_v31 = vrot.slane %v18990_v55, 4  ;;  %v9983_v35 = vsel %vm9066_vm5, %v18990_v55, %v9982_v2  ;;  %v9475_v41 = vrot.slane %v18933_v37, 3 }
 0x54b   : > { %v14866_v48 = vpop.f32.mrb[36].mxu1  ;;  %v10120_v3 = vsel %vm9066_vm5, %v10119_v32, %v10118_v52  ;;  %v9477_v50 = vrot.slane %v18959_v8, 2  ;;  %v9474_v52 = vsel %vm9057_vm2, %v9473_v46, %v9472_v36 }
 0x54c   : > { %v19017_v39 = vmax.f32 %v14722_v22, %v14866_v48  ;;  %v8478_v21 = vpop.f32.mrb[37].mxu1  ;;  %v9847_v38 = vsel %vm9066_vm5, %v9846_v6, %v9845_v10  ;;  %v9711_v7 = vsel %vm9066_vm5, %v9710_v31, %v9709_v47  ;;  %v9476_v13 = vsel %vm9060_vm3, %v9475_v41, %v9474_v52 }
 0x54d   : > { %v19022_v9 = vmax.f32 %v7869_v56, %v8478_v21  ;;  %v14867_v59 = vpop.f32.mrb[38].mxu1  ;;  %v9198_v10 = vrot.slane %v18858_v40, 2  ;;  %v9199_v47 = vrot.slane %v18870_v45, 1  ;;  %v9478_v6 = vsel %vm9063_vm4, %v9477_v50, %v9476_v13 }
 0x54e   : > { %22717 = vst [vmem:[#allocation39_spill] sm:$0xff] %v19017_v39  ;;  %v19026_v2 = vmax.f32 %v14723_v34, %v14867_v59  ;;  %v8481_v61 = vpop.f32.mrb[39].mxu1  ;;  %v19028_v22 = vpop.f32.mrb[36].mxu0 }
 0x54f   : > { %v19033_v63 = vmax.f32 %v7872_v19, %v8481_v61  ;;  %v19035_v56 = vpop.f32.mrb[37].mxu0  ;;  %v9545_v24 = vrot.slane %v19022_v9, 1  ;;  %v9272_v26 = vrot.slane %v19022_v9, 5  ;;  %v9135_v34 = vrot.slane %v19022_v9, 3 }
 0x550   : > { %22718 = vst [vmem:[#allocation40_spill] sm:$0xff] %v19026_v2  ;;  %v19040_v4 = vpop.f32.mrb[38].mxu0  ;;  %v9408_v32 = vrot.slane %v19022_v9, 7  ;;  %v9200_v31 = vsel %vm9054_vm1, %v9199_v47, %v9198_v10  ;;  %v9202_v19 = vrot.slane %v18933_v37, 7  ;;  %v9480_v10 = vsel %vm9066_vm5, %v9479_v54, %v9478_v6 }
 0x551   : > { %v19046_v16 = vpop.f32.mrb[39].mxu0  ;;  %v9546_v48 = vsel %vm9069_vm6, %v9545_v24, %v9544_v57  ;;  %v9273_v46 = vsel %vm9069_vm6, %v9272_v26, %v9271_v25  ;;  %v9136_v41 = vsel %vm9069_vm6, %v9135_v34, %v9134_v30  ;;  %v10121_v21 = vrot.slane %v19033_v63, 1 }
 0x552   : > { %v9409_v36 = vsel %vm9069_vm6, %v9408_v32, %v9407_v1  ;;  %v9848_v59 = vrot.slane %v19033_v63, 5  ;;  %v9712_v50 = vrot.slane %v19033_v63, 3  ;;  %v9984_v52 = vrot.slane %v19033_v63, 7 }
 0x553   : > { %v14870_v61 = vpop.f32.mrb[40].mxu1  ;;  %v10122_v13 = vsel %vm9069_vm6, %v10121_v21, %v10120_v3  ;;  %v9201_v57 = vsel %vm9057_vm2, %v18906_v51, %v9200_v31  ;;  %v9204_v25 = vrot.slane %v18959_v8, 6  ;;  %v9481_v54 = vsel %vm9069_vm6, %v19022_v9, %v9480_v10 }
 0x554   : > { %v19062_v30 = vmax.f32 %v18988_v33, %v14870_v61  ;;  %v8494_v1 = vpop.f32.mrb[41].mxu1  ;;  %v9849_v47 = vsel %vm9069_vm6, %v9848_v59, %v9847_v38  ;;  %v9713_v24 = vsel %vm9069_vm6, %v9712_v50, %v9711_v7  ;;  %v9985_v26 = vsel %vm9069_vm6, %v9984_v52, %v9983_v35 }
 0x555   : > { %v19068_v34 = vmax.f32 %v18992_v23, %v8494_v1  ;;  %v14871_v3 = vpop.f32.mrb[42].mxu1  ;;  %v9203_v32 = vsel %vm9060_vm3, %v9202_v19, %v9201_v57  ;;  %v9206_v6 = vrot.slane %v18984_v60, 5  ;;  %v9208_v35 = vrot.slane %v19022_v9, 4 }
 0x556   : > { %22719 = vst [vmem:[#allocation69_spill] sm:$0xff] %v19062_v30  ;;  %v19075_v33 = vmax.f32 %v18997_v49, %v14871_v3  ;;  %v8497_v31 = vpop.f32.mrb[43].mxu1  ;;  %v19077_v38 = vpop.f32.mrb[40].mxu0  ;;  %v9205_v7 = vsel %vm9063_vm4, %v9204_v25, %v9203_v32  ;;  %v9053_v23 = vrot.slane %v18870_v45, 7  ;;  %v9342_v2 = vrot.slane %v18984_v60, 7 }
 0x557   : > { %v19083_v21 = vmax.f32 %v19002_v43, %v8497_v31  ;;  %v9547_v19 = vsel %vm9072_vm7, %v19068_v34, %v9546_v48  ;;  %v19087_v59 = vpop.f32.mrb[41].mxu0  ;;  %v9274_v49 = vrot.slane %v19068_v34, 4  ;;  %v9137_v50 = vrot.slane %v19068_v34, 2 }
 0x558   : > { %22720 = vst [vmem:[#allocation41_spill] sm:$0xff] %v19075_v33  ;;  %9590 = vrot.lane.b32.xlu0 %v9547_v19, %s15483_s27  ;;  %v19092_v52 = vpop.f32.mrb[42].mxu0  ;;  %v9410_v61 = vrot.slane %v19068_v34, 6  ;;  %v9482_v10 = vrot.slane %v19068_v34, 7  ;;  %v9207_v43 = vsel %vm9066_vm5, %v9206_v6, %v9205_v7  ;;  %v9210_v57 = vrot.slane %v19068_v34, 3 }
 0x559   : > { %v9275_v48 = vsel %vm9072_vm7, %v9274_v49, %v9273_v46  ;;  %v19099_v25 = vpop.f32.mrb[43].mxu0  ;;  %v9138_v1 = vsel %vm9072_vm7, %v9137_v50, %v9136_v41  ;;  %v19104_v3 = vsel %vm9072_vm7, %v19083_v21, %v10122_v13  ;;  %v9850_v32 = vrot.slane %v19083_v21, 4 }
 0x55a   : > { %v9411_v31 = vsel %vm9072_vm7, %v9410_v61, %v9409_v36  ;;  %v9714_v19 = vrot.slane %v19083_v21, 2  ;;  %v9986_v6 = vrot.slane %v19083_v21, 6  ;;  %v9483_v7 = vsel %vm9072_vm7, %v9482_v10, %v9481_v54 }
 0x55b   : > { %v14874_v33 = vpop.f32.mrb[44].mxu1  ;;  %v19112_v46 = vsel %vm9072_vm7, %v9850_v32, %v9849_v47  ;;  %9530 = vst.msk [vmem:[#allocation2 + $0x18] sm:$0xff] %vm9120_vm8, %v9483_v7  ;;  %v9209_v41 = vsel %vm9069_vm6, %v9208_v35, %v9207_v43  ;;  %v9055_v13 = vsel %vm9054_vm1, %v9053_v23, %v18858_v40  ;;  %v9056_v49 = vrot.slane %v18906_v51, 6 }
 0x55c   : > { %v19120_v36 = vmax.f32 %v19028_v22, %v14874_v33  ;;  %9318 = vrot.lane.b32.xlu0 %v9275_v48, %s15483_s27  ;;  %v8510_v50 = vpop.f32.mrb[45].mxu1  ;;  %v19124_v54 = vsel %vm9072_vm7, %v9714_v19, %v9713_v24  ;;  %v19127_v47 = vsel %vm9072_vm7, %v9986_v6, %v9985_v26  ;;  %v9211_v61 = vsel %vm9072_vm7, %v9210_v57, %v9209_v41 }
 0x55d   : > { %v19131_v35 = vmax.f32 %v19035_v56, %v8510_v50  ;;  %v14875_v23 = vpop.f32.mrb[46].mxu1  ;;  %9258 = vst.msk [vmem:[#allocation2 + $0x8] sm:$0xff] %vm9120_vm8, %v9211_v61  ;;  %v9058_v22 = vsel %vm9057_vm2, %v9056_v49, %v9055_v13  ;;  %v9059_v33 = vrot.slane %v18933_v37, 5  ;;  %v9062_v10 = vrot.slane %v18959_v8, 4 }
 0x55e   : > { %22721 = vst [vmem:[#allocation42_spill] sm:$0xff] %v19120_v36  ;;  %v19138_v24 = vmax.f32 %v19040_v4, %v14875_v23  ;;  %v8513_v43 = vpop.f32.mrb[47].mxu1  ;;  %v19140_v26 = vpop.f32.mrb[44].mxu0  ;;  %v9065_v57 = vrot.slane %v18984_v60, 3  ;;  %v9068_v56 = vrot.slane %v19022_v9, 2  ;;  %v9071_v48 = vrot.slane %v19068_v34, 1 }
 0x55f   : > { %v19146_v32 = vmax.f32 %v19046_v16, %v8513_v43  ;;  %v19148_v19 = vpop.f32.mrb[45].mxu0  ;;  %v9548_v6 = vrot.slane %v19131_v35, 7  ;;  %v9276_v7 = vrot.slane %v19131_v35, 3  ;;  %v9139_v4 = vrot.slane %v19131_v35, 1 }
 0x560   : > { %22722 = vst [vmem:[#allocation43_spill] sm:$0xff] %v19138_v24  ;;  %9181 = vrot.lane.b32.xlu0 %v9138_v1, %s15483_s27  ;;  %v19154_v41 = vpop.f32.mrb[46].mxu0  ;;  %v9412_v13 = vrot.slane %v19131_v35, 5  ;;  %v9061_v49 = vsel %vm9060_vm3, %v9059_v33, %v9058_v22  ;;  %v9334_v50 = vrot.slane %v18858_v40, 4  ;;  %v9335_v16 = vrot.slane %v18870_v45, 3 }
 0x561   : > { %v19160_v61 = vpop.f32.mrb[47].mxu0  ;;  %v10124_v23 = vrot.slane %v19146_v32, 7  ;;  %v9852_v43 = vrot.slane %v19146_v32, 3  ;;  %v9716_v24 = vrot.slane %v19146_v32, 1  ;;  %v9988_v1 = vrot.slane %v19146_v32, 5 }
 0x562   : > { %v9064_v36 = vsel %vm9063_vm4, %v9062_v10, %v9061_v49  ;;  %v9336_v44 = vsel %vm9054_vm1, %v9335_v16, %v9334_v50  ;;  %v9337_v22 = vrot.slane %v18906_v51, 2  ;;  %v9339_v40 = vrot.slane %v18933_v37, 1 }
 0x563   : > { %v14878_v33 = vpop.f32.mrb[48].mxu1  ;;  %v9067_v45 = vsel %vm9066_vm5, %v9065_v57, %v9064_v36  ;;  %v9344_v17 = vrot.slane %v19022_v9, 6  ;;  %v9346_v15 = vrot.slane %v19068_v34, 5  ;;  %v10046_v37 = vrot.slane %v18862_v14, 6 }
 0x564   : > { %v19175_v58 = vmax.f32 %v19077_v38, %v14878_v33  ;;  %9454 = vrot.lane.b32.xlu0 %v9411_v31, %s15483_s27  ;;  %v8526_v10 = vpop.f32.mrb[49].mxu1  ;;  %v9070_v49 = vsel %vm9069_vm6, %v9068_v56, %v9067_v45  ;;  %v9338_v51 = vsel %vm9057_vm2, %v9337_v22, %v9336_v44  ;;  %v10047_v38 = vrot.slane %v18878_v27, 5 }
 0x565   : > { %v19182_v36 = vmax.f32 %v19087_v59, %v8526_v10  ;;  %v14879_v60 = vpop.f32.mrb[50].mxu1  ;;  %v9073_v9 = vsel %vm9072_vm7, %v9071_v48, %v9070_v49  ;;  %v9340_v34 = vsel %vm9060_vm3, %v9339_v40, %v9338_v51  ;;  %v10049_v59 = vrot.slane %v18910_v11, 4 }
 0x566   : > { %22723 = vst [vmem:[#allocation68_spill] sm:$0xff] %v19175_v58  ;;  %v19188_v57 = vmax.f32 %v19092_v52, %v14879_v60  ;;  %v8529_v31 = vpop.f32.mrb[51].mxu1  ;;  %v19190_v50 = vpop.f32.mrb[48].mxu0  ;;  %9121 = vst.msk [vmem:[#allocation2] sm:$0xff] %vm9120_vm8, %v9073_v9  ;;  %v9341_v44 = vsel %vm9063_vm4, %v18959_v8, %v9340_v34  ;;  %v10051_v56 = vrot.slane %v18937_v20, 3  ;;  %v10053_v10 = vrot.slane %v18963_v62, 2 }
 0x567   : > { %v19198_v48 = vmax.f32 %v19099_v25, %v8529_v31  ;;  %v19200_v16 = vpop.f32.mrb[49].mxu0  ;;  %v9549_v52 = vrot.slane %v19182_v36, 6  ;;  %v9277_v22 = vrot.slane %v19182_v36, 2  ;;  %v9140_v40 = vsel %vm9054_vm1, %v19182_v36, %v9139_v4 }
 0x568   : > { %22724 = vst [vmem:[#allocation44_spill] sm:$0xff] %v19188_v57  ;;  %10166 = vrot.lane.b32.xlu0 %v19104_v3, %s15483_s27  ;;  %v19208_v8 = vpop.f32.mrb[50].mxu0  ;;  %v9413_v33 = vrot.slane %v19182_v36, 4  ;;  %v9343_v45 = vsel %vm9066_vm5, %v9342_v2, %v9341_v44  ;;  %v10048_v25 = vsel %vm9054_vm1, %v10047_v38, %v10046_v37  ;;  %v10555_v58 = vrot.slane %v18928_v18, 2 }
 0x569   : > { %v19214_v49 = vpop.f32.mrb[51].mxu0  ;;  %v9550_v51 = vsel %vm9054_vm1, %v9549_v52, %v9548_v6  ;;  %v9278_v60 = vsel %vm9054_vm1, %v9277_v22, %v9276_v7  ;;  %v10125_v4 = vrot.slane %v19198_v48, 6  ;;  %v9853_v3 = vrot.slane %v19198_v48, 2 }
 0x56a   : > { %v9414_v9 = vsel %vm9054_vm1, %v9413_v33, %v9412_v13  ;;  %v19223_v34 = vsel %vm9054_vm1, %v19198_v48, %v9716_v24  ;;  %v9989_v2 = vrot.slane %v19198_v48, 4  ;;  %v9345_v37 = vsel %vm9069_vm6, %v9344_v17, %v9343_v45 }
 0x56b   : > { %v14882_v38 = vpop.f32.mrb[52].mxu1  ;;  %v10126_v31 = vsel %vm9054_vm1, %v10125_v4, %v10124_v23  ;;  %v9854_v6 = vsel %vm9054_vm1, %v9853_v3, %v9852_v43  ;;  %v9347_v7 = vsel %vm9072_vm7, %v9346_v15, %v9345_v37  ;;  %v10050_v44 = vsel %vm9057_vm2, %v10049_v59, %v10048_v25  ;;  %v15319_v25 = vld [vmem:[%s22211_s13 + $0x40] sm:$0xff]  }
 0x56c   : > { %v19232_v52 = vmax.f32 %v19140_v26, %v14882_v38  ;;  %9894 = vrot.lane.b32.xlu0 %v19112_v46, %s15483_s27  ;;  %v8542_v24 = vpop.f32.mrb[53].mxu1  ;;  %v9990_v13 = vsel %vm9054_vm1, %v9989_v2, %v9988_v1  ;;  %9394 = vst.msk [vmem:[#allocation2 + $0x10] sm:$0xff] %vm9120_vm8, %v9347_v7  ;;  %v10052_v17 = vsel %vm9060_vm3, %v10051_v56, %v10050_v44  ;;  %v10055_v23 = vrot.slane %v18990_v55, 1  ;;  %v15320_v37 = vld [vmem:[%s22211_s13] sm:$0xff]  }
 0x56d   : > { %v19241_v43 = vmax.f32 %v19148_v19, %v8542_v24  ;;  %v14883_v15 = vpop.f32.mrb[54].mxu1  ;;  %v10054_v59 = vsel %vm9063_vm4, %v10053_v10, %v10052_v17  ;;  %v10058_v26 = vrot.slane %v19083_v21, 7  ;;  %v9774_v22 = vrot.slane %v18862_v14, 2  ;;  %v15321_v38 = vld [vmem:[%s22211_s13 + $0xc0] sm:$0xff]   ;;  %13870 = vmatprep.subr.bf16.mxu0 %v15319_v25 }
 0x56e   : > { %22725 = vst [vmem:[#allocation45_spill] sm:$0xff] %v19232_v52  ;;  %v19247_v46 = vmax.f32 %v19154_v41, %v14883_v15  ;;  %v8545_v1 = vpop.f32.mrb[55].mxu1  ;;  %v19249_v33 = vpop.f32.mrb[52].mxu0  ;;  %v10056_v56 = vsel %vm9066_vm5, %v10055_v23, %v10054_v59  ;;  %v9775_v45 = vrot.slane %v18878_v27, 1  ;;  %v9778_v19 = vrot.slane %v18937_v20, 7  ;;  %v15322_v23 = vld [vmem:[%s22211_s13 + $0x80] sm:$0xff]   ;;  %13871 = vmatpush3.bf16.msra.mxu0 %v15320_v37  ;;  %13898 = vmatprep.subr.bf16.mxu1 %v15321_v38 }
 0x56f   : > { %v19258_v10 = vmax.f32 %v19160_v61, %v8545_v1  ;;  %v19260_v4 = vpop.f32.mrb[53].mxu0  ;;  %v9551_v41 = vrot.slane %v19241_v43, 5  ;;  %v9279_v3 = vrot.slane %v19241_v43, 1  ;;  %v9141_v2 = vrot.slane %v19241_v43, 7  ;;  %13899 = vmatpush3.bf16.msra.mxu1 %v15322_v23 }
 0x570   : > { %22726 = vst [vmem:[#allocation63_spill] sm:$0xff] %v19247_v46  ;;  %9758 = vrot.lane.b32.xlu0 %v19124_v54, %s15483_s27  ;;  %v19273_v61 = vpop.f32.mrb[54].mxu0  ;;  %v9415_v7 = vrot.slane %v19241_v43, 3  ;;  %v10057_v44 = vsel %vm9069_vm6, %v19033_v63, %v10056_v56  ;;  %v9776_v24 = vsel %vm9054_vm1, %v9775_v45, %v9774_v22  ;;  %v9780_v17 = vrot.slane %v18963_v62, 6 }
 0x571   : > { %v19283_v15 = vpop.f32.mrb[55].mxu0  ;;  %v9552_v54 = vsel %vm9057_vm2, %v9551_v41, %v9550_v51  ;;  %v9280_v59 = vsel %vm9057_vm2, %v9279_v3, %v9278_v60  ;;  %v9142_v1 = vsel %vm9057_vm2, %v9141_v2, %v9140_v40  ;;  %v10127_v46 = vrot.slane %v19258_v10, 5 }
 0x572   : > { %v9416_v22 = vsel %vm9057_vm2, %v9415_v7, %v9414_v9  ;;  %v9855_v56 = vrot.slane %v19258_v10, 1  ;;  %v9718_v45 = vrot.slane %v19258_v10, 7  ;;  %v9991_v25 = vrot.slane %v19258_v10, 3 }
 0x573   : > { %v14886_v57 = vpop.f32.mrb[56].mxu1  ;;  %v10128_v51 = vsel %vm9057_vm2, %v10127_v46, %v10126_v31  ;;  %v10059_v60 = vsel %vm9072_vm7, %v10058_v26, %v10057_v44  ;;  %v9777_v40 = vsel %vm9057_vm2, %v18910_v11, %v9776_v24  ;;  %v9782_v41 = vrot.slane %v18990_v55, 5 }
 0x574   : > { %v19299_v3 = vmax.f32 %v19190_v50, %v14886_v57  ;;  %10030 = vrot.lane.b32.xlu0 %v19127_v47, %s15483_s27  ;;  %v8558_v9 = vpop.f32.mrb[57].mxu1  ;;  %v9856_v2 = vsel %vm9057_vm2, %v9855_v56, %v9854_v6  ;;  %v9719_v37 = vsel %vm9057_vm2, %v9718_v45, %v19223_v34  ;;  %v9992_v31 = vsel %vm9057_vm2, %v9991_v25, %v9990_v13 }
 0x575   : > { %10106 = vst.msk [vmem:[#allocation2 + $0x38] sm:$0xff] %vm9120_vm8, %v10059_v60  ;;  %v19309_v26 = vmax.f32 %v19200_v16, %v8558_v9  ;;  %v14887_v46 = vpop.f32.mrb[58].mxu1  ;;  %v9779_v57 = vsel %vm9060_vm3, %v9778_v19, %v9777_v40  ;;  %v9784_v50 = vrot.slane %v19033_v63, 4  ;;  %v9786_v47 = vrot.slane %v19083_v21, 3 }
 0x576   : > { %22727 = vst [vmem:[#allocation67_spill] sm:$0xff] %v19299_v3  ;;  %v19315_v38 = vmax.f32 %v19208_v8, %v14887_v46  ;;  %v8561_v6 = vpop.f32.mrb[59].mxu1  ;;  %v19317_v7 = vpop.f32.mrb[56].mxu0  ;;  %v9781_v34 = vsel %vm9063_vm4, %v9780_v17, %v9779_v57  ;;  %v9638_v13 = vrot.slane %v18878_v27, 7  ;;  %v9640_v16 = vrot.slane %v18910_v11, 6 }
 0x577   : > { %v19323_v44 = vmax.f32 %v19214_v49, %v8561_v6  ;;  %v19325_v19 = vpop.f32.mrb[57].mxu0  ;;  %v9553_v24 = vrot.slane %v19309_v26, 4  ;;  %v9281_v8 = vsel %vm9060_vm3, %v19309_v26, %v9280_v59  ;;  %v9143_v23 = vrot.slane %v19309_v26, 6 }
 0x578   : > { %22728 = vst [vmem:[#allocation46_spill] sm:$0xff] %v19315_v38  ;;  %v19331_v56 = vpop.f32.mrb[58].mxu0  ;;  %v9417_v17 = vrot.slane %v19309_v26, 2  ;;  %v9783_v45 = vsel %vm9066_vm5, %v9782_v41, %v9781_v34  ;;  %v9639_v25 = vsel %vm9054_vm1, %v9638_v13, %v18862_v14  ;;  %v9642_v49 = vrot.slane %v18937_v20, 5 }
 0x579   : > { %v19338_v60 = vpop.f32.mrb[59].mxu0  ;;  %v9554_v40 = vsel %vm9060_vm3, %v9553_v24, %v9552_v54  ;;  %v9144_v9 = vsel %vm9060_vm3, %v9143_v23, %v9142_v1  ;;  %v10129_v59 = vrot.slane %v19323_v44, 4  ;;  %v9857_v46 = vsel %vm9060_vm3, %v19323_v44, %v9856_v2 }
 0x57a   : > { %v9418_v57 = vsel %vm9060_vm3, %v9417_v17, %v9416_v22  ;;  %v9720_v41 = vrot.slane %v19323_v44, 6  ;;  %v9993_v6 = vrot.slane %v19323_v44, 2  ;;  %v9785_v34 = vsel %vm9069_vm6, %v9784_v50, %v9783_v45 }
 0x57b   : > { %v14890_v13 = vpop.f32.mrb[60].mxu1  ;;  %v10130_v38 = vsel %vm9060_vm3, %v10129_v59, %v10128_v51  ;;  %v9787_v54 = vsel %vm9072_vm7, %v9786_v47, %v9785_v34  ;;  %v9641_v1 = vsel %vm9057_vm2, %v9640_v16, %v9639_v25  ;;  %v9644_v24 = vrot.slane %v18963_v62, 4 }
 0x57c   : > { %v19354_v23 = vmax.f32 %v19249_v33, %v14890_v13  ;;  %v8574_v2 = vpop.f32.mrb[61].mxu1  ;;  %v9721_v22 = vsel %vm9060_vm3, %v9720_v41, %v9719_v37  ;;  %v9994_v17 = vsel %vm9060_vm3, %v9993_v6, %v9992_v31  ;;  %9834 = vst.msk [vmem:[#allocation2 + $0x28] sm:$0xff] %vm9120_vm8, %v9787_v54  ;;  %v9643_v50 = vsel %vm9060_vm3, %v9642_v49, %v9641_v1 }
 0x57d   : > { %v19361_v51 = vmax.f32 %v19260_v4, %v8574_v2  ;;  %v14891_v47 = vpop.f32.mrb[62].mxu1  ;;  %v9645_v16 = vsel %vm9063_vm4, %v9644_v24, %v9643_v50  ;;  %v9646_v45 = vrot.slane %v18990_v55, 3  ;;  %v9648_v33 = vrot.slane %v19033_v63, 2  ;;  %v15324_v2 = vld [vmem:[%s22211_s13 + $0x8] sm:$0xff]  }
 0x57e   : > { %22729 = vst [vmem:[#allocation47_spill] sm:$0xff] %v19354_v23  ;;  %v19367_v25 = vmax.f32 %v19273_v61, %v14891_v47  ;;  %v8577_v37 = vpop.f32.mrb[63].mxu1  ;;  %v19369_v59 = vpop.f32.mrb[60].mxu0  ;;  %v9650_v31 = vrot.slane %v19083_v21, 1  ;;  %v9910_v49 = vrot.slane %v18862_v14, 4  ;;  %v9911_v4 = vrot.slane %v18878_v27, 3 }
 0x57f   : > { %v19375_v41 = vmax.f32 %v19283_v15, %v8577_v37  ;;  %v19377_v6 = vpop.f32.mrb[61].mxu0  ;;  %v9555_v34 = vrot.slane %v19361_v51, 3  ;;  %v9282_v13 = vrot.slane %v19361_v51, 7  ;;  %v9145_v61 = vrot.slane %v19361_v51, 5  ;;  %v15323_v15 = vld [vmem:[%s22211_s13 + $0x48] sm:$0xff]  }
 0x580   : > { %22730 = vst [vmem:[#allocation48_spill] sm:$0xff] %v19367_v25  ;;  %v19382_v54 = vpop.f32.mrb[62].mxu0  ;;  %v9419_v1 = vrot.slane %v19361_v51, 1  ;;  %v9647_v24 = vsel %vm9066_vm5, %v9646_v45, %v9645_v16  ;;  %v9912_v14 = vsel %vm9054_vm1, %v9911_v4, %v9910_v49  ;;  %v9913_v27 = vrot.slane %v18910_v11, 2  ;;  %13872 = vmatprep.subr.bf16.mxu0 %v15323_v15 }
 0x581   : > { %v19394_v50 = vpop.f32.mrb[63].mxu0  ;;  %v9556_v47 = vsel %vm9063_vm4, %v9555_v34, %v9554_v40  ;;  %v9283_v37 = vsel %vm9063_vm4, %v9282_v13, %v9281_v8  ;;  %v9146_v16 = vsel %vm9063_vm4, %v9145_v61, %v9144_v9  ;;  %v10131_v45 = vrot.slane %v19375_v41, 3  ;;  %13873 = vmatpush3.bf16.msra.mxu0 %v15324_v2 }
 0x582   : > { %v9420_v11 = vsel %vm9063_vm4, %v9419_v1, %v9418_v57  ;;  %v9858_v49 = vrot.slane %v19375_v41, 7  ;;  %v9722_v4 = vrot.slane %v19375_v41, 5  ;;  %v9995_v25 = vrot.slane %v19375_v41, 1 }
 0x583   : > { %v14894_v3 = vpop.f32.mrb[64].mxu1  ;;  %v10132_v23 = vsel %vm9063_vm4, %v10131_v45, %v10130_v38  ;;  %v9649_v40 = vsel %vm9069_vm6, %v9648_v33, %v9647_v24  ;;  %v9914_v8 = vsel %vm9057_vm2, %v9913_v27, %v9912_v14  ;;  %v9915_v9 = vrot.slane %v18937_v20, 1  ;;  %v15328_v27 = vld [vmem:[%s22211_s13 + $0x88] sm:$0xff]  }
 0x584   : > { %v19409_v34 = vmax.f32 %v19317_v7, %v14894_v3  ;;  %v8590_v57 = vpop.f32.mrb[65].mxu1  ;;  %v9859_v13 = vsel %vm9063_vm4, %v9858_v49, %v9857_v46  ;;  %v9723_v61 = vsel %vm9063_vm4, %v9722_v4, %v9721_v22  ;;  %v9996_v1 = vsel %vm9063_vm4, %v9995_v25, %v9994_v17  ;;  %v15325_v17 = vld [vmem:[%s22211_s13 + $0x50] sm:$0xff]  }
 0x585   : > { %v19415_v15 = vmax.f32 %v19325_v19, %v8590_v57  ;;  %v14895_v38 = vpop.f32.mrb[66].mxu1  ;;  %v9651_v33 = vsel %vm9072_vm7, %v9650_v31, %v9649_v40  ;;  %v9916_v24 = vsel %vm9060_vm3, %v9915_v9, %v9914_v8  ;;  %v9918_v20 = vrot.slane %v18990_v55, 7  ;;  %v15326_v55 = vld [vmem:[%s22211_s13 + $0xc8] sm:$0xff]   ;;  %13874 = vmatprep.subr.bf16.mxu0 %v15325_v17  ;;  %v15329_v40 = vld [vmem:[%s22211_s13 + $0x58] sm:$0xff]   ;;  %v15330_v8 = vld [vmem:[%s22211_s13 + $0xd0] sm:$0xff]  }
 0x586   : > { %22731 = vst [vmem:[#allocation64_spill] sm:$0xff] %v19409_v34  ;;  %v19421_v3 = vmax.f32 %v19331_v56, %v14895_v38  ;;  %v8593_v7 = vpop.f32.mrb[67].mxu1  ;;  %v19423_v14 = vpop.f32.mrb[64].mxu0  ;;  %9698 = vst.msk [vmem:[#allocation2 + $0x20] sm:$0xff] %vm9120_vm8, %v9651_v33  ;;  %v9917_v46 = vsel %vm9063_vm4, %v18963_v62, %v9916_v24  ;;  %v9920_v19 = vrot.slane %v19033_v63, 6  ;;  %v9922_v22 = vrot.slane %v19083_v21, 5  ;;  %13900 = vmatprep.subr.bf16.mxu1 %v15326_v55 }
 0x587   : > { %v19437_v56 = vmax.f32 %v19338_v60, %v8593_v7  ;;  %v19439_v25 = vpop.f32.mrb[65].mxu0  ;;  %v9557_v31 = vrot.slane %v19415_v15, 2  ;;  %v9284_v62 = vrot.slane %v19415_v15, 6  ;;  %v9147_v63 = vrot.slane %v19415_v15, 4  ;;  %v15327_v21 = vld [vmem:[%s22211_s13 + $0x10] sm:$0xff]   ;;  %13901 = vmatpush3.bf16.msra.mxu1 %v15328_v27  ;;  %v15331_v24 = vld [vmem:[%s22211_s13 + $0x18] sm:$0xff]  }
 0x588   : > { %22732 = vst [vmem:[#allocation71_spill] sm:$0xff] %v19421_v3  ;;  %v19450_v2 = vpop.f32.mrb[66].mxu0  ;;  %v19454_v60 = vsel %vm9066_vm5, %v19415_v15, %v9420_v11  ;;  %v9919_v45 = vsel %vm9066_vm5, %v9918_v20, %v9917_v46  ;;  %v10414_v49 = vrot.slane %v18855_v42, 3  ;;  %v10415_v4 = vrot.slane %v18867_v28, 2  ;;  %13875 = vmatpush3.bf16.msra.mxu0 %v15327_v21  ;;  %v15332_v20 = vld [vmem:[%s22211_s13 + $0x90] sm:$0xff]   ;;  %13902 = vmatprep.subr.bf16.mxu1 %v15330_v8 }
 0x589   : > { %v19465_v9 = vpop.f32.mrb[67].mxu0  ;;  %v9558_v11 = vsel %vm9066_vm5, %v9557_v31, %v9556_v47  ;;  %v9285_v57 = vsel %vm9066_vm5, %v9284_v62, %v9283_v37  ;;  %v9148_v38 = vsel %vm9066_vm5, %v9147_v63, %v9146_v16  ;;  %v10133_v33 = vrot.slane %v19437_v56, 2  ;;  %13876 = vmatprep.subr.bf16.mxu0 %v15329_v40 }
 0x58a   : > { %v9860_v7 = vrot.slane %v19437_v56, 6  ;;  %v9724_v47 = vrot.slane %v19437_v56, 4  ;;  %v19481_v37 = vsel %vm9066_vm5, %v19437_v56, %v9996_v1  ;;  %v9921_v16 = vsel %vm9069_vm6, %v9920_v19, %v9919_v45 }
 0x58b   : > { %v14898_v46 = vpop.f32.mrb[68].mxu1  ;;  %v10134_v17 = vsel %vm9066_vm5, %v10133_v33, %v10132_v23  ;;  %v9923_v55 = vsel %vm9072_vm7, %v9922_v22, %v9921_v16  ;;  %v10416_v31 = vsel %vm9054_vm1, %v10415_v4, %v10414_v49  ;;  %v10417_v62 = vrot.slane %v18902_v53, 1  ;;  %13903 = vmatpush3.bf16.msra.mxu1 %v15332_v20  ;;  %v15333_v33 = vld [vmem:[%s22211_s13 + $0x60] sm:$0xff]  }
 0x58c   : > { %v19489_v63 = vmax.f32 %v19369_v59, %v14898_v46  ;;  %v8606_v21 = vpop.f32.mrb[69].mxu1  ;;  %v9861_v1 = vsel %vm9066_vm5, %v9860_v7, %v9859_v13  ;;  %v9725_v27 = vsel %vm9066_vm5, %v9724_v47, %v9723_v61  ;;  %9970 = vst.msk [vmem:[#allocation2 + $0x30] sm:$0xff] %vm9120_vm8, %v9923_v55  ;;  %v10420_v19 = vrot.slane %v18955_v0, 7  ;;  %13877 = vmatpush3.bf16.msra.mxu0 %v15331_v24  ;;  %v15334_v24 = vld [vmem:[%s22211_s13 + $0xd8] sm:$0xff]   ;;  %v15335_v46 = vld [vmem:[%s22211_s13 + $0x20] sm:$0xff]  }
 0x58d   : > { %v19496_v23 = vmax.f32 %v19377_v6, %v8606_v21  ;;  %v14899_v22 = vpop.f32.mrb[70].mxu1  ;;  %v10418_v45 = vsel %vm9057_vm2, %v10417_v62, %v10416_v31  ;;  %v10422_v49 = vrot.slane %v18979_v5, 6  ;;  %v10424_v59 = vrot.slane %v19017_v39, 5  ;;  %v15336_v55 = vld [vmem:[%s22211_s13 + $0x98] sm:$0xff]   ;;  %13878 = vmatprep.subr.bf16.mxu0 %v15333_v33  ;;  %13904 = vmatprep.subr.bf16.mxu1 %v15334_v24  ;;  %v15339_v33 = vld [vmem:[%s22211_s13 + $0x28] sm:$0xff]   ;;  %v15340_v24 = vld [vmem:[%s22211_s13 + $0xa0] sm:$0xff]  }
 0x58e   : > { %22733 = vst [vmem:[#allocation49_spill] sm:$0xff] %v19489_v63  ;;  %v19502_v13 = vmax.f32 %v19382_v54, %v14899_v22  ;;  %v8609_v61 = vpop.f32.mrb[71].mxu1  ;;  %v19504_v4 = vpop.f32.mrb[68].mxu0  ;;  %v10419_v40 = vsel %vm9060_vm3, %v18928_v18, %v10418_v45  ;;  %v10426_v6 = vrot.slane %v19062_v30, 4  ;;  %v10278_v8 = vrot.slane %v18855_v42, 1  ;;  %v15337_v45 = vld [vmem:[%s22211_s13 + $0x68] sm:$0xff]  }
 0x58f   : > { %v19517_v54 = vmax.f32 %v19394_v50, %v8609_v61  ;;  %v19519_v20 = vpop.f32.mrb[69].mxu0  ;;  %v9559_v7 = vrot.slane %v19496_v23, 1  ;;  %v9286_v47 = vrot.slane %v19496_v23, 5  ;;  %v9149_v16 = vrot.slane %v19496_v23, 3  ;;  %v15338_v61 = vld [vmem:[%s22211_s13 + $0xe0] sm:$0xff]   ;;  %13905 = vmatpush3.bf16.msra.mxu1 %v15336_v55 }
 0x590   : > { %22734 = vst [vmem:[#allocation51_spill] sm:$0xff] %v19502_v13  ;;  %v19530_v31 = vpop.f32.mrb[70].mxu0  ;;  %v9422_v50 = vrot.slane %v19496_v23, 7  ;;  %v10421_v62 = vsel %vm9063_vm4, %v10420_v19, %v10419_v40  ;;  %v10279_v21 = vsel %vm9054_vm1, %v18867_v28, %v10278_v8  ;;  %v10280_v22 = vrot.slane %v18902_v53, 7  ;;  %13879 = vmatpush3.bf16.msra.mxu0 %v15335_v46  ;;  %13906 = vmatprep.subr.bf16.mxu1 %v15338_v61 }
 0x591   : > { %22735 = vst [vmem:[#allocation52_spill] sm:$0xff] %v19517_v54  ;;  %v19543_v13 = vpop.f32.mrb[71].mxu0  ;;  %v9560_v3 = vsel %vm9069_vm6, %v9559_v7, %v9558_v11  ;;  %v9287_v19 = vsel %vm9069_vm6, %v9286_v47, %v9285_v57  ;;  %v9150_v40 = vsel %vm9069_vm6, %v9149_v16, %v9148_v38  ;;  %v10135_v8 = vrot.slane %v19517_v54, 1  ;;  %13880 = vmatprep.subr.bf16.mxu0 %v15337_v45 }
 0x592   : > { %v9423_v63 = vsel %vm9069_vm6, %v9422_v50, %v19454_v60  ;;  %v9862_v11 = vrot.slane %v19517_v54, 5  ;;  %v9726_v57 = vrot.slane %v19517_v54, 3  ;;  %v9998_v38 = vrot.slane %v19517_v54, 7 }
 0x593   : > { %v14902_v7 = vpop.f32.mrb[72].mxu1  ;;  %v10136_v47 = vsel %vm9069_vm6, %v10135_v8, %v10134_v17  ;;  %v10423_v16 = vsel %vm9066_vm5, %v10422_v49, %v10421_v62  ;;  %v10281_v46 = vsel %vm9057_vm2, %v10280_v22, %v10279_v21  ;;  %v10282_v55 = vrot.slane %v18928_v18, 6  ;;  %13907 = vmatpush3.bf16.msra.mxu1 %v15340_v24 }
 0x594   : > { %v19565_v34 = vmax.f32 %v19423_v14, %v14902_v7  ;;  %v8622_v60 = vpop.f32.mrb[73].mxu1  ;;  %v9863_v50 = vsel %vm9069_vm6, %v9862_v11, %v9861_v1  ;;  %v9727_v52 = vsel %vm9069_vm6, %v9726_v57, %v9725_v27  ;;  %v9999_v45 = vsel %vm9069_vm6, %v9998_v38, %v19481_v37  ;;  %13881 = vmatpush3.bf16.msra.mxu0 %v15339_v33 }
 0x595   : > { %v19572_v61 = vmax.f32 %v19439_v25, %v8622_v60  ;;  %v14903_v17 = vpop.f32.mrb[74].mxu1  ;;  %v10425_v49 = vsel %vm9069_vm6, %v10424_v59, %v10423_v16  ;;  %v10283_v62 = vsel %vm9060_vm3, %v10282_v55, %v10281_v46  ;;  %v10284_v21 = vrot.slane %v18955_v0, 5 }
 0x596   : > { %22736 = vst [vmem:[#allocation53_spill] sm:$0xff] %v19565_v34  ;;  %v19578_v14 = vmax.f32 %v19450_v2, %v14903_v17  ;;  %v8625_v1 = vpop.f32.mrb[75].mxu1  ;;  %v19580_v27 = vpop.f32.mrb[72].mxu0  ;;  %v19583_v37 = vsel %vm9072_vm7, %v10426_v6, %v10425_v49  ;;  %v10286_v25 = vrot.slane %v18979_v5, 4  ;;  %v10288_v22 = vrot.slane %v19017_v39, 3 }
 0x597   : > { %v19588_v59 = vmax.f32 %v19465_v9, %v8625_v1  ;;  %v9561_v8 = vsel %vm9072_vm7, %v19572_v61, %v9560_v3  ;;  %v19592_v33 = vpop.f32.mrb[73].mxu0  ;;  %v9288_v2 = vrot.slane %v19572_v61, 4  ;;  %v9151_v24 = vrot.slane %v19572_v61, 2 }
 0x598   : > { %22737 = vst [vmem:[#allocation66_spill] sm:$0xff] %v19578_v14  ;;  %9592 = vrot.lane.b32.xlu1 %v9561_v8, %s15483_s27  ;;  %v19597_v6 = vpop.f32.mrb[74].mxu0  ;;  %v9424_v11 = vrot.slane %v19572_v61, 6  ;;  %v10285_v57 = vsel %vm9063_vm4, %v10284_v21, %v10283_v62  ;;  %v10290_v9 = vrot.slane %v19062_v30, 2  ;;  %v10686_v38 = vrot.slane %v18855_v42, 7  ;;  %v15342_v8 = vld [vmem:[%s22211_s13 + $0xe8] sm:$0xff]  }
 0x599   : > { %v9289_v3 = vsel %vm9072_vm7, %v9288_v2, %v9287_v19  ;;  %v19604_v7 = vpop.f32.mrb[75].mxu0  ;;  %v9152_v16 = vsel %vm9072_vm7, %v9151_v24, %v9150_v40  ;;  %v19609_v46 = vsel %vm9072_vm7, %v19588_v59, %v10136_v47  ;;  %v9864_v55 = vrot.slane %v19588_v59, 4  ;;  %13908 = vmatprep.subr.bf16.mxu1 %v15342_v8  ;;  %v15346_v8 = vld [vmem:[%s22211_s13 + $0xf0] sm:$0xff]  }
 0x59a   : > { %v19613_v60 = vsel %vm9072_vm7, %v9424_v11, %v9423_v63  ;;  %v9728_v17 = vrot.slane %v19588_v59, 2  ;;  %v10000_v49 = vrot.slane %v19588_v59, 6  ;;  %v10287_v62 = vsel %vm9066_vm5, %v10286_v25, %v10285_v57  ;;  %v15341_v63 = vld [vmem:[%s22211_s13 + $0x70] sm:$0xff]   ;;  %v15344_v57 = vld [vmem:[%s22211_s13 + $0xa8] sm:$0xff]  }
 0x59b   : > { %v14906_v19 = vpop.f32.mrb[76].mxu1  ;;  %v19619_v21 = vsel %vm9072_vm7, %v9864_v55, %v9863_v50  ;;  %v10289_v40 = vsel %vm9069_vm6, %v10288_v22, %v10287_v62  ;;  %v10687_v47 = vrot.slane %v18867_v28, 6  ;;  %v10689_v1 = vrot.slane %v18902_v53, 5  ;;  %v15343_v25 = vld [vmem:[%s22211_s13 + $0x30] sm:$0xff]   ;;  %13882 = vmatprep.subr.bf16.mxu0 %v15341_v63  ;;  %13909 = vmatpush3.bf16.msra.mxu1 %v15344_v57 }
 0x59c   : > { %v19634_v50 = vmax.f32 %v19504_v4, %v14906_v19  ;;  %9320 = vrot.lane.b32.xlu1 %v9289_v3, %s15483_s27  ;;  %v8638_v22 = vpop.f32.mrb[77].mxu1  ;;  %v19638_v2 = vsel %vm9072_vm7, %v9728_v17, %v9727_v52  ;;  %v19641_v24 = vsel %vm9072_vm7, %v10000_v49, %v9999_v45  ;;  %v19644_v11 = vsel %vm9072_vm7, %v10290_v9, %v10289_v40 }
 0x59d   : > { %22739 = vst [vmem:[#allocation54_spill] sm:$0xff] %v19644_v11  ;;  %v19650_v55 = vmax.f32 %v19519_v20, %v8638_v22  ;;  %v14907_v4 = vpop.f32.mrb[78].mxu1  ;;  %v10688_v3 = vsel %vm9054_vm1, %v10687_v47, %v10686_v38  ;;  %v10691_v62 = vrot.slane %v18928_v18, 4  ;;  %v10693_v52 = vrot.slane %v18955_v0, 3  ;;  %13883 = vmatpush3.bf16.msra.mxu0 %v15343_v25  ;;  %13910 = vmatprep.subr.bf16.mxu1 %v15346_v8 }
 0x59e   : > { %22738 = vst [vmem:[#allocation73_spill] sm:$0xff] %v19634_v50  ;;  %v19656_v45 = vmax.f32 %v19530_v31, %v14907_v4  ;;  %v8641_v9 = vpop.f32.mrb[79].mxu1  ;;  %v19658_v17 = vpop.f32.mrb[76].mxu0  ;;  %v10690_v49 = vsel %vm9057_vm2, %v10689_v1, %v10688_v3  ;;  %v10695_v20 = vrot.slane %v18979_v5, 2  ;;  %v10697_v19 = vrot.slane %v19017_v39, 1  ;;  %v15345_v1 = vld [vmem:[%s22211_s13 + $0x78] sm:$0xff]  }
 0x59f   : > { %22740 = vst [vmem:[#allocation55_spill] sm:$0xff] %v19650_v55  ;;  %v19664_v38 = vmax.f32 %v19543_v13, %v8641_v9  ;;  %v19666_v40 = vpop.f32.mrb[77].mxu0  ;;  %v9153_v63 = vrot.slane %v19650_v55, 1  ;;  %v9426_v25 = vrot.slane %v19650_v55, 5  ;;  %v10692_v22 = vsel %vm9060_vm3, %v10691_v62, %v10690_v49  ;;  %v15347_v3 = vld [vmem:[%s22211_s13 + $0x38] sm:$0xff]   ;;  %v15348_v9 = vld [vmem:[%s22211_s13 + $0xb0] sm:$0xff]   ;;  %13884 = vmatprep.subr.bf16.mxu0 %v15345_v1 }
 0x5a0   : > { %22741 = vst [vmem:[#allocation56_spill] sm:$0xff] %v19656_v45  ;;  %9183 = vrot.lane.b32.xlu1 %v9152_v16, %s15483_s27  ;;  %v19678_v13 = vpop.f32.mrb[78].mxu0  ;;  %v10550_v57 = vrot.slane %v18855_v42, 5  ;;  %v10551_v4 = vrot.slane %v18867_v28, 4  ;;  %v15349_v28 = vld [vmem:[%s22211_s13 + $0xf8] sm:$0xff]   ;;  %v10694_v42 = vsel %vm9063_vm4, %v10693_v52, %v10692_v22  ;;  %v10553_v34 = vrot.slane %v18902_v53, 3  ;;  %13911 = vmatpush3.bf16.msra.mxu1 %v15348_v9 }
 0x5a1   : > { %22742 = vst [vmem:[#allocation70_spill] sm:$0xff] %v19664_v38  ;;  %v19690_v31 = vpop.f32.mrb[79].mxu0  ;;  %v10138_v16 = vrot.slane %v19664_v38, 7  ;;  %v9866_v47 = vrot.slane %v19664_v38, 3  ;;  %v9730_v62 = vrot.slane %v19664_v38, 1  ;;  %13885 = vmatpush3.bf16.msra.mxu0 %v15347_v3  ;;  %v15350_v49 = vld [vmem:[%s22211_s13 + $0xb8] sm:$0xff]   ;;  %v10696_v8 = vsel %vm9066_vm5, %v10695_v20, %v10694_v42  ;;  %13912 = vmatprep.subr.bf16.mxu1 %v15349_v28 }
 0x5a2   : > { %v10552_v14 = vsel %vm9054_vm1, %v10551_v4, %v10550_v57  ;;  %v10557_v45 = vrot.slane %v18955_v0, 1  ;;  %v10560_v11 = vrot.slane %v19017_v39, 7  ;;  %v10562_v52 = vrot.slane %v19062_v30, 6 }
 0x5a3   : > { %v14910_v1 = vpop.f32.mrb[80].mxu1  ;;  %v10698_v4 = vsel %vm9069_vm6, %v10697_v19, %v10696_v8  ;;  %v10554_v3 = vsel %vm9057_vm2, %v10553_v34, %v10552_v14  ;;  %v10442_v42 = vrot.slane %v19634_v50, 3  ;;  %v22749_v39 = vrot.slane %v19650_v55, 3 }
 0x5a4   : > { %v19711_v22 = vmax.f32 %v19580_v27, %v14910_v1  ;;  %9456 = vrot.lane.b32.xlu1 %v19613_v60, %s15483_s27  ;;  %v8654_v57 = vpop.f32.mrb[81].mxu1  ;;  %v19723_v28 = vsel %vm9072_vm7, %v19062_v30, %v10698_v4  ;;  %v10556_v27 = vsel %vm9060_vm3, %v10555_v58, %v10554_v3  ;;  %v9484_v1 = vrot.slane %v19131_v35, 6  ;;  %13913 = vmatpush3.bf16.msra.mxu1 %v15350_v49 }
 0x5a5   : > { %v19719_v20 = vmax.f32 %v19592_v33, %v8654_v57  ;;  %v14911_v9 = vpop.f32.mrb[82].mxu1  ;;  %22745 = vst [vmem:[#allocation4_spill] sm:$0xff] %v19723_v28  ;;  %v10558_v34 = vsel %vm9063_vm4, %v10557_v45, %v10556_v27  ;;  %v9485_v33 = vrot.slane %v19182_v36, 5  ;;  %v22748_v30 = vrot.slane %v19650_v55, 7 }
 0x5a6   : > { %22743 = vst [vmem:[#allocation57_spill] sm:$0xff] %v19711_v22  ;;  %v19728_v60 = vmax.f32 %v19597_v6, %v14911_v9  ;;  %v8657_v19 = vpop.f32.mrb[83].mxu1  ;;  %v19730_v8 = vpop.f32.mrb[80].mxu0  ;;  %v10443_v14 = vrot.slane %v19711_v22, 2 }
 0x5a7   : > { %22744 = vst [vmem:[#allocation58_spill] sm:$0xff] %v19719_v20  ;;  %v19736_v57 = vmax.f32 %v19604_v7, %v8657_v19  ;;  %v19738_v4 = vpop.f32.mrb[81].mxu0  ;;  %v9563_v58 = vrot.slane %v19719_v20, 6  ;;  %v9291_v6 = vrot.slane %v19719_v20, 2  ;;  %v9154_v3 = vsel %vm9054_vm1, %v19719_v20, %v9153_v63 }
 0x5a8   : > { %22746 = vst [vmem:[#allocation16_spill] sm:$0xff] %v19728_v60  ;;  %10168 = vrot.lane.b32.xlu1 %v19609_v46, %s15483_s27  ;;  %v19746_v45 = vpop.f32.mrb[82].mxu0  ;;  %v9427_v9 = vrot.slane %v19719_v20, 4  ;;  %v10559_v7 = vsel %vm9066_vm5, %v18979_v5, %v10558_v34  ;;  %v10444_v49 = vsel %vm9054_vm1, %v10443_v14, %v10442_v42  ;;  %v9486_v27 = vsel %vm9054_vm1, %v9485_v33, %v9484_v1 }
 0x5a9   : > { %22747 = vst [vmem:[#allocation50_spill] sm:$0xff] %v19736_v57  ;;  %v19753_v19 = vpop.f32.mrb[83].mxu0  ;;  %v9564_v63 = vsel %vm9054_vm1, %v9563_v58, %v22748_v30  ;;  %v9292_v46 = vsel %vm9054_vm1, %v9291_v6, %v22749_v39  ;;  %v10139_v53 = vrot.slane %v19736_v57, 6  ;;  %v9867_v0 = vrot.slane %v19736_v57, 2 }
 0x5aa   : > { %v9428_v34 = vsel %vm9054_vm1, %v9427_v9, %v9426_v25  ;;  %v9731_v42 = vsel %vm9054_vm1, %v19736_v57, %v9730_v62  ;;  %v10003_v1 = vrot.slane %v19736_v57, 4  ;;  %v10561_v14 = vsel %vm9069_vm6, %v10560_v11, %v10559_v7 }
 0x5ab   : > { %v14914_v33 = vpop.f32.mrb[84].mxu1  ;;  %v10140_v30 = vsel %vm9054_vm1, %v10139_v53, %v10138_v16  ;;  %v9868_v58 = vsel %vm9054_vm1, %v9867_v0, %v9866_v47  ;;  %v19771_v39 = vsel %vm9072_vm7, %v10562_v52, %v10561_v14  ;;  %v9487_v6 = vrot.slane %v19241_v43, 4 }
 0x5ac   : > { %22750 = vst [vmem:[#allocation3_spill] sm:$0xff] %v19771_v39  ;;  %v19775_v5 = vmax.f32 %v19658_v17, %v14914_v33  ;;  %9896 = vrot.lane.b32.xlu1 %v19619_v21, %s15483_s27  ;;  %v8670_v25 = vpop.f32.mrb[85].mxu1  ;;  %v22752_v62 = vrot.slane %v19664_v38, 5  ;;  %v9489_v53 = vrot.slane %v19309_v26, 3  ;;  %v9491_v0 = vrot.slane %v19361_v51, 2 }
 0x5ad   : > { %v19785_v47 = vmax.f32 %v19666_v40, %v8670_v25  ;;  %v14915_v16 = vpop.f32.mrb[86].mxu1  ;;  %v9488_v52 = vsel %vm9057_vm2, %v9487_v6, %v9486_v27  ;;  %v9493_v17 = vrot.slane %v19415_v15, 1  ;;  %v9496_v9 = vrot.slane %v19572_v61, 7 }
 0x5ae   : > { %22751 = vst [vmem:[#allocation8_spill] sm:$0xff] %v19775_v5  ;;  %v10004_v11 = vsel %vm9054_vm1, %v10003_v1, %v22752_v62  ;;  %v19791_v21 = vmax.f32 %v19678_v13, %v14915_v16  ;;  %v8673_v7 = vpop.f32.mrb[87].mxu1  ;;  %v19793_v14 = vpop.f32.mrb[84].mxu0  ;;  %v10445_v1 = vrot.slane %v19775_v5, 1  ;;  %v9490_v33 = vsel %vm9060_vm3, %v9489_v53, %v9488_v52 }
 0x5af   : > { %22753 = vst [vmem:[#allocation82_spill] sm:$0xff] %v19785_v47  ;;  %v10306_v40 = vrot.slane %v19634_v50, 1  ;;  %v19799_v25 = vmax.f32 %v19690_v31, %v8673_v7  ;;  %v19801_v27 = vpop.f32.mrb[85].mxu0  ;;  %v9565_v6 = vrot.slane %v19785_v47, 5  ;;  %v9293_v62 = vrot.slane %v19785_v47, 1 }
 0x5b0   : > { %22754 = vst [vmem:[#allocation74_spill] sm:$0xff] %v19791_v21  ;;  %v9155_v13 = vrot.slane %v19785_v47, 7  ;;  %9760 = vrot.lane.b32.xlu1 %v19638_v2, %s15483_s27  ;;  %v19808_v16 = vpop.f32.mrb[86].mxu0  ;;  %v9429_v53 = vrot.slane %v19785_v47, 3  ;;  %v10446_v52 = vsel %vm9057_vm2, %v10445_v1, %v10444_v49  ;;  %v9492_v31 = vsel %vm9063_vm4, %v9491_v0, %v9490_v33 }
 0x5b1   : > { %22755 = vst [vmem:[#allocation10_spill] sm:$0xff] %v19799_v25  ;;  %v10307_v7 = vsel %vm9054_vm1, %v19711_v22, %v10306_v40  ;;  %v19815_v57 = vpop.f32.mrb[87].mxu0  ;;  %v9566_v38 = vsel %vm9057_vm2, %v9565_v6, %v9564_v63  ;;  %v9294_v18 = vsel %vm9057_vm2, %v9293_v62, %v9292_v46  ;;  %v10141_v2 = vrot.slane %v19799_v25, 5 }
 0x5b2   : > { %v9156_v20 = vsel %vm9057_vm2, %v9155_v13, %v9154_v3  ;;  %v9430_v55 = vsel %vm9057_vm2, %v9429_v53, %v9428_v34  ;;  %v9869_v47 = vrot.slane %v19799_v25, 1  ;;  %v9732_v49 = vrot.slane %v19799_v25, 7 }
 0x5b3   : > { %v10005_v0 = vrot.slane %v19799_v25, 3  ;;  %v14918_v1 = vpop.f32.mrb[88].mxu1  ;;  %v10142_v33 = vsel %vm9057_vm2, %v10141_v2, %v10140_v30  ;;  %v9494_v40 = vsel %vm9066_vm5, %v9493_v17, %v9492_v31  ;;  %v10308_v63 = vrot.slane %v19775_v5, 7 }
 0x5b4   : > { %v9212_v46 = vrot.slane %v19131_v35, 2  ;;  %v19830_v3 = vmax.f32 %v19730_v8, %v14918_v1  ;;  %10032 = vrot.lane.b32.xlu1 %v19641_v24, %s15483_s27  ;;  %v8686_v34 = vpop.f32.mrb[89].mxu1  ;;  %v9870_v6 = vsel %vm9057_vm2, %v9869_v47, %v9868_v58  ;;  %v9733_v62 = vsel %vm9057_vm2, %v9732_v49, %v9731_v42 }
 0x5b5   : > { %v10006_v13 = vsel %vm9057_vm2, %v10005_v0, %v10004_v11  ;;  %v19838_v30 = vmax.f32 %v19738_v4, %v8686_v34  ;;  %v14919_v17 = vpop.f32.mrb[90].mxu1  ;;  %v9495_v53 = vsel %vm9069_vm6, %v19496_v23, %v9494_v40  ;;  %v10309_v8 = vsel %vm9057_vm2, %v10308_v63, %v10307_v7 }
 0x5b6   : > { %22756 = vst [vmem:[#allocation84_spill] sm:$0xff] %v19830_v3  ;;  %v9213_v31 = vrot.slane %v19182_v36, 1  ;;  %v19845_v24 = vmax.f32 %v19746_v45, %v14919_v17  ;;  %v8689_v2 = vpop.f32.mrb[91].mxu1  ;;  %v19847_v58 = vpop.f32.mrb[88].mxu0  ;;  %v10447_v42 = vsel %vm9060_vm3, %v19830_v3, %v10446_v52  ;;  %v9497_v4 = vsel %vm9072_vm7, %v9496_v9, %v9495_v53 }
 0x5b7   : > { %22757 = vst [vmem:[#allocation77_spill] sm:$0xff] %v19838_v30  ;;  %v10310_v11 = vrot.slane %v19830_v3, 6  ;;  %v19854_v47 = vmax.f32 %v19753_v19, %v8689_v2  ;;  %v19856_v49 = vpop.f32.mrb[89].mxu0  ;;  %v9567_v7 = vrot.slane %v19838_v30, 4  ;;  %v9295_v45 = vsel %vm9060_vm3, %v19838_v30, %v9294_v18  ;;  %9531 = vst.msk [vmem:[#allocation2 + $0x98] sm:$0xff] %vm9120_vm8, %v9497_v4 }
 0x5b8   : > { %22758 = vst [vmem:[#allocation79_spill] sm:$0xff] %v19845_v24  ;;  %v9157_v0 = vrot.slane %v19838_v30, 6  ;;  %v19863_v1 = vpop.f32.mrb[90].mxu0  ;;  %v9431_v9 = vrot.slane %v19838_v30, 2  ;;  %v9214_v19 = vsel %vm9054_vm1, %v9213_v31, %v9212_v46  ;;  %v9216_v40 = vrot.slane %v19309_v26, 7 }
 0x5b9   : > { %22759 = vst [vmem:[#allocation5_spill] sm:$0xff] %v19854_v47  ;;  %v10311_v52 = vsel %vm9060_vm3, %v10310_v11, %v10309_v8  ;;  %v19869_v63 = vpop.f32.mrb[91].mxu0  ;;  %v9568_v34 = vsel %vm9060_vm3, %v9567_v7, %v9566_v38  ;;  %v10143_v17 = vrot.slane %v19854_v47, 4  ;;  %v9871_v53 = vsel %vm9060_vm3, %v19854_v47, %v9870_v6 }
 0x5ba   : > { %v9158_v18 = vsel %vm9060_vm3, %v9157_v0, %v9156_v20  ;;  %v9432_v2 = vsel %vm9060_vm3, %v9431_v9, %v9430_v55  ;;  %v9734_v4 = vrot.slane %v19854_v47, 6  ;;  %v10007_v8 = vrot.slane %v19854_v47, 2 }
 0x5bb   : > { %v9215_v46 = vsel %vm9057_vm2, %v19241_v43, %v9214_v19  ;;  %v14922_v31 = vpop.f32.mrb[92].mxu1  ;;  %v10144_v11 = vsel %vm9060_vm3, %v10143_v17, %v10142_v33  ;;  %v9218_v20 = vrot.slane %v19361_v51, 6  ;;  %v9220_v7 = vrot.slane %v19415_v15, 5 }
 0x5bc   : > { %v9217_v38 = vsel %vm9060_vm3, %v9216_v40, %v9215_v46  ;;  %v19886_v6 = vmax.f32 %v19793_v14, %v14922_v31  ;;  %v8702_v55 = vpop.f32.mrb[93].mxu1  ;;  %v9735_v0 = vsel %vm9060_vm3, %v9734_v4, %v9733_v62  ;;  %v10008_v9 = vsel %vm9060_vm3, %v10007_v8, %v10006_v13 }
 0x5bd   : > { %v9222_v47 = vrot.slane %v19496_v23, 4  ;;  %v19892_v19 = vmax.f32 %v19801_v27, %v8702_v55  ;;  %v14923_v33 = vpop.f32.mrb[94].mxu1  ;;  %v9219_v40 = vsel %vm9063_vm4, %v9218_v20, %v9217_v38  ;;  %v9224_v17 = vrot.slane %v19572_v61, 3 }
 0x5be   : > { %22760 = vst [vmem:[#allocation81_spill] sm:$0xff] %v19886_v6  ;;  %v10714_v46 = vrot.slane %v19634_v50, 7  ;;  %v19898_v14 = vmax.f32 %v19808_v16, %v14923_v33  ;;  %v8705_v31 = vpop.f32.mrb[95].mxu1  ;;  %v19900_v25 = vpop.f32.mrb[92].mxu0  ;;  %v10448_v62 = vrot.slane %v19886_v6, 7  ;;  %v10312_v13 = vrot.slane %v19886_v6, 5 }
 0x5bf   : > { %22761 = vst [vmem:[#allocation78_spill] sm:$0xff] %v19892_v19  ;;  %v9221_v27 = vsel %vm9066_vm5, %v9220_v7, %v9219_v40  ;;  %v19906_v4 = vmax.f32 %v19815_v57, %v8705_v31  ;;  %v19908_v8 = vpop.f32.mrb[93].mxu0  ;;  %v9569_v38 = vrot.slane %v19892_v19, 3  ;;  %v9296_v20 = vrot.slane %v19892_v19, 7 }
 0x5c0   : > { %22762 = vst [vmem:[#allocation75_spill] sm:$0xff] %v19898_v14  ;;  %v9159_v16 = vrot.slane %v19892_v19, 5  ;;  %v19913_v55 = vpop.f32.mrb[94].mxu0  ;;  %v9433_v33 = vrot.slane %v19892_v19, 1  ;;  %v10449_v30 = vsel %vm9063_vm4, %v10448_v62, %v10447_v42  ;;  %v10313_v7 = vsel %vm9063_vm4, %v10312_v13, %v10311_v52 }
 0x5c1   : > { %22763 = vst [vmem:[#allocation9_spill] sm:$0xff] %v19906_v4  ;;  %v9223_v57 = vsel %vm9069_vm6, %v9222_v47, %v9221_v27  ;;  %v19919_v40 = vpop.f32.mrb[95].mxu0  ;;  %v9570_v31 = vsel %vm9063_vm4, %v9569_v38, %v9568_v34  ;;  %v9297_v24 = vsel %vm9063_vm4, %v9296_v20, %v9295_v45  ;;  %v10145_v21 = vrot.slane %v19906_v4, 3 }
 0x5c2   : > { %v9160_v14 = vsel %vm9063_vm4, %v9159_v16, %v9158_v18  ;;  %v9434_v60 = vsel %vm9063_vm4, %v9433_v33, %v9432_v2  ;;  %v9872_v19 = vrot.slane %v19906_v4, 7  ;;  %v9736_v42 = vrot.slane %v19906_v4, 5 }
 0x5c3   : > { %v10009_v52 = vrot.slane %v19906_v4, 1  ;;  %v14926_v62 = vpop.f32.mrb[96].mxu1  ;;  %v10146_v47 = vsel %vm9063_vm4, %v10145_v21, %v10144_v11  ;;  %v9225_v13 = vsel %vm9072_vm7, %v9224_v17, %v9223_v57  ;;  %v10715_v34 = vrot.slane %v19711_v22, 6 }
 0x5c4   : > { %v10717_v45 = vrot.slane %v19775_v5, 5  ;;  %v19934_v18 = vmax.f32 %v19847_v58, %v14926_v62  ;;  %v8718_v27 = vpop.f32.mrb[97].mxu1  ;;  %v9873_v2 = vsel %vm9063_vm4, %v9872_v19, %v9871_v53  ;;  %v9737_v38 = vsel %vm9063_vm4, %v9736_v42, %v9735_v0  ;;  %9259 = vst.msk [vmem:[#allocation2 + $0x88] sm:$0xff] %vm9120_vm8, %v9225_v13 }
 0x5c5   : > { %v10010_v20 = vsel %vm9063_vm4, %v10009_v52, %v10008_v9  ;;  %v19941_v21 = vmax.f32 %v19856_v49, %v8718_v27  ;;  %v14927_v11 = vpop.f32.mrb[98].mxu1  ;;  %v10716_v17 = vsel %vm9054_vm1, %v10715_v34, %v10714_v46  ;;  %v10719_v16 = vrot.slane %v19830_v3, 4 }
 0x5c6   : > { %22764 = vst [vmem:[#allocation83_spill] sm:$0xff] %v19934_v18  ;;  %v10721_v58 = vrot.slane %v19886_v6, 3  ;;  %v19947_v33 = vmax.f32 %v19863_v1, %v14927_v11  ;;  %v8721_v53 = vpop.f32.mrb[99].mxu1  ;;  %v19949_v19 = vpop.f32.mrb[96].mxu0  ;;  %v10450_v0 = vrot.slane %v19934_v18, 6  ;;  %v10314_v9 = vrot.slane %v19934_v18, 4 }
 0x5c7   : > { %22765 = vst [vmem:[#allocation76_spill] sm:$0xff] %v19941_v21  ;;  %v10718_v49 = vsel %vm9057_vm2, %v10717_v45, %v10716_v17  ;;  %v19955_v57 = vmax.f32 %v19869_v63, %v8721_v53  ;;  %v19957_v46 = vpop.f32.mrb[97].mxu0  ;;  %v9571_v42 = vrot.slane %v19941_v21, 2  ;;  %v9298_v52 = vrot.slane %v19941_v21, 6 }
 0x5c8   : > { %22766 = vst [vmem:[#allocation11_spill] sm:$0xff] %v19947_v33  ;;  %v9161_v1 = vrot.slane %v19941_v21, 4  ;;  %v19962_v62 = vpop.f32.mrb[98].mxu0  ;;  %v9435_v13 = vsel %vm9066_vm5, %v19941_v21, %v9434_v60  ;;  %v10451_v34 = vsel %vm9066_vm5, %v10450_v0, %v10449_v30  ;;  %v10315_v45 = vsel %vm9066_vm5, %v10314_v9, %v10313_v7 }
 0x5c9   : > { %22767 = vst [vmem:[#allocation85_spill] sm:$0xff] %v19955_v57  ;;  %v10720_v63 = vsel %vm9060_vm3, %v10719_v16, %v10718_v49  ;;  %v19969_v27 = vpop.f32.mrb[99].mxu0  ;;  %v9572_v11 = vsel %vm9066_vm5, %v9571_v42, %v9570_v31  ;;  %v9299_v17 = vsel %vm9066_vm5, %v9298_v52, %v9297_v24  ;;  %v10147_v4 = vrot.slane %v19955_v57, 2 }
 0x5ca   : > { %v9162_v53 = vsel %vm9066_vm5, %v9161_v1, %v9160_v14  ;;  %v9591_v33 = vpop.permute.xlu0 %9590  ;;  %v9874_v39 = vrot.slane %v19955_v57, 6  ;;  %v9738_v60 = vrot.slane %v19955_v57, 4  ;;  %v10011_v30 = vsel %vm9066_vm5, %v19955_v57, %v10010_v20 }
 0x5cb   : > { %v10722_v7 = vsel %vm9063_vm4, %v10721_v58, %v10720_v63  ;;  %9602 = vst.msk [vmem:[#allocation2 + $0x18] sm:$0xff] %vm9193_vm9, %v9591_v33  ;;  %v14930_v16 = vpop.f32.mrb[100].mxu1  ;;  %v10148_v31 = vsel %vm9066_vm5, %v10147_v4, %v10146_v47  ;;  %v10723_v24 = vrot.slane %v19934_v18, 2  ;;  %v9074_v14 = vrot.slane %v19182_v36, 7 }
 0x5cc   : > { %v9076_v0 = vrot.slane %v19241_v43, 6  ;;  %v19986_v9 = vmax.f32 %v19900_v25, %v14930_v16  ;;  %v8734_v49 = vpop.f32.mrb[101].mxu1  ;;  %v9875_v42 = vsel %vm9066_vm5, %v9874_v39, %v9873_v2  ;;  %v9739_v20 = vsel %vm9066_vm5, %v9738_v60, %v9737_v38 }
 0x5cd   : > { %v9078_v58 = vrot.slane %v19309_v26, 5  ;;  %v19992_v33 = vmax.f32 %v19908_v8, %v8734_v49  ;;  %v14931_v4 = vpop.f32.mrb[102].mxu1  ;;  %v10724_v47 = vsel %vm9066_vm5, %v10723_v24, %v10722_v7  ;;  %v9075_v52 = vsel %vm9054_vm1, %v9074_v14, %v19131_v35 }
 0x5ce   : > { %22768 = vst [vmem:[#allocation80_spill] sm:$0xff] %v19986_v9  ;;  %v19999_v25 = vmax.f32 %v19913_v55, %v14931_v4  ;;  %v9319_v63 = vpop.permute.xlu0 %9318  ;;  %v8737_v39 = vpop.f32.mrb[103].mxu1  ;;  %v10452_v2 = vrot.slane %v19986_v9, 5  ;;  %v10316_v38 = vrot.slane %v19986_v9, 3  ;;  %v10725_v8 = vrot.slane %v19986_v9, 1 }
 0x5cf   : > { %22769 = vst [vmem:[#allocation91_spill] sm:$0xff] %v19992_v33  ;;  %9330 = vst.msk [vmem:[#allocation2 + $0x8] sm:$0xff] %vm9193_vm9, %v9319_v63  ;;  %v20006_v60 = vmax.f32 %v19919_v40, %v8737_v39  ;;  %v20008_v7 = vpop.f32.mrb[100].mxu0  ;;  %v9573_v16 = vrot.slane %v19992_v33, 1  ;;  %v9300_v55 = vrot.slane %v19992_v33, 5  ;;  %v9163_v24 = vrot.slane %v19992_v33, 3 }
 0x5d0   : > { %22770 = vst [vmem:[#allocation6_spill] sm:$0xff] %v19999_v25  ;;  %v20013_v14 = vpop.f32.mrb[101].mxu0  ;;  %v9436_v49 = vrot.slane %v19992_v33, 7  ;;  %v10453_v4 = vsel %vm9069_vm6, %v10452_v2, %v10451_v34  ;;  %v10317_v1 = vsel %vm9069_vm6, %v10316_v38, %v10315_v45  ;;  %v10726_v63 = vsel %vm9069_vm6, %v10725_v8, %v10724_v47 }
 0x5d1   : > { %22771 = vst [vmem:[#allocation96_spill] sm:$0xff] %v20006_v60  ;;  %v20019_v40 = vpop.f32.mrb[102].mxu0  ;;  %v9574_v39 = vsel %vm9069_vm6, %v9573_v16, %v9572_v11  ;;  %v9301_v57 = vsel %vm9069_vm6, %v9300_v55, %v9299_v17  ;;  %v9164_v21 = vsel %vm9069_vm6, %v9163_v24, %v9162_v53  ;;  %v10149_v25 = vrot.slane %v20006_v60, 1 }
 0x5d2   : > { %v9182_v28 = vpop.permute.xlu0 %9181  ;;  %v20025_v54 = vpop.f32.mrb[103].mxu0  ;;  %v9437_v33 = vsel %vm9069_vm6, %v9436_v49, %v9435_v13  ;;  %v9876_v34 = vrot.slane %v20006_v60, 5  ;;  %v9740_v45 = vrot.slane %v20006_v60, 3  ;;  %v10012_v47 = vrot.slane %v20006_v60, 7 }
 0x5d3   : > { %9194 = vst.msk [vmem:[#allocation2] sm:$0xff] %vm9193_vm9, %v9182_v28  ;;  %v14934_v11 = vpop.f32.mrb[104].mxu1  ;;  %v10150_v17 = vsel %vm9069_vm6, %v10149_v25, %v10148_v31  ;;  %v9077_v53 = vsel %vm9057_vm2, %v9076_v0, %v9075_v52  ;;  %v9082_v2 = vrot.slane %v19415_v15, 3  ;;  %v9084_v38 = vrot.slane %v19496_v23, 2 }
 0x5d4   : > { %v20037_v8 = vmax.f32 %v19949_v19, %v14934_v11  ;;  %v8750_v13 = vpop.f32.mrb[105].mxu1  ;;  %v9877_v16 = vsel %vm9069_vm6, %v9876_v34, %v9875_v42  ;;  %v9741_v55 = vsel %vm9069_vm6, %v9740_v45, %v9739_v20  ;;  %v10013_v24 = vsel %vm9069_vm6, %v10012_v47, %v10011_v30 }
 0x5d5   : > { %v20043_v28 = vmax.f32 %v19957_v46, %v8750_v13  ;;  %v14935_v31 = vpop.f32.mrb[106].mxu1  ;;  %v9079_v0 = vsel %vm9060_vm3, %v9078_v58, %v9077_v53  ;;  %v9086_v52 = vrot.slane %v19572_v61, 1  ;;  %v10578_v25 = vrot.slane %v19634_v50, 5 }
 0x5d6   : > { %22772 = vst [vmem:[#allocation89_spill] sm:$0xff] %v20037_v8  ;;  %v20049_v19 = vmax.f32 %v19962_v62, %v14935_v31  ;;  %v9455_v49 = vpop.permute.xlu0 %9454  ;;  %v8753_v11 = vpop.f32.mrb[107].mxu1  ;;  %v10454_v42 = vrot.slane %v20037_v8, 4  ;;  %v10318_v20 = vrot.slane %v20037_v8, 2  ;;  %v20055_v46 = vsel %vm9072_vm7, %v20037_v8, %v10726_v63 }
 0x5d7   : > { %22773 = vst [vmem:[#allocation86_spill] sm:$0xff] %v20043_v28  ;;  %9466 = vst.msk [vmem:[#allocation2 + $0x10] sm:$0xff] %vm9193_vm9, %v9455_v49  ;;  %v20059_v30 = vmax.f32 %v19969_v27, %v8753_v11  ;;  %v9575_v58 = vsel %vm9072_vm7, %v20043_v28, %v9574_v39  ;;  %v20063_v62 = vpop.f32.mrb[104].mxu0  ;;  %v9302_v34 = vrot.slane %v20043_v28, 4  ;;  %v9165_v45 = vrot.slane %v20043_v28, 2 }
 0x5d8   : > { %22774 = vst [vmem:[#allocation12_spill] sm:$0xff] %v20049_v19  ;;  %9594 = vrot.lane.b32.xlu0 %v9575_v58, %s15483_s27  ;;  %v20068_v47 = vpop.f32.mrb[105].mxu0  ;;  %v9438_v63 = vrot.slane %v20043_v28, 6  ;;  %v20072_v53 = vsel %vm9072_vm7, %v10454_v42, %v10453_v4  ;;  %v20075_v27 = vsel %vm9072_vm7, %v10318_v20, %v10317_v1  ;;  %v22776_v39 = vrot.slane %v19361_v51, 4 }
 0x5d9   : > { %22775 = vst [vmem:[#allocation98_spill] sm:$0xff] %v20059_v30  ;;  %v9303_v31 = vsel %vm9072_vm7, %v9302_v34, %v9301_v57  ;;  %v20081_v49 = vpop.f32.mrb[106].mxu0  ;;  %v9166_v11 = vsel %vm9072_vm7, %v9165_v45, %v9164_v21  ;;  %v20086_v58 = vsel %vm9072_vm7, %v20059_v30, %v10150_v17  ;;  %v9878_v4 = vrot.slane %v20059_v30, 4 }
 0x5da   : > { %v9081_v13 = vsel %vm9063_vm4, %v22776_v39, %v9079_v0  ;;  %v10167_v42 = vpop.permute.xlu0 %10166  ;;  %v20089_v50 = vpop.f32.mrb[107].mxu0  ;;  %v9439_v1 = vsel %vm9072_vm7, %v9438_v63, %v9437_v33  ;;  %v9742_v20 = vrot.slane %v20059_v30, 2  ;;  %v10014_v0 = vrot.slane %v20059_v30, 6 }
 0x5db   : > { %v9083_v57 = vsel %vm9066_vm5, %v9082_v2, %v9081_v13  ;;  %10178 = vst.msk [vmem:[#allocation2 + $0x38] sm:$0xff] %vm9193_vm9, %v10167_v42  ;;  %v14938_v21 = vpop.f32.mrb[108].mxu1  ;;  %v20097_v34 = vsel %vm9072_vm7, %v9878_v4, %v9877_v16  ;;  %v10579_v45 = vrot.slane %v19711_v22, 4  ;;  %v10581_v39 = vrot.slane %v19775_v5, 3 }
 0x5dc   : > { %v9085_v17 = vsel %vm9069_vm6, %v9084_v38, %v9083_v57  ;;  %v20103_v33 = vmax.f32 %v20008_v7, %v14938_v21  ;;  %9322 = vrot.lane.b32.xlu0 %v9303_v31, %s15483_s27  ;;  %v8766_v63 = vpop.f32.mrb[109].mxu1  ;;  %v20107_v2 = vsel %vm9072_vm7, %v9742_v20, %v9741_v55  ;;  %v20110_v13 = vsel %vm9072_vm7, %v10014_v0, %v10013_v24 }
 0x5dd   : > { %v9087_v16 = vsel %vm9072_vm7, %v9086_v52, %v9085_v17  ;;  %v20114_v38 = vmax.f32 %v20013_v14, %v8766_v63  ;;  %v14939_v4 = vpop.f32.mrb[110].mxu1  ;;  %v10580_v7 = vsel %vm9054_vm1, %v10579_v45, %v10578_v25  ;;  %v10583_v42 = vrot.slane %v19830_v3, 2 }
 0x5de   : > { %22777 = vst [vmem:[#allocation88_spill] sm:$0xff] %v20103_v33  ;;  %9122 = vst.msk [vmem:[#allocation2 + $0x80] sm:$0xff] %vm9120_vm8, %v9087_v16  ;;  %v10585_v31 = vrot.slane %v19886_v6, 1  ;;  %v20121_v55 = vmax.f32 %v20019_v40, %v14939_v4  ;;  %v9895_v20 = vpop.permute.xlu0 %9894  ;;  %v8769_v24 = vpop.f32.mrb[111].mxu1  ;;  %v10582_v0 = vsel %vm9057_vm2, %v10581_v39, %v10580_v7  ;;  %v10588_v52 = vrot.slane %v19986_v9, 7 }
 0x5df   : > { %v10590_v14 = vrot.slane %v20037_v8, 6  ;;  %9906 = vst.msk [vmem:[#allocation2 + $0x28] sm:$0xff] %vm9193_vm9, %v9895_v20  ;;  %v20128_v57 = vmax.f32 %v20025_v54, %v8769_v24  ;;  %v20130_v25 = vpop.f32.mrb[108].mxu0  ;;  %v10584_v21 = vsel %vm9060_vm3, %v10583_v42, %v10582_v0  ;;  %v9348_v40 = vrot.slane %v19131_v35, 4 }
 0x5e0   : > { %22778 = vst [vmem:[#allocation13_spill] sm:$0xff] %v20121_v55  ;;  %v9349_v17 = vrot.slane %v19182_v36, 3  ;;  %9185 = vrot.lane.b32.xlu0 %v9166_v11, %s15483_s27  ;;  %v20136_v45 = vpop.f32.mrb[109].mxu0  ;;  %v10586_v39 = vsel %vm9063_vm4, %v10585_v31, %v10584_v21  ;;  %v9351_v63 = vrot.slane %v19241_v43, 2  ;;  %v9353_v16 = vrot.slane %v19309_v26, 1 }
 0x5e1   : > { %22779 = vst [vmem:[#allocation99_spill] sm:$0xff] %v20128_v57  ;;  %v9356_v54 = vrot.slane %v19415_v15, 7  ;;  %v20142_v4 = vpop.f32.mrb[110].mxu0  ;;  %v10587_v7 = vsel %vm9066_vm5, %v19934_v18, %v10586_v39  ;;  %v9358_v36 = vrot.slane %v19496_v23, 6  ;;  %v9360_v11 = vrot.slane %v19572_v61, 5  ;;  %v22780_v61 = vld [vmem:[#allocation34_spill] sm:$0xff] }
 0x5e2   : > { %v9350_v35 = vsel %vm9054_vm1, %v9349_v17, %v9348_v40  ;;  %v9759_v42 = vpop.permute.xlu0 %9758  ;;  %v20149_v20 = vpop.f32.mrb[111].mxu0  ;;  %v10589_v43 = vsel %vm9069_vm6, %v10588_v52, %v10587_v7  ;;  %v10990_v15 = vrot.slane %v18860_v29, 3  ;;  %v10991_v31 = vrot.slane %v18873_v12, 2  ;;  %v22781_v40 = vld [vmem:[#allocation37_spill] sm:$0xff] }
 0x5e3   : > { %v9352_v26 = vsel %vm9057_vm2, %v9351_v63, %v9350_v35  ;;  %9770 = vst.msk [vmem:[#allocation2 + $0x20] sm:$0xff] %vm9193_vm9, %v9759_v42  ;;  %v14942_v24 = vpop.f32.mrb[112].mxu1  ;;  %v20157_v0 = vsel %vm9072_vm7, %v10590_v14, %v10589_v43  ;;  %v10993_v21 = vrot.slane %v22780_v61, 1  ;;  %v10996_v17 = vrot.slane %v22781_v40, 7  ;;  %v22783_v35 = vld [vmem:[#allocation38_spill] sm:$0xff] }
 0x5e4   : > { %v9354_v23 = vsel %vm9060_vm3, %v9353_v16, %v9352_v26  ;;  %v20163_v52 = vmax.f32 %v20063_v62, %v14942_v24  ;;  %9458 = vrot.lane.b32.xlu0 %v9439_v1, %s15483_s27  ;;  %v8782_v39 = vpop.f32.mrb[113].mxu1  ;;  %v10992_v7 = vsel %vm9054_vm1, %v10991_v31, %v10990_v15  ;;  %v10998_v14 = vrot.slane %v22783_v35, 6  ;;  %v22784_v62 = vld [vmem:[#allocation40_spill] sm:$0xff]  ;;  %v22786_v15 = vld [vmem:[#allocation35_spill] sm:$0xff] }
 0x5e5   : > { %v9355_v63 = vsel %vm9063_vm4, %v19361_v51, %v9354_v23  ;;  %v20171_v42 = vmax.f32 %v20068_v47, %v8782_v39  ;;  %v14943_v16 = vpop.f32.mrb[114].mxu1  ;;  %v10994_v26 = vsel %vm9057_vm2, %v10993_v21, %v10992_v7  ;;  %v11000_v24 = vrot.slane %v22784_v62, 5  ;;  %v22787_v23 = vld [vmem:[#allocation41_spill] sm:$0xff] }
 0x5e6   : > { %22782 = vst [vmem:[#allocation94_spill] sm:$0xff] %v20163_v52  ;;  %v9357_v43 = vsel %vm9066_vm5, %v9356_v54, %v9355_v63  ;;  %v20177_v1 = vmax.f32 %v20081_v49, %v14943_v16  ;;  %v10031_v5 = vpop.permute.xlu0 %10030  ;;  %v8785_v8 = vpop.f32.mrb[115].mxu1  ;;  %v10995_v31 = vsel %vm9060_vm3, %v22786_v15, %v10994_v26  ;;  %v11002_v47 = vrot.slane %v22787_v23, 4 }
 0x5e7   : > { %v9359_v51 = vsel %vm9069_vm6, %v9358_v36, %v9357_v43  ;;  %10042 = vst.msk [vmem:[#allocation2 + $0x30] sm:$0xff] %vm9193_vm9, %v10031_v5  ;;  %v20185_v54 = vmax.f32 %v20089_v50, %v8785_v8  ;;  %v20187_v21 = vpop.f32.mrb[112].mxu0  ;;  %v10997_v49 = vsel %vm9063_vm4, %v10996_v17, %v10995_v31  ;;  %v9576_v63 = vrot.slane %v20114_v38, 7 }
 0x5e8   : > { %22785 = vst [vmem:[#allocation93_spill] sm:$0xff] %v20177_v1  ;;  %v9361_v39 = vsel %vm9072_vm7, %v9360_v11, %v9359_v51  ;;  %10470 = vrot.lane.b32.xlu0 %v19583_v37, %s15483_s27  ;;  %v20194_v36 = vpop.f32.mrb[113].mxu0  ;;  %v10999_v5 = vsel %vm9066_vm5, %v10998_v14, %v10997_v49  ;;  %v9577_v50 = vrot.slane %v20171_v42, 6  ;;  %v10060_v8 = vrot.slane %v19146_v32, 6 }
 0x5e9   : > { %22788 = vst [vmem:[#allocation7_spill] sm:$0xff] %v20185_v54  ;;  %9395 = vst.msk [vmem:[#allocation2 + $0x90] sm:$0xff] %vm9120_vm8, %v9361_v39  ;;  %v10061_v7 = vrot.slane %v19198_v48, 5  ;;  %v20201_v11 = vpop.f32.mrb[114].mxu0  ;;  %v11001_v17 = vsel %vm9069_vm6, %v11000_v24, %v10999_v5  ;;  %v10063_v16 = vrot.slane %v19258_v10, 4  ;;  %v10065_v37 = vrot.slane %v19323_v44, 3 }
 0x5ea   : > { %v10067_v43 = vrot.slane %v19375_v41, 2  ;;  %v20207_v26 = vpop.f32.mrb[115].mxu0  ;;  %v20210_v14 = vsel %vm9072_vm7, %v11002_v47, %v11001_v17  ;;  %v9578_v51 = vsel %vm9054_vm1, %v9577_v50, %v9576_v63  ;;  %v10069_v39 = vrot.slane %v19437_v56, 1 }
 0x5eb   : > { %v10062_v31 = vsel %vm9054_vm1, %v10061_v7, %v10060_v8  ;;  %v14946_v49 = vpop.f32.mrb[116].mxu1  ;;  %v10072_v5 = vrot.slane %v19588_v59, 7  ;;  %v10854_v9 = vrot.slane %v18860_v29, 1  ;;  %v10856_v18 = vrot.slane %v22780_v61, 7 }
 0x5ec   : > { %v10064_v24 = vsel %vm9057_vm2, %v10063_v16, %v10062_v31  ;;  %v20220_v6 = vmax.f32 %v20130_v25, %v14946_v49  ;;  %10170 = vrot.lane.b32.xlu0 %v20086_v58, %s15483_s27  ;;  %v8798_v47 = vpop.f32.mrb[117].mxu1  ;;  %v10858_v50 = vrot.slane %v22786_v15, 6  ;;  %v10860_v8 = vrot.slane %v22781_v40, 5 }
 0x5ed   : > { %v10066_v63 = vsel %vm9060_vm3, %v10065_v37, %v10064_v24  ;;  %v20228_v7 = vmax.f32 %v20136_v45, %v8798_v47  ;;  %v14947_v17 = vpop.f32.mrb[118].mxu1  ;;  %v10855_v25 = vsel %vm9054_vm1, %v18873_v12, %v10854_v9  ;;  %v10862_v31 = vrot.slane %v22783_v35, 4 }
 0x5ee   : > { %22789 = vst [vmem:[#allocation97_spill] sm:$0xff] %v20220_v6  ;;  %v10068_v16 = vsel %vm9063_vm4, %v10067_v43, %v10066_v63  ;;  %v20235_v58 = vmax.f32 %v20142_v4, %v14947_v17  ;;  %v8801_v49 = vpop.f32.mrb[119].mxu1  ;;  %v20237_v37 = vpop.f32.mrb[116].mxu0  ;;  %v10857_v3 = vsel %vm9057_vm2, %v10856_v18, %v10855_v25  ;;  %v10864_v45 = vrot.slane %v22784_v62, 3  ;;  %v22792_v63 = vld [vmem:[#allocation52_spill] sm:$0xff] }
 0x5ef   : > { %v10070_v24 = vsel %vm9066_vm5, %v10069_v39, %v10068_v16  ;;  %v20243_v47 = vmax.f32 %v20149_v20, %v8801_v49  ;;  %v20245_v43 = vpop.f32.mrb[117].mxu0  ;;  %v9579_v9 = vrot.slane %v20228_v7, 5  ;;  %v10859_v17 = vsel %vm9060_vm3, %v10858_v50, %v10857_v3 }
 0x5f0   : > { %22790 = vst [vmem:[#allocation92_spill] sm:$0xff] %v20235_v58  ;;  %v10071_v4 = vsel %vm9069_vm6, %v22792_v63, %v10070_v24  ;;  %9898 = vrot.lane.b32.xlu0 %v20097_v34, %s15483_s27  ;;  %v20253_v39 = vpop.f32.mrb[118].mxu0  ;;  %v10861_v16 = vsel %vm9063_vm4, %v10860_v8, %v10859_v17  ;;  %v10866_v20 = vrot.slane %v22787_v23, 2  ;;  %v9304_v25 = vrot.slane %v20114_v38, 3 }
 0x5f1   : > { %22791 = vst [vmem:[#allocation87_spill] sm:$0xff] %v20243_v47  ;;  %v10073_v18 = vsel %vm9072_vm7, %v10072_v5, %v10071_v4  ;;  %v20259_v49 = vpop.f32.mrb[119].mxu0  ;;  %v9580_v22 = vsel %vm9057_vm2, %v9579_v9, %v9578_v51  ;;  %v10863_v3 = vsel %vm9066_vm5, %v10862_v31, %v10861_v16  ;;  %v9305_v34 = vrot.slane %v20171_v42, 2 }
 0x5f2   : > { %10107 = vst.msk [vmem:[#allocation2 + $0xb8] sm:$0xff] %vm9120_vm8, %v10073_v18  ;;  %v9307_v50 = vrot.slane %v20228_v7, 1  ;;  %v10865_v5 = vsel %vm9069_vm6, %v10864_v45, %v10863_v3  ;;  %v9788_v8 = vrot.slane %v19146_v32, 2  ;;  %v9789_v24 = vrot.slane %v19198_v48, 1 }
 0x5f3   : > { %v9792_v4 = vrot.slane %v19323_v44, 7  ;;  %v14950_v17 = vpop.f32.mrb[120].mxu1  ;;  %v20271_v58 = vsel %vm9072_vm7, %v10866_v20, %v10865_v5  ;;  %v9306_v51 = vsel %vm9054_vm1, %v9305_v34, %v9304_v25  ;;  %v9794_v31 = vrot.slane %v19375_v41, 6 }
 0x5f4   : > { %v9796_v9 = vrot.slane %v19437_v56, 5  ;;  %v20277_v18 = vmax.f32 %v20187_v21, %v14950_v17  ;;  %9762 = vrot.lane.b32.xlu0 %v20107_v2, %s15483_s27  ;;  %v8814_v45 = vpop.f32.mrb[121].mxu1  ;;  %v9308_v16 = vsel %vm9057_vm2, %v9307_v50, %v9306_v51  ;;  %v9790_v3 = vsel %vm9054_vm1, %v9789_v24, %v9788_v8 }
 0x5f5   : > { %v9798_v20 = vrot.slane %v22792_v63, 4  ;;  %v20285_v5 = vmax.f32 %v20194_v36, %v8814_v45  ;;  %v14951_v25 = vpop.f32.mrb[122].mxu1  ;;  %v9791_v34 = vsel %vm9057_vm2, %v19258_v10, %v9790_v3  ;;  %v9800_v21 = vrot.slane %v19588_v59, 3 }
 0x5f6   : > { %22793 = vst [vmem:[#allocation14_spill] sm:$0xff] %v20277_v18  ;;  %v11262_v17 = vrot.slane %v18860_v29, 7  ;;  %v20292_v2 = vmax.f32 %v20201_v11, %v14951_v25  ;;  %v8817_v1 = vpop.f32.mrb[123].mxu1  ;;  %v20294_v50 = vpop.f32.mrb[120].mxu0  ;;  %v9793_v8 = vsel %vm9060_vm3, %v9792_v4, %v9791_v34  ;;  %v11263_v24 = vrot.slane %v18873_v12, 6 }
 0x5f7   : > { %v11265_v36 = vrot.slane %v22780_v61, 5  ;;  %v20300_v51 = vmax.f32 %v20207_v26, %v8817_v1  ;;  %v20302_v45 = vpop.f32.mrb[121].mxu0  ;;  %v9581_v3 = vrot.slane %v20285_v5, 4  ;;  %v9309_v11 = vsel %vm9060_vm3, %v20285_v5, %v9308_v16 }
 0x5f8   : > { %22794 = vst [vmem:[#allocation100_spill] sm:$0xff] %v20292_v2  ;;  %v9795_v25 = vsel %vm9063_vm4, %v9794_v31, %v9793_v8  ;;  %10034 = vrot.lane.b32.xlu0 %v20110_v13, %s15483_s27  ;;  %v20310_v4 = vpop.f32.mrb[122].mxu0  ;;  %v11264_v2 = vsel %vm9054_vm1, %v11263_v24, %v11262_v17  ;;  %v11267_v1 = vrot.slane %v22786_v15, 4  ;;  %v11269_v26 = vrot.slane %v22781_v40, 3 }
 0x5f9   : > { %22795 = vst [vmem:[#allocation90_spill] sm:$0xff] %v20300_v51  ;;  %v9797_v34 = vsel %vm9066_vm5, %v9796_v9, %v9795_v25  ;;  %v20316_v55 = vpop.f32.mrb[123].mxu0  ;;  %v9582_v60 = vsel %vm9060_vm3, %v9581_v3, %v9580_v22  ;;  %v11266_v31 = vsel %vm9057_vm2, %v11265_v36, %v11264_v2  ;;  %v11271_v13 = vrot.slane %v22783_v35, 2 }
 0x5fa   : > { %v9799_v16 = vsel %vm9069_vm6, %v9798_v20, %v9797_v34  ;;  %v11268_v9 = vsel %vm9060_vm3, %v11267_v1, %v11266_v31  ;;  %v11273_v17 = vrot.slane %v22784_v62, 1  ;;  %v9167_v24 = vrot.slane %v20114_v38, 1 }
 0x5fb   : > { %v9801_v8 = vsel %vm9072_vm7, %v9800_v21, %v9799_v16  ;;  %v14954_v25 = vpop.f32.mrb[124].mxu1  ;;  %v11270_v30 = vsel %vm9063_vm4, %v11269_v26, %v11268_v9  ;;  %v9169_v22 = vrot.slane %v20228_v7, 7  ;;  %v9171_v20 = vrot.slane %v20285_v5, 6  ;;  %v22797_v21 = vld [vmem:[#allocation54_spill] sm:$0xff] }
 0x5fc   : > { %9835 = vst.msk [vmem:[#allocation2 + $0xa8] sm:$0xff] %vm9120_vm8, %v9801_v8  ;;  %v9652_v2 = vrot.slane %v19198_v48, 7  ;;  %v20332_v36 = vmax.f32 %v20237_v37, %v14954_v25  ;;  %10334 = vrot.lane.b32.xlu0 %v22797_v21, %s15483_s27  ;;  %v8830_v3 = vpop.f32.mrb[125].mxu1  ;;  %v11272_v34 = vsel %vm9066_vm5, %v11271_v13, %v11270_v30  ;;  %v9168_v1 = vsel %vm9054_vm1, %v20171_v42, %v9167_v24 }
 0x5fd   : > { %v9654_v26 = vrot.slane %v19258_v10, 6  ;;  %v20341_v16 = vmax.f32 %v20245_v43, %v8830_v3  ;;  %v14955_v31 = vpop.f32.mrb[126].mxu1  ;;  %v11274_v8 = vsel %vm9069_vm6, %v11273_v17, %v11272_v34  ;;  %v9170_v37 = vsel %vm9057_vm2, %v9169_v22, %v9168_v1  ;;  %v22800_v34 = vld [vmem:[#allocation4_spill] sm:$0xff] }
 0x5fe   : > { %22796 = vst [vmem:[#allocation15_spill] sm:$0xff] %v20332_v36  ;;  %v9653_v9 = vsel %vm9054_vm1, %v9652_v2, %v19146_v32  ;;  %v20348_v25 = vmax.f32 %v20253_v39, %v14955_v31  ;;  %v8833_v30 = vpop.f32.mrb[127].mxu1  ;;  %v20350_v13 = vpop.f32.mrb[124].mxu0  ;;  %v20354_v24 = vsel %vm9072_vm7, %v22787_v23, %v11274_v8  ;;  %v9172_v43 = vsel %vm9060_vm3, %v9171_v20, %v9170_v37 }
 0x5ff   : > { %v9655_v21 = vsel %vm9057_vm2, %v9654_v26, %v9653_v9  ;;  %v20359_v17 = vmax.f32 %v20259_v49, %v8833_v30  ;;  %v20361_v22 = vpop.f32.mrb[125].mxu0  ;;  %v9583_v2 = vrot.slane %v20341_v16, 3  ;;  %v9310_v39 = vrot.slane %v20341_v16, 7 }
 0x600   : > { %22798 = vst [vmem:[#allocation101_spill] sm:$0xff] %v20348_v25  ;;  %v9173_v3 = vrot.slane %v20341_v16, 5  ;;  %10742 = vrot.lane.b32.xlu0 %v22800_v34, %s15483_s27  ;;  %v20368_v1 = vpop.f32.mrb[126].mxu0  ;;  %v9656_v20 = vrot.slane %v19323_v44, 5  ;;  %v9658_v26 = vrot.slane %v19375_v41, 4  ;;  %v9660_v49 = vrot.slane %v19437_v56, 3 }
 0x601   : > { %22799 = vst [vmem:[#allocation95_spill] sm:$0xff] %v20359_v17  ;;  %v9662_v31 = vrot.slane %v22792_v63, 2  ;;  %v20374_v8 = vpop.f32.mrb[127].mxu0  ;;  %v9584_v37 = vsel %vm9063_vm4, %v9583_v2, %v9582_v60  ;;  %v9311_v9 = vsel %vm9063_vm4, %v9310_v39, %v9309_v11  ;;  %v9664_v34 = vrot.slane %v19588_v59, 1 }
 0x602   : > { %v9174_v30 = vsel %vm9063_vm4, %v9173_v3, %v9172_v43  ;;  %v9657_v25 = vsel %vm9060_vm3, %v9656_v20, %v9655_v21  ;;  %v11126_v28 = vrot.slane %v18860_v29, 5  ;;  %v11127_v18 = vrot.slane %v18873_v12, 4  ;;  %v22802_v21 = vld [vmem:[#allocation3_spill] sm:$0xff] }
 0x603   : > { %v11129_v36 = vrot.slane %v22780_v61, 3  ;;  %v14958_v6 = vpop.f32.mrb[128].mxu1  ;;  %v9659_v52 = vsel %vm9063_vm4, %v9658_v26, %v9657_v25  ;;  %v11131_v33 = vrot.slane %v22786_v15, 2  ;;  %v11133_v60 = vrot.slane %v22781_v40, 1 }
 0x604   : > { %v11136_v11 = vrot.slane %v22784_v62, 7  ;;  %v20389_v43 = vmax.f32 %v20294_v50, %v14958_v6  ;;  %10606 = vrot.lane.b32.xlu0 %v22802_v21, %s15483_s27  ;;  %v8846_v2 = vpop.f32.mrb[129].mxu1  ;;  %v9661_v39 = vsel %vm9066_vm5, %v9660_v49, %v9659_v52  ;;  %v11128_v3 = vsel %vm9054_vm1, %v11127_v18, %v11126_v28 }
 0x605   : > { %v11138_v20 = vrot.slane %v22787_v23, 6  ;;  %v20397_v25 = vmax.f32 %v20302_v45, %v8846_v2  ;;  %v14959_v26 = vpop.f32.mrb[130].mxu1  ;;  %v9663_v61 = vsel %vm9069_vm6, %v9662_v31, %v9661_v39  ;;  %v11130_v62 = vsel %vm9057_vm2, %v11129_v36, %v11128_v3 }
 0x606   : > { %22801 = vst [vmem:[#allocation18_spill] sm:$0xff] %v20389_v43  ;;  %v9440_v6 = vrot.slane %v20114_v38, 5  ;;  %v20403_v50 = vmax.f32 %v20310_v4, %v14959_v26  ;;  %v8849_v21 = vpop.f32.mrb[131].mxu1  ;;  %v20405_v40 = vpop.f32.mrb[128].mxu0  ;;  %v9665_v28 = vsel %vm9072_vm7, %v9664_v34, %v9663_v61  ;;  %v11132_v52 = vsel %vm9060_vm3, %v11131_v33, %v11130_v62 }
 0x607   : > { %22803 = vst [vmem:[#allocation59_spill] sm:$0xff] %v20397_v25  ;;  %v9441_v18 = vrot.slane %v20171_v42, 4  ;;  %v20411_v45 = vmax.f32 %v20316_v55, %v8849_v21  ;;  %v20413_v49 = vpop.f32.mrb[129].mxu0  ;;  %v9585_v36 = vrot.slane %v20397_v25, 2  ;;  %v9312_v31 = vrot.slane %v20397_v25, 6  ;;  %9699 = vst.msk [vmem:[#allocation2 + $0xa0] sm:$0xff] %vm9120_vm8, %v9665_v28 }
 0x608   : > { %v9175_v4 = vrot.slane %v20397_v25, 4  ;;  %10474 = vrot.lane.b32.xlu0 %v20072_v53, %s15483_s27  ;;  %v20421_v61 = vpop.f32.mrb[130].mxu0  ;;  %v11134_v33 = vsel %vm9063_vm4, %v11133_v60, %v11132_v52  ;;  %v9443_v62 = vrot.slane %v20228_v7, 3  ;;  %v9445_v34 = vrot.slane %v20285_v5, 2 }
 0x609   : > { %22804 = vst [vmem:[#allocation17_spill] sm:$0xff] %v20411_v45  ;;  %v9442_v55 = vsel %vm9054_vm1, %v9441_v18, %v9440_v6  ;;  %v20427_v2 = vpop.f32.mrb[131].mxu0  ;;  %v9586_v39 = vsel %vm9066_vm5, %v9585_v36, %v9584_v37  ;;  %v9313_v3 = vsel %vm9066_vm5, %v9312_v31, %v9311_v9  ;;  %v11135_v53 = vsel %vm9066_vm5, %v22783_v35, %v11134_v33 }
 0x60a   : > { %v9176_v26 = vsel %vm9066_vm5, %v9175_v4, %v9174_v30  ;;  %v9593_v21 = vpop.permute.xlu1 %9592  ;;  %v11137_v60 = vsel %vm9069_vm6, %v11136_v11, %v11135_v53  ;;  %v9444_v6 = vsel %vm9057_vm2, %v9443_v62, %v9442_v55  ;;  %v9447_v28 = vrot.slane %v20341_v16, 1  ;;  %v22807_v53 = vld [vmem:[#allocation56_spill] sm:$0xff] }
 0x60b   : > { %v9924_v52 = vrot.slane %v19146_v32, 4  ;;  %9603 = vst.msk [vmem:[#allocation2 + $0x98] sm:$0xff] %vm9193_vm9, %v9593_v21  ;;  %v14962_v18 = vpop.f32.mrb[132].mxu1  ;;  %v20440_v37 = vsel %vm9072_vm7, %v11138_v20, %v11137_v60  ;;  %v9446_v9 = vsel %vm9060_vm3, %v9445_v34, %v9444_v6  ;;  %v9925_v30 = vrot.slane %v19198_v48, 3 }
 0x60c   : > { %v9927_v36 = vrot.slane %v19258_v10, 2  ;;  %v20446_v11 = vmax.f32 %v20350_v13, %v14962_v18  ;;  %10338 = vrot.lane.b32.xlu0 %v20075_v27, %s15483_s27  ;;  %v8862_v31 = vpop.f32.mrb[133].mxu1  ;;  %v9448_v32 = vsel %vm9063_vm4, %v9447_v28, %v9446_v9  ;;  %v9929_v4 = vrot.slane %v19323_v44, 1  ;;  %v22809_v28 = vld [vmem:[#allocation16_spill] sm:$0xff]  ;;  %v22810_v18 = vld [vmem:[#allocation74_spill] sm:$0xff] }
 0x60d   : > { %v9932_v20 = vrot.slane %v19437_v56, 7  ;;  %v20454_v33 = vmax.f32 %v20361_v22, %v8862_v31  ;;  %v14963_v55 = vpop.f32.mrb[134].mxu1  ;;  %v9449_v48 = vsel %vm9066_vm5, %v20397_v25, %v9448_v32  ;;  %v9926_v10 = vsel %vm9054_vm1, %v9925_v30, %v9924_v52 }
 0x60e   : > { %22805 = vst [vmem:[#allocation61_spill] sm:$0xff] %v20446_v11  ;;  %v9934_v13 = vrot.slane %v22792_v63, 6  ;;  %v20461_v27 = vmax.f32 %v20368_v1, %v14963_v55  ;;  %v9321_v62 = vpop.permute.xlu1 %9320  ;;  %v8865_v34 = vpop.f32.mrb[135].mxu1  ;;  %v9928_v44 = vsel %vm9057_vm2, %v9927_v36, %v9926_v10  ;;  %v9936_v56 = vrot.slane %v19588_v59, 5  ;;  %v11337_v55 = vld [vmem:[#allocation2 + $0x18] sm:$0xff] }
 0x60f   : > { %22806 = vst [vmem:[#allocation19_spill] sm:$0xff] %v20454_v33  ;;  %v11018_v22 = vrot.slane %v22807_v53, 3  ;;  %9331 = vst.msk [vmem:[#allocation2 + $0x88] sm:$0xff] %vm9193_vm9, %v9321_v62  ;;  %v20468_v21 = vmax.f32 %v20374_v8, %v8865_v34  ;;  %v9587_v60 = vrot.slane %v20454_v33, 1  ;;  %v9314_v63 = vrot.slane %v20454_v33, 5  ;;  %v22811_v34 = vld [vmem:[#allocation75_spill] sm:$0xff] }
 0x610   : > { %v9177_v1 = vrot.slane %v20454_v33, 3  ;;  %10746 = vrot.lane.b32.xlu0 %v20055_v46, %s15483_s27  ;;  %v9450_v6 = vrot.slane %v20454_v33, 7  ;;  %v9930_v59 = vsel %vm9060_vm3, %v9929_v4, %v9928_v44  ;;  %v11019_v52 = vrot.slane %v22809_v28, 2 }
 0x611   : > { %22808 = vst [vmem:[#allocation20_spill] sm:$0xff] %v20468_v21  ;;  %v11021_v9 = vrot.slane %v22810_v18, 1  ;;  %v9588_v8 = vsel %vm9069_vm6, %v9587_v60, %v9586_v39  ;;  %v9315_v30 = vsel %vm9069_vm6, %v9314_v63, %v9313_v3  ;;  %v9931_v31 = vsel %vm9063_vm4, %v19375_v41, %v9930_v59  ;;  %v22812_v41 = vld [vmem:[#allocation11_spill] sm:$0xff]  ;;  %v22815_v59 = vld [vmem:[#allocation6_spill] sm:$0xff] }
 0x612   : > { %v9178_v36 = vsel %vm9069_vm6, %v9177_v1, %v9176_v26  ;;  %v9184_v32 = vpop.permute.xlu1 %9183  ;;  %v11353_v46 = vld [vmem:[#allocation2 + $0x98] sm:$0xff]  ;;  %v9451_v10 = vsel %vm9069_vm6, %v9450_v6, %v9449_v48  ;;  %v9933_v4 = vsel %vm9066_vm5, %v9932_v20, %v9931_v31  ;;  %v11020_v62 = vsel %vm9054_vm1, %v11019_v52, %v11018_v22  ;;  %v22814_v22 = vld [vmem:[#allocation79_spill] sm:$0xff] }
 0x613   : > { %v11024_v44 = vrot.slane %v22811_v34, 7  ;;  %9195 = vst.msk [vmem:[#allocation2 + $0x80] sm:$0xff] %vm9193_vm9, %v9184_v32  ;;  %v14966_v39 = vpop.f32.mrb[136].mxu1  ;;  %v11401_v3 = vpack.c.bf16 %v11353_v46, %v11337_v55  ;;  %v9935_v26 = vsel %vm9069_vm6, %v9934_v13, %v9933_v4  ;;  %v11022_v60 = vsel %vm9057_vm2, %v11021_v9, %v11020_v62  ;;  %v11335_v4 = vld [vmem:[#allocation2 + $0x8] sm:$0xff] }
 0x614   : > { %v11026_v63 = vrot.slane %v22812_v41, 6  ;;  %v20493_v1 = vmax.f32 %v20405_v40, %v14966_v39  ;;  %10610 = vrot.lane.b32.xlu0 %v20157_v0, %s15483_s27  ;;  %v8878_v20 = vpop.f32.mrb[137].mxu1  ;;  %v9937_v48 = vsel %vm9072_vm7, %v9936_v56, %v9935_v26  ;;  %v11023_v6 = vsel %vm9060_vm3, %v22814_v22, %v11022_v60  ;;  %v22817_v0 = vld [vmem:[#allocation42_spill] sm:$0xff]  ;;  %v22818_v39 = vld [vmem:[#allocation68_spill] sm:$0xff] }
 0x615   : > { %v11028_v52 = vrot.slane %v22815_v59, 5  ;;  %v20502_v13 = vmax.f32 %v20413_v49, %v8878_v20  ;;  %v14967_v9 = vpop.f32.mrb[138].mxu1  ;;  %12542 = vmatprep.mubr.bf16.mxu1 %v11401_v3  ;;  %9971 = vst.msk [vmem:[#allocation2 + $0xb0] sm:$0xff] %vm9120_vm8, %v9937_v48  ;;  %v11025_v40 = vsel %vm9063_vm4, %v11024_v44, %v11023_v6  ;;  %v11030_v31 = vrot.slane %v20049_v19, 4  ;;  %v22819_v3 = vld [vmem:[#allocation45_spill] sm:$0xff] }
 0x616   : > { %22813 = vst [vmem:[#allocation62_spill] sm:$0xff] %v20493_v1  ;;  %v10428_v32 = vrot.slane %v22817_v0, 3  ;;  %v20509_v56 = vmax.f32 %v20421_v61, %v14967_v9  ;;  %v9457_v55 = vpop.permute.xlu1 %9456  ;;  %v8881_v46 = vpop.f32.mrb[139].mxu1  ;;  %v11351_v62 = vld [vmem:[#allocation2 + $0x88] sm:$0xff]  ;;  %v11027_v49 = vsel %vm9066_vm5, %v11026_v63, %v11025_v40  ;;  %v10429_v26 = vrot.slane %v22818_v39, 2 }
 0x617   : > { %22816 = vst [vmem:[#allocation21_spill] sm:$0xff] %v20502_v13  ;;  %v10431_v60 = vrot.slane %v22819_v3, 1  ;;  %9467 = vst.msk [vmem:[#allocation2 + $0x90] sm:$0xff] %vm9193_vm9, %v9457_v55  ;;  %v20516_v44 = vmax.f32 %v20427_v2, %v8881_v46  ;;  %v9589_v20 = vsel %vm9072_vm7, %v20502_v13, %v9588_v8  ;;  %v11399_v61 = vpack.c.bf16 %v11351_v62, %v11335_v4  ;;  %v22821_v46 = vld [vmem:[#allocation47_spill] sm:$0xff] }
 0x618   : > { %v9316_v48 = vrot.slane %v20502_v13, 4  ;;  %11046 = vrot.lane.b32.xlu0 %v20210_v14, %s15483_s27  ;;  %9596 = vrot.lane.b32.xlu1 %v9589_v20, %s15483_s27  ;;  %v9179_v63 = vrot.slane %v20502_v13, 2  ;;  %v9452_v6 = vrot.slane %v20502_v13, 6  ;;  %v11029_v9 = vsel %vm9069_vm6, %v11028_v52, %v11027_v49  ;;  %v11334_v4 = vld [vmem:[#allocation2] sm:$0xff]  ;;  %v22823_v49 = vld [vmem:[#allocation64_spill] sm:$0xff] }
 0x619   : > { %22820 = vst [vmem:[#allocation22_spill] sm:$0xff] %v20516_v44  ;;  %v10430_v2 = vsel %vm9054_vm1, %v10429_v26, %v10428_v32  ;;  %12493 = vmatprep.mubr.bf16.mxu0 %v11399_v61  ;;  %v20530_v8 = vsel %vm9072_vm7, %v11030_v31, %v11029_v9  ;;  %v10434_v14 = vrot.slane %v22821_v46, 7  ;;  %v22822_v52 = vld [vmem:[#allocation67_spill] sm:$0xff]  ;;  %v10436_v26 = vrot.slane %v22823_v49, 6 }
 0x61a   : > { %v9317_v40 = vsel %vm9072_vm7, %v9316_v48, %v9315_v30  ;;  %v10432_v55 = vsel %vm9057_vm2, %v10431_v60, %v10430_v2  ;;  %v11350_v62 = vld [vmem:[#allocation2 + $0x80] sm:$0xff]  ;;  %v10169_v20 = vpop.permute.xlu1 %10168  ;;  %v9180_v33 = vsel %vm9072_vm7, %v9179_v63, %v9178_v36  ;;  %v9453_v13 = vsel %vm9072_vm7, %v9452_v6, %v9451_v10  ;;  %v22824_v60 = vld [vmem:[#allocation49_spill] sm:$0xff] }
 0x61b   : > { %v10433_v32 = vsel %vm9060_vm3, %v22822_v52, %v10432_v55  ;;  %v11398_v30 = vpack.c.bf16 %v11350_v62, %v11334_v4  ;;  %10179 = vst.msk [vmem:[#allocation2 + $0xb8] sm:$0xff] %vm9193_vm9, %v10169_v20  ;;  %v10438_v61 = vrot.slane %v22824_v60, 5  ;;  %v22825_v48 = vld [vmem:[#allocation53_spill] sm:$0xff]  ;;  %v10882_v10 = vrot.slane %v22807_v53, 1 }
 0x61c   : > { %v10435_v31 = vsel %vm9063_vm4, %v10434_v14, %v10433_v32  ;;  %v10440_v9 = vrot.slane %v22825_v48, 4  ;;  %10910 = vrot.lane.b32.xlu0 %v20271_v58, %s15483_s27  ;;  %9324 = vrot.lane.b32.xlu1 %v9317_v40, %s15483_s27  ;;  %v10884_v63 = vrot.slane %v22810_v18, 7  ;;  %v10886_v6 = vrot.slane %v22814_v22, 6  ;;  %v11336_v58 = vld [vmem:[#allocation2 + $0x10] sm:$0xff] }
 0x61d   : > { %v10437_v36 = vsel %vm9066_vm5, %v10436_v26, %v10435_v31  ;;  %12494 = vmatmul.mubr.bf16.vlgmr.msra.gmra.mrb[132].mxu0 %v11398_v30  ;;  %v10888_v55 = vrot.slane %v22811_v34, 5  ;;  %v10890_v14 = vrot.slane %v22812_v41, 4  ;;  %v10892_v4 = vrot.slane %v22815_v59, 3 }
 0x61e   : > { %v10439_v2 = vsel %vm9069_vm6, %v10438_v61, %v10437_v36  ;;  %v11352_v62 = vld [vmem:[#allocation2 + $0x90] sm:$0xff]  ;;  %v9897_v40 = vpop.permute.xlu1 %9896  ;;  %v10883_v32 = vsel %vm9054_vm1, %v22809_v28, %v10882_v10  ;;  %v10894_v26 = vrot.slane %v20049_v19, 2  ;;  %v10292_v30 = vrot.slane %v22817_v0, 1 }
 0x61f   : > { %v10441_v20 = vsel %vm9072_vm7, %v10440_v9, %v10439_v2  ;;  %v11400_v31 = vpack.c.bf16 %v11352_v62, %v11336_v58  ;;  %9907 = vst.msk [vmem:[#allocation2 + $0xa8] sm:$0xff] %vm9193_vm9, %v9897_v40  ;;  %v10885_v61 = vsel %vm9057_vm2, %v10884_v63, %v10883_v32  ;;  %v10294_v36 = vrot.slane %v22819_v3, 7 }
 0x620   : > { %v10296_v25 = vrot.slane %v22822_v52, 6  ;;  %11318 = vrot.lane.b32.xlu0 %v20354_v24, %s15483_s27  ;;  %9187 = vrot.lane.b32.xlu1 %v9180_v33, %s15483_s27  ;;  %v10887_v9 = vsel %vm9060_vm3, %v10886_v6, %v10885_v61  ;;  %v10293_v10 = vsel %vm9054_vm1, %v22818_v39, %v10292_v30  ;;  %v10298_v2 = vrot.slane %v22821_v46, 5 }
 0x621   : > { %v10300_v58 = vrot.slane %v22823_v49, 4  ;;  %12543 = vmatmul.mubr.bf16.vlgmr.msra.gmra.mrb[140].mxu1 %v11400_v31  ;;  %v10889_v63 = vsel %vm9063_vm4, %v10888_v55, %v10887_v9  ;;  %v10295_v62 = vsel %vm9057_vm2, %v10294_v36, %v10293_v10  ;;  %v10302_v40 = vrot.slane %v22824_v60, 3 }
 0x622   : > { %v10304_v24 = vrot.slane %v22825_v48, 2  ;;  %v9761_v32 = vpop.permute.xlu1 %9760  ;;  %v10891_v33 = vsel %vm9066_vm5, %v10890_v14, %v10889_v63  ;;  %v10297_v6 = vsel %vm9060_vm3, %v10296_v25, %v10295_v62  ;;  %v11290_v30 = vrot.slane %v22807_v53, 7 }
 0x623   : > { %v11291_v61 = vrot.slane %v22809_v28, 6  ;;  %9771 = vst.msk [vmem:[#allocation2 + $0xa0] sm:$0xff] %vm9193_vm9, %v9761_v32  ;;  %v10893_v31 = vsel %vm9069_vm6, %v10892_v4, %v10891_v33  ;;  %v10299_v55 = vsel %vm9063_vm4, %v10298_v2, %v10297_v6  ;;  %v11293_v36 = vrot.slane %v22810_v18, 5  ;;  %v15351_v4 = vld [vmem:[%s22211_s13 + $0x140] sm:$0xff]  }
 0x624   : > { %v11295_v9 = vrot.slane %v22814_v22, 4  ;;  %11182 = vrot.lane.b32.xlu0 %v20440_v37, %s15483_s27  ;;  %9460 = vrot.lane.b32.xlu1 %v9453_v13, %s15483_s27  ;;  %v10895_v25 = vsel %vm9072_vm7, %v10894_v26, %v10893_v31  ;;  %v10301_v14 = vsel %vm9066_vm5, %v10300_v58, %v10299_v55  ;;  %v11297_v63 = vrot.slane %v22811_v34, 3  ;;  %v15352_v2 = vld [vmem:[%s22211_s13 + $0x100] sm:$0xff]  }
 0x625   : > { %v11292_v10 = vsel %vm9054_vm1, %v11291_v61, %v11290_v30  ;;  %v10303_v37 = vsel %vm9069_vm6, %v10302_v40, %v10301_v14  ;;  %v11299_v26 = vrot.slane %v22812_v41, 2  ;;  %v11301_v58 = vrot.slane %v22815_v59, 1  ;;  %13926 = vmatprep.subr.bf16.mxu0 %v15351_v4 }
 0x626   : > { %v11294_v13 = vsel %vm9057_vm2, %v11293_v36, %v11292_v10  ;;  %v10033_v62 = vpop.permute.xlu1 %10032  ;;  %v10305_v32 = vsel %vm9072_vm7, %v10304_v24, %v10303_v37  ;;  %v10700_v6 = vrot.slane %v22817_v0, 7  ;;  %v10701_v30 = vrot.slane %v22818_v39, 6  ;;  %13927 = vmatpush3.bf16.msra.mxu0 %v15352_v2  ;;  %v15353_v24 = vld [vmem:[%s22211_s13 + $0x148] sm:$0xff]   ;;  %v15354_v36 = vld [vmem:[%s22211_s13 + $0x1c0] sm:$0xff]  }
 0x627   : > { %v11296_v33 = vsel %vm9060_vm3, %v11295_v9, %v11294_v13  ;;  %10043 = vst.msk [vmem:[#allocation2 + $0xb0] sm:$0xff] %vm9193_vm9, %v10033_v62  ;;  %v10703_v61 = vrot.slane %v22819_v3, 5  ;;  %v10705_v31 = vrot.slane %v22822_v52, 4  ;;  %v10707_v55 = vrot.slane %v22821_v46, 3  ;;  %v15355_v9 = vld [vmem:[%s22211_s13 + $0x108] sm:$0xff]   ;;  %v15356_v2 = vld [vmem:[%s22211_s13 + $0x180] sm:$0xff]   ;;  %13928 = vmatprep.subr.bf16.mxu0 %v15353_v24  ;;  %13954 = vmatprep.subr.bf16.mxu1 %v15354_v36 }
 0x628   : > { %v11298_v40 = vsel %vm9063_vm4, %v11297_v63, %v11296_v33  ;;  %11050 = vrot.lane.b32.xlu0 %v20530_v8, %s15483_s27  ;;  %10472 = vrot.lane.b32.xlu1 %v10441_v20, %s15483_s27  ;;  %v10702_v10 = vsel %vm9054_vm1, %v10701_v30, %v10700_v6  ;;  %v10709_v63 = vrot.slane %v22823_v49, 2  ;;  %v10711_v4 = vrot.slane %v22824_v60, 1 }
 0x629   : > { %v11300_v14 = vsel %vm9066_vm5, %v11299_v26, %v11298_v40  ;;  %v10704_v13 = vsel %vm9057_vm2, %v10703_v61, %v10702_v10  ;;  %v11154_v8 = vrot.slane %v22807_v53, 5  ;;  %v11155_v20 = vrot.slane %v22809_v28, 4  ;;  %v20633_v26 = vld [vmem:[#allocation2 + $0x20] sm:$0xff]  ;;  %13955 = vmatpush3.bf16.msra.mxu1 %v15356_v2 }
 0x62a   : > { %v11302_v37 = vsel %vm9069_vm6, %v11301_v58, %v11300_v14  ;;  %22826 = vst [vmem:[#allocation23_spill] sm:$0xff] %v20633_v26  ;;  %v20635_v62 = vld [vmem:[#allocation2 + $0xa0] sm:$0xff]  ;;  %v10706_v6 = vsel %vm9060_vm3, %v10705_v31, %v10704_v13  ;;  %v11157_v30 = vrot.slane %v22810_v18, 3  ;;  %v11159_v58 = vrot.slane %v22814_v22, 2  ;;  %13929 = vmatpush3.bf16.msra.mxu0 %v15355_v9 }
 0x62b   : > { %22827 = vst [vmem:[#allocation24_spill] sm:$0xff] %v20635_v62  ;;  %v11303_v33 = vsel %vm9072_vm7, %v20049_v19, %v11302_v37  ;;  %v10708_v61 = vsel %vm9063_vm4, %v10707_v55, %v10706_v6  ;;  %v11156_v24 = vsel %vm9054_vm1, %v11155_v20, %v11154_v8  ;;  %v11161_v36 = vrot.slane %v22811_v34, 1  ;;  %v20653_v37 = vld [vmem:[#allocation2 + $0x30] sm:$0xff] }
 0x62c   : > { %10914 = vrot.lane.b32.xlu0 %v10895_v25, %s15483_s27  ;;  %10336 = vrot.lane.b32.xlu1 %v10305_v32, %s15483_s27  ;;  %v10710_v31 = vsel %vm9066_vm5, %v10709_v63, %v10708_v61  ;;  %v11158_v14 = vsel %vm9057_vm2, %v11157_v30, %v11156_v24  ;;  %v11164_v10 = vrot.slane %v22815_v59, 7  ;;  %v11166_v2 = vrot.slane %v20049_v19, 6  ;;  %22828 = vst [vmem:[#allocation60_spill] sm:$0xff] %v20653_v37  ;;  %v15358_v30 = vld [vmem:[%s22211_s13 + $0x1c8] sm:$0xff]  }
 0x62d   : > { %v10712_v55 = vsel %vm9069_vm6, %v10711_v4, %v10710_v31  ;;  %v11160_v13 = vsel %vm9060_vm3, %v11159_v58, %v11158_v14  ;;  %v10564_v9 = vrot.slane %v22817_v0, 5  ;;  %v10565_v25 = vrot.slane %v22818_v39, 4  ;;  %v15357_v4 = vld [vmem:[%s22211_s13 + $0x150] sm:$0xff]   ;;  %v15360_v14 = vld [vmem:[%s22211_s13 + $0x188] sm:$0xff]   ;;  %13956 = vmatprep.subr.bf16.mxu1 %v15358_v30 }
 0x62e   : > { %v20659_v8 = vld [vmem:[#allocation2 + $0xb0] sm:$0xff]  ;;  %v10713_v32 = vsel %vm9072_vm7, %v22825_v48, %v10712_v55  ;;  %v11162_v63 = vsel %vm9063_vm4, %v11161_v36, %v11160_v13  ;;  %v10567_v20 = vrot.slane %v22819_v3, 3  ;;  %v10569_v6 = vrot.slane %v22822_v52, 2  ;;  %13930 = vmatprep.subr.bf16.mxu0 %v15357_v4  ;;  %13957 = vmatpush3.bf16.msra.mxu1 %v15360_v14 }
 0x62f   : > { %22829 = vst [vmem:[#allocation25_spill] sm:$0xff] %v20659_v8  ;;  %v11163_v61 = vsel %vm9066_vm5, %v22812_v41, %v11162_v63  ;;  %v10566_v24 = vsel %vm9054_vm1, %v10565_v25, %v10564_v9  ;;  %v10571_v36 = vrot.slane %v22821_v46, 1  ;;  %v15359_v31 = vld [vmem:[%s22211_s13 + $0x110] sm:$0xff]   ;;  %v10574_v9 = vrot.slane %v22824_v60, 7 }
 0x630   : > { %11322 = vrot.lane.b32.xlu0 %v11303_v33, %s15483_s27  ;;  %10744 = vrot.lane.b32.xlu1 %v10713_v32, %s15483_s27  ;;  %v11165_v55 = vsel %vm9069_vm6, %v11164_v10, %v11163_v61  ;;  %v10568_v13 = vsel %vm9057_vm2, %v10567_v20, %v10566_v24  ;;  %v10576_v25 = vrot.slane %v22825_v48, 6  ;;  %v10152_v40 = vrot.slane %v20128_v57, 7 }
 0x631   : > { %v11167_v63 = vsel %vm9072_vm7, %v11166_v2, %v11165_v55  ;;  %v10570_v58 = vsel %vm9060_vm3, %v10569_v6, %v10568_v13  ;;  %v10153_v37 = vrot.slane %v20185_v54, 6  ;;  %v10155_v10 = vrot.slane %v20243_v47, 5  ;;  %13931 = vmatpush3.bf16.msra.mxu0 %v15359_v31 }
 0x632   : > { %v10572_v33 = vsel %vm9063_vm4, %v10571_v36, %v10570_v58  ;;  %v10157_v32 = vrot.slane %v20300_v51, 4  ;;  %v10159_v20 = vrot.slane %v20359_v17, 3  ;;  %v10161_v61 = vrot.slane %v20411_v45, 2 }
 0x633   : > { %v10573_v2 = vsel %vm9066_vm5, %v22823_v49, %v10572_v33  ;;  %v10154_v6 = vsel %vm9054_vm1, %v10153_v37, %v10152_v40  ;;  %v10163_v4 = vrot.slane %v20468_v21, 1  ;;  %v9880_v24 = vrot.slane %v20128_v57, 3 }
 0x634   : > { %11186 = vrot.lane.b32.xlu0 %v11167_v63, %s15483_s27  ;;  %v10575_v30 = vsel %vm9069_vm6, %v10574_v9, %v10573_v2  ;;  %v10156_v58 = vsel %vm9057_vm2, %v10155_v10, %v10154_v6  ;;  %v9881_v36 = vrot.slane %v20185_v54, 2  ;;  %v9883_v40 = vrot.slane %v20243_v47, 1 }
 0x635   : > { %v10577_v31 = vsel %vm9072_vm7, %v10576_v25, %v10575_v30  ;;  %v10158_v14 = vsel %vm9060_vm3, %v10157_v32, %v10156_v58  ;;  %v9886_v37 = vrot.slane %v20359_v17, 7  ;;  %v9888_v9 = vrot.slane %v20411_v45, 6  ;;  %v15361_v58 = vld [vmem:[%s22211_s13 + $0x158] sm:$0xff]  }
 0x636   : > { %10608 = vrot.lane.b32.xlu1 %v10577_v31, %s15483_s27  ;;  %v10160_v55 = vsel %vm9063_vm4, %v10159_v20, %v10158_v14  ;;  %v9882_v13 = vsel %vm9054_vm1, %v9881_v36, %v9880_v24  ;;  %v9890_v63 = vrot.slane %v20468_v21, 5  ;;  %v9892_v10 = vrot.slane %v20516_v44, 4  ;;  %v15363_v24 = vld [vmem:[%s22211_s13 + $0x118] sm:$0xff]   ;;  %13932 = vmatprep.subr.bf16.mxu0 %v15361_v58 }
 0x637   : > { %v10162_v33 = vsel %vm9066_vm5, %v10161_v61, %v10160_v55  ;;  %v9884_v25 = vsel %vm9057_vm2, %v9883_v40, %v9882_v13  ;;  %v9744_v32 = vrot.slane %v20128_v57, 1  ;;  %v9746_v20 = vrot.slane %v20243_v47, 7  ;;  %v15362_v61 = vld [vmem:[%s22211_s13 + $0x1d0] sm:$0xff]   ;;  %13933 = vmatpush3.bf16.msra.mxu0 %v15363_v24  ;;  %v15368_v24 = vld [vmem:[%s22211_s13 + $0x198] sm:$0xff]  }
 0x638   : > { %v10164_v2 = vsel %vm9069_vm6, %v10163_v4, %v10162_v33  ;;  %v9885_v6 = vsel %vm9060_vm3, %v20300_v51, %v9884_v25  ;;  %v9748_v30 = vrot.slane %v20300_v51, 6  ;;  %v9750_v14 = vrot.slane %v20359_v17, 5  ;;  %v15364_v40 = vld [vmem:[%s22211_s13 + $0x190] sm:$0xff]   ;;  %13958 = vmatprep.subr.bf16.mxu1 %v15362_v61 }
 0x639   : > { %v10165_v4 = vsel %vm9072_vm7, %v20516_v44, %v10164_v2  ;;  %v9887_v36 = vsel %vm9063_vm4, %v9886_v37, %v9885_v6  ;;  %v9745_v31 = vsel %vm9054_vm1, %v20185_v54, %v9744_v32  ;;  %v9752_v33 = vrot.slane %v20411_v45, 4  ;;  %13959 = vmatpush3.bf16.msra.mxu1 %v15364_v40 }
 0x63a   : > { %10172 = vrot.lane.b32.xlu1 %v10165_v4, %s15483_s27  ;;  %v9889_v55 = vsel %vm9066_vm5, %v9888_v9, %v9887_v36  ;;  %v9747_v13 = vsel %vm9057_vm2, %v9746_v20, %v9745_v31  ;;  %v9754_v25 = vrot.slane %v20468_v21, 3  ;;  %v9756_v2 = vrot.slane %v20516_v44, 2  ;;  %v15365_v9 = vld [vmem:[%s22211_s13 + $0x160] sm:$0xff]   ;;  %v15366_v20 = vld [vmem:[%s22211_s13 + $0x1d8] sm:$0xff]  }
 0x63b   : > { %v9891_v37 = vsel %vm9069_vm6, %v9890_v63, %v9889_v55  ;;  %v9749_v32 = vsel %vm9060_vm3, %v9748_v30, %v9747_v13  ;;  %v10016_v6 = vrot.slane %v20128_v57, 5  ;;  %v15367_v63 = vld [vmem:[%s22211_s13 + $0x120] sm:$0xff]   ;;  %v10017_v4 = vrot.slane %v20185_v54, 4  ;;  %13934 = vmatprep.subr.bf16.mxu0 %v15365_v9  ;;  %13960 = vmatprep.subr.bf16.mxu1 %v15366_v20  ;;  %v22839_v57 = vld [vmem:[#allocation78_spill] sm:$0xff] }
 0x63c   : > { %v9893_v30 = vsel %vm9072_vm7, %v9892_v10, %v9891_v37  ;;  %v9751_v58 = vsel %vm9063_vm4, %v9750_v14, %v9749_v32  ;;  %v10019_v61 = vrot.slane %v20243_v47, 3  ;;  %v10021_v31 = vrot.slane %v20300_v51, 2  ;;  %v22830_v37 = vld [vmem:[#allocation88_spill] sm:$0xff]  ;;  %v22831_v51 = vld [vmem:[#allocation94_spill] sm:$0xff]  ;;  %v22832_v47 = vld [vmem:[#allocation97_spill] sm:$0xff]  ;;  %13935 = vmatpush3.bf16.msra.mxu0 %v15367_v63 }
 0x63d   : > { %v9753_v36 = vsel %vm9066_vm5, %v9752_v33, %v9751_v58  ;;  %v10023_v55 = vrot.slane %v20359_v17, 1  ;;  %v10026_v13 = vrot.slane %v20468_v21, 7  ;;  %v10018_v14 = vsel %vm9054_vm1, %v10017_v4, %v10016_v6  ;;  %v22833_v20 = vld [vmem:[#allocation15_spill] sm:$0xff]  ;;  %13961 = vmatpush3.bf16.msra.mxu1 %v15368_v24 }
 0x63e   : > { %9900 = vrot.lane.b32.xlu1 %v9893_v30, %s15483_s27  ;;  %v9755_v10 = vsel %vm9069_vm6, %v9754_v25, %v9753_v36  ;;  %v10028_v40 = vrot.slane %v20516_v44, 6  ;;  %v10456_v32 = vrot.slane %v22830_v37, 3  ;;  %v10020_v58 = vsel %vm9057_vm2, %v10019_v61, %v10018_v14  ;;  %v22834_v36 = vld [vmem:[#allocation55_spill] sm:$0xff]  ;;  %v22835_v14 = vld [vmem:[#allocation58_spill] sm:$0xff] }
 0x63f   : > { %v9757_v33 = vsel %vm9072_vm7, %v9756_v2, %v9755_v10  ;;  %v10457_v17 = vrot.slane %v22831_v51, 2  ;;  %v10459_v21 = vrot.slane %v22832_v47, 1  ;;  %v10022_v9 = vsel %vm9060_vm3, %v10021_v31, %v10020_v58  ;;  %v22836_v44 = vld [vmem:[#allocation82_spill] sm:$0xff] }
 0x640   : > { %v10462_v30 = vrot.slane %v22833_v20, 7  ;;  %v10464_v25 = vrot.slane %v20389_v43, 6  ;;  %v10466_v6 = vrot.slane %v20446_v11, 5  ;;  %v10024_v4 = vsel %vm9063_vm4, %v10023_v55, %v10022_v9  ;;  %v22837_v55 = vld [vmem:[#allocation14_spill] sm:$0xff] }
 0x641   : > { %v10458_v2 = vsel %vm9054_vm1, %v10457_v17, %v10456_v32  ;;  %v10468_v61 = vrot.slane %v20493_v1, 4  ;;  %v9498_v10 = vrot.slane %v22834_v36, 6  ;;  %v10025_v63 = vsel %vm9066_vm5, %v20411_v45, %v10024_v4  ;;  %v22838_v32 = vld [vmem:[#allocation77_spill] sm:$0xff] }
 0x642   : > { %9764 = vrot.lane.b32.xlu1 %v9757_v33, %s15483_s27  ;;  %v10460_v31 = vsel %vm9057_vm2, %v10459_v21, %v10458_v2  ;;  %v9499_v58 = vrot.slane %v22835_v14, 5  ;;  %v9501_v54 = vrot.slane %v22836_v44, 4  ;;  %v10027_v24 = vsel %vm9069_vm6, %v10026_v13, %v10025_v63  ;;  %v22840_v21 = vld [vmem:[#allocation76_spill] sm:$0xff]  ;;  %v22841_v13 = vld [vmem:[#allocation86_spill] sm:$0xff] }
 0x643   : > { %v10461_v17 = vsel %vm9060_vm3, %v22837_v55, %v10460_v31  ;;  %v9503_v9 = vrot.slane %v22838_v32, 3  ;;  %v9505_v8 = vrot.slane %v22839_v57, 2  ;;  %v10029_v33 = vsel %vm9072_vm7, %v10028_v40, %v10027_v24 }
 0x644   : > { %v10463_v26 = vsel %vm9063_vm4, %v10462_v30, %v10461_v17  ;;  %v9500_v4 = vsel %vm9054_vm1, %v9499_v58, %v9498_v10  ;;  %v9507_v2 = vrot.slane %v22840_v21, 1  ;;  %v9510_v63 = vrot.slane %v22841_v13, 7 }
 0x645   : > { %v10465_v45 = vsel %vm9066_vm5, %v10464_v25, %v10463_v26  ;;  %v9502_v62 = vsel %vm9057_vm2, %v9501_v54, %v9500_v4  ;;  %v10320_v31 = vrot.slane %v22830_v37, 1  ;;  %v10322_v30 = vrot.slane %v22832_v47, 7 }
 0x646   : > { %10036 = vrot.lane.b32.xlu1 %v10029_v33, %s15483_s27  ;;  %v10467_v48 = vsel %vm9069_vm6, %v10466_v6, %v10465_v45  ;;  %v9504_v40 = vsel %vm9060_vm3, %v9503_v9, %v9502_v62  ;;  %v10324_v10 = vrot.slane %v22837_v55, 6  ;;  %v10326_v25 = vrot.slane %v22833_v20, 5  ;;  %v15369_v6 = vld [vmem:[%s22211_s13 + $0x168] sm:$0xff]  }
 0x647   : > { %v10469_v58 = vsel %vm9072_vm7, %v10468_v61, %v10467_v48  ;;  %v9506_v26 = vsel %vm9063_vm4, %v9505_v8, %v9504_v40  ;;  %v10321_v54 = vsel %vm9054_vm1, %v22831_v51, %v10320_v31  ;;  %v10328_v45 = vrot.slane %v20389_v43, 4  ;;  %v15370_v48 = vld [vmem:[%s22211_s13 + $0x1e0] sm:$0xff]   ;;  %v15371_v8 = vld [vmem:[%s22211_s13 + $0x128] sm:$0xff]   ;;  %13936 = vmatprep.subr.bf16.mxu0 %v15369_v6 }
 0x648   : > { %v9508_v24 = vsel %vm9066_vm5, %v9507_v2, %v9506_v26  ;;  %v10323_v17 = vsel %vm9057_vm2, %v10322_v30, %v10321_v54  ;;  %v10330_v62 = vrot.slane %v20446_v11, 3  ;;  %v22842_v61 = vld [vmem:[#allocation91_spill] sm:$0xff]  ;;  %v10332_v4 = vrot.slane %v20493_v1, 2  ;;  %13962 = vmatprep.subr.bf16.mxu1 %v15370_v48  ;;  %13937 = vmatpush3.bf16.msra.mxu0 %v15371_v8 }
 0x649   : > { %v9509_v9 = vsel %vm9069_vm6, %v22842_v61, %v9508_v24  ;;  %v10325_v33 = vsel %vm9060_vm3, %v10324_v10, %v10323_v17  ;;  %v9226_v2 = vrot.slane %v22834_v36, 2  ;;  %v15372_v31 = vld [vmem:[%s22211_s13 + $0x1a0] sm:$0xff]   ;;  %v9227_v54 = vrot.slane %v22835_v14, 1 }
 0x64a   : > { %10476 = vrot.lane.b32.xlu1 %v10469_v58, %s15483_s27  ;;  %v9595_v40 = vpop.permute.xlu0 %9594  ;;  %v9511_v30 = vsel %vm9072_vm7, %v9510_v63, %v9509_v9  ;;  %v10327_v26 = vsel %vm9063_vm4, %v10326_v25, %v10325_v33  ;;  %v9230_v24 = vrot.slane %v22838_v32, 7  ;;  %v9232_v17 = vrot.slane %v22839_v57, 6  ;;  %v15373_v63 = vld [vmem:[%s22211_s13 + $0x170] sm:$0xff]   ;;  %v15374_v25 = vld [vmem:[%s22211_s13 + $0x1e8] sm:$0xff]   ;;  %13963 = vmatpush3.bf16.msra.mxu1 %v15372_v31 }
 0x64b   : > { %9532 = vst.msk [vmem:[#allocation2 + $0x118] sm:$0xff] %vm9120_vm8, %v9511_v30  ;;  %v10329_v10 = vsel %vm9066_vm5, %v10328_v45, %v10327_v26  ;;  %v9234_v3 = vrot.slane %v22840_v21, 5  ;;  %v9236_v58 = vrot.slane %v22842_v61, 4  ;;  %v15375_v45 = vld [vmem:[%s22211_s13 + $0x130] sm:$0xff]   ;;  %v9228_v9 = vsel %vm9054_vm1, %v9227_v54, %v9226_v2  ;;  %v15376_v33 = vld [vmem:[%s22211_s13 + $0x1a8] sm:$0xff]   ;;  %13938 = vmatprep.subr.bf16.mxu0 %v15373_v63  ;;  %13964 = vmatprep.subr.bf16.mxu1 %v15374_v25 }
 0x64c   : > { %9604 = vst.msk [vmem:[#allocation2 + $0x118] sm:$0xff] %vm9193_vm9, %v9595_v40  ;;  %v10331_v6 = vsel %vm9069_vm6, %v10330_v62, %v10329_v10  ;;  %v9238_v48 = vrot.slane %v22841_v13, 3  ;;  %v10728_v8 = vrot.slane %v22830_v37, 7  ;;  %v9229_v26 = vsel %vm9057_vm2, %v22836_v44, %v9228_v9  ;;  %13939 = vmatpush3.bf16.msra.mxu0 %v15375_v45 }
 0x64d   : > { %v10333_v30 = vsel %vm9072_vm7, %v10332_v4, %v10331_v6  ;;  %v10729_v40 = vrot.slane %v22831_v51, 6  ;;  %v10731_v62 = vrot.slane %v22832_v47, 5  ;;  %v9231_v2 = vsel %vm9060_vm3, %v9230_v24, %v9229_v26 }
 0x64e   : > { %10340 = vrot.lane.b32.xlu1 %v10333_v30, %s15483_s27  ;;  %v9323_v31 = vpop.permute.xlu0 %9322  ;;  %v10733_v54 = vrot.slane %v22837_v55, 4  ;;  %v10735_v10 = vrot.slane %v22833_v20, 3  ;;  %v10737_v4 = vrot.slane %v20389_v43, 2  ;;  %v9233_v6 = vsel %vm9063_vm4, %v9232_v17, %v9231_v2  ;;  %13965 = vmatpush3.bf16.msra.mxu1 %v15376_v33 }
 0x64f   : > { %v10730_v9 = vsel %vm9054_vm1, %v10729_v40, %v10728_v8  ;;  %v10739_v60 = vrot.slane %v20446_v11, 1  ;;  %v9088_v63 = vrot.slane %v22835_v14, 7  ;;  %v9235_v25 = vsel %vm9066_vm5, %v9234_v3, %v9233_v6 }
 0x650   : > { %v10732_v24 = vsel %vm9057_vm2, %v10731_v62, %v10730_v9  ;;  %v9090_v30 = vrot.slane %v22836_v44, 6  ;;  %v9092_v26 = vrot.slane %v22838_v32, 5  ;;  %v9237_v49 = vsel %vm9069_vm6, %v9236_v58, %v9235_v25 }
 0x651   : > { %v10734_v17 = vsel %vm9060_vm3, %v10733_v54, %v10732_v24  ;;  %v9089_v8 = vsel %vm9054_vm1, %v9088_v63, %v22834_v36  ;;  %v9094_v40 = vrot.slane %v22839_v57, 4  ;;  %v9239_v45 = vsel %vm9072_vm7, %v9238_v48, %v9237_v49 }
 0x652   : > { %v10736_v3 = vsel %vm9063_vm4, %v10735_v10, %v10734_v17  ;;  %v9091_v62 = vsel %vm9057_vm2, %v9090_v30, %v9089_v8  ;;  %v9096_v2 = vrot.slane %v22840_v21, 3  ;;  %9260 = vst.msk [vmem:[#allocation2 + $0x108] sm:$0xff] %vm9120_vm8, %v9239_v45  ;;  %v9098_v54 = vrot.slane %v22842_v61, 2  ;;  %v9186_v10 = vpop.permute.xlu0 %9185 }
 0x653   : > { %v10738_v33 = vsel %vm9066_vm5, %v10737_v4, %v10736_v3  ;;  %v9093_v58 = vsel %vm9060_vm3, %v9092_v26, %v9091_v62  ;;  %v9100_v6 = vrot.slane %v22841_v13, 1  ;;  %9332 = vst.msk [vmem:[#allocation2 + $0x108] sm:$0xff] %vm9193_vm9, %v9323_v31  ;;  %v10592_v9 = vrot.slane %v22830_v37, 5  ;;  %v22862_v37 = vld [vmem:[#allocation5_spill] sm:$0xff] }
 0x654   : > { %v10740_v49 = vsel %vm9069_vm6, %v10739_v60, %v10738_v33  ;;  %v9095_v48 = vsel %vm9063_vm4, %v9094_v40, %v9093_v58  ;;  %v10593_v63 = vrot.slane %v22831_v51, 4  ;;  %v10595_v24 = vrot.slane %v22832_v47, 3  ;;  %v22854_v47 = vld [vmem:[#allocation36_spill] sm:$0xff] }
 0x655   : > { %v10741_v4 = vsel %vm9072_vm7, %v20493_v1, %v10740_v49  ;;  %v9097_v25 = vsel %vm9066_vm5, %v9096_v2, %v9095_v48  ;;  %v10597_v30 = vrot.slane %v22837_v55, 2  ;;  %v10599_v26 = vrot.slane %v22833_v20, 1  ;;  %v15377_v48 = vld [vmem:[%s22211_s13 + $0x178] sm:$0xff]  }
 0x656   : > { %10748 = vrot.lane.b32.xlu1 %v10741_v4, %s15483_s27  ;;  %v9099_v60 = vsel %vm9069_vm6, %v9098_v54, %v9097_v25  ;;  %v10594_v31 = vsel %vm9054_vm1, %v10593_v63, %v10592_v9  ;;  %v10602_v17 = vrot.slane %v20446_v11, 7  ;;  %v10604_v45 = vrot.slane %v20493_v1, 6  ;;  %v22843_v9 = vld [vmem:[#allocation43_spill] sm:$0xff]  ;;  %v22844_v63 = vld [vmem:[#allocation44_spill] sm:$0xff]  ;;  %13940 = vmatprep.subr.bf16.mxu0 %v15377_v48 }
 0x657   : > { %v9101_v8 = vsel %vm9072_vm7, %v9100_v6, %v9099_v60  ;;  %v10596_v40 = vsel %vm9057_vm2, %v10595_v24, %v10594_v31  ;;  %v9362_v3 = vrot.slane %v22834_v36, 4  ;;  %v9363_v2 = vrot.slane %v22835_v14, 3  ;;  %v22846_v31 = vld [vmem:[#allocation48_spill] sm:$0xff] }
 0x658   : > { %9123 = vst.msk [vmem:[#allocation2 + $0x100] sm:$0xff] %vm9120_vm8, %v9101_v8  ;;  %v10598_v62 = vsel %vm9060_vm3, %v10597_v30, %v10596_v40  ;;  %v9365_v33 = vrot.slane %v22836_v44, 2  ;;  %v9367_v58 = vrot.slane %v22838_v32, 1  ;;  %v9370_v6 = vrot.slane %v22840_v21, 7  ;;  %v9459_v32 = vpop.permute.xlu0 %9458  ;;  %v15378_v21 = vld [vmem:[%s22211_s13 + $0x1f0] sm:$0xff]   ;;  %v22845_v30 = vld [vmem:[#allocation63_spill] sm:$0xff] }
 0x659   : > { %9196 = vst.msk [vmem:[#allocation2 + $0x100] sm:$0xff] %vm9193_vm9, %v9186_v10  ;;  %v10600_v54 = vsel %vm9063_vm4, %v10599_v26, %v10598_v62  ;;  %v9372_v49 = vrot.slane %v22842_v61, 6  ;;  %v9374_v36 = vrot.slane %v22841_v13, 5  ;;  %v9364_v44 = vsel %vm9054_vm1, %v9363_v2, %v9362_v3  ;;  %v15379_v13 = vld [vmem:[%s22211_s13 + $0x138] sm:$0xff]   ;;  %v15380_v61 = vld [vmem:[%s22211_s13 + $0x1b0] sm:$0xff]   ;;  %v22847_v62 = vld [vmem:[#allocation71_spill] sm:$0xff]  ;;  %13966 = vmatprep.subr.bf16.mxu1 %v15378_v21 }
 0x65a   : > { %v10601_v14 = vsel %vm9066_vm5, %v20389_v43, %v10600_v54  ;;  %v11004_v10 = vrot.slane %v22843_v9, 3  ;;  %v11005_v4 = vrot.slane %v22844_v63, 2  ;;  %v9366_v24 = vsel %vm9057_vm2, %v9365_v33, %v9364_v44  ;;  %13941 = vmatpush3.bf16.msra.mxu0 %v15379_v13  ;;  %v15382_v33 = vld [vmem:[%s22211_s13 + $0x240] sm:$0xff]   ;;  %13967 = vmatpush3.bf16.msra.mxu1 %v15380_v61  ;;  %v22850_v21 = vld [vmem:[#allocation46_spill] sm:$0xff]  ;;  %v22853_v61 = vld [vmem:[#allocation65_spill] sm:$0xff] }
 0x65b   : > { %v10603_v25 = vsel %vm9069_vm6, %v10602_v17, %v10601_v14  ;;  %v11007_v60 = vrot.slane %v22845_v30, 1  ;;  %v11010_v26 = vrot.slane %v22846_v31, 7  ;;  %v9368_v40 = vsel %vm9060_vm3, %v9367_v58, %v9366_v24  ;;  %v15381_v17 = vld [vmem:[%s22211_s13 + $0x1f8] sm:$0xff]   ;;  %v22848_v54 = vld [vmem:[#allocation51_spill] sm:$0xff]  ;;  %13982 = vmatprep.subr.bf16.mxu0 %v15382_v33 }
 0x65c   : > { %v10605_v8 = vsel %vm9072_vm7, %v10604_v45, %v10603_v25  ;;  %v11006_v3 = vsel %vm9054_vm1, %v11005_v4, %v11004_v10  ;;  %v11012_v2 = vrot.slane %v22847_v62, 6  ;;  %v9369_v45 = vsel %vm9063_vm4, %v22839_v57, %v9368_v40  ;;  %v22849_v14 = vld [vmem:[#allocation66_spill] sm:$0xff]  ;;  %v22851_v25 = vld [vmem:[#allocation31_spill] sm:$0xff]  ;;  %13968 = vmatprep.subr.bf16.mxu1 %v15381_v17  ;;  %v10471_v20 = vpop.permute.xlu0 %10470 }
 0x65d   : > { %10612 = vrot.lane.b32.xlu1 %v10605_v8, %s15483_s27  ;;  %v11008_v58 = vsel %vm9057_vm2, %v11007_v60, %v11006_v3  ;;  %v11014_v48 = vrot.slane %v22848_v54, 5  ;;  %v11016_v44 = vrot.slane %v22849_v14, 4  ;;  %v15383_v10 = vld [vmem:[%s22211_s13 + $0x1b8] sm:$0xff]   ;;  %v9371_v4 = vsel %vm9066_vm5, %v9370_v6, %v9369_v45  ;;  %v22852_v8 = vld [vmem:[#allocation32_spill] sm:$0xff]  ;;  %v22857_v33 = vld [vmem:[#allocation39_spill] sm:$0xff] }
 0x65e   : > { %v11009_v13 = vsel %vm9060_vm3, %v22850_v21, %v11008_v58  ;;  %v10350_v24 = vrot.slane %v22851_v25, 2  ;;  %v10351_v57 = vrot.slane %v22852_v8, 1  ;;  %v9373_v60 = vsel %vm9069_vm6, %v9372_v49, %v9371_v4  ;;  %v22855_v58 = vld [vmem:[#allocation72_spill] sm:$0xff]  ;;  %v22856_v49 = vld [vmem:[#allocation33_spill] sm:$0xff]  ;;  %13969 = vmatpush3.bf16.msra.mxu1 %v15383_v10 }
 0x65f   : > { %v11011_v40 = vsel %vm9063_vm4, %v11010_v26, %v11009_v13  ;;  %v10354_v3 = vrot.slane %v22853_v61, 7  ;;  %v10356_v1 = vrot.slane %v22854_v47, 6  ;;  %v9375_v11 = vsel %vm9072_vm7, %v9374_v36, %v9373_v60  ;;  %v22858_v13 = vld [vmem:[#allocation69_spill] sm:$0xff] }
 0x660   : > { %v11013_v6 = vsel %vm9066_vm5, %v11012_v2, %v11011_v40  ;;  %v10352_v45 = vsel %vm9054_vm1, %v10351_v57, %v10350_v24  ;;  %v10358_v43 = vrot.slane %v22855_v58, 5  ;;  %9396 = vst.msk [vmem:[#allocation2 + $0x110] sm:$0xff] %vm9120_vm8, %v9375_v11  ;;  %v10360_v4 = vrot.slane %v22857_v33, 4  ;;  %v10171_v46 = vpop.permute.xlu0 %10170 }
 0x661   : > { %v11015_v17 = vsel %vm9069_vm6, %v11014_v48, %v11013_v6  ;;  %v10353_v26 = vsel %vm9057_vm2, %v22856_v49, %v10352_v45  ;;  %v10362_v55 = vrot.slane %v22858_v13, 3  ;;  %9468 = vst.msk [vmem:[#allocation2 + $0x110] sm:$0xff] %vm9193_vm9, %v9459_v32  ;;  %v10868_v24 = vrot.slane %v22843_v9, 1 }
 0x662   : > { %v11017_v36 = vsel %vm9072_vm7, %v11016_v44, %v11015_v17  ;;  %v10355_v2 = vsel %vm9060_vm3, %v10354_v3, %v10353_v26  ;;  %v10870_v11 = vrot.slane %v22845_v30, 7  ;;  %v10872_v57 = vrot.slane %v22850_v21, 6  ;;  %v22860_v26 = vld [vmem:[#allocation50_spill] sm:$0xff] }
 0x663   : > { %11048 = vrot.lane.b32.xlu1 %v11017_v36, %s15483_s27  ;;  %v10357_v48 = vsel %vm9063_vm4, %v10356_v1, %v10355_v2  ;;  %v10874_v60 = vrot.slane %v22846_v31, 5  ;;  %v10876_v10 = vrot.slane %v22847_v62, 4  ;;  %v10869_v44 = vsel %vm9054_vm1, %v22844_v63, %v10868_v24  ;;  %v22859_v1 = vld [vmem:[#allocation70_spill] sm:$0xff] }
 0x664   : > { %v10359_v32 = vsel %vm9066_vm5, %v10358_v43, %v10357_v48  ;;  %v10878_v40 = vrot.slane %v22848_v54, 3  ;;  %v10880_v3 = vrot.slane %v22849_v14, 2  ;;  %v10871_v45 = vsel %vm9057_vm2, %v10870_v11, %v10869_v44  ;;  %v22861_v43 = vld [vmem:[#allocation10_spill] sm:$0xff]  ;;  %v22863_v11 = vld [vmem:[#allocation9_spill] sm:$0xff]  ;;  %v9899_v19 = vpop.permute.xlu0 %9898 }
 0x665   : > { %v10361_v6 = vsel %vm9069_vm6, %v10360_v4, %v10359_v32  ;;  %v10074_v17 = vrot.slane %v22859_v1, 6  ;;  %v10075_v36 = vrot.slane %v22860_v26, 5  ;;  %v10873_v51 = vsel %vm9060_vm3, %v10872_v57, %v10871_v45  ;;  %v22864_v44 = vld [vmem:[#allocation85_spill] sm:$0xff] }
 0x666   : > { %v10363_v2 = vsel %vm9072_vm7, %v10362_v55, %v10361_v6  ;;  %v10077_v48 = vrot.slane %v22861_v43, 4  ;;  %v10079_v24 = vrot.slane %v22862_v37, 3  ;;  %v10875_v52 = vsel %vm9063_vm4, %v10874_v60, %v10873_v51  ;;  %v22865_v6 = vld [vmem:[#allocation98_spill] sm:$0xff] }
 0x667   : > { %10410 = vst.msk [vmem:[#allocation2 + $0x48] sm:$0xff] %vm9120_vm8, %v10363_v2  ;;  %v10076_v4 = vsel %vm9054_vm1, %v10075_v36, %v10074_v17  ;;  %v10081_v32 = vrot.slane %v22863_v11, 2  ;;  %v10083_v39 = vrot.slane %v22864_v44, 1  ;;  %v10877_v55 = vsel %vm9066_vm5, %v10876_v10, %v10875_v52 }
 0x668   : > { %10482 = vst.msk [vmem:[#allocation2 + $0x48] sm:$0xff] %vm9193_vm9, %v10471_v20  ;;  %v10078_v57 = vsel %vm9057_vm2, %v10077_v48, %v10076_v4  ;;  %v10086_v45 = vrot.slane %v22865_v6, 7  ;;  %v11276_v0 = vrot.slane %v22843_v9, 7  ;;  %v10879_v2 = vsel %vm9069_vm6, %v10878_v40, %v10877_v55  ;;  %v15386_v20 = vld [vmem:[%s22211_s13 + $0x2c0] sm:$0xff]  }
 0x669   : > { %v10080_v51 = vsel %vm9060_vm3, %v10079_v24, %v10078_v57  ;;  %v11277_v60 = vrot.slane %v22844_v63, 6  ;;  %v11279_v17 = vrot.slane %v22845_v30, 5  ;;  %v10881_v52 = vsel %vm9072_vm7, %v10880_v3, %v10879_v2  ;;  %14010 = vmatprep.subr.bf16.mxu1 %v15386_v20  ;;  %v22866_v57 = vld [vmem:[#allocation96_spill] sm:$0xff] }
 0x66a   : > { %v10082_v10 = vsel %vm9063_vm4, %v10081_v32, %v10080_v51  ;;  %v11281_v36 = vrot.slane %v22850_v21, 4  ;;  %v11283_v48 = vrot.slane %v22846_v31, 3  ;;  %10912 = vrot.lane.b32.xlu1 %v10881_v52, %s15483_s27  ;;  %v11285_v4 = vrot.slane %v22847_v62, 2 }
 0x66b   : > { %v10084_v40 = vsel %vm9066_vm5, %v10083_v39, %v10082_v10  ;;  %v11278_v24 = vsel %vm9054_vm1, %v11277_v60, %v11276_v0  ;;  %v11287_v55 = vrot.slane %v22848_v54, 1  ;;  %v9802_v2 = vrot.slane %v22859_v1, 2 }
 0x66c   : > { %v10085_v3 = vsel %vm9069_vm6, %v22866_v57, %v10084_v40  ;;  %v11280_v32 = vsel %vm9057_vm2, %v11279_v17, %v11278_v24  ;;  %v9803_v51 = vrot.slane %v22860_v26, 1  ;;  %v9806_v0 = vrot.slane %v22862_v37, 7 }
 0x66d   : > { %v10087_v52 = vsel %vm9072_vm7, %v10086_v45, %v10085_v3  ;;  %v11282_v39 = vsel %vm9060_vm3, %v11281_v36, %v11280_v32  ;;  %v9808_v60 = vrot.slane %v22863_v11, 6  ;;  %v9810_v17 = vrot.slane %v22864_v44, 5 }
 0x66e   : > { %10108 = vst.msk [vmem:[#allocation2 + $0x138] sm:$0xff] %vm9120_vm8, %v10087_v52  ;;  %v11284_v20 = vsel %vm9063_vm4, %v11283_v48, %v11282_v39  ;;  %v9804_v10 = vsel %vm9054_vm1, %v9803_v51, %v9802_v2  ;;  %v9812_v40 = vrot.slane %v22866_v57, 4  ;;  %v9814_v24 = vrot.slane %v22865_v6, 3 }
 0x66f   : > { %10180 = vst.msk [vmem:[#allocation2 + $0x138] sm:$0xff] %vm9193_vm9, %v10171_v46  ;;  %v11286_v45 = vsel %vm9066_vm5, %v11285_v4, %v11284_v20  ;;  %v9805_v36 = vsel %vm9057_vm2, %v22861_v43, %v9804_v10  ;;  %v11140_v3 = vrot.slane %v22843_v9, 5  ;;  %v11141_v2 = vrot.slane %v22844_v63, 4 }
 0x670   : > { %v11288_v32 = vsel %vm9069_vm6, %v11287_v55, %v11286_v45  ;;  %v9807_v48 = vsel %vm9060_vm3, %v9806_v0, %v9805_v36  ;;  %v11143_v51 = vrot.slane %v22845_v30, 3  ;;  %v11145_v52 = vrot.slane %v22850_v21, 2  ;;  %v9763_v45 = vpop.permute.xlu0 %9762  ;;  %v22871_v21 = vld [vmem:[#allocation100_spill] sm:$0xff] }
 0x671   : > { %v11289_v46 = vsel %vm9072_vm7, %v22849_v14, %v11288_v32  ;;  %v9809_v4 = vsel %vm9063_vm4, %v9808_v60, %v9807_v48  ;;  %v11147_v39 = vrot.slane %v22846_v31, 1  ;;  %v11142_v55 = vsel %vm9054_vm1, %v11141_v2, %v11140_v3  ;;  %v22870_v31 = vld [vmem:[#allocation101_spill] sm:$0xff] }
 0x672   : > { %11320 = vrot.lane.b32.xlu1 %v11289_v46, %s15483_s27  ;;  %v9811_v20 = vsel %vm9066_vm5, %v9810_v17, %v9809_v4  ;;  %v11150_v0 = vrot.slane %v22848_v54, 7  ;;  %v11152_v10 = vrot.slane %v22849_v14, 6  ;;  %v11144_v32 = vsel %vm9057_vm2, %v11143_v51, %v11142_v55  ;;  %v22867_v55 = vld [vmem:[#allocation13_spill] sm:$0xff] }
 0x673   : > { %v9813_v36 = vsel %vm9069_vm6, %v9812_v40, %v9811_v20  ;;  %v9666_v60 = vrot.slane %v22860_v26, 7  ;;  %v9668_v48 = vrot.slane %v22861_v43, 6  ;;  %v11146_v46 = vsel %vm9060_vm3, %v11145_v52, %v11144_v32  ;;  %v22868_v32 = vld [vmem:[#allocation93_spill] sm:$0xff] }
 0x674   : > { %v9815_v30 = vsel %vm9072_vm7, %v9814_v24, %v9813_v36  ;;  %v9670_v17 = vrot.slane %v22862_v37, 5  ;;  %v9672_v3 = vrot.slane %v22863_v11, 4  ;;  %v11148_v2 = vsel %vm9063_vm4, %v11147_v39, %v11146_v46  ;;  %v22869_v46 = vld [vmem:[#allocation92_spill] sm:$0xff] }
 0x675   : > { %9836 = vst.msk [vmem:[#allocation2 + $0x128] sm:$0xff] %vm9120_vm8, %v9815_v30  ;;  %v9667_v40 = vsel %vm9054_vm1, %v9666_v60, %v22859_v1  ;;  %v9674_v51 = vrot.slane %v22864_v44, 3  ;;  %v9676_v4 = vrot.slane %v22866_v57, 2  ;;  %v11149_v24 = vsel %vm9066_vm5, %v22847_v62, %v11148_v2 }
 0x676   : > { %9908 = vst.msk [vmem:[#allocation2 + $0x128] sm:$0xff] %vm9193_vm9, %v9899_v19  ;;  %v9669_v52 = vsel %vm9057_vm2, %v9668_v48, %v9667_v40  ;;  %v9678_v20 = vrot.slane %v22865_v6, 1  ;;  %v11032_v30 = vrot.slane %v22867_v55, 3  ;;  %v11151_v39 = vsel %vm9069_vm6, %v11150_v0, %v11149_v24  ;;  %v10035_v40 = vpop.permute.xlu0 %10034 }
 0x677   : > { %v9671_v36 = vsel %vm9060_vm3, %v9670_v17, %v9669_v52  ;;  %v11033_v60 = vrot.slane %v22868_v32, 2  ;;  %v11035_v14 = vrot.slane %v22869_v46, 1  ;;  %v11153_v54 = vsel %vm9072_vm7, %v11152_v10, %v11151_v39 }
 0x678   : > { %v9673_v19 = vsel %vm9063_vm4, %v9672_v3, %v9671_v36  ;;  %v11038_v2 = vrot.slane %v22870_v31, 7  ;;  %v11040_v48 = vrot.slane %v20403_v50, 6  ;;  %11184 = vrot.lane.b32.xlu1 %v11153_v54, %s15483_s27  ;;  %v11042_v17 = vrot.slane %v20461_v27, 5 }
 0x679   : > { %v9675_v62 = vsel %vm9066_vm5, %v9674_v51, %v9673_v19  ;;  %v11034_v0 = vsel %vm9054_vm1, %v11033_v60, %v11032_v30  ;;  %v11044_v24 = vrot.slane %v20509_v56, 4  ;;  %v9938_v3 = vrot.slane %v22859_v1, 4 }
 0x67a   : > { %v9677_v52 = vsel %vm9069_vm6, %v9676_v4, %v9675_v62  ;;  %v11036_v10 = vsel %vm9057_vm2, %v11035_v14, %v11034_v0  ;;  %v9939_v39 = vrot.slane %v22860_v26, 3  ;;  %v9941_v51 = vrot.slane %v22861_v43, 2  ;;  %v10335_v0 = vpop.permute.xlu0 %10334 }
 0x67b   : > { %v9679_v36 = vsel %vm9072_vm7, %v9678_v20, %v9677_v52  ;;  %v11037_v54 = vsel %vm9060_vm3, %v22871_v21, %v11036_v10  ;;  %v9943_v30 = vrot.slane %v22862_v37, 1  ;;  %v9946_v14 = vrot.slane %v22864_v44, 7 }
 0x67c   : > { %9700 = vst.msk [vmem:[#allocation2 + $0x120] sm:$0xff] %vm9120_vm8, %v9679_v36  ;;  %v11039_v60 = vsel %vm9063_vm4, %v11038_v2, %v11037_v54  ;;  %v9940_v62 = vsel %vm9054_vm1, %v9939_v39, %v9938_v3  ;;  %v9948_v1 = vrot.slane %v22866_v57, 6  ;;  %v9950_v43 = vrot.slane %v22865_v6, 5 }
 0x67d   : > { %9772 = vst.msk [vmem:[#allocation2 + $0x120] sm:$0xff] %vm9193_vm9, %v9763_v45  ;;  %v11041_v26 = vsel %vm9066_vm5, %v11040_v48, %v11039_v60  ;;  %v9942_v4 = vsel %vm9057_vm2, %v9941_v51, %v9940_v62  ;;  %v10896_v37 = vrot.slane %v22867_v55, 1  ;;  %v10898_v2 = vrot.slane %v22869_v46, 7 }
 0x67e   : > { %v11043_v20 = vsel %vm9069_vm6, %v11042_v17, %v11041_v26  ;;  %v9944_v19 = vsel %vm9060_vm3, %v9943_v30, %v9942_v4  ;;  %v10900_v44 = vrot.slane %v22871_v21, 6  ;;  %v10902_v6 = vrot.slane %v22870_v31, 5 }
 0x67f   : > { %v11045_v57 = vsel %vm9072_vm7, %v11044_v24, %v11043_v20  ;;  %v9945_v45 = vsel %vm9063_vm4, %v22863_v11, %v9944_v19  ;;  %v10897_v48 = vsel %vm9054_vm1, %v22868_v32, %v10896_v37  ;;  %v10904_v10 = vrot.slane %v20403_v50, 4  ;;  %v10743_v19 = vpop.permute.xlu0 %10742 }
 0x680   : > { %11052 = vrot.lane.b32.xlu1 %v11045_v57, %s15483_s27  ;;  %v9947_v17 = vsel %vm9066_vm5, %v9946_v14, %v9945_v45  ;;  %v10899_v52 = vsel %vm9057_vm2, %v10898_v2, %v10897_v48  ;;  %v10906_v3 = vrot.slane %v20461_v27, 3  ;;  %v10908_v11 = vrot.slane %v20509_v56, 2 }
 0x681   : > { %v9949_v24 = vsel %vm9069_vm6, %v9948_v1, %v9947_v17  ;;  %v10901_v39 = vsel %vm9060_vm3, %v10900_v44, %v10899_v52  ;;  %v10214_v36 = vrot.slane %v22852_v8, 7  ;;  %v10216_v30 = vrot.slane %v22856_v49, 6 }
 0x682   : > { %v9951_v54 = vsel %vm9072_vm7, %v9950_v43, %v9949_v24  ;;  %v10903_v51 = vsel %vm9063_vm4, %v10902_v6, %v10901_v39  ;;  %v10218_v60 = vrot.slane %v22853_v61, 5  ;;  %v10220_v1 = vrot.slane %v22854_v47, 4 }
 0x683   : > { %9972 = vst.msk [vmem:[#allocation2 + $0x130] sm:$0xff] %vm9120_vm8, %v9951_v54  ;;  %v10905_v62 = vsel %vm9066_vm5, %v10904_v10, %v10903_v51  ;;  %v10215_v14 = vsel %vm9054_vm1, %v10214_v36, %v22851_v25  ;;  %v10222_v26 = vrot.slane %v22855_v58, 3  ;;  %v10224_v37 = vrot.slane %v22857_v33, 2 }
 0x684   : > { %10044 = vst.msk [vmem:[#allocation2 + $0x130] sm:$0xff] %vm9193_vm9, %v10035_v40  ;;  %v10907_v4 = vsel %vm9069_vm6, %v10906_v3, %v10905_v62  ;;  %v10217_v43 = vsel %vm9057_vm2, %v10216_v30, %v10215_v14  ;;  %v10226_v20 = vrot.slane %v22858_v13, 1  ;;  %v11304_v57 = vrot.slane %v22867_v55, 7 }
 0x685   : > { %v10909_v2 = vsel %vm9072_vm7, %v10908_v11, %v10907_v4  ;;  %v10219_v44 = vsel %vm9060_vm3, %v10218_v60, %v10217_v43  ;;  %v11305_v45 = vrot.slane %v22868_v32, 6  ;;  %v11307_v48 = vrot.slane %v22869_v46, 5  ;;  %v21182_v43 = vpop.permute.xlu0 %10606 }
 0x686   : > { %10916 = vrot.lane.b32.xlu1 %v10909_v2, %s15483_s27  ;;  %v10221_v40 = vsel %vm9063_vm4, %v10220_v1, %v10219_v44  ;;  %v11309_v6 = vrot.slane %v22871_v21, 4  ;;  %v11311_v17 = vrot.slane %v22870_v31, 3  ;;  %v11313_v3 = vrot.slane %v20403_v50, 2 }
 0x687   : > { %v10223_v52 = vsel %vm9066_vm5, %v10222_v26, %v10221_v40  ;;  %v11306_v10 = vsel %vm9054_vm1, %v11305_v45, %v11304_v57  ;;  %v11315_v24 = vrot.slane %v20461_v27, 1  ;;  %v10622_v36 = vrot.slane %v22851_v25, 6 }
 0x688   : > { %v10225_v39 = vsel %vm9069_vm6, %v10224_v37, %v10223_v52  ;;  %v11308_v11 = vsel %vm9057_vm2, %v11307_v48, %v11306_v10  ;;  %v10623_v54 = vrot.slane %v22852_v8, 5  ;;  %v10625_v60 = vrot.slane %v22856_v49, 4 }
 0x689   : > { %v10227_v51 = vsel %vm9072_vm7, %v10226_v20, %v10225_v39  ;;  %v11310_v30 = vsel %vm9060_vm3, %v11309_v6, %v11308_v11  ;;  %v10627_v62 = vrot.slane %v22853_v61, 3  ;;  %v10629_v26 = vrot.slane %v22854_v47, 2 }
 0x68a   : > { %10274 = vst.msk [vmem:[#allocation2 + $0x40] sm:$0xff] %vm9120_vm8, %v10227_v51  ;;  %v11312_v14 = vsel %vm9063_vm4, %v11311_v17, %v11310_v30  ;;  %v10624_v1 = vsel %vm9054_vm1, %v10623_v54, %v10622_v36  ;;  %v10631_v4 = vrot.slane %v22855_v58, 1  ;;  %v10634_v2 = vrot.slane %v22858_v13, 7 }
 0x68b   : > { %10346 = vst.msk [vmem:[#allocation2 + $0x40] sm:$0xff] %vm9193_vm9, %v10335_v0  ;;  %v11314_v37 = vsel %vm9066_vm5, %v11313_v3, %v11312_v14  ;;  %v10626_v20 = vsel %vm9057_vm2, %v10625_v60, %v10624_v1  ;;  %v11168_v44 = vrot.slane %v22867_v55, 5  ;;  %v11169_v40 = vrot.slane %v22868_v32, 4  ;;  %v10475_v1 = vpop.permute.xlu0 %10474 }
 0x68c   : > { %v11316_v57 = vsel %vm9069_vm6, %v11315_v24, %v11314_v37  ;;  %v10628_v45 = vsel %vm9060_vm3, %v10627_v62, %v10626_v20  ;;  %v11171_v48 = vrot.slane %v22869_v46, 3  ;;  %v11173_v17 = vrot.slane %v22871_v21, 2 }
 0x68d   : > { %v11317_v6 = vsel %vm9072_vm7, %v20509_v56, %v11316_v57  ;;  %v10630_v0 = vsel %vm9063_vm4, %v10629_v26, %v10628_v45  ;;  %v11175_v52 = vrot.slane %v22870_v31, 1  ;;  %v11170_v3 = vsel %vm9054_vm1, %v11169_v40, %v11168_v44  ;;  %v21212_v26 = vpop.permute.xlu1 %9596  ;;  %v22873_v40 = vld [vmem:[#allocation57_spill] sm:$0xff] }
 0x68e   : > { %11324 = vrot.lane.b32.xlu1 %v11317_v6, %s15483_s27  ;;  %v10632_v10 = vsel %vm9066_vm5, %v10631_v4, %v10630_v0  ;;  %v11178_v24 = vrot.slane %v20461_v27, 7  ;;  %v11180_v39 = vrot.slane %v20509_v56, 6  ;;  %v11172_v36 = vsel %vm9057_vm2, %v11171_v48, %v11170_v3  ;;  %v22875_v0 = vld [vmem:[#allocation81_spill] sm:$0xff] }
 0x68f   : > { %v10633_v11 = vsel %vm9069_vm6, %v22857_v33, %v10632_v10  ;;  %v10486_v54 = vrot.slane %v22851_v25, 4  ;;  %v10487_v51 = vrot.slane %v22852_v8, 3  ;;  %v11174_v60 = vsel %vm9060_vm3, %v11173_v17, %v11172_v36  ;;  %v22878_v36 = vld [vmem:[#allocation89_spill] sm:$0xff] }
 0x690   : > { %v10635_v30 = vsel %vm9072_vm7, %v10634_v2, %v10633_v11  ;;  %v10489_v62 = vrot.slane %v22856_v49, 2  ;;  %v10491_v14 = vrot.slane %v22853_v61, 1  ;;  %v11176_v4 = vsel %vm9063_vm4, %v11175_v52, %v11174_v60  ;;  %v22872_v2 = vld [vmem:[#allocation73_spill] sm:$0xff]  ;;  %v22876_v52 = vld [vmem:[#allocation83_spill] sm:$0xff] }
 0x691   : > { %10682 = vst.msk [vmem:[#allocation2 + $0x58] sm:$0xff] %vm9120_vm8, %v10635_v30  ;;  %v10488_v37 = vsel %vm9054_vm1, %v10487_v51, %v10486_v54  ;;  %v10494_v25 = vrot.slane %v22855_v58, 7  ;;  %v10496_v8 = vrot.slane %v22857_v33, 6  ;;  %v11177_v49 = vsel %vm9066_vm5, %v20403_v50, %v11176_v4  ;;  %v22874_v58 = vld [vmem:[#allocation84_spill] sm:$0xff] }
 0x692   : > { %10754 = vst.msk [vmem:[#allocation2 + $0x58] sm:$0xff] %vm9193_vm9, %v10743_v19  ;;  %v10490_v61 = vsel %vm9057_vm2, %v10489_v62, %v10488_v37  ;;  %v10498_v20 = vrot.slane %v22858_v13, 5  ;;  %v10378_v44 = vrot.slane %v22872_v2, 2  ;;  %v11179_v57 = vsel %vm9069_vm6, %v11178_v24, %v11177_v49  ;;  %v22877_v24 = vld [vmem:[#allocation80_spill] sm:$0xff]  ;;  %v10339_v62 = vpop.permute.xlu0 %10338 }
 0x693   : > { %v10492_v45 = vsel %vm9060_vm3, %v10491_v14, %v10490_v61  ;;  %v10379_v48 = vrot.slane %v22873_v40, 1  ;;  %v10382_v6 = vrot.slane %v22874_v58, 7  ;;  %v11181_v33 = vsel %vm9072_vm7, %v11180_v39, %v11179_v57  ;;  %v22879_v39 = vld [vmem:[#allocation8_spill] sm:$0xff]  ;;  %v21244_v14 = vpop.permute.xlu1 %9324 }
 0x694   : > { %v10493_v19 = vsel %vm9063_vm4, %v22854_v47, %v10492_v45  ;;  %v10384_v17 = vrot.slane %v22875_v0, 6  ;;  %v10386_v10 = vrot.slane %v22876_v52, 5  ;;  %11188 = vrot.lane.b32.xlu1 %v11181_v33, %s15483_s27  ;;  %v10388_v11 = vrot.slane %v22877_v24, 4  ;;  %s13088_s27 = sshll.u32 %s22924_s20, 3 }
 0x695   : > { %v10495_v13 = vsel %vm9066_vm5, %v10494_v25, %v10493_v19  ;;  %v10380_v3 = vsel %vm9054_vm1, %v10379_v48, %v10378_v44  ;;  %v10390_v54 = vrot.slane %v22878_v36, 3  ;;  %v10242_v47 = vrot.slane %v22873_v40, 7  ;;  %s553_s26 = scalar_lea.vmem %s22215_s17, %s13088_s27 }
 0x696   : > { %v10497_v51 = vsel %vm9069_vm6, %v10496_v8, %v10495_v13  ;;  %v10381_v30 = vsel %vm9057_vm2, %v22879_v39, %v10380_v3  ;;  %v10244_v60 = vrot.slane %v22879_v39, 6  ;;  %v10246_v25 = vrot.slane %v22874_v58, 5 }
 0x697   : > { %v10499_v4 = vsel %vm9072_vm7, %v10498_v20, %v10497_v51  ;;  %v10383_v37 = vsel %vm9060_vm3, %v10382_v6, %v10381_v30  ;;  %v10248_v49 = vrot.slane %v22875_v0, 4  ;;  %v10243_v61 = vsel %vm9054_vm1, %v10242_v47, %v22872_v2 }
 0x698   : > { %10546 = vst.msk [vmem:[#allocation2 + $0x50] sm:$0xff] %vm9120_vm8, %v10499_v4  ;;  %v10385_v8 = vsel %vm9063_vm4, %v10384_v17, %v10383_v37  ;;  %v10250_v44 = vrot.slane %v22876_v52, 3  ;;  %v10252_v57 = vrot.slane %v22877_v24, 2  ;;  %v10245_v45 = vsel %vm9057_vm2, %v10244_v60, %v10243_v61  ;;  %v10747_v4 = vpop.permute.xlu0 %10746  ;;  %v21275_v37 = vpop.permute.xlu1 %9187 }
 0x699   : > { %10618 = vst.msk [vmem:[#allocation2 + $0x50] sm:$0xff] %vm9193_vm9, %v21182_v43  ;;  %v10387_v20 = vsel %vm9066_vm5, %v10386_v10, %v10385_v8  ;;  %v10254_v48 = vrot.slane %v22878_v36, 1  ;;  %v10650_v6 = vrot.slane %v22872_v2, 6  ;;  %v10247_v19 = vsel %vm9060_vm3, %v10246_v25, %v10245_v45 }
 0x69a   : > { %v10389_v33 = vsel %vm9069_vm6, %v10388_v11, %v10387_v20  ;;  %v10651_v17 = vrot.slane %v22873_v40, 5  ;;  %v10653_v13 = vrot.slane %v22879_v39, 4  ;;  %v10249_v43 = vsel %vm9063_vm4, %v10248_v49, %v10247_v19 }
 0x69b   : > { %v10391_v3 = vsel %vm9072_vm7, %v10390_v54, %v10389_v33  ;;  %v10655_v10 = vrot.slane %v22874_v58, 3  ;;  %v10657_v51 = vrot.slane %v22875_v0, 2  ;;  %v10251_v30 = vsel %vm9066_vm5, %v10250_v44, %v10249_v43  ;;  %v22880_v43 = vld [vmem:[#allocation37_spill] sm:$0xff] }
 0x69c   : > { %10412 = vst.msk [vmem:[#allocation2 + $0x148] sm:$0xff] %vm9120_vm8, %v10391_v3  ;;  %v10652_v11 = vsel %vm9054_vm1, %v10651_v17, %v10650_v6  ;;  %v10659_v47 = vrot.slane %v22876_v52, 1  ;;  %v10662_v60 = vrot.slane %v22878_v36, 7  ;;  %v10253_v54 = vsel %vm9069_vm6, %v10252_v57, %v10251_v30  ;;  %v10611_v3 = vpop.permute.xlu0 %10610 }
 0x69d   : > { %10484 = vst.msk [vmem:[#allocation2 + $0x148] sm:$0xff] %vm9193_vm9, %v10475_v1  ;;  %v10654_v25 = vsel %vm9057_vm2, %v10653_v13, %v10652_v11  ;;  %v10514_v49 = vrot.slane %v22872_v2, 4  ;;  %v10515_v8 = vrot.slane %v22873_v40, 3  ;;  %v10255_v61 = vsel %vm9072_vm7, %v10254_v48, %v10253_v54  ;;  %v22881_v11 = vld [vmem:[#allocation40_spill] sm:$0xff]  ;;  %v22882_v54 = vld [vmem:[#allocation34_spill] sm:$0xff] }
 0x69e   : > { %v10656_v44 = vsel %vm9060_vm3, %v10655_v10, %v10654_v25  ;;  %v10517_v20 = vrot.slane %v22879_v39, 2  ;;  %v10519_v45 = vrot.slane %v22874_v58, 1  ;;  %10276 = vst.msk [vmem:[#allocation2 + $0x140] sm:$0xff] %vm9120_vm8, %v10255_v61  ;;  %v10522_v6 = vrot.slane %v22876_v52, 7 }
 0x69f   : > { %v10658_v1 = vsel %vm9063_vm4, %v10657_v51, %v10656_v44  ;;  %v10516_v57 = vsel %vm9054_vm1, %v10515_v8, %v10514_v49  ;;  %v10524_v2 = vrot.slane %v22877_v24, 6  ;;  %10348 = vst.msk [vmem:[#allocation2 + $0x140] sm:$0xff] %vm9193_vm9, %v10339_v62  ;;  %v10526_v39 = vrot.slane %v22878_v36, 5  ;;  %v21306_v51 = vpop.permute.xlu1 %9460 }
 0x6a0   : > { %v10660_v40 = vsel %vm9066_vm5, %v10659_v47, %v10658_v1  ;;  %v10518_v48 = vsel %vm9057_vm2, %v10517_v20, %v10516_v57  ;;  %v10926_v58 = vrot.slane %v18860_v29, 2  ;;  %v10927_v17 = vrot.slane %v18873_v12, 1 }
 0x6a1   : > { %v10661_v33 = vsel %vm9069_vm6, %v22877_v24, %v10660_v40  ;;  %v10520_v19 = vsel %vm9060_vm3, %v10519_v45, %v10518_v48  ;;  %v10930_v52 = vrot.slane %v22786_v15, 7  ;;  %v10932_v10 = vrot.slane %v22880_v43, 6 }
 0x6a2   : > { %v10663_v13 = vsel %vm9072_vm7, %v10662_v60, %v10661_v33  ;;  %v10521_v62 = vsel %vm9063_vm4, %v22875_v0, %v10520_v19  ;;  %v10934_v36 = vrot.slane %v22783_v35, 5  ;;  %v10928_v30 = vsel %vm9054_vm1, %v10927_v17, %v10926_v58  ;;  %v11047_v17 = vpop.permute.xlu0 %11046 }
 0x6a3   : > { %10684 = vst.msk [vmem:[#allocation2 + $0x158] sm:$0xff] %vm9120_vm8, %v10663_v13  ;;  %v10523_v24 = vsel %vm9066_vm5, %v10522_v6, %v10521_v62  ;;  %v10936_v47 = vrot.slane %v22881_v11, 4  ;;  %v10938_v60 = vrot.slane %v22787_v23, 3  ;;  %v10929_v25 = vsel %vm9057_vm2, %v22882_v54, %v10928_v30  ;;  %v22883_v6 = vld [vmem:[#allocation59_spill] sm:$0xff] }
 0x6a4   : > { %10756 = vst.msk [vmem:[#allocation2 + $0x158] sm:$0xff] %vm9193_vm9, %v10747_v4  ;;  %v10525_v0 = vsel %vm9069_vm6, %v10524_v2, %v10523_v24  ;;  %v9512_v49 = vrot.slane %v20114_v38, 6  ;;  %v9513_v8 = vrot.slane %v20171_v42, 5  ;;  %v10931_v44 = vsel %vm9060_vm3, %v10930_v52, %v10929_v25 }
 0x6a5   : > { %v10527_v61 = vsel %vm9072_vm7, %v10526_v39, %v10525_v0  ;;  %v9515_v20 = vrot.slane %v20228_v7, 4  ;;  %v9517_v45 = vrot.slane %v20285_v5, 3  ;;  %v10933_v4 = vsel %vm9063_vm4, %v10932_v10, %v10931_v44  ;;  %v22884_v39 = vld [vmem:[#allocation21_spill] sm:$0xff]  ;;  %v21337_v10 = vpop.permute.xlu1 %10472 }
 0x6a6   : > { %10548 = vst.msk [vmem:[#allocation2 + $0x150] sm:$0xff] %vm9120_vm8, %v10527_v61  ;;  %v9514_v1 = vsel %vm9054_vm1, %v9513_v8, %v9512_v49  ;;  %v9519_v57 = vrot.slane %v20341_v16, 2  ;;  %v9521_v2 = vrot.slane %v22883_v6, 1  ;;  %v10935_v40 = vsel %vm9066_vm5, %v10934_v36, %v10933_v4 }
 0x6a7   : > { %10620 = vst.msk [vmem:[#allocation2 + $0x150] sm:$0xff] %vm9193_vm9, %v10611_v3  ;;  %v9516_v48 = vsel %vm9057_vm2, %v9515_v20, %v9514_v1  ;;  %v9524_v58 = vrot.slane %v22884_v39, 7  ;;  %v10790_v33 = vrot.slane %v18873_v12, 7  ;;  %v10937_v19 = vsel %vm9069_vm6, %v10936_v47, %v10935_v40 }
 0x6a8   : > { %v9518_v52 = vsel %vm9060_vm3, %v9517_v45, %v9516_v48  ;;  %v10792_v13 = vrot.slane %v22882_v54, 6  ;;  %v10794_v62 = vrot.slane %v22786_v15, 5  ;;  %v10939_v3 = vsel %vm9072_vm7, %v10938_v60, %v10937_v19  ;;  %v22885_v60 = vld [vmem:[#allocation19_spill] sm:$0xff]  ;;  %v10911_v19 = vpop.permute.xlu0 %10910 }
 0x6a9   : > { %v9520_v36 = vsel %vm9063_vm4, %v9519_v57, %v9518_v52  ;;  %v10791_v24 = vsel %vm9054_vm1, %v10790_v33, %v18860_v29  ;;  %v10796_v30 = vrot.slane %v22880_v43, 4  ;;  %10986 = vst.msk [vmem:[#allocation2 + $0x68] sm:$0xff] %vm9120_vm8, %v10939_v3  ;;  %v10798_v25 = vrot.slane %v22783_v35, 3 }
 0x6aa   : > { %v9522_v47 = vsel %vm9066_vm5, %v9521_v2, %v9520_v36  ;;  %v10793_v0 = vsel %vm9057_vm2, %v10792_v13, %v10791_v24  ;;  %v10800_v49 = vrot.slane %v22881_v11, 2  ;;  %11058 = vst.msk [vmem:[#allocation2 + $0x68] sm:$0xff] %vm9193_vm9, %v11047_v17  ;;  %v10802_v44 = vrot.slane %v22787_v23, 1 }
 0x6ab   : > { %v9523_v8 = vsel %vm9069_vm6, %v22885_v60, %v9522_v47  ;;  %v10795_v61 = vsel %vm9060_vm3, %v10794_v62, %v10793_v0  ;;  %v9240_v20 = vrot.slane %v20114_v38, 2  ;;  %v9241_v1 = vrot.slane %v20171_v42, 1  ;;  %v21370_v62 = vpop.permute.xlu1 %10336 }
 0x6ac   : > { %v9525_v45 = vsel %vm9072_vm7, %v9524_v58, %v9523_v8  ;;  %v10797_v4 = vsel %vm9063_vm4, %v10796_v30, %v10795_v61  ;;  %v9244_v57 = vrot.slane %v20285_v5, 7  ;;  %v9246_v40 = vrot.slane %v20341_v16, 6 }
 0x6ad   : > { %9533 = vst.msk [vmem:[#allocation2 + $0x198] sm:$0xff] %vm9120_vm8, %v9525_v45  ;;  %v10799_v2 = vsel %vm9066_vm5, %v10798_v25, %v10797_v4  ;;  %v9248_v48 = vrot.slane %v22883_v6, 5  ;;  %v9250_v33 = vrot.slane %v22885_v60, 4  ;;  %v9242_v17 = vsel %vm9054_vm1, %v9241_v1, %v9240_v20 }
 0x6ae   : > { %9605 = vst.msk [vmem:[#allocation2 + $0x198] sm:$0xff] %vm9193_vm9, %v21212_v26  ;;  %v10801_v58 = vsel %vm9069_vm6, %v10800_v49, %v10799_v2  ;;  %v9252_v52 = vrot.slane %v22884_v39, 3  ;;  %v11198_v13 = vrot.slane %v18860_v29, 6  ;;  %v9243_v36 = vsel %vm9057_vm2, %v20228_v7, %v9242_v17 }
 0x6af   : > { %v10803_v3 = vsel %vm9072_vm7, %v10802_v44, %v10801_v58  ;;  %v11199_v24 = vrot.slane %v18873_v12, 5  ;;  %v11201_v26 = vrot.slane %v22882_v54, 4  ;;  %v9245_v30 = vsel %vm9060_vm3, %v9244_v57, %v9243_v36 }
 0x6b0   : > { %10850 = vst.msk [vmem:[#allocation2 + $0x60] sm:$0xff] %vm9120_vm8, %v10803_v3  ;;  %v11203_v47 = vrot.slane %v22786_v15, 3  ;;  %v11205_v0 = vrot.slane %v22880_v43, 2  ;;  %v11207_v25 = vrot.slane %v22783_v35, 1  ;;  %v9247_v49 = vsel %vm9063_vm4, %v9246_v40, %v9245_v30  ;;  %v21400_v3 = vpop.permute.xlu1 %10744  ;;  %v11369_v30 = vld [vmem:[#allocation2 + $0x118] sm:$0xff] }
 0x6b1   : > { %10922 = vst.msk [vmem:[#allocation2 + $0x60] sm:$0xff] %vm9193_vm9, %v10911_v19  ;;  %v11200_v8 = vsel %vm9054_vm1, %v11199_v24, %v11198_v13  ;;  %v11210_v61 = vrot.slane %v22787_v23, 7  ;;  %v9102_v44 = vrot.slane %v20171_v42, 7  ;;  %v9249_v20 = vsel %vm9066_vm5, %v9248_v48, %v9247_v49 }
 0x6b2   : > { %v11202_v45 = vsel %vm9057_vm2, %v11201_v26, %v11200_v8  ;;  %v9104_v4 = vrot.slane %v20228_v7, 6  ;;  %v9106_v1 = vrot.slane %v20285_v5, 5  ;;  %v9251_v57 = vsel %vm9069_vm6, %v9250_v33, %v9249_v20 }
 0x6b3   : > { %v11204_v2 = vsel %vm9060_vm3, %v11203_v47, %v11202_v45  ;;  %v9103_v40 = vsel %vm9054_vm1, %v9102_v44, %v20114_v38  ;;  %v9108_v58 = vrot.slane %v20341_v16, 4  ;;  %v9253_v19 = vsel %vm9072_vm7, %v9252_v52, %v9251_v57 }
 0x6b4   : > { %v11206_v17 = vsel %vm9063_vm4, %v11205_v0, %v11204_v2  ;;  %v9105_v48 = vsel %vm9057_vm2, %v9104_v4, %v9103_v40  ;;  %v9110_v13 = vrot.slane %v22883_v6, 3  ;;  %9261 = vst.msk [vmem:[#allocation2 + $0x188] sm:$0xff] %vm9120_vm8, %v9253_v19  ;;  %v9112_v24 = vrot.slane %v22885_v60, 2  ;;  %v11319_v0 = vpop.permute.xlu0 %11318 }
 0x6b5   : > { %v11208_v33 = vsel %vm9066_vm5, %v11207_v25, %v11206_v17  ;;  %v9107_v36 = vsel %vm9060_vm3, %v9106_v1, %v9105_v48  ;;  %v9114_v26 = vrot.slane %v22884_v39, 1  ;;  %v11385_v52 = vld [vmem:[#allocation2 + $0x198] sm:$0xff]  ;;  %9333 = vst.msk [vmem:[#allocation2 + $0x188] sm:$0xff] %vm9193_vm9, %v21244_v14  ;;  %v11062_v25 = vrot.slane %v18860_v29, 4 }
 0x6b6   : > { %v11209_v47 = vsel %vm9069_vm6, %v22881_v11, %v11208_v33  ;;  %v9109_v49 = vsel %vm9063_vm4, %v9108_v58, %v9107_v36  ;;  %v11417_v8 = vpack.c.bf16 %v11385_v52, %v11369_v30  ;;  %v11063_v45 = vrot.slane %v18873_v12, 3  ;;  %v21432_v58 = vpop.permute.xlu1 %10608  ;;  %v11367_v36 = vld [vmem:[#allocation2 + $0x108] sm:$0xff] }
 0x6b7   : > { %v11211_v44 = vsel %vm9072_vm7, %v11210_v61, %v11209_v47  ;;  %v9111_v20 = vsel %vm9066_vm5, %v9110_v13, %v9109_v49  ;;  %v11065_v4 = vrot.slane %v22882_v54, 2  ;;  %v11067_v1 = vrot.slane %v22786_v15, 1 }
 0x6b8   : > { %11258 = vst.msk [vmem:[#allocation2 + $0x78] sm:$0xff] %vm9120_vm8, %v11211_v44  ;;  %v9113_v14 = vsel %vm9069_vm6, %v9112_v24, %v9111_v20  ;;  %12550 = vmatprep.mubr.bf16.mxu1 %v11417_v8  ;;  %v11070_v57 = vrot.slane %v22783_v35, 7  ;;  %v11072_v2 = vrot.slane %v22881_v11, 6  ;;  %v11064_v61 = vsel %vm9054_vm1, %v11063_v45, %v11062_v25  ;;  %v22886_v20 = vld [vmem:[#allocation12_spill] sm:$0xff] }
 0x6b9   : > { %11330 = vst.msk [vmem:[#allocation2 + $0x78] sm:$0xff] %vm9193_vm9, %v11319_v0  ;;  %v9115_v29 = vsel %vm9072_vm7, %v9114_v26, %v9113_v14  ;;  %v11074_v12 = vrot.slane %v22787_v23, 5  ;;  %v9376_v54 = vrot.slane %v20114_v38, 4  ;;  %v11066_v40 = vsel %vm9057_vm2, %v11065_v4, %v11064_v61 }
 0x6ba   : > { %9124 = vst.msk [vmem:[#allocation2 + $0x180] sm:$0xff] %vm9120_vm8, %v9115_v29  ;;  %v9377_v15 = vrot.slane %v20171_v42, 3  ;;  %v9379_v35 = vrot.slane %v20228_v7, 2  ;;  %v9381_v11 = vrot.slane %v20285_v5, 1  ;;  %v11068_v19 = vsel %vm9060_vm3, %v11067_v1, %v11066_v40  ;;  %v21463_v4 = vpop.permute.xlu1 %10172  ;;  %v22887_v1 = vld [vmem:[#allocation42_spill] sm:$0xff] }
 0x6bb   : > { %9197 = vst.msk [vmem:[#allocation2 + $0x180] sm:$0xff] %vm9193_vm9, %v21275_v37  ;;  %v9384_v23 = vrot.slane %v22883_v6, 7  ;;  %v9386_v38 = vrot.slane %v22885_v60, 6  ;;  %v9388_v17 = vrot.slane %v22884_v39, 5  ;;  %v11069_v42 = vsel %vm9063_vm4, %v22880_v43, %v11068_v19  ;;  %v11183_v37 = vpop.permute.xlu0 %11182 }
 0x6bc   : > { %v9378_v7 = vsel %vm9054_vm1, %v9377_v15, %v9376_v54  ;;  %v10954_v5 = vrot.slane %v22807_v53, 2  ;;  %v10955_v48 = vrot.slane %v22809_v28, 1  ;;  %v11071_v13 = vsel %vm9066_vm5, %v11070_v57, %v11069_v42  ;;  %v11383_v6 = vld [vmem:[#allocation2 + $0x188] sm:$0xff]  ;;  %v22889_v54 = vld [vmem:[#allocation67_spill] sm:$0xff] }
 0x6bd   : > { %v9380_v33 = vsel %vm9057_vm2, %v9379_v35, %v9378_v7  ;;  %v10958_v60 = vrot.slane %v22814_v22, 7  ;;  %v10960_v39 = vrot.slane %v22811_v34, 6  ;;  %v11073_v24 = vsel %vm9069_vm6, %v11072_v2, %v11071_v13  ;;  %v22888_v2 = vld [vmem:[#allocation68_spill] sm:$0xff]  ;;  %v22890_v15 = vld [vmem:[#allocation47_spill] sm:$0xff] }
 0x6be   : > { %v9382_v43 = vsel %vm9060_vm3, %v9381_v11, %v9380_v33  ;;  %v11415_v26 = vpack.c.bf16 %v11383_v6, %v11367_v36  ;;  %v10956_v30 = vsel %vm9054_vm1, %v10955_v48, %v10954_v5  ;;  %v11075_v52 = vsel %vm9072_vm7, %v11074_v12, %v11073_v24  ;;  %v22891_v42 = vld [vmem:[#allocation64_spill] sm:$0xff]  ;;  %v22892_v5 = vld [vmem:[#allocation49_spill] sm:$0xff]  ;;  %v11366_v13 = vld [vmem:[#allocation2 + $0x100] sm:$0xff] }
 0x6bf   : > { %v9383_v47 = vsel %vm9063_vm4, %v20341_v16, %v9382_v43  ;;  %v10957_v0 = vsel %vm9057_vm2, %v22810_v18, %v10956_v30  ;;  %v10962_v49 = vrot.slane %v22812_v41, 5  ;;  %11122 = vst.msk [vmem:[#allocation2 + $0x70] sm:$0xff] %vm9120_vm8, %v11075_v52  ;;  %v10964_v44 = vrot.slane %v22815_v59, 4  ;;  %v22894_v36 = vld [vmem:[#allocation53_spill] sm:$0xff] }
 0x6c0   : > { %v9385_v8 = vsel %vm9066_vm5, %v9384_v23, %v9383_v47  ;;  %12501 = vmatprep.mubr.bf16.mxu0 %v11415_v26  ;;  %v10959_v25 = vsel %vm9060_vm3, %v10958_v60, %v10957_v0  ;;  %v10966_v45 = vrot.slane %v22886_v20, 3  ;;  %11194 = vst.msk [vmem:[#allocation2 + $0x70] sm:$0xff] %vm9193_vm9, %v11183_v37  ;;  %v10364_v57 = vrot.slane %v22887_v1, 2  ;;  %v11051_v23 = vpop.permute.xlu0 %11050  ;;  %v22893_v37 = vld [vmem:[#allocation45_spill] sm:$0xff]  ;;  %v21495_v0 = vpop.permute.xlu1 %9900 }
 0x6c1   : > { %v9387_v16 = vsel %vm9069_vm6, %v9386_v38, %v9385_v8  ;;  %v10961_v14 = vsel %vm9063_vm4, %v10960_v39, %v10959_v25  ;;  %v10365_v29 = vrot.slane %v22888_v2, 1  ;;  %v10368_v40 = vrot.slane %v22889_v54, 7 }
 0x6c2   : > { %v9389_v61 = vsel %vm9072_vm7, %v9388_v17, %v9387_v16  ;;  %v10963_v12 = vsel %vm9066_vm5, %v10962_v49, %v10961_v14  ;;  %v10370_v35 = vrot.slane %v22890_v15, 6  ;;  %v11382_v11 = vld [vmem:[#allocation2 + $0x180] sm:$0xff]  ;;  %v10372_v7 = vrot.slane %v22891_v42, 5 }
 0x6c3   : > { %9397 = vst.msk [vmem:[#allocation2 + $0x190] sm:$0xff] %vm9120_vm8, %v9389_v61  ;;  %v10965_v19 = vsel %vm9069_vm6, %v10964_v44, %v10963_v12  ;;  %v10366_v38 = vsel %vm9054_vm1, %v10365_v29, %v10364_v57  ;;  %v10374_v48 = vrot.slane %v22892_v5, 4  ;;  %v10376_v6 = vrot.slane %v22894_v36, 3  ;;  %v11355_v29 = vld [vmem:[#allocation2 + $0xa8] sm:$0xff] }
 0x6c4   : > { %9469 = vst.msk [vmem:[#allocation2 + $0x190] sm:$0xff] %vm9193_vm9, %v21306_v51  ;;  %v10967_v17 = vsel %vm9072_vm7, %v10966_v45, %v10965_v19  ;;  %v10367_v33 = vsel %vm9057_vm2, %v22893_v37, %v10366_v38  ;;  %v11414_v60 = vpack.c.bf16 %v11382_v11, %v11366_v13  ;;  %v10818_v24 = vrot.slane %v22809_v28, 7 }
 0x6c5   : > { %10988 = vst.msk [vmem:[#allocation2 + $0x168] sm:$0xff] %vm9120_vm8, %v10967_v17  ;;  %v10369_v39 = vsel %vm9060_vm3, %v10368_v40, %v10367_v33  ;;  %v10820_v43 = vrot.slane %v22810_v18, 6  ;;  %v10822_v26 = vrot.slane %v22814_v22, 5  ;;  %v10824_v30 = vrot.slane %v22811_v34, 4 }
 0x6c6   : > { %11060 = vst.msk [vmem:[#allocation2 + $0x168] sm:$0xff] %vm9193_vm9, %v11051_v23  ;;  %v10371_v51 = vsel %vm9063_vm4, %v10370_v35, %v10369_v39  ;;  %12502 = vmatmul.mubr.bf16.gmra.mrb[136].mxu0 %v11414_v60  ;;  %v10826_v52 = vrot.slane %v22812_v41, 3  ;;  %v10828_v47 = vrot.slane %v22815_v59, 2  ;;  %v10819_v8 = vsel %vm9054_vm1, %v10818_v24, %v22807_v53  ;;  %v15384_v39 = vld [vmem:[%s22211_s13 + $0x200] sm:$0xff]  }
 0x6c7   : > { %v10373_v49 = vsel %vm9066_vm5, %v10372_v7, %v10371_v51  ;;  %v10830_v25 = vrot.slane %v22886_v20, 1  ;;  %v10228_v44 = vrot.slane %v22888_v2, 7  ;;  %v10821_v16 = vsel %vm9057_vm2, %v10820_v43, %v10819_v8  ;;  %v11339_v7 = vld [vmem:[#allocation2 + $0x28] sm:$0xff]  ;;  %v10915_v43 = vpop.permute.xlu0 %10914 }
 0x6c8   : > { %v10375_v45 = vsel %vm9069_vm6, %v10374_v48, %v10373_v49  ;;  %v10230_v14 = vrot.slane %v22893_v37, 6  ;;  %v10232_v57 = vrot.slane %v22889_v54, 5  ;;  %v10823_v12 = vsel %vm9060_vm3, %v10822_v26, %v10821_v16  ;;  %v21530_v49 = vpop.permute.xlu1 %9764 }
 0x6c9   : > { %v10377_v61 = vsel %vm9072_vm7, %v10376_v6, %v10375_v45  ;;  %v10229_v40 = vsel %vm9054_vm1, %v10228_v44, %v22887_v1  ;;  %v10234_v35 = vrot.slane %v22890_v15, 4  ;;  %v10825_v11 = vsel %vm9063_vm4, %v10824_v30, %v10823_v12  ;;  %v11368_v6 = vld [vmem:[#allocation2 + $0x110] sm:$0xff]  ;;  %v11357_v30 = vld [vmem:[#allocation2 + $0xb8] sm:$0xff]  ;;  %v22896_v12 = vld [vmem:[#allocation23_spill] sm:$0xff] }
 0x6ca   : > { %10411 = vst.msk [vmem:[#allocation2 + $0xc8] sm:$0xff] %vm9120_vm8, %v10377_v61  ;;  %v10231_v19 = vsel %vm9057_vm2, %v10230_v14, %v10229_v40  ;;  %v10236_v23 = vrot.slane %v22891_v42, 3  ;;  %v10238_v38 = vrot.slane %v22892_v5, 2  ;;  %v10827_v48 = vsel %vm9066_vm5, %v10826_v52, %v10825_v11  ;;  %v15385_v52 = vld [vmem:[%s22211_s13 + $0x248] sm:$0xff]   ;;  %v11341_v61 = vld [vmem:[#allocation2 + $0x38] sm:$0xff] }
 0x6cb   : > { %10483 = vst.msk [vmem:[#allocation2 + $0xc8] sm:$0xff] %vm9193_vm9, %v21337_v10  ;;  %v10233_v13 = vsel %vm9060_vm3, %v10232_v57, %v10231_v19  ;;  %v10240_v17 = vrot.slane %v22894_v36, 1  ;;  %v11403_v33 = vpack.c.bf16 %v11355_v29, %v11339_v7  ;;  %v11384_v60 = vld [vmem:[#allocation2 + $0x190] sm:$0xff]  ;;  %v10829_v24 = vsel %vm9069_vm6, %v10828_v47, %v10827_v48 }
 0x6cc   : > { %v10235_v26 = vsel %vm9063_vm4, %v10234_v35, %v10233_v13  ;;  %v11416_v51 = vpack.c.bf16 %v11384_v60, %v11368_v6  ;;  %v11226_v10 = vrot.slane %v22807_v53, 6  ;;  %v10831_v8 = vsel %vm9072_vm7, %v10830_v25, %v10829_v24  ;;  %v22895_v25 = vld [vmem:[#allocation24_spill] sm:$0xff] }
 0x6cd   : > { %v10237_v44 = vsel %vm9066_vm5, %v10236_v23, %v10235_v26  ;;  %12591 = vmatprep.mubr.bf16.mxu0 %v11403_v33  ;;  %v11227_v47 = vrot.slane %v22809_v28, 5  ;;  %v11229_v45 = vrot.slane %v22810_v18, 4  ;;  %10852 = vst.msk [vmem:[#allocation2 + $0x160] sm:$0xff] %vm9120_vm8, %v10831_v8  ;;  %v11231_v14 = vrot.slane %v22814_v22, 3  ;;  %v15389_v33 = vld [vmem:[%s22211_s13 + $0x250] sm:$0xff]  }
 0x6ce   : > { %v10239_v16 = vsel %vm9069_vm6, %v10238_v38, %v10237_v44  ;;  %12551 = vmatmul.mubr.bf16.gmra.mrb[144].mxu1 %v11416_v51  ;;  %v11233_v57 = vrot.slane %v22811_v34, 2  ;;  %v11235_v29 = vrot.slane %v22812_v41, 1  ;;  %v22897_v40 = vpack.c.bf16 %v22895_v25, %v22896_v12  ;;  %10924 = vst.msk [vmem:[#allocation2 + $0x160] sm:$0xff] %vm9193_vm9, %v10915_v43  ;;  %v15387_v38 = vld [vmem:[%s22211_s13 + $0x208] sm:$0xff]  }
 0x6cf   : > { %v10241_v35 = vsel %vm9072_vm7, %v10240_v17, %v10239_v16  ;;  %v11228_v11 = vsel %vm9054_vm1, %v11227_v47, %v11226_v10  ;;  %v11238_v19 = vrot.slane %v22886_v20, 7  ;;  %v11405_v23 = vpack.c.bf16 %v11357_v30, %v11341_v61  ;;  %v21569_v30 = vpop.permute.xlu1 %10036  ;;  %v15388_v47 = vld [vmem:[%s22211_s13 + $0x280] sm:$0xff]   ;;  %v11323_v16 = vpop.permute.xlu0 %11322 }
 0x6d0   : > { %12592 = vmatmul.mubr.bf16.vlgmr.msra.gmra.mrb[140].mxu0 %v22897_v40  ;;  %10275 = vst.msk [vmem:[#allocation2 + $0xc0] sm:$0xff] %vm9120_vm8, %v10241_v35  ;;  %v11230_v7 = vsel %vm9057_vm2, %v11229_v45, %v11228_v11  ;;  %v10636_v48 = vrot.slane %v22887_v1, 6  ;;  %v10637_v13 = vrot.slane %v22888_v2, 5  ;;  %v10639_v17 = vrot.slane %v22893_v37, 4  ;;  %v15391_v45 = vld [vmem:[%s22211_s13 + $0x210] sm:$0xff]  }
 0x6d1   : > { %13983 = vmatpush3.bf16.msra.mxu0 %v15384_v39  ;;  %10347 = vst.msk [vmem:[#allocation2 + $0xc0] sm:$0xff] %vm9193_vm9, %v21370_v62  ;;  %v11232_v6 = vsel %vm9060_vm3, %v11231_v14, %v11230_v7  ;;  %12640 = vmatprep.mubr.bf16.mxu1 %v11405_v23  ;;  %v10641_v60 = vrot.slane %v22889_v54, 3  ;;  %v10643_v39 = vrot.slane %v22890_v15, 2  ;;  %v10645_v24 = vrot.slane %v22891_v42, 1  ;;  %v22898_v23 = vld [vmem:[#allocation25_spill] sm:$0xff] }
 0x6d2   : > { %13984 = vmatprep.subr.bf16.mxu0 %v15385_v52  ;;  %v11234_v43 = vsel %vm9063_vm4, %v11233_v57, %v11232_v6  ;;  %v10638_v26 = vsel %vm9054_vm1, %v10637_v13, %v10636_v48  ;;  %v10648_v51 = vrot.slane %v22894_v36, 7  ;;  %v11090_v10 = vrot.slane %v22807_v53, 4 }
 0x6d3   : > { %v11236_v62 = vsel %vm9066_vm5, %v11235_v29, %v11234_v43  ;;  %v10640_v52 = vsel %vm9057_vm2, %v10639_v17, %v10638_v26  ;;  %v11091_v8 = vrot.slane %v22809_v28, 3  ;;  %v11093_v44 = vrot.slane %v22810_v18, 2  ;;  %v15390_v18 = vld [vmem:[%s22211_s13 + $0x2c8] sm:$0xff]   ;;  %v15393_v29 = vld [vmem:[%s22211_s13 + $0x258] sm:$0xff]   ;;  %v21631_v43 = vpop.permute.xlu1 %10476 }
 0x6d4   : > { %v11237_v53 = vsel %vm9069_vm6, %v22815_v59, %v11236_v62  ;;  %v10642_v14 = vsel %vm9060_vm3, %v10641_v60, %v10640_v52  ;;  %v11095_v57 = vrot.slane %v22814_v22, 1  ;;  %v11098_v28 = vrot.slane %v22812_v41, 7  ;;  %v15395_v17 = vld [vmem:[%s22211_s13 + $0x218] sm:$0xff]  }
 0x6d5   : > { %13985 = vmatpush3.bf16.msra.mxu0 %v15387_v38  ;;  %v11239_v61 = vsel %vm9072_vm7, %v11238_v19, %v11237_v53  ;;  %v10644_v25 = vsel %vm9063_vm4, %v10643_v39, %v10642_v14  ;;  %v11092_v12 = vsel %vm9054_vm1, %v11091_v8, %v11090_v10  ;;  %v11100_v40 = vrot.slane %v22815_v59, 6  ;;  %v22899_v38 = vld [vmem:[#allocation60_spill] sm:$0xff]  ;;  %v11187_v10 = vpop.permute.xlu0 %11186  ;;  %v22901_v8 = vld [vmem:[#allocation99_spill] sm:$0xff] }
 0x6d6   : > { %13986 = vmatprep.subr.bf16.mxu0 %v15389_v33  ;;  %11260 = vst.msk [vmem:[#allocation2 + $0x178] sm:$0xff] %vm9120_vm8, %v11239_v61  ;;  %v10646_v41 = vsel %vm9066_vm5, %v10645_v24, %v10644_v25  ;;  %v11094_v22 = vsel %vm9057_vm2, %v11093_v44, %v11092_v12  ;;  %v11102_v35 = vrot.slane %v22886_v20, 5  ;;  %v10500_v11 = vrot.slane %v22887_v1, 4  ;;  %v15392_v20 = vld [vmem:[%s22211_s13 + $0x288] sm:$0xff]   ;;  %v15394_v1 = vld [vmem:[%s22211_s13 + $0x2d0] sm:$0xff]   ;;  %v21619_v33 = vld [vmem:[#allocation2 + $0x40] sm:$0xff] }
 0x6d7   : > { %v22900_v7 = vpack.c.bf16 %v22898_v23, %v22899_v38  ;;  %11332 = vst.msk [vmem:[#allocation2 + $0x178] sm:$0xff] %vm9193_vm9, %v11323_v16  ;;  %v10647_v19 = vsel %vm9069_vm6, %v22892_v5, %v10646_v41  ;;  %v11096_v59 = vsel %vm9060_vm3, %v11095_v57, %v11094_v22  ;;  %v10501_v48 = vrot.slane %v22888_v2, 3  ;;  %v15397_v24 = vld [vmem:[%s22211_s13 + $0x260] sm:$0xff]   ;;  %v22906_v25 = vld [vmem:[#allocation17_spill] sm:$0xff]  ;;  %v15401_v41 = vld [vmem:[%s22211_s13 + $0x268] sm:$0xff]  }
 0x6d8   : > { %v10503_v13 = vrot.slane %v22893_v37, 2  ;;  %v21621_v6 = vld [vmem:[#allocation2 + $0xc0] sm:$0xff]  ;;  %v10649_v2 = vsel %vm9072_vm7, %v10648_v51, %v10647_v19  ;;  %v11097_v37 = vsel %vm9063_vm4, %v22811_v34, %v11096_v59  ;;  %v10505_v60 = vrot.slane %v22889_v54, 1 }
 0x6d9   : > { %12641 = vmatmul.mubr.bf16.vlgmr.msra.gmra.mrb[148].mxu1 %v22900_v7  ;;  %13987 = vmatpush3.bf16.msra.mxu0 %v15391_v45  ;;  %v10508_v39 = vrot.slane %v22891_v42, 7  ;;  %v11406_v26 = vpack.c.bf16 %v21621_v6, %v21619_v33  ;;  %10683 = vst.msk [vmem:[#allocation2 + $0xd8] sm:$0xff] %vm9120_vm8, %v10649_v2  ;;  %v11099_v51 = vsel %vm9066_vm5, %v11098_v28, %v11097_v37  ;;  %v10510_v54 = vrot.slane %v22892_v5, 6  ;;  %v22902_v53 = vld [vmem:[#allocation7_spill] sm:$0xff]  ;;  %v22904_v28 = vld [vmem:[#allocation90_spill] sm:$0xff]  ;;  %v15403_v37 = vld [vmem:[%s22211_s13 + $0x228] sm:$0xff]  }
 0x6da   : > { %14011 = vmatpush3.bf16.msra.mxu1 %v15388_v47  ;;  %13988 = vmatprep.subr.bf16.mxu0 %v15393_v29  ;;  %v10502_v34 = vsel %vm9054_vm1, %v10501_v48, %v10500_v11  ;;  %10755 = vst.msk [vmem:[#allocation2 + $0xd8] sm:$0xff] %vm9193_vm9, %v21400_v3  ;;  %v11101_v42 = vsel %vm9069_vm6, %v11100_v40, %v11099_v51  ;;  %v10512_v52 = vrot.slane %v22894_v36, 5  ;;  %v10088_v44 = vrot.slane %v22901_v8, 6  ;;  %v22903_v14 = vld [vmem:[#allocation87_spill] sm:$0xff]  ;;  %v15396_v3 = vld [vmem:[%s22211_s13 + $0x290] sm:$0xff]   ;;  %v15398_v40 = vld [vmem:[%s22211_s13 + $0x2d8] sm:$0xff]   ;;  %v21676_v48 = vpop.permute.xlu1 %10340 }
 0x6db   : > { %14012 = vmatprep.subr.bf16.mxu1 %v15390_v18  ;;  %v10504_v62 = vsel %vm9057_vm2, %v10503_v13, %v10502_v34  ;;  %v11103_v47 = vsel %vm9072_vm7, %v11102_v35, %v11101_v42  ;;  %v10089_v16 = vrot.slane %v22902_v53, 5  ;;  %v10091_v5 = vrot.slane %v22903_v14, 4  ;;  %v15399_v36 = vld [vmem:[%s22211_s13 + $0x220] sm:$0xff]   ;;  %v22907_v35 = vld [vmem:[#allocation22_spill] sm:$0xff]  ;;  %v15405_v42 = vld [vmem:[%s22211_s13 + $0x270] sm:$0xff]  }
 0x6dc   : > { %v10506_v45 = vsel %vm9060_vm3, %v10505_v60, %v10504_v62  ;;  %11124 = vst.msk [vmem:[#allocation2 + $0x170] sm:$0xff] %vm9120_vm8, %v11103_v47  ;;  %v10093_v18 = vrot.slane %v22904_v28, 3  ;;  %v22905_v29 = vld [vmem:[#allocation95_spill] sm:$0xff]  ;;  %v10097_v12 = vrot.slane %v22906_v25, 1  ;;  %v10100_v11 = vrot.slane %v22907_v35, 7  ;;  %v15400_v2 = vld [vmem:[%s22211_s13 + $0x298] sm:$0xff]  }
 0x6dd   : > { %13989 = vmatpush3.bf16.msra.mxu0 %v15395_v17  ;;  %v10507_v57 = vsel %vm9063_vm4, %v22890_v15, %v10506_v45  ;;  %v10095_v61 = vrot.slane %v22905_v29, 2  ;;  %11196 = vst.msk [vmem:[#allocation2 + $0x170] sm:$0xff] %vm9193_vm9, %v11187_v10  ;;  %v10090_v22 = vsel %vm9054_vm1, %v10089_v16, %v10088_v44  ;;  %v9816_v23 = vrot.slane %v22901_v8, 2  ;;  %v15420_v33 = vld [vmem:[%s22211_s13 + $0x380] sm:$0xff]  }
 0x6de   : > { %14013 = vmatpush3.bf16.msra.mxu1 %v15392_v20  ;;  %13990 = vmatprep.subr.bf16.mxu0 %v15397_v24  ;;  %v10509_v15 = vsel %vm9066_vm5, %v10508_v39, %v10507_v57  ;;  %v10092_v7 = vsel %vm9057_vm2, %v10091_v5, %v10090_v22  ;;  %v9817_v19 = vrot.slane %v22902_v53, 1  ;;  %v9820_v59 = vrot.slane %v22904_v28, 7  ;;  %v22908_v24 = vld [vmem:[#allocation20_spill] sm:$0xff] }
 0x6df   : > { %14014 = vmatprep.subr.bf16.mxu1 %v15394_v1  ;;  %v10511_v38 = vsel %vm9069_vm6, %v10510_v54, %v10509_v15  ;;  %v10094_v20 = vsel %vm9060_vm3, %v10093_v18, %v10092_v7  ;;  %v9822_v1 = vrot.slane %v22905_v29, 6  ;;  %v9824_v17 = vrot.slane %v22906_v25, 5  ;;  %v15402_v54 = vld [vmem:[%s22211_s13 + $0x2e0] sm:$0xff]   ;;  %v15406_v22 = vld [vmem:[%s22211_s13 + $0x2e8] sm:$0xff]  }
 0x6e0   : > { %v10513_v13 = vsel %vm9072_vm7, %v10512_v52, %v10511_v38  ;;  %v10096_v60 = vsel %vm9063_vm4, %v10095_v61, %v10094_v20  ;;  %v9818_v39 = vsel %vm9054_vm1, %v9817_v19, %v9816_v23  ;;  %v9826_v51 = vrot.slane %v22908_v24, 4  ;;  %v15404_v18 = vld [vmem:[%s22211_s13 + $0x2a0] sm:$0xff]   ;;  %v15407_v61 = vld [vmem:[%s22211_s13 + $0x230] sm:$0xff]   ;;  %v21733_v23 = vpop.permute.xlu1 %10748 }
 0x6e1   : > { %13991 = vmatpush3.bf16.msra.mxu0 %v15399_v36  ;;  %10547 = vst.msk [vmem:[#allocation2 + $0xd0] sm:$0xff] %vm9120_vm8, %v10513_v13  ;;  %v9828_v34 = vrot.slane %v22907_v35, 3  ;;  %v10098_v10 = vsel %vm9066_vm5, %v10097_v12, %v10096_v60  ;;  %v9819_v62 = vsel %vm9057_vm2, %v22903_v14, %v9818_v39  ;;  %v9680_v52 = vrot.slane %v22902_v53, 7  ;;  %v21759_v60 = vld [vmem:[#allocation2 + $0x50] sm:$0xff] }
 0x6e2   : > { %14015 = vmatpush3.bf16.msra.mxu1 %v15396_v3  ;;  %13992 = vmatprep.subr.bf16.mxu0 %v15401_v41  ;;  %10619 = vst.msk [vmem:[#allocation2 + $0xd0] sm:$0xff] %vm9193_vm9, %v21432_v58  ;;  %v9682_v44 = vrot.slane %v22903_v14, 6  ;;  %v10099_v47 = vsel %vm9069_vm6, %v22908_v24, %v10098_v10  ;;  %v9821_v45 = vsel %vm9060_vm3, %v9820_v59, %v9819_v62  ;;  %v9684_v16 = vrot.slane %v22904_v28, 5 }
 0x6e3   : > { %14016 = vmatprep.subr.bf16.mxu1 %v15398_v40  ;;  %v9686_v5 = vrot.slane %v22905_v29, 4  ;;  %v10101_v58 = vsel %vm9072_vm7, %v10100_v11, %v10099_v47  ;;  %v9823_v3 = vsel %vm9063_vm4, %v9822_v1, %v9821_v45  ;;  %v9681_v36 = vsel %vm9054_vm1, %v9680_v52, %v22901_v8  ;;  %v15409_v11 = vld [vmem:[%s22211_s13 + $0x278] sm:$0xff]  }
 0x6e4   : > { %v9688_v57 = vrot.slane %v22906_v25, 3  ;;  %10109 = vst.msk [vmem:[#allocation2 + $0x1b8] sm:$0xff] %vm9120_vm8, %v10101_v58  ;;  %v9825_v12 = vsel %vm9066_vm5, %v9824_v17, %v9823_v3  ;;  %v9683_v40 = vsel %vm9057_vm2, %v9682_v44, %v9681_v36  ;;  %v9690_v41 = vrot.slane %v22908_v24, 2  ;;  %v22910_v52 = vld [vmem:[#allocation94_spill] sm:$0xff]  ;;  %v21783_v36 = vpop.permute.xlu1 %10612 }
 0x6e5   : > { %13993 = vmatpush3.bf16.msra.mxu0 %v15403_v37  ;;  %v9692_v15 = vrot.slane %v22907_v35, 1  ;;  %10181 = vst.msk [vmem:[#allocation2 + $0x1b8] sm:$0xff] %vm9193_vm9, %v21463_v4  ;;  %v9827_v38 = vsel %vm9069_vm6, %v9826_v51, %v9825_v12  ;;  %v9685_v7 = vsel %vm9060_vm3, %v9684_v16, %v9683_v40  ;;  %v9952_v19 = vrot.slane %v22901_v8, 4  ;;  %v22911_v47 = vld [vmem:[#allocation14_spill] sm:$0xff]  ;;  %v22912_v16 = vld [vmem:[#allocation15_spill] sm:$0xff] }
 0x6e6   : > { %14017 = vmatpush3.bf16.msra.mxu1 %v15400_v2  ;;  %13994 = vmatprep.subr.bf16.mxu0 %v15405_v42  ;;  %v9953_v59 = vrot.slane %v22902_v53, 3  ;;  %v9829_v13 = vsel %vm9072_vm7, %v9828_v34, %v9827_v38  ;;  %v9687_v20 = vsel %vm9063_vm4, %v9686_v5, %v9685_v7  ;;  %v9955_v1 = vrot.slane %v22903_v14, 2  ;;  %v15408_v53 = vld [vmem:[%s22211_s13 + $0x2a8] sm:$0xff]   ;;  %v15410_v14 = vld [vmem:[%s22211_s13 + $0x2f0] sm:$0xff]   ;;  %v15414_v42 = vld [vmem:[%s22211_s13 + $0x340] sm:$0xff]  }
 0x6e7   : > { %14018 = vmatprep.subr.bf16.mxu1 %v15402_v54  ;;  %v9957_v17 = vrot.slane %v22904_v28, 1  ;;  %9837 = vst.msk [vmem:[#allocation2 + $0x1a8] sm:$0xff] %vm9120_vm8, %v9829_v13  ;;  %v9689_v4 = vsel %vm9066_vm5, %v9688_v57, %v9687_v20  ;;  %v9960_v37 = vrot.slane %v22906_v25, 7  ;;  %v9962_v8 = vrot.slane %v22908_v24, 6  ;;  %v15411_v28 = vld [vmem:[%s22211_s13 + $0x238] sm:$0xff]   ;;  %v22909_v34 = vld [vmem:[#allocation88_spill] sm:$0xff] }
 0x6e8   : > { %v9954_v2 = vsel %vm9054_vm1, %v9953_v59, %v9952_v19  ;;  %9909 = vst.msk [vmem:[#allocation2 + $0x1a8] sm:$0xff] %vm9193_vm9, %v21495_v0  ;;  %v9691_v25 = vsel %vm9069_vm6, %v9690_v41, %v9689_v4  ;;  %v9964_v51 = vrot.slane %v22907_v35, 5  ;;  %v10392_v54 = vrot.slane %v22909_v34, 2  ;;  %v22913_v58 = vld [vmem:[#allocation18_spill] sm:$0xff]  ;;  %v22916_v38 = vld [vmem:[#allocation97_spill] sm:$0xff]  ;;  %v11359_v4 = vld [vmem:[#allocation2 + $0xc8] sm:$0xff] }
 0x6e9   : > { %13995 = vmatpush3.bf16.msra.mxu0 %v15407_v61  ;;  %v21761_v39 = vld [vmem:[#allocation2 + $0xd0] sm:$0xff]  ;;  %v9956_v24 = vsel %vm9057_vm2, %v9955_v1, %v9954_v2  ;;  %v9693_v62 = vsel %vm9072_vm7, %v9692_v15, %v9691_v25  ;;  %v10393_v44 = vrot.slane %v22910_v52, 1  ;;  %v10396_v45 = vrot.slane %v22911_v47, 7  ;;  %v22915_v40 = vld [vmem:[#allocation62_spill] sm:$0xff]  ;;  %v11371_v25 = vld [vmem:[#allocation2 + $0x128] sm:$0xff] }
 0x6ea   : > { %14019 = vmatpush3.bf16.msra.mxu1 %v15404_v18  ;;  %13996 = vmatprep.subr.bf16.mxu0 %v15409_v11  ;;  %v11408_v10 = vpack.c.bf16 %v21761_v39, %v21759_v60  ;;  %v9958_v0 = vsel %vm9060_vm3, %v9957_v17, %v9956_v24  ;;  %9701 = vst.msk [vmem:[#allocation2 + $0x1a0] sm:$0xff] %vm9120_vm8, %v9693_v62  ;;  %v10398_v5 = vrot.slane %v22912_v16, 6  ;;  %v10400_v3 = vrot.slane %v22913_v58, 5  ;;  %v22914_v61 = vld [vmem:[#allocation61_spill] sm:$0xff]  ;;  %v11373_v15 = vld [vmem:[#allocation2 + $0x138] sm:$0xff]  ;;  %v15424_v39 = vld [vmem:[%s22211_s13 + $0x388] sm:$0xff]  }
 0x6eb   : > { %14020 = vmatprep.subr.bf16.mxu1 %v15406_v22  ;;  %v9959_v35 = vsel %vm9063_vm4, %v22905_v29, %v9958_v0  ;;  %9773 = vst.msk [vmem:[#allocation2 + $0x1a0] sm:$0xff] %vm9193_vm9, %v21530_v49  ;;  %v10394_v18 = vsel %vm9054_vm1, %v10393_v44, %v10392_v54  ;;  %v10402_v12 = vrot.slane %v22914_v61, 4  ;;  %v10404_v41 = vrot.slane %v22915_v40, 3  ;;  %v15412_v29 = vld [vmem:[%s22211_s13 + $0x2b0] sm:$0xff]   ;;  %v15413_v59 = vld [vmem:[%s22211_s13 + $0x2f8] sm:$0xff]  }
 0x6ec   : > { %v9961_v57 = vsel %vm9066_vm5, %v9960_v37, %v9959_v35  ;;  %v11389_v22 = vld [vmem:[#allocation2 + $0x1b8] sm:$0xff]  ;;  %v10395_v49 = vsel %vm9057_vm2, %v22916_v38, %v10394_v18  ;;  %v10256_v7 = vrot.slane %v22910_v52, 7  ;;  %v10258_v19 = vrot.slane %v22916_v38, 6  ;;  %v15423_v60 = vld [vmem:[%s22211_s13 + $0x310] sm:$0xff]  }
 0x6ed   : > { %13997 = vmatpush3.bf16.msra.mxu0 %v15411_v28  ;;  %v9963_v11 = vsel %vm9069_vm6, %v9962_v8, %v9961_v57  ;;  %v11421_v13 = vpack.c.bf16 %v11389_v22, %v11373_v15  ;;  %v10397_v1 = vsel %vm9060_vm3, %v10396_v45, %v10395_v49  ;;  %v10260_v17 = vrot.slane %v22911_v47, 5  ;;  %v21811_v28 = vld [vmem:[#allocation2 + $0xd8] sm:$0xff]  ;;  %v21829_v57 = vpop.permute.xlu1 %11048  ;;  %v11370_v49 = vld [vmem:[#allocation2 + $0x120] sm:$0xff] }
 0x6ee   : > { %14021 = vmatpush3.bf16.msra.mxu1 %v15408_v53  ;;  %14038 = vmatprep.subr.bf16.mxu0 %v15414_v42  ;;  %v9965_v20 = vsel %vm9072_vm7, %v9964_v51, %v9963_v11  ;;  %v10399_v2 = vsel %vm9063_vm4, %v10398_v5, %v10397_v1  ;;  %v10257_v37 = vsel %vm9054_vm1, %v10256_v7, %v22909_v34  ;;  %v10262_v8 = vrot.slane %v22912_v16, 4  ;;  %v15415_v0 = vld [vmem:[%s22211_s13 + $0x2b8] sm:$0xff]  }
 0x6ef   : > { %14022 = vmatprep.subr.bf16.mxu1 %v15410_v14  ;;  %9973 = vst.msk [vmem:[#allocation2 + $0x1b0] sm:$0xff] %vm9120_vm8, %v9965_v20  ;;  %v10264_v53 = vrot.slane %v22913_v58, 3  ;;  %v11343_v14 = vld [vmem:[#allocation2 + $0x48] sm:$0xff]  ;;  %12648 = vmatprep.mubr.bf16.mxu1 %v11421_v13  ;;  %v10401_v51 = vsel %vm9066_vm5, %v10400_v3, %v10399_v2  ;;  %v10259_v54 = vsel %vm9057_vm2, %v10258_v19, %v10257_v37  ;;  %v10266_v42 = vrot.slane %v22914_v61, 2  ;;  %v21824_v5 = vld [vmem:[#allocation2 + $0x58] sm:$0xff]  ;;  %v15418_v3 = vld [vmem:[%s22211_s13 + $0x3c0] sm:$0xff]  }
 0x6f0   : > { %10045 = vst.msk [vmem:[#allocation2 + $0x1b0] sm:$0xff] %vm9193_vm9, %v21569_v30  ;;  %v11387_v24 = vld [vmem:[#allocation2 + $0x1a8] sm:$0xff]  ;;  %v10268_v62 = vrot.slane %v22915_v40, 1  ;;  %v10403_v35 = vsel %vm9069_vm6, %v10402_v12, %v10401_v51  ;;  %v10261_v30 = vsel %vm9060_vm3, %v10260_v17, %v10259_v54  ;;  %v11407_v45 = vpack.c.bf16 %v11359_v4, %v11343_v14  ;;  %v21831_v18 = vpop.f32.mrb[132].mxu0 }
 0x6f1   : > { %v11419_v44 = vpack.c.bf16 %v11387_v24, %v11371_v25  ;;  %v10263_v15 = vsel %vm9063_vm4, %v10262_v8, %v10261_v30  ;;  %v11409_v12 = vpack.c.bf16 %v21811_v28, %v21824_v5  ;;  %v10664_v22 = vrot.slane %v22909_v34, 6  ;;  %v21838_v11 = vpop.f32.mrb[133].mxu0  ;;  %v21873_v30 = vpop.permute.xlu1 %10912 }
 0x6f2   : > { %14023 = vmatpush3.bf16.msra.mxu1 %v15412_v29  ;;  %v10405_v29 = vsel %vm9072_vm7, %v10404_v41, %v10403_v35  ;;  %v11386_v7 = vld [vmem:[#allocation2 + $0x1a0] sm:$0xff]  ;;  %v10265_v19 = vsel %vm9066_vm5, %v10264_v53, %v10263_v15  ;;  %v10667_v41 = vrot.slane %v22916_v38, 4  ;;  %v10669_v13 = vrot.slane %v22911_v47, 3  ;;  %v21845_v20 = vpop.f32.mrb[134].mxu0 }
 0x6f3   : > { %14024 = vmatprep.subr.bf16.mxu1 %v15413_v59  ;;  %12599 = vmatprep.mubr.bf16.mxu0 %v11419_v44  ;;  %10413 = vst.msk [vmem:[#allocation2 + $0x1c8] sm:$0xff] %vm9120_vm8, %v10405_v29  ;;  %v10665_v59 = vrot.slane %v22910_v52, 5  ;;  %v11418_v1 = vpack.c.bf16 %v11386_v7, %v11370_v49  ;;  %v10267_v17 = vsel %vm9069_vm6, %v10266_v42, %v10265_v19  ;;  %v10671_v4 = vrot.slane %v22912_v16, 2  ;;  %v21852_v37 = vpop.f32.mrb[135].mxu0  ;;  %v22918_v19 = vld [vmem:[#allocation48_spill] sm:$0xff] }
 0x6f4   : > { %10485 = vst.msk [vmem:[#allocation2 + $0x1c8] sm:$0xff] %vm9193_vm9, %v21631_v43  ;;  %v10673_v2 = vrot.slane %v22913_v58, 1  ;;  %v10269_v8 = vsel %vm9072_vm7, %v10268_v62, %v10267_v17  ;;  %v10676_v14 = vrot.slane %v22915_v40, 7  ;;  %v10528_v28 = vrot.slane %v22909_v34, 4  ;;  %v21858_v43 = vpop.f32.mrb[140].mxu1  ;;  %v11372_v34 = vld [vmem:[#allocation2 + $0x130] sm:$0xff] }
 0x6f5   : > { %v10666_v53 = vsel %vm9054_vm1, %v10665_v59, %v10664_v22  ;;  %12600 = vmatmul.mubr.bf16.gmra.mrb[144].mxu0 %v11418_v1  ;;  %10277 = vst.msk [vmem:[#allocation2 + $0x1c0] sm:$0xff] %vm9120_vm8, %v10269_v8  ;;  %v10529_v24 = vrot.slane %v22910_v52, 3  ;;  %v10531_v51 = vrot.slane %v22916_v38, 2  ;;  %v10533_v54 = vrot.slane %v22911_v47, 1  ;;  %v21865_v42 = vpop.f32.mrb[141].mxu1  ;;  %v15416_v17 = vld [vmem:[%s22211_s13 + $0x300] sm:$0xff]  }
 0x6f6   : > { %14025 = vmatpush3.bf16.msra.mxu1 %v15415_v0  ;;  %v10668_v25 = vsel %vm9057_vm2, %v10667_v41, %v10666_v53  ;;  %10349 = vst.msk [vmem:[#allocation2 + $0x1c0] sm:$0xff] %vm9193_vm9, %v21676_v48  ;;  %12689 = vmatprep.mubr.bf16.mxu0 %v11407_v45  ;;  %v10536_v44 = vrot.slane %v22913_v58, 7  ;;  %v10538_v35 = vrot.slane %v22914_v61, 6  ;;  %v10540_v52 = vrot.slane %v22915_v40, 5  ;;  %v21875_v38 = vpop.f32.mrb[142].mxu1  ;;  %v22917_v40 = vld [vmem:[#allocation46_spill] sm:$0xff] }
 0x6f7   : > { %14066 = vmatprep.subr.bf16.mxu1 %v15418_v3  ;;  %v11388_v62 = vld [vmem:[#allocation2 + $0x1b0] sm:$0xff]  ;;  %v10670_v0 = vsel %vm9060_vm3, %v10669_v13, %v10668_v25  ;;  %v10530_v48 = vsel %vm9054_vm1, %v10529_v24, %v10528_v28  ;;  %v10940_v45 = vrot.slane %v22843_v9, 2  ;;  %v21880_v3 = vpop.f32.mrb[143].mxu1  ;;  %v10941_v15 = vrot.slane %v22844_v63, 1  ;;  %v22919_v41 = vld [vmem:[#allocation71_spill] sm:$0xff] }
 0x6f8   : > { %v11420_v47 = vpack.c.bf16 %v11388_v62, %v11372_v34  ;;  %v10672_v5 = vsel %vm9063_vm4, %v10671_v4, %v10670_v0  ;;  %v10532_v58 = vsel %vm9057_vm2, %v10531_v51, %v10530_v48  ;;  %v10944_v22 = vrot.slane %v22917_v40, 7  ;;  %v22920_v53 = vld [vmem:[#allocation51_spill] sm:$0xff] }
 0x6f9   : > { %v10674_v29 = vsel %vm9066_vm5, %v10673_v2, %v10672_v5  ;;  %v10534_v7 = vsel %vm9060_vm3, %v10533_v54, %v10532_v58  ;;  %v10946_v59 = vrot.slane %v22918_v19, 6  ;;  %v10948_v13 = vrot.slane %v22919_v41, 5  ;;  %v11375_v2 = vld [vmem:[#allocation2 + $0x148] sm:$0xff]  ;;  %v22921_v24 = vld [vmem:[#allocation63_spill] sm:$0xff]  ;;  %v22922_v54 = vld [vmem:[#allocation66_spill] sm:$0xff] }
 0x6fa   : > { %12649 = vmatmul.mubr.bf16.gmra.mrb[152].mxu1 %v11420_v47  ;;  %v10675_v49 = vsel %vm9069_vm6, %v22914_v61, %v10674_v29  ;;  %v10535_v4 = vsel %vm9063_vm4, %v22912_v16, %v10534_v7  ;;  %v10942_v61 = vsel %vm9054_vm1, %v10941_v15, %v10940_v45  ;;  %v10950_v28 = vrot.slane %v22920_v53, 4  ;;  %v21913_v47 = vpop.permute.xlu1 %11320  ;;  %v11374_v45 = vld [vmem:[#allocation2 + $0x140] sm:$0xff]  ;;  %v15419_v58 = vld [vmem:[%s22211_s13 + $0x308] sm:$0xff]  }
 0x6fb   : > { %12738 = vmatprep.mubr.bf16.mxu1 %v11409_v12  ;;  %v10677_v1 = vsel %vm9072_vm7, %v10676_v14, %v10675_v49  ;;  %v11391_v8 = vld [vmem:[#allocation2 + $0x1c8] sm:$0xff]  ;;  %v10537_v25 = vsel %vm9066_vm5, %v10536_v44, %v10535_v4  ;;  %v10943_v51 = vsel %vm9057_vm2, %v22921_v24, %v10942_v61  ;;  %v10952_v16 = vrot.slane %v22922_v54, 3  ;;  %v15421_v49 = vld [vmem:[%s22211_s13 + $0x350] sm:$0xff]  }
 0x6fc   : > { %10685 = vst.msk [vmem:[#allocation2 + $0x1d8] sm:$0xff] %vm9120_vm8, %v10677_v1  ;;  %v11423_v12 = vpack.c.bf16 %v11391_v8, %v11375_v2  ;;  %v15417_v14 = vld [vmem:[%s22211_s13 + $0x348] sm:$0xff]   ;;  %v10539_v34 = vsel %vm9069_vm6, %v10538_v35, %v10537_v25  ;;  %v10945_v62 = vsel %vm9060_vm3, %v10944_v22, %v10943_v51  ;;  %v10804_v0 = vrot.slane %v22844_v63, 7 }
 0x6fd   : > { %10757 = vst.msk [vmem:[#allocation2 + $0x1d8] sm:$0xff] %vm9193_vm9, %v21733_v23  ;;  %v10806_v44 = vrot.slane %v22921_v24, 6  ;;  %12690 = vmatmul.mubr.bf16.vlgmr.msra.gmra.mrb[148].mxu0 %v11406_v26  ;;  %v10541_v5 = vsel %vm9072_vm7, %v10540_v52, %v10539_v34  ;;  %v10947_v48 = vsel %vm9063_vm4, %v10946_v59, %v10945_v62  ;;  %v11390_v23 = vld [vmem:[#allocation2 + $0x1c0] sm:$0xff]  ;;  %v10808_v35 = vrot.slane %v22917_v40, 5  ;;  %v15422_v7 = vld [vmem:[%s22211_s13 + $0x3c8] sm:$0xff]  }
 0x6fe   : > { %v10810_v29 = vrot.slane %v22918_v19, 4  ;;  %14039 = vmatpush3.bf16.msra.mxu0 %v15416_v17  ;;  %10549 = vst.msk [vmem:[#allocation2 + $0x1d0] sm:$0xff] %vm9120_vm8, %v10541_v5  ;;  %12697 = vmatprep.mubr.bf16.mxu0 %v11423_v12  ;;  %v10949_v6 = vsel %vm9066_vm5, %v10948_v13, %v10947_v48  ;;  %v11422_v26 = vpack.c.bf16 %v11390_v23, %v11374_v45  ;;  %v10812_v15 = vrot.slane %v22919_v41, 3 }
 0x6ff   : > { %v10805_v52 = vsel %vm9054_vm1, %v10804_v0, %v22843_v9  ;;  %10621 = vst.msk [vmem:[#allocation2 + $0x1d0] sm:$0xff] %vm9193_vm9, %v21783_v36  ;;  %14040 = vmatprep.subr.bf16.mxu0 %v15417_v14  ;;  %v10951_v22 = vsel %vm9069_vm6, %v10950_v28, %v10949_v6  ;;  %v10814_v13 = vrot.slane %v22920_v53, 2  ;;  %v10816_v1 = vrot.slane %v22922_v54, 1  ;;  %v15425_v0 = vld [vmem:[%s22211_s13 + $0x358] sm:$0xff]  }
 0x700   : > { %v10807_v59 = vsel %vm9057_vm2, %v10806_v44, %v10805_v52  ;;  %v10953_v17 = vsel %vm9072_vm7, %v10952_v16, %v10951_v22  ;;  %v11212_v4 = vrot.slane %v22843_v9, 6  ;;  %v11213_v2 = vrot.slane %v22844_v63, 5  ;;  %v21969_v16 = vpop.permute.xlu1 %11184  ;;  %v11376_v52 = vld [vmem:[#allocation2 + $0x150] sm:$0xff] }
 0x701   : > { %v10809_v36 = vsel %vm9060_vm3, %v10808_v35, %v10807_v59  ;;  %10987 = vst.msk [vmem:[#allocation2 + $0xe8] sm:$0xff] %vm9120_vm8, %v10953_v17  ;;  %v11215_v61 = vrot.slane %v22921_v24, 4  ;;  %v11217_v28 = vrot.slane %v22917_v40, 3  ;;  %v11219_v25 = vrot.slane %v22918_v19, 2  ;;  %v15426_v35 = vld [vmem:[%s22211_s13 + $0x3d0] sm:$0xff]   ;;  %v15429_v59 = vld [vmem:[%s22211_s13 + $0x360] sm:$0xff]  }
 0x702   : > { %12739 = vmatmul.mubr.bf16.vlgmr.msra.gmra.mrb[156].mxu1 %v11408_v10  ;;  %v10811_v8 = vsel %vm9063_vm4, %v10810_v29, %v10809_v36  ;;  %14041 = vmatpush3.bf16.msra.mxu0 %v15419_v58  ;;  %11059 = vst.msk [vmem:[#allocation2 + $0xe8] sm:$0xff] %vm9193_vm9, %v21829_v57  ;;  %v11214_v12 = vsel %vm9054_vm1, %v11213_v2, %v11212_v4  ;;  %v11221_v14 = vrot.slane %v22919_v41, 1  ;;  %v11224_v51 = vrot.slane %v22922_v54, 7  ;;  %v11377_v57 = vld [vmem:[#allocation2 + $0x158] sm:$0xff] }
 0x703   : > { %14067 = vmatpush3.bf16.msra.mxu1 %v15420_v33  ;;  %v10813_v10 = vsel %vm9066_vm5, %v10812_v15, %v10811_v8  ;;  %14042 = vmatprep.subr.bf16.mxu0 %v15421_v49  ;;  %v11216_v44 = vsel %vm9057_vm2, %v11215_v61, %v11214_v12  ;;  %v11076_v5 = vrot.slane %v22843_v9, 4  ;;  %v11077_v48 = vrot.slane %v22844_v63, 3  ;;  %v15430_v17 = vld [vmem:[%s22211_s13 + $0x3d8] sm:$0xff]   ;;  %v11347_v8 = vld [vmem:[#allocation2 + $0x68] sm:$0xff] }
 0x704   : > { %14068 = vmatprep.subr.bf16.mxu1 %v15422_v7  ;;  %v11393_v34 = vld [vmem:[#allocation2 + $0x1d8] sm:$0xff]  ;;  %v10815_v62 = vsel %vm9069_vm6, %v10814_v13, %v10813_v10  ;;  %v11218_v29 = vsel %vm9060_vm3, %v11217_v28, %v11216_v44  ;;  %v11079_v58 = vrot.slane %v22921_v24, 2  ;;  %v11081_v63 = vrot.slane %v22917_v40, 1  ;;  %v22016_v2 = vpop.permute.xlu1 %11052  ;;  %v15434_v44 = vld [vmem:[%s22211_s13 + $0x3e0] sm:$0xff]  }
 0x705   : > { %v11425_v45 = vpack.c.bf16 %v11393_v34, %v11377_v57  ;;  %v10817_v23 = vsel %vm9072_vm7, %v10816_v1, %v10815_v62  ;;  %12698 = vmatmul.mubr.bf16.gmra.mrb[152].mxu0 %v11422_v26  ;;  %v11220_v33 = vsel %vm9063_vm4, %v11219_v25, %v11218_v29  ;;  %v11078_v9 = vsel %vm9054_vm1, %v11077_v48, %v11076_v5  ;;  %v15427_v24 = vld [vmem:[%s22211_s13 + $0x318] sm:$0xff]  }
 0x706   : > { %10851 = vst.msk [vmem:[#allocation2 + $0xe0] sm:$0xff] %vm9120_vm8, %v10817_v23  ;;  %v11084_v6 = vrot.slane %v22919_v41, 7  ;;  %14043 = vmatpush3.bf16.msra.mxu0 %v15423_v60  ;;  %v11392_v15 = vld [vmem:[#allocation2 + $0x1d0] sm:$0xff]  ;;  %v11222_v26 = vsel %vm9066_vm5, %v11221_v14, %v11220_v33  ;;  %v11080_v22 = vsel %vm9057_vm2, %v11079_v58, %v11078_v9  ;;  %v11086_v49 = vrot.slane %v22920_v53, 6  ;;  %v15435_v9 = vld [vmem:[%s22211_s13 + $0x328] sm:$0xff]  }
 0x707   : > { %12746 = vmatprep.mubr.bf16.mxu1 %v11425_v45  ;;  %10923 = vst.msk [vmem:[#allocation2 + $0xe0] sm:$0xff] %vm9193_vm9, %v21873_v30  ;;  %v11088_v40 = vrot.slane %v22922_v54, 5  ;;  %14069 = vmatpush3.bf16.msra.mxu1 %v15424_v39  ;;  %v11424_v41 = vpack.c.bf16 %v11392_v15, %v11376_v52  ;;  %v15428_v30 = vld [vmem:[%s22211_s13 + $0x390] sm:$0xff]   ;;  %v11223_v7 = vsel %vm9069_vm6, %v22920_v53, %v11222_v26  ;;  %v10968_v1 = vrot.slane %v22867_v55, 2 }
 0x708   : > { %14044 = vmatprep.subr.bf16.mxu0 %v15425_v0  ;;  %v11082_v13 = vsel %vm9060_vm3, %v11081_v63, %v11080_v22  ;;  %14070 = vmatprep.subr.bf16.mxu1 %v15426_v35  ;;  %v11225_v54 = vsel %vm9072_vm7, %v11224_v51, %v11223_v7  ;;  %v10969_v53 = vrot.slane %v22868_v32, 1  ;;  %v10972_v4 = vrot.slane %v22871_v21, 7  ;;  %v15432_v51 = vld [vmem:[%s22211_s13 + $0x398] sm:$0xff]   ;;  %v10917_v52 = vpop.permute.xlu1 %10916  ;;  %v15437_v22 = vld [vmem:[%s22211_s13 + $0x370] sm:$0xff]   ;;  %v15438_v7 = vld [vmem:[%s22211_s13 + $0x3e8] sm:$0xff]  }
 0x709   : > { %v11083_v36 = vsel %vm9063_vm4, %v22918_v19, %v11082_v13  ;;  %11259 = vst.msk [vmem:[#allocation2 + $0xf8] sm:$0xff] %vm9120_vm8, %v11225_v54  ;;  %v11363_v61 = vld [vmem:[#allocation2 + $0xe8] sm:$0xff]  ;;  %v10974_v25 = vrot.slane %v22870_v31, 6  ;;  %v10976_v60 = vrot.slane %v20403_v50, 5  ;;  %v15431_v19 = vld [vmem:[%s22211_s13 + $0x320] sm:$0xff]   ;;  %v10978_v14 = vrot.slane %v20461_v27, 4 }
 0x70a   : > { %12747 = vmatmul.mubr.bf16.gmra.mrb[160].mxu1 %v11424_v41  ;;  %v11085_v28 = vsel %vm9066_vm5, %v11084_v6, %v11083_v36  ;;  %14045 = vmatpush3.bf16.msra.mxu0 %v15427_v24  ;;  %11331 = vst.msk [vmem:[#allocation2 + $0xf8] sm:$0xff] %vm9193_vm9, %v21913_v47  ;;  %v11411_v39 = vpack.c.bf16 %v11363_v61, %v11347_v8  ;;  %v15433_v47 = vld [vmem:[%s22211_s13 + $0x368] sm:$0xff]   ;;  %v10832_v62 = vrot.slane %v22868_v32, 7  ;;  %v10834_v0 = vrot.slane %v22869_v46, 6  ;;  %v15436_v24 = vld [vmem:[%s22211_s13 + $0x3a0] sm:$0xff]   ;;  %v11349_v54 = vld [vmem:[#allocation2 + $0x78] sm:$0xff] }
 0x70b   : > { %v11087_v10 = vsel %vm9069_vm6, %v11086_v49, %v11085_v28  ;;  %v10970_v12 = vsel %vm9054_vm1, %v10969_v53, %v10968_v1  ;;  %14071 = vmatpush3.bf16.msra.mxu1 %v15428_v30  ;;  %14046 = vmatprep.subr.bf16.mxu0 %v15429_v59  ;;  %v10980_v48 = vrot.slane %v20509_v56, 3  ;;  %v10836_v45 = vrot.slane %v22871_v21, 5  ;;  %v15439_v61 = vld [vmem:[%s22211_s13 + $0x330] sm:$0xff]  }
 0x70c   : > { %v11089_v57 = vsel %vm9072_vm7, %v11088_v40, %v11087_v10  ;;  %v10971_v34 = vsel %vm9057_vm2, %v22869_v46, %v10970_v12  ;;  %14072 = vmatprep.subr.bf16.mxu1 %v15430_v17  ;;  %12787 = vmatprep.mubr.bf16.mxu0 %v11411_v39  ;;  %v10838_v23 = vrot.slane %v22870_v31, 4  ;;  %v10833_v29 = vsel %vm9054_vm1, %v10832_v62, %v22867_v55  ;;  %v15440_v39 = vld [vmem:[%s22211_s13 + $0x3a8] sm:$0xff]  }
 0x70d   : > { %11123 = vst.msk [vmem:[#allocation2 + $0xf0] sm:$0xff] %vm9120_vm8, %v11089_v57  ;;  %v10973_v5 = vsel %vm9060_vm3, %v10972_v4, %v10971_v34  ;;  %v10840_v58 = vrot.slane %v20403_v50, 3  ;;  %v10842_v33 = vrot.slane %v20461_v27, 2  ;;  %v10835_v6 = vsel %vm9057_vm2, %v10834_v0, %v10833_v29 }
 0x70e   : > { %11195 = vst.msk [vmem:[#allocation2 + $0xf0] sm:$0xff] %vm9193_vm9, %v21969_v16  ;;  %v10975_v35 = vsel %vm9063_vm4, %v10974_v25, %v10973_v5  ;;  %14047 = vmatpush3.bf16.msra.mxu0 %v15431_v19  ;;  %v10844_v16 = vrot.slane %v20509_v56, 1  ;;  %v11240_v15 = vrot.slane %v22867_v55, 6  ;;  %v10837_v49 = vsel %vm9060_vm3, %v10836_v45, %v10835_v6 }
 0x70f   : > { %v10977_v63 = vsel %vm9066_vm5, %v10976_v60, %v10975_v35  ;;  %14073 = vmatpush3.bf16.msra.mxu1 %v15432_v51  ;;  %14048 = vmatprep.subr.bf16.mxu0 %v15433_v47  ;;  %v11241_v40 = vrot.slane %v22868_v32, 5  ;;  %v11243_v41 = vrot.slane %v22869_v46, 4  ;;  %v10839_v59 = vsel %vm9063_vm4, %v10838_v23, %v10837_v49  ;;  %v11325_v47 = vpop.permute.xlu1 %11324  ;;  %v15444_v23 = vld [vmem:[%s22211_s13 + $0x3b0] sm:$0xff]  }
 0x710   : > { %v10979_v26 = vsel %vm9069_vm6, %v10978_v14, %v10977_v63  ;;  %14074 = vmatprep.subr.bf16.mxu1 %v15434_v44  ;;  %v11245_v13 = vrot.slane %v22871_v21, 3  ;;  %v11247_v1 = vrot.slane %v22870_v31, 2  ;;  %v10841_v36 = vsel %vm9066_vm5, %v10840_v58, %v10839_v59  ;;  %v22117_v44 = vld [vmem:[%s22212_s14] ss:$0 sm:$0xff] }
 0x711   : > { %v10981_v30 = vsel %vm9072_vm7, %v10980_v48, %v10979_v26  ;;  %v11365_v17 = vld [vmem:[#allocation2 + $0xf8] sm:$0xff]  ;;  %v11242_v53 = vsel %vm9054_vm1, %v11241_v40, %v11240_v15  ;;  %v11249_v4 = vrot.slane %v20403_v50, 1  ;;  %v11252_v8 = vrot.slane %v20509_v56, 7  ;;  %v11346_v63 = vld [vmem:[#allocation2 + $0x60] sm:$0xff] }
 0x712   : > { %10989 = vst.msk [vmem:[#allocation2 + $0x1e8] sm:$0xff] %vm9120_vm8, %v10981_v30  ;;  %14049 = vmatpush3.bf16.msra.mxu0 %v15435_v9  ;;  %v11413_v28 = vpack.c.bf16 %v11365_v17, %v11349_v54  ;;  %v10843_v25 = vsel %vm9069_vm6, %v10842_v33, %v10841_v36  ;;  %v11244_v60 = vsel %vm9057_vm2, %v11243_v41, %v11242_v53  ;;  %v11104_v19 = vrot.slane %v22867_v55, 4  ;;  %v15442_v55 = vld [vmem:[%s22211_s13 + $0x3f0] sm:$0xff]   ;;  %v11362_v33 = vld [vmem:[#allocation2 + $0xe0] sm:$0xff]  ;;  %v11381_v41 = vld [vmem:[#allocation2 + $0x178] sm:$0xff] }
 0x713   : > { %11061 = vst.msk [vmem:[#allocation2 + $0x1e8] sm:$0xff] %vm9193_vm9, %v22016_v2  ;;  %14075 = vmatpush3.bf16.msra.mxu1 %v15436_v24  ;;  %14050 = vmatprep.subr.bf16.mxu0 %v15437_v22  ;;  %v10845_v10 = vsel %vm9072_vm7, %v10844_v16, %v10843_v25  ;;  %v15441_v2 = vld [vmem:[%s22211_s13 + $0x378] sm:$0xff]   ;;  %v11246_v12 = vsel %vm9060_vm3, %v11245_v13, %v11244_v60  ;;  %v11105_v14 = vrot.slane %v22868_v32, 3  ;;  %v11107_v51 = vrot.slane %v22869_v46, 2  ;;  %v11348_v22 = vld [vmem:[#allocation2 + $0x70] sm:$0xff]  ;;  %v11378_v59 = vld [vmem:[#allocation2 + $0x160] sm:$0xff] }
 0x714   : > { %14076 = vmatprep.subr.bf16.mxu1 %v15438_v7  ;;  %12836 = vmatprep.mubr.bf16.mxu1 %v11413_v28  ;;  %10853 = vst.msk [vmem:[#allocation2 + $0x1e0] sm:$0xff] %vm9120_vm8, %v10845_v10  ;;  %v11248_v57 = vsel %vm9063_vm4, %v11247_v1, %v11246_v12  ;;  %v11109_v34 = vrot.slane %v22871_v21, 1  ;;  %v11112_v46 = vrot.slane %v20403_v50, 7  ;;  %v11114_v0 = vrot.slane %v20461_v27, 6  ;;  %v15443_v21 = vld [vmem:[%s22211_s13 + $0x338] sm:$0xff]   ;;  %v11380_v54 = vld [vmem:[#allocation2 + $0x170] sm:$0xff] }
 0x715   : > { %10925 = vst.msk [vmem:[#allocation2 + $0x1e0] sm:$0xff] %vm9193_vm9, %v10917_v52  ;;  %v11250_v62 = vsel %vm9066_vm5, %v11249_v4, %v11248_v57  ;;  %v11106_v32 = vsel %vm9054_vm1, %v11105_v14, %v11104_v19  ;;  %v13888_v50 = vadd.f32 %v21838_v11, %v21831_v18  ;;  %v13891_v45 = vadd.f32 %v21852_v37, %v21845_v20  ;;  %v15445_v18 = vld [vmem:[%s22211_s13 + $0x3f8] sm:$0xff]   ;;  %v11189_v52 = vpop.permute.xlu1 %11188  ;;  %v11364_v26 = vld [vmem:[#allocation2 + $0xf0] sm:$0xff]  ;;  %v15447_v36 = vld [vmem:[%s22213_s15] sm:$0xff]  }
 0x716   : > { %14051 = vmatpush3.bf16.msra.mxu0 %v15439_v61  ;;  %v11251_v5 = vsel %vm9069_vm6, %v20461_v27, %v11250_v62  ;;  %v11108_v48 = vsel %vm9057_vm2, %v11107_v51, %v11106_v32  ;;  %v11116_v27 = vrot.slane %v20509_v56, 5  ;;  %v13916_v58 = vadd.f32 %v21865_v42, %v21858_v43  ;;  %v11379_v43 = vld [vmem:[#allocation2 + $0x168] sm:$0xff]  ;;  %v15449_v4 = vld [vmem:[%s22213_s15 + $0x10] sm:$0xff]   ;;  %v15451_v61 = vld [vmem:[%s22213_s15 + $0x20] sm:$0xff]  }
 0x717   : > { %14077 = vmatpush3.bf16.msra.mxu1 %v15440_v39  ;;  %14052 = vmatprep.subr.bf16.mxu0 %v15441_v2  ;;  %v11253_v35 = vsel %vm9072_vm7, %v11252_v8, %v11251_v5  ;;  %v11110_v29 = vsel %vm9060_vm3, %v11109_v34, %v11108_v48  ;;  %v12496_v20 = vadd.f32 %v13888_v50, %v22117_v44  ;;  %v15448_v53 = vld [vmem:[%s22213_s15 + $0x8] sm:$0xff]   ;;  %v15450_v8 = vld [vmem:[%s22213_s15 + $0x18] sm:$0xff]   ;;  %v15453_v25 = vld [vmem:[%s22213_s15 + $0x30] sm:$0xff]  }
 0x718   : > { %14078 = vmatprep.subr.bf16.mxu1 %v15442_v55  ;;  %11261 = vst.msk [vmem:[#allocation2 + $0x1f8] sm:$0xff] %vm9120_vm8, %v11253_v35  ;;  %v11111_v11 = vsel %vm9063_vm4, %v22870_v31, %v11110_v29  ;;  %v12499_v37 = vadd.f32 %v13891_v45, %v22117_v44  ;;  %v13919_v56 = vadd.f32 %v21880_v3, %v21875_v38  ;;  %v15446_v38 = vld [vmem:[%s22211_s13 + $0x3b8] sm:$0xff]   ;;  %v15452_v28 = vld [vmem:[%s22213_s15 + $0x28] sm:$0xff]  }
 0x719   : > { %11333 = vst.msk [vmem:[#allocation2 + $0x1f8] sm:$0xff] %vm9193_vm9, %v11325_v47  ;;  %v11113_v9 = vsel %vm9066_vm5, %v11112_v46, %v11111_v11  ;;  %v22150_v31 = vadd.f32 %v13916_v58, %v12496_v20  ;;  %v11410_v24 = vpack.c.bf16 %v11362_v33, %v11346_v63  ;;  %v11412_v49 = vpack.c.bf16 %v11364_v26, %v11348_v22  ;;  %v15454_v60 = vld [vmem:[%s22213_s15 + $0x38] sm:$0xff]  }
 0x71a   : > { %v11395_v42 = vld [vmem:[#allocation2 + $0x1e8] sm:$0xff]  ;;  %14053 = vmatpush3.bf16.msra.mxu0 %v15443_v21  ;;  %v11115_v16 = vsel %vm9069_vm6, %v11114_v0, %v11113_v9  ;;  %v22152_v15 = vadd.f32 %v13919_v56, %v12499_v37 }
 0x71b   : > { %v11427_v6 = vpack.c.bf16 %v11395_v42, %v11379_v43  ;;  %14079 = vmatpush3.bf16.msra.mxu1 %v15444_v23  ;;  %v11117_v3 = vsel %vm9072_vm7, %v11116_v27, %v11115_v16  ;;  %14968 = vmatprep.subr.bf16.mxu0 %v15447_v36 }
 0x71c   : > { %14080 = vmatprep.subr.bf16.mxu1 %v15445_v18  ;;  %11125 = vst.msk [vmem:[#allocation2 + $0x1f0] sm:$0xff] %vm9120_vm8, %v11117_v3  ;;  %v11394_v40 = vld [vmem:[#allocation2 + $0x1e0] sm:$0xff] }
 0x71d   : > { %12788 = vmatmul.mubr.bf16.vlgmr.msra.gmra.mrb[156].mxu0 %v11410_v24  ;;  %11197 = vst.msk [vmem:[#allocation2 + $0x1f0] sm:$0xff] %vm9193_vm9, %v11189_v52  ;;  %v11426_v13 = vpack.c.bf16 %v11394_v40, %v11378_v59 }
 0x71e   : > { %12795 = vmatprep.mubr.bf16.mxu0 %v11427_v6  ;;  %14969 = vmatpush3.bf16.msra.mxu0 %v15447_v36 }
 0x71f   : > { %14081 = vmatpush3.bf16.msra.mxu1 %v15446_v38  ;;  %14970 = vmatprep.subr.bf16.mxu0 %v15448_v53 }
 0x720   : > { %v11397_v30 = vld [vmem:[#allocation2 + $0x1f8] sm:$0xff] }
 0x721   : > { %v11429_v7 = vpack.c.bf16 %v11397_v30, %v11381_v41 }
 0x722   : > { %12837 = vmatmul.mubr.bf16.vlgmr.msra.gmra.mrb[164].mxu1 %v11412_v49  ;;  %14971 = vmatpush3.bf16.msra.mxu0 %v15448_v53 }
 0x723   : > { %12844 = vmatprep.mubr.bf16.mxu1 %v11429_v7  ;;  %14972 = vmatprep.subr.bf16.mxu0 %v15449_v4 }
 0x724   : > { %v11396_v1 = vld [vmem:[#allocation2 + $0x1f0] sm:$0xff] }
 0x725   : > { %12796 = vmatmul.mubr.bf16.gmra.mrb[160].mxu0 %v11426_v13  ;;  %v11428_v17 = vpack.c.bf16 %v11396_v1, %v11380_v54 }
 0x726   : > { %14973 = vmatpush3.bf16.msra.mxu0 %v15449_v4 }
 0x727   : > { %14974 = vmatprep.subr.bf16.mxu0 %v15450_v8 }
 0x72a   : > { %12845 = vmatmul.mubr.bf16.gmra.mrb[168].mxu1 %v11428_v17  ;;  %14975 = vmatpush3.bf16.msra.mxu0 %v15450_v8 }
 0x72b   : > { %14976 = vmatprep.subr.bf16.mxu0 %v15451_v61 }
 0x72e   : > { %14977 = vmatpush3.bf16.msra.mxu0 %v15451_v61 }
 0x72f   : > { %14978 = vmatprep.subr.bf16.mxu0 %v15452_v28 }
 0x732   : > { %14979 = vmatpush3.bf16.msra.mxu0 %v15452_v28 }
 0x733   : > { %14980 = vmatprep.subr.bf16.mxu0 %v15453_v25 }
 0x736   : > { %14981 = vmatpush3.bf16.msra.mxu0 %v15453_v25 }
 0x737   : > { %14982 = vmatprep.subr.bf16.mxu0 %v15454_v60 }
 0x73a   : > { %14983 = vmatpush3.bf16.msra.mxu0 %v15454_v60 }
 0x799   : > { %v13892_v19 = vpop.f32.mrb[136].mxu0 }
 0x79a   : > { %v13893_v39 = vpop.f32.mrb[137].mxu0 }
 0x79b   : > { %v13894_v10 = vadd.f32 %v13893_v39, %v13892_v19  ;;  %v13895_v2 = vpop.f32.mrb[138].mxu0 }
 0x79c   : > { %v13896_v12 = vpop.f32.mrb[139].mxu0 }
 0x79d   : > { %v13897_v14 = vadd.f32 %v13896_v12, %v13895_v2  ;;  %v12504_v34 = vadd.f32 %v13894_v10, %v22117_v44 }
 0x79f   : > { %v12507_v21 = vadd.f32 %v13897_v14, %v22117_v44 }
 0x7a1   : > { %v13920_v51 = vpop.f32.mrb[144].mxu1 }
 0x7a2   : > { %v13921_v57 = vpop.f32.mrb[145].mxu1 }
 0x7a3   : > { %v13942_v55 = vpop.f32.mrb[140].mxu0  ;;  %v13922_v62 = vadd.f32 %v13921_v57, %v13920_v51  ;;  %v13923_v32 = vpop.f32.mrb[146].mxu1 }
 0x7a4   : > { %v13943_v47 = vpop.f32.mrb[141].mxu0  ;;  %v13924_v5 = vpop.f32.mrb[147].mxu1 }
 0x7a5   : > { %v13944_v46 = vadd.f32 %v13943_v47, %v13942_v55  ;;  %v13945_v0 = vpop.f32.mrb[142].mxu0  ;;  %v12553_v50 = vadd.f32 %v13922_v62, %v12504_v34  ;;  %v13925_v45 = vadd.f32 %v13924_v5, %v13923_v32 }
 0x7a6   : > { %v13946_v48 = vpop.f32.mrb[143].mxu0 }
 0x7a7   : > { %v12594_v23 = vadd.f32 %v13944_v46, %v22150_v31  ;;  %v13947_v35 = vadd.f32 %v13946_v48, %v13945_v0  ;;  %v12556_v29 = vadd.f32 %v13925_v45, %v12507_v21 }
 0x7a9   : > { %v12597_v27 = vadd.f32 %v13947_v35, %v22152_v15 }
 0x7ac   : > { %v13970_v58 = vpop.f32.mrb[148].mxu1 }
 0x7ad   : > { %v13971_v33 = vpop.f32.mrb[149].mxu1 }
 0x7ae   : > { %v13972_v18 = vadd.f32 %v13971_v33, %v13970_v58  ;;  %v13973_v11 = vpop.f32.mrb[150].mxu1 }
 0x7af   : > { %v13974_v20 = vpop.f32.mrb[151].mxu1 }
 0x7b0   : > { %v12643_v37 = vadd.f32 %v13972_v18, %v12594_v23  ;;  %v13975_v56 = vadd.f32 %v13974_v20, %v13973_v11 }
 0x7b2   : > { %v12646_v43 = vadd.f32 %v13975_v56, %v12597_v27 }
 0x7c8   : > { %v13948_v42 = vpop.f32.mrb[144].mxu0 }
 0x7c9   : > { %v13949_v44 = vpop.f32.mrb[145].mxu0 }
 0x7ca   : > { %v13950_v9 = vadd.f32 %v13949_v44, %v13948_v42  ;;  %v13951_v63 = vpop.f32.mrb[146].mxu0 }
 0x7cb   : > { %v13952_v6 = vpop.f32.mrb[147].mxu0 }
 0x7cc   : > { %v12602_v16 = vadd.f32 %v13950_v9, %v12553_v50  ;;  %v13953_v52 = vadd.f32 %v13952_v6, %v13951_v63 }
 0x7cd   : > { %v13976_v31 = vpop.f32.mrb[152].mxu1 }
 0x7ce   : > { %v13977_v24 = vpop.f32.mrb[153].mxu1  ;;  %v12605_v38 = vadd.f32 %v13953_v52, %v12556_v29 }
 0x7cf   : > { %v13978_v3 = vadd.f32 %v13977_v24, %v13976_v31  ;;  %v13979_v15 = vpop.f32.mrb[154].mxu1 }
 0x7d0   : > { %v13980_v26 = vpop.f32.mrb[155].mxu1  ;;  %v13998_v40 = vpop.f32.mrb[148].mxu0 }
 0x7d1   : > { %v12651_v22 = vadd.f32 %v13978_v3, %v12602_v16  ;;  %v13981_v49 = vadd.f32 %v13980_v26, %v13979_v15  ;;  %v13999_v41 = vpop.f32.mrb[149].mxu0 }
 0x7d2   : > { %v14000_v7 = vadd.f32 %v13999_v41, %v13998_v40  ;;  %v14001_v59 = vpop.f32.mrb[150].mxu0 }
 0x7d3   : > { %v12654_v30 = vadd.f32 %v13981_v49, %v12605_v38  ;;  %v14002_v13 = vpop.f32.mrb[151].mxu0 }
 0x7d4   : > { %v12692_v1 = vadd.f32 %v14000_v7, %v12643_v37  ;;  %v14003_v54 = vadd.f32 %v14002_v13, %v14001_v59 }
 0x7d5   : > { %v14026_v17 = vpop.f32.mrb[156].mxu1 }
 0x7d6   : > { %v14027_v36 = vpop.f32.mrb[157].mxu1  ;;  %v12695_v53 = vadd.f32 %v14003_v54, %v12646_v43  ;;  %v13394_v54 = vld [vmem:[%s22214_s16] ss:$0 sm:$0xff] }
 0x7d7   : > { %v14028_v4 = vadd.f32 %v14027_v36, %v14026_v17  ;;  %v14029_v8 = vpop.f32.mrb[158].mxu1 }
 0x7d8   : > { %v14030_v61 = vpop.f32.mrb[159].mxu1  ;;  %v14004_v60 = vpop.f32.mrb[152].mxu0 }
 0x7d9   : > { %v12741_v28 = vadd.f32 %v14028_v4, %v12692_v1  ;;  %v14031_v25 = vadd.f32 %v14030_v61, %v14029_v8  ;;  %v14005_v19 = vpop.f32.mrb[153].mxu0 }
 0x7da   : > { %v14006_v10 = vadd.f32 %v14005_v19, %v14004_v60  ;;  %v14007_v2 = vpop.f32.mrb[154].mxu0 }
 0x7db   : > { %v12744_v39 = vadd.f32 %v14031_v25, %v12695_v53  ;;  %v14008_v12 = vpop.f32.mrb[155].mxu0 }
 0x7dc   : > { %v12700_v14 = vadd.f32 %v14006_v10, %v12651_v22  ;;  %v14009_v51 = vadd.f32 %v14008_v12, %v14007_v2 }
 0x7dd   : > { %v14032_v55 = vpop.f32.mrb[160].mxu1 }
 0x7de   : > { %v14033_v57 = vpop.f32.mrb[161].mxu1  ;;  %v12703_v47 = vadd.f32 %v14009_v51, %v12654_v30 }
 0x7df   : > { %v14034_v34 = vadd.f32 %v14033_v57, %v14032_v55  ;;  %v14035_v62 = vpop.f32.mrb[162].mxu1 }
 0x7e0   : > { %v14036_v32 = vpop.f32.mrb[163].mxu1 }
 0x7e1   : > { %v12749_v46 = vadd.f32 %v14034_v34, %v12700_v14  ;;  %v14037_v0 = vadd.f32 %v14036_v32, %v14035_v62 }
 0x7e3   : > { %v12752_v21 = vadd.f32 %v14037_v0, %v12703_v47 }
 0x7f0   : > { %v14054_v5 = vpop.f32.mrb[156].mxu0 }
 0x7f1   : > { %v14055_v48 = vpop.f32.mrb[157].mxu0 }
 0x7f2   : > { %v14056_v50 = vadd.f32 %v14055_v48, %v14054_v5  ;;  %v14057_v45 = vpop.f32.mrb[158].mxu0 }
 0x7f3   : > { %v14058_v23 = vpop.f32.mrb[159].mxu0 }
 0x7f4   : > { %v12790_v35 = vadd.f32 %v14056_v50, %v12741_v28  ;;  %v14059_v29 = vadd.f32 %v14058_v23, %v14057_v45 }
 0x7f5   : > { %v14082_v27 = vpop.f32.mrb[164].mxu1 }
 0x7f6   : > { %v12793_v58 = vadd.f32 %v14059_v29, %v12744_v39  ;;  %v14083_v33 = vpop.f32.mrb[165].mxu1 }
 0x7f7   : > { %v14084_v18 = vadd.f32 %v14083_v33, %v14082_v27  ;;  %v14085_v11 = vpop.f32.mrb[166].mxu1 }
 0x7f8   : > { %v14086_v20 = vpop.f32.mrb[167].mxu1  ;;  %v14060_v37 = vpop.f32.mrb[160].mxu0 }
 0x7f9   : > { %v12839_v56 = vadd.f32 %v14084_v18, %v12790_v35  ;;  %v14087_v43 = vadd.f32 %v14086_v20, %v14085_v11  ;;  %v14061_v42 = vpop.f32.mrb[161].mxu0 }
 0x7fa   : > { %v14062_v44 = vadd.f32 %v14061_v42, %v14060_v37  ;;  %v14063_v9 = vpop.f32.mrb[162].mxu0 }
 0x7fb   : > { %v12842_v63 = vadd.f32 %v14087_v43, %v12793_v58  ;;  %v14064_v6 = vpop.f32.mrb[163].mxu0  ;;  %v12853_v31 = vmax.f32 %v12839_v56, 0.0 }
 0x7fc   : > { %v12798_v16 = vadd.f32 %v14062_v44, %v12749_v46  ;;  %v14065_v52 = vadd.f32 %v14064_v6, %v14063_v9 }
 0x7fd   : > { %v12854_v24 = vmax.f32 %v12842_v63, 0.0  ;;  %v14088_v38 = vpop.f32.mrb[168].mxu1 }
 0x7fe   : > { %v12801_v3 = vadd.f32 %v14065_v52, %v12752_v21  ;;  %v14089_v15 = vpop.f32.mrb[169].mxu1 }
 0x7ff   : > { %v14090_v26 = vadd.f32 %v14089_v15, %v14088_v38  ;;  %v14091_v22 = vpop.f32.mrb[170].mxu1  ;;  %v12857_v49 = vpack.c.bf16 %v12854_v24, %v12853_v31 }
 0x800   : > { %v14092_v40 = vpop.f32.mrb[171].mxu1 }
 0x801   : > { %v12847_v41 = vadd.f32 %v14090_v26, %v12798_v16  ;;  %v14093_v30 = vadd.f32 %v14092_v40, %v14091_v22  ;;  %14984 = vmatprep.mubr.bf16.mxu0 %v12857_v49 }
 0x803   : > { %v12850_v7 = vadd.f32 %v14093_v30, %v12801_v3  ;;  %v12855_v59 = vmax.f32 %v12847_v41, 0.0 }
 0x805   : > { %v12856_v13 = vmax.f32 %v12850_v7, 0.0 }
 0x807   : > { %v12858_v1 = vpack.c.bf16 %v12856_v13, %v12855_v59 }
 0x809   : > { %14985 = vmatmul.mubr.bf16.vlgmr.msra.gmra.mrb[164].mxu0 %v12858_v1 }
 0x8dc   : > { %v14986_v17 = vpop.f32.mrb[164].mxu0 }
 0x8dd   : > { %v12964_v36 = vpop.f32.mrb[165].mxu0  ;;  %v12973_v28 = vadd.f32 %v14986_v17, %v13394_v54 }
 0x8de   : > { %v12965_v53 = vadd.f32 %v13394_v54, %v12964_v36  ;;  %v14987_v4 = vpop.f32.mrb[166].mxu0 }
 0x8df   : > { %v12967_v8 = vpop.f32.mrb[167].mxu0  ;;  %v12976_v25 = vadd.f32 %v14987_v4, %v13394_v54 }
 0x8e0   : > { %v12968_v61 = vadd.f32 %v13394_v54, %v12967_v8  ;;  %12979 = vmax.xlane.f32.xlu0 %v12965_v53 }
 0x8e2   : > { %12981 = vmax.xlane.f32.xlu1 %v12968_v61 }
 0x8e4   : > { %12983 = vmax.xlane.f32.xlu0 %v12973_v28 }
 0x8e8   : > { %12985 = vmax.xlane.f32.xlu0 %v12976_v25 }
 0x96d   : > { %v12980_v60 = vpop.xlane.xlu0 %12979 }
 0x96e   : > { %v12987_v19 = vsub.f32 %v12965_v53, %v12980_v60 }
 0x96f   : > { %v12982_v39 = vpop.xlane.xlu1 %12981 }
 0x970   : > { %v12991_v10 = vmul.f32 1.442695, %v12987_v19  ;;  %v12988_v2 = vsub.f32 %v12968_v61, %v12982_v39 }
 0x971   : > { %v12984_v12 = vpop.xlane.xlu0 %12983 }
 0x972   : > { %15455 = vpow2.f32 %v12991_v10  ;;  %v12993_v14 = vmul.f32 1.442695, %v12988_v2  ;;  %v12989_v51 = vsub.f32 %v12973_v28, %v12984_v12 }
 0x974   : > { %15457 = vpow2.f32 %v12993_v14  ;;  %v12995_v55 = vmul.f32 1.442695, %v12989_v51 }
 0x975   : > { %v12986_v57 = vpop.xlane.xlu0 %12985 }
 0x976   : > { %15459 = vpow2.f32 %v12995_v55  ;;  %v12990_v47 = vsub.f32 %v12976_v25, %v12986_v57 }
 0x978   : > { %v12997_v34 = vmul.f32 1.442695, %v12990_v47 }
 0x97a   : > { %15461 = vpow2.f32 %v12997_v34 }
 0x97c   : > { %v15456_v62 = vpop.eup %15455 }
 0x97d   : > { %12999 = vadd.xlane.f32.xlu1 %v15456_v62 }
 0x97e   : > { %v15458_v32 = vpop.eup %15457 }
 0x97f   : > { %13001 = vadd.xlane.f32.xlu0 %v15458_v32 }
 0x980   : > { %v15460_v46 = vpop.eup %15459 }
 0x981   : > { %13003 = vadd.xlane.f32.xlu1 %v15460_v46 }
 0x984   : > { %v15462_v0 = vpop.eup %15461 }
 0x985   : > { %13005 = vadd.xlane.f32.xlu0 %v15462_v0 }
 0xa0a   : > { %v13000_v21 = vpop.xlane.xlu1 %12999 }
 0xa0b   : > { %15463 = vlog2.f32 %v13000_v21 }
 0xa0c   : > { %v13002_v5 = vpop.xlane.xlu0 %13001 }
 0xa0d   : > { %15465 = vlog2.f32 %v13002_v5 }
 0xa0e   : > { %v13004_v48 = vpop.xlane.xlu1 %13003 }
 0xa0f   : > { %15467 = vlog2.f32 %v13004_v48 }
 0xa12   : > { %v13006_v50 = vpop.xlane.xlu0 %13005 }
 0xa13   : > { %15469 = vlog2.f32 %v13006_v50 }
 0xa15   : > { %v15464_v45 = vpop.eup %15463 }
 0xa16   : > { %v13008_v23 = vmul.f32 0.6931472, %v15464_v45 }
 0xa17   : > { %v15466_v35 = vpop.eup %15465 }
 0xa18   : > { %v13015_v29 = vsub.f32 %v12987_v19, %v13008_v23  ;;  %v13010_v27 = vmul.f32 0.6931472, %v15466_v35 }
 0xa19   : > { %v15468_v58 = vpop.eup %15467 }
 0xa1a   : > { %13019 = vst [vmem:[%s553_s26] sm:$0xff] %v13015_v29  ;;  %v13016_v33 = vsub.f32 %v12988_v2, %v13010_v27  ;;  %v13012_v18 = vmul.f32 0.6931472, %v15468_v58 }
 0xa1c   : > { %13020 = vst [vmem:[%s553_s26 + $0x8] sm:$0xff] %v13016_v33  ;;  %v13017_v11 = vsub.f32 %v12989_v51, %v13012_v18 }
 0xa1d   : > { %v15470_v20 = vpop.eup %15469 }
 0xa1e   : > { %13021 = vst [vmem:[%s553_s26 + $0x10] sm:$0xff] %v13017_v11  ;;  %v13014_v37 = vmul.f32 0.6931472, %v15470_v20 }
 0xa20   : > { %v13018_v56 = vsub.f32 %v12990_v47, %v13014_v37 }
 0xa22   : > { %13022 = vst [vmem:[%s553_s26 + $0x18] sm:$0xff] %v13018_v56 }
 0xa23 PF: > { %s27_s24 = sadd.s32 1, %s15477_s24  }
 0xa24   : > { %p24_p4 = scmp.ge.s32.totalorder %s27_s24, 4  }
 0xa26   :  { %26 = sbr.rel (!%p24_p4) target bundleno = 3 (0x3), region = 118 }

</bundles_post_ra>
